<compile_context>
chip_gen: v7x
topology: tpu7x:2x2x1
jax: 0.10.0
libtpu: 0.0.40
codegen_flags: <defaults>
</compile_context>

<pallas_src>
import numpy as np
import jax
import jax.numpy as jnp
from jax import lax
from jax.experimental import pallas as pl
from jax.experimental.pallas import tpu as pltpu

CP = 128  # channel / lane padding width (TPU vreg lane count)
# Set to jnp.bfloat16 on v6e/v7x for the fast bf16 MXU path (accumulation
# stays f32 via preferred_element_type).  f32 keeps the numerics tight here.
_MM_DTYPE = jnp.float32


# --------------------------------------------------------------------------
# Fused ConvSequence kernel (one batch element per grid step).
# --------------------------------------------------------------------------
def _make_conv_sequence_kernel(H, W, Cin):
    Ho, Wo = H // 2, W // 2

    def conv3x3(pad_ref, w_ref, b_ref, hh, ww):
        # pad_ref: (hh+2, ww+2, CP) zero-bordered activation scratch.
        # w_ref: (3, 3, CP, CP), b_ref: (1, CP).  Returns (hh, ww, CP) f32.
        acc = jnp.zeros((hh * ww, CP), jnp.float32)
        for dy in range(3):
            for dx in range(3):
                patch = pad_ref[dy:dy + hh, dx:dx + ww, :]
                acc = acc + jnp.dot(
                    patch.reshape(hh * ww, CP).astype(_MM_DTYPE),
                    w_ref[dy, dx].astype(_MM_DTYPE),
                    preferred_element_type=jnp.float32)
        return (acc + b_ref[...]).reshape(hh, ww, CP)

    def maxpool(y):
        # y: (H, W, CP) -> (Ho, Wo, CP).  Max-pool k=3, s=2, p=1 on both axes.
        # Edge-clamped taps duplicate an element already inside the window,
        # so they are equivalent to the -inf padding F.max_pool2d uses.
        yr = y.reshape(Ho, 2, W, CP)
        even, odd = yr[:, 0], yr[:, 1]                              # rows 2i / 2i+1
        up = jnp.concatenate([even[0:1], odd[0:Ho - 1]], axis=0)    # rows 2i-1
        t = jnp.maximum(jnp.maximum(even, odd), up)                 # (Ho, W, CP)
        cols = []
        for j in range(Wo):                                         # 3-tap max over W
            lo = max(2 * j - 1, 0)
            c = jnp.maximum(
                lax.slice_in_dim(t, 2 * j, 2 * j + 1, axis=1),
                lax.slice_in_dim(t, 2 * j + 1, 2 * j + 2, axis=1))
            cols.append(jnp.maximum(c, lax.slice_in_dim(t, lo, lo + 1, axis=1)))
        return jnp.concatenate(cols, axis=1)                        # (Ho, Wo, CP)

    def kernel(x_ref, w1, b1, w2, b2, w3, b3, w4, b4, w5, b5,
               o_ref, big_pad, small_pad):
        # Zero the padded-activation scratch: supplies the convs' spatial zero
        # padding in-kernel.  Re-zeroed every step (a few dozen vregs of
        # stores, negligible vs 45 MXU matmuls) so no reliance on pid==0.
        big_pad[...] = jnp.zeros(big_pad.shape, big_pad.dtype)
        small_pad[...] = jnp.zeros(small_pad.shape, small_pad.dtype)
        big_pad[1:H + 1, 1:W + 1, 0:Cin] = x_ref[0]

        y = conv3x3(big_pad, w1, b1, H, W)                        # self.conv
        p = maxpool(y)                                            # F.max_pool2d

        # Residual blocks: relu applied once per activation write; the
        # residual adds use the pre-relu values kept in registers.
        small_pad[1:Ho + 1, 1:Wo + 1, :] = jnp.maximum(p, 0.0)
        h = conv3x3(small_pad, w2, b2, Ho, Wo)                    # res_block0.conv0
        small_pad[1:Ho + 1, 1:Wo + 1, :] = jnp.maximum(h, 0.0)
        r = conv3x3(small_pad, w3, b3, Ho, Wo) + p                # res_block0 out
        small_pad[1:Ho + 1, 1:Wo + 1, :] = jnp.maximum(r, 0.0)
        h = conv3x3(small_pad, w4, b4, Ho, Wo)                    # res_block1.conv0
        small_pad[1:Ho + 1, 1:Wo + 1, :] = jnp.maximum(h, 0.0)
        out = conv3x3(small_pad, w5, b5, Ho, Wo) + r              # res_block1 out

        o_ref[0, :, :, :] = out.astype(o_ref.dtype)               # one lane-dense store

    return kernel


# --------------------------------------------------------------------------
# Wrapper: NCHW in/out (PyTorch layout), fused Pallas call in between.
# --------------------------------------------------------------------------
def conv_sequence_forward(x_nchw, params):
    """ConvSequence forward. x_nchw: (N, Cin, H, W) -> (N, Cout, H//2, W//2)."""
    N, Cin, H, W = x_nchw.shape
    assert H % 2 == 0 and W % 2 == 0  # TODO(synk): odd spatial dims unsupported
    (w1, b1) = params["conv"]
    (w2, b2), (w3, b3) = params["res0"]
    (w4, b4), (w5, b5) = params["res1"]
    Cout = w1.shape[-1]
    assert Cin <= CP and Cout <= CP
    Ho, Wo = H // 2, W // 2

    def pad_w(w):  # (3,3,ci,co) -> (3,3,CP,CP), zero-padded (lane-dense weights)
        ci, co = w.shape[2], w.shape[3]
        return jnp.zeros((3, 3, CP, CP), jnp.float32).at[:, :, :ci, :co].set(
            w.astype(jnp.float32))

    def pad_b(b):
        return jnp.zeros((1, CP), jnp.float32).at[0, :b.shape[0]].set(
            b.astype(jnp.float32))

    x_nhwc = jnp.transpose(x_nchw.astype(jnp.float32), (0, 2, 3, 1))

    w_spec = pl.BlockSpec((3, 3, CP, CP), lambda n: (0, 0, 0, 0))
    b_spec = pl.BlockSpec((1, CP), lambda n: (0, 0))
    out = pl.pallas_call(
        _make_conv_sequence_kernel(H, W, Cin),
        out_shape=jax.ShapeDtypeStruct((N, Ho, Wo, CP), jnp.float32),
        grid=(N,),
        in_specs=[pl.BlockSpec((1, H, W, Cin), lambda n: (n, 0, 0, 0))]
                 + [w_spec, b_spec] * 5,
        out_specs=pl.BlockSpec((1, Ho, Wo, CP), lambda n: (n, 0, 0, 0)),
        scratch_shapes=[pltpu.VMEM((H + 2, W + 2, CP), jnp.float32),
                        pltpu.VMEM((Ho + 2, Wo + 2, CP), jnp.float32)],
        compiler_params=pltpu.CompilerParams(
            dimension_semantics=("parallel",),
            vmem_limit_bytes=32 * 1024 * 1024),
    )(x_nhwc,
      pad_w(w1), pad_b(b1), pad_w(w2), pad_b(b2), pad_w(w3), pad_b(b3),
      pad_w(w4), pad_b(b4), pad_w(w5), pad_b(b5))

    # Drop the lane padding and restore PyTorch's NCHW layout (boundary glue).
    return jnp.transpose(out[..., :Cout], (0, 3, 1, 2))


# --------------------------------------------------------------------------
# Parameters (deterministic init mimicking torch Conv2d defaults, HWIO layout).
# --------------------------------------------------------------------------
def _init_conv(key, cin, cout):
    kw, kb = jax.random.split(key)
    bound = 1.0 / np.sqrt(cin * 9)
    w = jax.random.uniform(kw, (3, 3, cin, cout), jnp.float32, -bound, bound)
    b = jax.random.uniform(kb, (cout,), jnp.float32, -bound, bound)
    return w, b


def init_conv_sequence_params(key, in_channels, out_channels):
    k0, k1, k2, k3, k4 = jax.random.split(key, 5)
    return {
        "conv": _init_conv(k0, in_channels, out_channels),
        "res0": (_init_conv(k1, out_channels, out_channels),
                 _init_conv(k2, out_channels, out_channels)),
        "res1": (_init_conv(k3, out_channels, out_channels),
                 _init_conv(k4, out_channels, out_channels)),
    }


# --------------------------------------------------------------------------
# Pure-JAX reference (f32, HIGHEST precision) for the numerical check.
# --------------------------------------------------------------------------
def _ref_forward(x_nchw, params):
    x = jnp.transpose(x_nchw.astype(jnp.float32), (0, 2, 3, 1))

    def conv(v, wb, pre_relu=False):
        w, b = wb
        if pre_relu:
            v = jnp.maximum(v, 0.0)
        y = lax.conv_general_dilated(
            v, w, (1, 1), ((1, 1), (1, 1)),
            dimension_numbers=("NHWC", "HWIO", "NHWC"),
            precision=lax.Precision.HIGHEST)
        return y + b

    x = conv(x, params["conv"])
    x = lax.reduce_window(x, -jnp.inf, lax.max, (1, 3, 3, 1), (1, 2, 2, 1),
                          ((0, 0), (1, 1), (1, 1), (0, 0)))
    for blk in ("res0", "res1"):
        c0, c1 = params[blk]
        x = conv(conv(x, c0, pre_relu=True), c1, pre_relu=True) + x
    return jnp.transpose(x, (0, 3, 1, 2))


if __name__ == "__main__":
    key = jax.random.PRNGKey(0)
    kx, kp = jax.random.split(key)

    # Small shapes: batch=2, input (4, 16, 16), out_channels=32 -> (2, 32, 8, 8)
    x = jax.random.normal(kx, (2, 4, 16, 16), jnp.float32)
    params = init_conv_sequence_params(kp, in_channels=4, out_channels=32)

    fwd = jax.jit(conv_sequence_forward)
    out = jax.block_until_ready(fwd(x, params))
    assert out.shape == (2, 32, 8, 8), out.shape  # ConvSequence.get_output_shape

    ref = jax.block_until_ready(_ref_forward(x, params))
    np.testing.assert_allclose(np.asarray(out), np.asarray(ref),
                               rtol=2e-2, atol=2e-2)

    print("KERNEL_OK")
</pallas_src>

<mosaic_0001>
module attributes {stable_mosaic.version = 11 : i64} {
  func.func @kernel(%arg0: i32, %arg1: memref<1x16x16x4xf32, #tpu.memory_space<vmem>>, %arg2: memref<3x3x128x128xf32, #tpu.memory_space<vmem>>, %arg3: memref<1x128xf32, #tpu.memory_space<vmem>>, %arg4: memref<3x3x128x128xf32, #tpu.memory_space<vmem>>, %arg5: memref<1x128xf32, #tpu.memory_space<vmem>>, %arg6: memref<3x3x128x128xf32, #tpu.memory_space<vmem>>, %arg7: memref<1x128xf32, #tpu.memory_space<vmem>>, %arg8: memref<3x3x128x128xf32, #tpu.memory_space<vmem>>, %arg9: memref<1x128xf32, #tpu.memory_space<vmem>>, %arg10: memref<3x3x128x128xf32, #tpu.memory_space<vmem>>, %arg11: memref<1x128xf32, #tpu.memory_space<vmem>>, %arg12: memref<1x8x8x128xf32, #tpu.memory_space<vmem>>, %arg13: memref<18x18x128xf32, #tpu.memory_space<vmem>>, %arg14: memref<10x10x128xf32, #tpu.memory_space<vmem>>) attributes {dimension_semantics = [#tpu.dimension_semantics<parallel>], iteration_bounds = array<i64: 2>, scalar_prefetch = 0 : i64, scratch_operands = 2 : i64, tpu.core_type = #tpu.core_type<tc>, window_params = [{transform_indices = @transform_0, window_bounds = array<i64: 1, 16, 16, 4>}, {pipeline_mode = #tpu.pipeline_mode<synchronous>, transform_indices = @transform_1, window_bounds = array<i64: 3, 3, 128, 128>}, {pipeline_mode = #tpu.pipeline_mode<synchronous>, transform_indices = @transform_2, window_bounds = array<i64: 1, 128>}, {pipeline_mode = #tpu.pipeline_mode<synchronous>, transform_indices = @transform_3, window_bounds = array<i64: 3, 3, 128, 128>}, {pipeline_mode = #tpu.pipeline_mode<synchronous>, transform_indices = @transform_4, window_bounds = array<i64: 1, 128>}, {pipeline_mode = #tpu.pipeline_mode<synchronous>, transform_indices = @transform_5, window_bounds = array<i64: 3, 3, 128, 128>}, {pipeline_mode = #tpu.pipeline_mode<synchronous>, transform_indices = @transform_6, window_bounds = array<i64: 1, 128>}, {pipeline_mode = #tpu.pipeline_mode<synchronous>, transform_indices = @transform_7, window_bounds = array<i64: 3, 3, 128, 128>}, {pipeline_mode = #tpu.pipeline_mode<synchronous>, transform_indices = @transform_8, window_bounds = array<i64: 1, 128>}, {pipeline_mode = #tpu.pipeline_mode<synchronous>, transform_indices = @transform_9, window_bounds = array<i64: 3, 3, 128, 128>}, {pipeline_mode = #tpu.pipeline_mode<synchronous>, transform_indices = @transform_10, window_bounds = array<i64: 1, 128>}, {transform_indices = @transform_11, window_bounds = array<i64: 1, 8, 8, 128>}]} {
    %cst = arith.constant 0.000000e+00 : f32
    %0 = vector.broadcast %cst : f32 to vector<18x18x128xf32>
    %c0 = arith.constant 0 : index
    %c0_0 = arith.constant 0 : index
    %c0_1 = arith.constant 0 : index
    %1 = vector.load %arg13[%c0, %c0_0, %c0_1] : memref<18x18x128xf32, #tpu.memory_space<vmem>>, vector<18x18x128xf32>
    tpu.vector_store %arg13[%c0, %c0_0, %c0_1], %0 {strides = array<i32>} : memref<18x18x128xf32, #tpu.memory_space<vmem>>, vector<18x18x128xf32>,
    %cst_2 = arith.constant 0.000000e+00 : f32
    %2 = vector.broadcast %cst_2 : f32 to vector<10x10x128xf32>
    %c0_3 = arith.constant 0 : index
    %c0_4 = arith.constant 0 : index
    %c0_5 = arith.constant 0 : index
    %3 = vector.load %arg14[%c0_3, %c0_4, %c0_5] : memref<10x10x128xf32, #tpu.memory_space<vmem>>, vector<10x10x128xf32>
    tpu.vector_store %arg14[%c0_3, %c0_4, %c0_5], %2 {strides = array<i32>} : memref<10x10x128xf32, #tpu.memory_space<vmem>>, vector<10x10x128xf32>,
    %c0_6 = arith.constant 0 : index
    %c0_7 = arith.constant 0 : index
    %c0_8 = arith.constant 0 : index
    %c0_9 = arith.constant 0 : index
    %4 = vector.load %arg1[%c0_6, %c0_7, %c0_8, %c0_9] : memref<1x16x16x4xf32, #tpu.memory_space<vmem>>, vector<1x16x16x4xf32>
    %5 = vector.shape_cast %4 : vector<1x16x16x4xf32> to vector<16x16x4xf32>
    %c1 = arith.constant 1 : index
    %c1_10 = arith.constant 1 : index
    %c0_11 = arith.constant 0 : index
    %6 = vector.load %arg13[%c1, %c1_10, %c0_11] : memref<18x18x128xf32, #tpu.memory_space<vmem>>, vector<16x16x4xf32>
    tpu.vector_store %arg13[%c1, %c1_10, %c0_11], %5 {strides = array<i32>} : memref<18x18x128xf32, #tpu.memory_space<vmem>>, vector<16x16x4xf32>,
    %cst_12 = arith.constant 0.000000e+00 : f32
    %7 = vector.broadcast %cst_12 : f32 to vector<256x128xf32>
    %c0_13 = arith.constant 0 : index
    %c0_14 = arith.constant 0 : index
    %c0_15 = arith.constant 0 : index
    %8 = vector.load %arg13[%c0_13, %c0_14, %c0_15] : memref<18x18x128xf32, #tpu.memory_space<vmem>>, vector<16x16x128xf32>
    %9 = vector.shape_cast %8 : vector<16x16x128xf32> to vector<256x128xf32>
    %c0_16 = arith.constant 0 : index
    %c0_17 = arith.constant 0 : index
    %c0_18 = arith.constant 0 : index
    %c0_19 = arith.constant 0 : index
    %10 = vector.load %arg2[%c0_16, %c0_17, %c0_18, %c0_19] : memref<3x3x128x128xf32, #tpu.memory_space<vmem>>, vector<1x1x128x128xf32>
    %11 = vector.shape_cast %10 : vector<1x1x128x128xf32> to vector<128x128xf32>
    %cst_20 = arith.constant dense<0.000000e+00> : vector<256x128xf32>
    %12 = tpu.matmul %9, %11, %cst_20 {dimension_numbers = #tpu.dot_dimension_numbers<[1], [0], [0], [1], [0, 0, 1, 1], [], []>} : vector<256x128xf32>, vector<128x128xf32>, vector<256x128xf32> -> vector<256x128xf32>
    %13 = arith.addf %7, %12 : vector<256x128xf32>
    %c0_21 = arith.constant 0 : index
    %c1_22 = arith.constant 1 : index
    %c0_23 = arith.constant 0 : index
    %14 = vector.load %arg13[%c0_21, %c1_22, %c0_23] : memref<18x18x128xf32, #tpu.memory_space<vmem>>, vector<16x16x128xf32>
    %15 = vector.shape_cast %14 : vector<16x16x128xf32> to vector<256x128xf32>
    %c0_24 = arith.constant 0 : index
    %c1_25 = arith.constant 1 : index
    %c0_26 = arith.constant 0 : index
    %c0_27 = arith.constant 0 : index
    %16 = vector.load %arg2[%c0_24, %c1_25, %c0_26, %c0_27] : memref<3x3x128x128xf32, #tpu.memory_space<vmem>>, vector<1x1x128x128xf32>
    %17 = vector.shape_cast %16 : vector<1x1x128x128xf32> to vector<128x128xf32>
    %cst_28 = arith.constant dense<0.000000e+00> : vector<256x128xf32>
    %18 = tpu.matmul %15, %17, %cst_28 {dimension_numbers = #tpu.dot_dimension_numbers<[1], [0], [0], [1], [0, 0, 1, 1], [], []>} : vector<256x128xf32>, vector<128x128xf32>, vector<256x128xf32> -> vector<256x128xf32>
    %19 = arith.addf %13, %18 : vector<256x128xf32>
    %c0_29 = arith.constant 0 : index
    %c2 = arith.constant 2 : index
    %c0_30 = arith.constant 0 : index
    %20 = vector.load %arg13[%c0_29, %c2, %c0_30] : memref<18x18x128xf32, #tpu.memory_space<vmem>>, vector<16x16x128xf32>
    %21 = vector.shape_cast %20 : vector<16x16x128xf32> to vector<256x128xf32>
    %c0_31 = arith.constant 0 : index
    %c2_32 = arith.constant 2 : index
    %c0_33 = arith.constant 0 : index
    %c0_34 = arith.constant 0 : index
    %22 = vector.load %arg2[%c0_31, %c2_32, %c0_33, %c0_34] : memref<3x3x128x128xf32, #tpu.memory_space<vmem>>, vector<1x1x128x128xf32>
    %23 = vector.shape_cast %22 : vector<1x1x128x128xf32> to vector<128x128xf32>
    %cst_35 = arith.constant dense<0.000000e+00> : vector<256x128xf32>
    %24 = tpu.matmul %21, %23, %cst_35 {dimension_numbers = #tpu.dot_dimension_numbers<[1], [0], [0], [1], [0, 0, 1, 1], [], []>} : vector<256x128xf32>, vector<128x128xf32>, vector<256x128xf32> -> vector<256x128xf32>
    %25 = arith.addf %19, %24 : vector<256x128xf32>
    %c1_36 = arith.constant 1 : index
    %c0_37 = arith.constant 0 : index
    %c0_38 = arith.constant 0 : index
    %26 = vector.load %arg13[%c1_36, %c0_37, %c0_38] : memref<18x18x128xf32, #tpu.memory_space<vmem>>, vector<16x16x128xf32>
    %27 = vector.shape_cast %26 : vector<16x16x128xf32> to vector<256x128xf32>
    %c1_39 = arith.constant 1 : index
    %c0_40 = arith.constant 0 : index
    %c0_41 = arith.constant 0 : index
    %c0_42 = arith.constant 0 : index
    %28 = vector.load %arg2[%c1_39, %c0_40, %c0_41, %c0_42] : memref<3x3x128x128xf32, #tpu.memory_space<vmem>>, vector<1x1x128x128xf32>
    %29 = vector.shape_cast %28 : vector<1x1x128x128xf32> to vector<128x128xf32>
    %cst_43 = arith.constant dense<0.000000e+00> : vector<256x128xf32>
    %30 = tpu.matmul %27, %29, %cst_43 {dimension_numbers = #tpu.dot_dimension_numbers<[1], [0], [0], [1], [0, 0, 1, 1], [], []>} : vector<256x128xf32>, vector<128x128xf32>, vector<256x128xf32> -> vector<256x128xf32>
    %31 = arith.addf %25, %30 : vector<256x128xf32>
    %c1_44 = arith.constant 1 : index
    %c1_45 = arith.constant 1 : index
    %c0_46 = arith.constant 0 : index
    %32 = vector.load %arg13[%c1_44, %c1_45, %c0_46] : memref<18x18x128xf32, #tpu.memory_space<vmem>>, vector<16x16x128xf32>
    %33 = vector.shape_cast %32 : vector<16x16x128xf32> to vector<256x128xf32>
    %c1_47 = arith.constant 1 : index
    %c1_48 = arith.constant 1 : index
    %c0_49 = arith.constant 0 : index
    %c0_50 = arith.constant 0 : index
    %34 = vector.load %arg2[%c1_47, %c1_48, %c0_49, %c0_50] : memref<3x3x128x128xf32, #tpu.memory_space<vmem>>, vector<1x1x128x128xf32>
    %35 = vector.shape_cast %34 : vector<1x1x128x128xf32> to vector<128x128xf32>
    %cst_51 = arith.constant dense<0.000000e+00> : vector<256x128xf32>
    %36 = tpu.matmul %33, %35, %cst_51 {dimension_numbers = #tpu.dot_dimension_numbers<[1], [0], [0], [1], [0, 0, 1, 1], [], []>} : vector<256x128xf32>, vector<128x128xf32>, vector<256x128xf32> -> vector<256x128xf32>
    %37 = arith.addf %31, %36 : vector<256x128xf32>
    %c1_52 = arith.constant 1 : index
    %c2_53 = arith.constant 2 : index
    %c0_54 = arith.constant 0 : index
    %38 = vector.load %arg13[%c1_52, %c2_53, %c0_54] : memref<18x18x128xf32, #tpu.memory_space<vmem>>, vector<16x16x128xf32>
    %39 = vector.shape_cast %38 : vector<16x16x128xf32> to vector<256x128xf32>
    %c1_55 = arith.constant 1 : index
    %c2_56 = arith.constant 2 : index
    %c0_57 = arith.constant 0 : index
    %c0_58 = arith.constant 0 : index
    %40 = vector.load %arg2[%c1_55, %c2_56, %c0_57, %c0_58] : memref<3x3x128x128xf32, #tpu.memory_space<vmem>>, vector<1x1x128x128xf32>
    %41 = vector.shape_cast %40 : vector<1x1x128x128xf32> to vector<128x128xf32>
    %cst_59 = arith.constant dense<0.000000e+00> : vector<256x128xf32>
    %42 = tpu.matmul %39, %41, %cst_59 {dimension_numbers = #tpu.dot_dimension_numbers<[1], [0], [0], [1], [0, 0, 1, 1], [], []>} : vector<256x128xf32>, vector<128x128xf32>, vector<256x128xf32> -> vector<256x128xf32>
    %43 = arith.addf %37, %42 : vector<256x128xf32>
    %c2_60 = arith.constant 2 : index
    %c0_61 = arith.constant 0 : index
    %c0_62 = arith.constant 0 : index
    %44 = vector.load %arg13[%c2_60, %c0_61, %c0_62] : memref<18x18x128xf32, #tpu.memory_space<vmem>>, vector<16x16x128xf32>
    %45 = vector.shape_cast %44 : vector<16x16x128xf32> to vector<256x128xf32>
    %c2_63 = arith.constant 2 : index
    %c0_64 = arith.constant 0 : index
    %c0_65 = arith.constant 0 : index
    %c0_66 = arith.constant 0 : index
    %46 = vector.load %arg2[%c2_63, %c0_64, %c0_65, %c0_66] : memref<3x3x128x128xf32, #tpu.memory_space<vmem>>, vector<1x1x128x128xf32>
    %47 = vector.shape_cast %46 : vector<1x1x128x128xf32> to vector<128x128xf32>
    %cst_67 = arith.constant dense<0.000000e+00> : vector<256x128xf32>
    %48 = tpu.matmul %45, %47, %cst_67 {dimension_numbers = #tpu.dot_dimension_numbers<[1], [0], [0], [1], [0, 0, 1, 1], [], []>} : vector<256x128xf32>, vector<128x128xf32>, vector<256x128xf32> -> vector<256x128xf32>
    %49 = arith.addf %43, %48 : vector<256x128xf32>
    %c2_68 = arith.constant 2 : index
    %c1_69 = arith.constant 1 : index
    %c0_70 = arith.constant 0 : index
    %50 = vector.load %arg13[%c2_68, %c1_69, %c0_70] : memref<18x18x128xf32, #tpu.memory_space<vmem>>, vector<16x16x128xf32>
    %51 = vector.shape_cast %50 : vector<16x16x128xf32> to vector<256x128xf32>
    %c2_71 = arith.constant 2 : index
    %c1_72 = arith.constant 1 : index
    %c0_73 = arith.constant 0 : index
    %c0_74 = arith.constant 0 : index
    %52 = vector.load %arg2[%c2_71, %c1_72, %c0_73, %c0_74] : memref<3x3x128x128xf32, #tpu.memory_space<vmem>>, vector<1x1x128x128xf32>
    %53 = vector.shape_cast %52 : vector<1x1x128x128xf32> to vector<128x128xf32>
    %cst_75 = arith.constant dense<0.000000e+00> : vector<256x128xf32>
    %54 = tpu.matmul %51, %53, %cst_75 {dimension_numbers = #tpu.dot_dimension_numbers<[1], [0], [0], [1], [0, 0, 1, 1], [], []>} : vector<256x128xf32>, vector<128x128xf32>, vector<256x128xf32> -> vector<256x128xf32>
    %55 = arith.addf %49, %54 : vector<256x128xf32>
    %c2_76 = arith.constant 2 : index
    %c2_77 = arith.constant 2 : index
    %c0_78 = arith.constant 0 : index
    %56 = vector.load %arg13[%c2_76, %c2_77, %c0_78] : memref<18x18x128xf32, #tpu.memory_space<vmem>>, vector<16x16x128xf32>
    %57 = vector.shape_cast %56 : vector<16x16x128xf32> to vector<256x128xf32>
    %c2_79 = arith.constant 2 : index
    %c2_80 = arith.constant 2 : index
    %c0_81 = arith.constant 0 : index
    %c0_82 = arith.constant 0 : index
    %58 = vector.load %arg2[%c2_79, %c2_80, %c0_81, %c0_82] : memref<3x3x128x128xf32, #tpu.memory_space<vmem>>, vector<1x1x128x128xf32>
    %59 = vector.shape_cast %58 : vector<1x1x128x128xf32> to vector<128x128xf32>
    %cst_83 = arith.constant dense<0.000000e+00> : vector<256x128xf32>
    %60 = tpu.matmul %57, %59, %cst_83 {dimension_numbers = #tpu.dot_dimension_numbers<[1], [0], [0], [1], [0, 0, 1, 1], [], []>} : vector<256x128xf32>, vector<128x128xf32>, vector<256x128xf32> -> vector<256x128xf32>
    %61 = arith.addf %55, %60 : vector<256x128xf32>
    %c0_84 = arith.constant 0 : index
    %c0_85 = arith.constant 0 : index
    %62 = vector.load %arg3[%c0_84, %c0_85] : memref<1x128xf32, #tpu.memory_space<vmem>>, vector<1x128xf32>
    %63 = vector.broadcast %62 : vector<1x128xf32> to vector<256x128xf32>
    %64 = arith.addf %61, %63 : vector<256x128xf32>
    %65 = vector.shape_cast %64 : vector<256x128xf32> to vector<16x16x128xf32>
    %66 = vector.shape_cast %65 : vector<16x16x128xf32> to vector<8x2x16x128xf32>
    %67 = vector.extract_strided_slice %66 {offsets = [0, 0, 0, 0], sizes = [8, 1, 16, 128], strides = [1, 1, 1, 1]} : vector<8x2x16x128xf32> to vector<8x1x16x128xf32>
    %68 = vector.shape_cast %67 : vector<8x1x16x128xf32> to vector<8x16x128xf32>
    %69 = vector.extract_strided_slice %66 {offsets = [0, 1, 0, 0], sizes = [8, 1, 16, 128], strides = [1, 1, 1, 1]} : vector<8x2x16x128xf32> to vector<8x1x16x128xf32>
    %70 = vector.shape_cast %69 : vector<8x1x16x128xf32> to vector<8x16x128xf32>
    %71 = vector.extract_strided_slice %68 {offsets = [0, 0, 0], sizes = [1, 16, 128], strides = [1, 1, 1]} : vector<8x16x128xf32> to vector<1x16x128xf32>
    %72 = vector.extract_strided_slice %70 {offsets = [0, 0, 0], sizes = [7, 16, 128], strides = [1, 1, 1]} : vector<8x16x128xf32> to vector<7x16x128xf32>
    %73 = tpu.concatenate %71, %72 in 0 : vector<1x16x128xf32>, vector<7x16x128xf32> -> vector<8x16x128xf32>
    %74 = arith.maximumf %68, %70 : vector<8x16x128xf32>
    %75 = arith.maximumf %74, %73 : vector<8x16x128xf32>
    %76 = vector.extract_strided_slice %75 {offsets = [0, 0, 0], sizes = [8, 1, 128], strides = [1, 1, 1]} : vector<8x16x128xf32> to vector<8x1x128xf32>
    %77 = vector.extract_strided_slice %75 {offsets = [0, 1, 0], sizes = [8, 1, 128], strides = [1, 1, 1]} : vector<8x16x128xf32> to vector<8x1x128xf32>
    %78 = arith.maximumf %76, %77 : vector<8x1x128xf32>
    %79 = vector.extract_strided_slice %75 {offsets = [0, 0, 0], sizes = [8, 1, 128], strides = [1, 1, 1]} : vector<8x16x128xf32> to vector<8x1x128xf32>
    %80 = arith.maximumf %78, %79 : vector<8x1x128xf32>
    %81 = vector.extract_strided_slice %75 {offsets = [0, 2, 0], sizes = [8, 1, 128], strides = [1, 1, 1]} : vector<8x16x128xf32> to vector<8x1x128xf32>
    %82 = vector.extract_strided_slice %75 {offsets = [0, 3, 0], sizes = [8, 1, 128], strides = [1, 1, 1]} : vector<8x16x128xf32> to vector<8x1x128xf32>
    %83 = arith.maximumf %81, %82 : vector<8x1x128xf32>
    %84 = vector.extract_strided_slice %75 {offsets = [0, 1, 0], sizes = [8, 1, 128], strides = [1, 1, 1]} : vector<8x16x128xf32> to vector<8x1x128xf32>
    %85 = arith.maximumf %83, %84 : vector<8x1x128xf32>
    %86 = vector.extract_strided_slice %75 {offsets = [0, 4, 0], sizes = [8, 1, 128], strides = [1, 1, 1]} : vector<8x16x128xf32> to vector<8x1x128xf32>
    %87 = vector.extract_strided_slice %75 {offsets = [0, 5, 0], sizes = [8, 1, 128], strides = [1, 1, 1]} : vector<8x16x128xf32> to vector<8x1x128xf32>
    %88 = arith.maximumf %86, %87 : vector<8x1x128xf32>
    %89 = vector.extract_strided_slice %75 {offsets = [0, 3, 0], sizes = [8, 1, 128], strides = [1, 1, 1]} : vector<8x16x128xf32> to vector<8x1x128xf32>
    %90 = arith.maximumf %88, %89 : vector<8x1x128xf32>
    %91 = vector.extract_strided_slice %75 {offsets = [0, 6, 0], sizes = [8, 1, 128], strides = [1, 1, 1]} : vector<8x16x128xf32> to vector<8x1x128xf32>
    %92 = vector.extract_strided_slice %75 {offsets = [0, 7, 0], sizes = [8, 1, 128], strides = [1, 1, 1]} : vector<8x16x128xf32> to vector<8x1x128xf32>
    %93 = arith.maximumf %91, %92 : vector<8x1x128xf32>
    %94 = vector.extract_strided_slice %75 {offsets = [0, 5, 0], sizes = [8, 1, 128], strides = [1, 1, 1]} : vector<8x16x128xf32> to vector<8x1x128xf32>
    %95 = arith.maximumf %93, %94 : vector<8x1x128xf32>
    %96 = vector.extract_strided_slice %75 {offsets = [0, 8, 0], sizes = [8, 1, 128], strides = [1, 1, 1]} : vector<8x16x128xf32> to vector<8x1x128xf32>
    %97 = vector.extract_strided_slice %75 {offsets = [0, 9, 0], sizes = [8, 1, 128], strides = [1, 1, 1]} : vector<8x16x128xf32> to vector<8x1x128xf32>
    %98 = arith.maximumf %96, %97 : vector<8x1x128xf32>
    %99 = vector.extract_strided_slice %75 {offsets = [0, 7, 0], sizes = [8, 1, 128], strides = [1, 1, 1]} : vector<8x16x128xf32> to vector<8x1x128xf32>
    %100 = arith.maximumf %98, %99 : vector<8x1x128xf32>
    %101 = vector.extract_strided_slice %75 {offsets = [0, 10, 0], sizes = [8, 1, 128], strides = [1, 1, 1]} : vector<8x16x128xf32> to vector<8x1x128xf32>
    %102 = vector.extract_strided_slice %75 {offsets = [0, 11, 0], sizes = [8, 1, 128], strides = [1, 1, 1]} : vector<8x16x128xf32> to vector<8x1x128xf32>
    %103 = arith.maximumf %101, %102 : vector<8x1x128xf32>
    %104 = vector.extract_strided_slice %75 {offsets = [0, 9, 0], sizes = [8, 1, 128], strides = [1, 1, 1]} : vector<8x16x128xf32> to vector<8x1x128xf32>
    %105 = arith.maximumf %103, %104 : vector<8x1x128xf32>
    %106 = vector.extract_strided_slice %75 {offsets = [0, 12, 0], sizes = [8, 1, 128], strides = [1, 1, 1]} : vector<8x16x128xf32> to vector<8x1x128xf32>
    %107 = vector.extract_strided_slice %75 {offsets = [0, 13, 0], sizes = [8, 1, 128], strides = [1, 1, 1]} : vector<8x16x128xf32> to vector<8x1x128xf32>
    %108 = arith.maximumf %106, %107 : vector<8x1x128xf32>
    %109 = vector.extract_strided_slice %75 {offsets = [0, 11, 0], sizes = [8, 1, 128], strides = [1, 1, 1]} : vector<8x16x128xf32> to vector<8x1x128xf32>
    %110 = arith.maximumf %108, %109 : vector<8x1x128xf32>
    %111 = vector.extract_strided_slice %75 {offsets = [0, 14, 0], sizes = [8, 1, 128], strides = [1, 1, 1]} : vector<8x16x128xf32> to vector<8x1x128xf32>
    %112 = vector.extract_strided_slice %75 {offsets = [0, 15, 0], sizes = [8, 1, 128], strides = [1, 1, 1]} : vector<8x16x128xf32> to vector<8x1x128xf32>
    %113 = arith.maximumf %111, %112 : vector<8x1x128xf32>
    %114 = vector.extract_strided_slice %75 {offsets = [0, 13, 0], sizes = [8, 1, 128], strides = [1, 1, 1]} : vector<8x16x128xf32> to vector<8x1x128xf32>
    %115 = arith.maximumf %113, %114 : vector<8x1x128xf32>
    %116 = tpu.concatenate %80, %85, %90, %95, %100, %105, %110, %115 in 1 : vector<8x1x128xf32>, vector<8x1x128xf32>, vector<8x1x128xf32>, vector<8x1x128xf32>, vector<8x1x128xf32>, vector<8x1x128xf32>, vector<8x1x128xf32>, vector<8x1x128xf32> -> vector<8x8x128xf32>
    %cst_86 = arith.constant 0.000000e+00 : f32
    %117 = vector.broadcast %cst_86 : f32 to vector<8x8x128xf32>
    %118 = arith.maximumf %116, %117 : vector<8x8x128xf32>
    %c1_87 = arith.constant 1 : index
    %c1_88 = arith.constant 1 : index
    %c0_89 = arith.constant 0 : index
    %119 = vector.load %arg14[%c1_87, %c1_88, %c0_89] : memref<10x10x128xf32, #tpu.memory_space<vmem>>, vector<8x8x128xf32>
    tpu.vector_store %arg14[%c1_87, %c1_88, %c0_89], %118 {strides = array<i32>} : memref<10x10x128xf32, #tpu.memory_space<vmem>>, vector<8x8x128xf32>,
    %cst_90 = arith.constant 0.000000e+00 : f32
    %120 = vector.broadcast %cst_90 : f32 to vector<64x128xf32>
    %c0_91 = arith.constant 0 : index
    %c0_92 = arith.constant 0 : index
    %c0_93 = arith.constant 0 : index
    %121 = vector.load %arg14[%c0_91, %c0_92, %c0_93] : memref<10x10x128xf32, #tpu.memory_space<vmem>>, vector<8x8x128xf32>
    %122 = vector.shape_cast %121 : vector<8x8x128xf32> to vector<64x128xf32>
    %c0_94 = arith.constant 0 : index
    %c0_95 = arith.constant 0 : index
    %c0_96 = arith.constant 0 : index
    %c0_97 = arith.constant 0 : index
    %123 = vector.load %arg4[%c0_94, %c0_95, %c0_96, %c0_97] : memref<3x3x128x128xf32, #tpu.memory_space<vmem>>, vector<1x1x128x128xf32>
    %124 = vector.shape_cast %123 : vector<1x1x128x128xf32> to vector<128x128xf32>
    %cst_98 = arith.constant dense<0.000000e+00> : vector<64x128xf32>
    %125 = tpu.matmul %122, %124, %cst_98 {dimension_numbers = #tpu.dot_dimension_numbers<[1], [0], [0], [1], [0, 0, 1, 1], [], []>} : vector<64x128xf32>, vector<128x128xf32>, vector<64x128xf32> -> vector<64x128xf32>
    %126 = arith.addf %120, %125 : vector<64x128xf32>
    %c0_99 = arith.constant 0 : index
    %c1_100 = arith.constant 1 : index
    %c0_101 = arith.constant 0 : index
    %127 = vector.load %arg14[%c0_99, %c1_100, %c0_101] : memref<10x10x128xf32, #tpu.memory_space<vmem>>, vector<8x8x128xf32>
    %128 = vector.shape_cast %127 : vector<8x8x128xf32> to vector<64x128xf32>
    %c0_102 = arith.constant 0 : index
    %c1_103 = arith.constant 1 : index
    %c0_104 = arith.constant 0 : index
    %c0_105 = arith.constant 0 : index
    %129 = vector.load %arg4[%c0_102, %c1_103, %c0_104, %c0_105] : memref<3x3x128x128xf32, #tpu.memory_space<vmem>>, vector<1x1x128x128xf32>
    %130 = vector.shape_cast %129 : vector<1x1x128x128xf32> to vector<128x128xf32>
    %cst_106 = arith.constant dense<0.000000e+00> : vector<64x128xf32>
    %131 = tpu.matmul %128, %130, %cst_106 {dimension_numbers = #tpu.dot_dimension_numbers<[1], [0], [0], [1], [0, 0, 1, 1], [], []>} : vector<64x128xf32>, vector<128x128xf32>, vector<64x128xf32> -> vector<64x128xf32>
    %132 = arith.addf %126, %131 : vector<64x128xf32>
    %c0_107 = arith.constant 0 : index
    %c2_108 = arith.constant 2 : index
    %c0_109 = arith.constant 0 : index
    %133 = vector.load %arg14[%c0_107, %c2_108, %c0_109] : memref<10x10x128xf32, #tpu.memory_space<vmem>>, vector<8x8x128xf32>
    %134 = vector.shape_cast %133 : vector<8x8x128xf32> to vector<64x128xf32>
    %c0_110 = arith.constant 0 : index
    %c2_111 = arith.constant 2 : index
    %c0_112 = arith.constant 0 : index
    %c0_113 = arith.constant 0 : index
    %135 = vector.load %arg4[%c0_110, %c2_111, %c0_112, %c0_113] : memref<3x3x128x128xf32, #tpu.memory_space<vmem>>, vector<1x1x128x128xf32>
    %136 = vector.shape_cast %135 : vector<1x1x128x128xf32> to vector<128x128xf32>
    %cst_114 = arith.constant dense<0.000000e+00> : vector<64x128xf32>
    %137 = tpu.matmul %134, %136, %cst_114 {dimension_numbers = #tpu.dot_dimension_numbers<[1], [0], [0], [1], [0, 0, 1, 1], [], []>} : vector<64x128xf32>, vector<128x128xf32>, vector<64x128xf32> -> vector<64x128xf32>
    %138 = arith.addf %132, %137 : vector<64x128xf32>
    %c1_115 = arith.constant 1 : index
    %c0_116 = arith.constant 0 : index
    %c0_117 = arith.constant 0 : index
    %139 = vector.load %arg14[%c1_115, %c0_116, %c0_117] : memref<10x10x128xf32, #tpu.memory_space<vmem>>, vector<8x8x128xf32>
    %140 = vector.shape_cast %139 : vector<8x8x128xf32> to vector<64x128xf32>
    %c1_118 = arith.constant 1 : index
    %c0_119 = arith.constant 0 : index
    %c0_120 = arith.constant 0 : index
    %c0_121 = arith.constant 0 : index
    %141 = vector.load %arg4[%c1_118, %c0_119, %c0_120, %c0_121] : memref<3x3x128x128xf32, #tpu.memory_space<vmem>>, vector<1x1x128x128xf32>
    %142 = vector.shape_cast %141 : vector<1x1x128x128xf32> to vector<128x128xf32>
    %cst_122 = arith.constant dense<0.000000e+00> : vector<64x128xf32>
    %143 = tpu.matmul %140, %142, %cst_122 {dimension_numbers = #tpu.dot_dimension_numbers<[1], [0], [0], [1], [0, 0, 1, 1], [], []>} : vector<64x128xf32>, vector<128x128xf32>, vector<64x128xf32> -> vector<64x128xf32>
    %144 = arith.addf %138, %143 : vector<64x128xf32>
    %c1_123 = arith.constant 1 : index
    %c1_124 = arith.constant 1 : index
    %c0_125 = arith.constant 0 : index
    %145 = vector.load %arg14[%c1_123, %c1_124, %c0_125] : memref<10x10x128xf32, #tpu.memory_space<vmem>>, vector<8x8x128xf32>
    %146 = vector.shape_cast %145 : vector<8x8x128xf32> to vector<64x128xf32>
    %c1_126 = arith.constant 1 : index
    %c1_127 = arith.constant 1 : index
    %c0_128 = arith.constant 0 : index
    %c0_129 = arith.constant 0 : index
    %147 = vector.load %arg4[%c1_126, %c1_127, %c0_128, %c0_129] : memref<3x3x128x128xf32, #tpu.memory_space<vmem>>, vector<1x1x128x128xf32>
    %148 = vector.shape_cast %147 : vector<1x1x128x128xf32> to vector<128x128xf32>
    %cst_130 = arith.constant dense<0.000000e+00> : vector<64x128xf32>
    %149 = tpu.matmul %146, %148, %cst_130 {dimension_numbers = #tpu.dot_dimension_numbers<[1], [0], [0], [1], [0, 0, 1, 1], [], []>} : vector<64x128xf32>, vector<128x128xf32>, vector<64x128xf32> -> vector<64x128xf32>
    %150 = arith.addf %144, %149 : vector<64x128xf32>
    %c1_131 = arith.constant 1 : index
    %c2_132 = arith.constant 2 : index
    %c0_133 = arith.constant 0 : index
    %151 = vector.load %arg14[%c1_131, %c2_132, %c0_133] : memref<10x10x128xf32, #tpu.memory_space<vmem>>, vector<8x8x128xf32>
    %152 = vector.shape_cast %151 : vector<8x8x128xf32> to vector<64x128xf32>
    %c1_134 = arith.constant 1 : index
    %c2_135 = arith.constant 2 : index
    %c0_136 = arith.constant 0 : index
    %c0_137 = arith.constant 0 : index
    %153 = vector.load %arg4[%c1_134, %c2_135, %c0_136, %c0_137] : memref<3x3x128x128xf32, #tpu.memory_space<vmem>>, vector<1x1x128x128xf32>
    %154 = vector.shape_cast %153 : vector<1x1x128x128xf32> to vector<128x128xf32>
    %cst_138 = arith.constant dense<0.000000e+00> : vector<64x128xf32>
    %155 = tpu.matmul %152, %154, %cst_138 {dimension_numbers = #tpu.dot_dimension_numbers<[1], [0], [0], [1], [0, 0, 1, 1], [], []>} : vector<64x128xf32>, vector<128x128xf32>, vector<64x128xf32> -> vector<64x128xf32>
    %156 = arith.addf %150, %155 : vector<64x128xf32>
    %c2_139 = arith.constant 2 : index
    %c0_140 = arith.constant 0 : index
    %c0_141 = arith.constant 0 : index
    %157 = vector.load %arg14[%c2_139, %c0_140, %c0_141] : memref<10x10x128xf32, #tpu.memory_space<vmem>>, vector<8x8x128xf32>
    %158 = vector.shape_cast %157 : vector<8x8x128xf32> to vector<64x128xf32>
    %c2_142 = arith.constant 2 : index
    %c0_143 = arith.constant 0 : index
    %c0_144 = arith.constant 0 : index
    %c0_145 = arith.constant 0 : index
    %159 = vector.load %arg4[%c2_142, %c0_143, %c0_144, %c0_145] : memref<3x3x128x128xf32, #tpu.memory_space<vmem>>, vector<1x1x128x128xf32>
    %160 = vector.shape_cast %159 : vector<1x1x128x128xf32> to vector<128x128xf32>
    %cst_146 = arith.constant dense<0.000000e+00> : vector<64x128xf32>
    %161 = tpu.matmul %158, %160, %cst_146 {dimension_numbers = #tpu.dot_dimension_numbers<[1], [0], [0], [1], [0, 0, 1, 1], [], []>} : vector<64x128xf32>, vector<128x128xf32>, vector<64x128xf32> -> vector<64x128xf32>
    %162 = arith.addf %156, %161 : vector<64x128xf32>
    %c2_147 = arith.constant 2 : index
    %c1_148 = arith.constant 1 : index
    %c0_149 = arith.constant 0 : index
    %163 = vector.load %arg14[%c2_147, %c1_148, %c0_149] : memref<10x10x128xf32, #tpu.memory_space<vmem>>, vector<8x8x128xf32>
    %164 = vector.shape_cast %163 : vector<8x8x128xf32> to vector<64x128xf32>
    %c2_150 = arith.constant 2 : index
    %c1_151 = arith.constant 1 : index
    %c0_152 = arith.constant 0 : index
    %c0_153 = arith.constant 0 : index
    %165 = vector.load %arg4[%c2_150, %c1_151, %c0_152, %c0_153] : memref<3x3x128x128xf32, #tpu.memory_space<vmem>>, vector<1x1x128x128xf32>
    %166 = vector.shape_cast %165 : vector<1x1x128x128xf32> to vector<128x128xf32>
    %cst_154 = arith.constant dense<0.000000e+00> : vector<64x128xf32>
    %167 = tpu.matmul %164, %166, %cst_154 {dimension_numbers = #tpu.dot_dimension_numbers<[1], [0], [0], [1], [0, 0, 1, 1], [], []>} : vector<64x128xf32>, vector<128x128xf32>, vector<64x128xf32> -> vector<64x128xf32>
    %168 = arith.addf %162, %167 : vector<64x128xf32>
    %c2_155 = arith.constant 2 : index
    %c2_156 = arith.constant 2 : index
    %c0_157 = arith.constant 0 : index
    %169 = vector.load %arg14[%c2_155, %c2_156, %c0_157] : memref<10x10x128xf32, #tpu.memory_space<vmem>>, vector<8x8x128xf32>
    %170 = vector.shape_cast %169 : vector<8x8x128xf32> to vector<64x128xf32>
    %c2_158 = arith.constant 2 : index
    %c2_159 = arith.constant 2 : index
    %c0_160 = arith.constant 0 : index
    %c0_161 = arith.constant 0 : index
    %171 = vector.load %arg4[%c2_158, %c2_159, %c0_160, %c0_161] : memref<3x3x128x128xf32, #tpu.memory_space<vmem>>, vector<1x1x128x128xf32>
    %172 = vector.shape_cast %171 : vector<1x1x128x128xf32> to vector<128x128xf32>
    %cst_162 = arith.constant dense<0.000000e+00> : vector<64x128xf32>
    %173 = tpu.matmul %170, %172, %cst_162 {dimension_numbers = #tpu.dot_dimension_numbers<[1], [0], [0], [1], [0, 0, 1, 1], [], []>} : vector<64x128xf32>, vector<128x128xf32>, vector<64x128xf32> -> vector<64x128xf32>
    %174 = arith.addf %168, %173 : vector<64x128xf32>
    %c0_163 = arith.constant 0 : index
    %c0_164 = arith.constant 0 : index
    %175 = vector.load %arg5[%c0_163, %c0_164] : memref<1x128xf32, #tpu.memory_space<vmem>>, vector<1x128xf32>
    %176 = vector.broadcast %175 : vector<1x128xf32> to vector<64x128xf32>
    %177 = arith.addf %174, %176 : vector<64x128xf32>
    %178 = vector.shape_cast %177 : vector<64x128xf32> to vector<8x8x128xf32>
    %cst_165 = arith.constant 0.000000e+00 : f32
    %179 = vector.broadcast %cst_165 : f32 to vector<8x8x128xf32>
    %180 = arith.maximumf %178, %179 : vector<8x8x128xf32>
    %c1_166 = arith.constant 1 : index
    %c1_167 = arith.constant 1 : index
    %c0_168 = arith.constant 0 : index
    %181 = vector.load %arg14[%c1_166, %c1_167, %c0_168] : memref<10x10x128xf32, #tpu.memory_space<vmem>>, vector<8x8x128xf32>
    tpu.vector_store %arg14[%c1_166, %c1_167, %c0_168], %180 {strides = array<i32>} : memref<10x10x128xf32, #tpu.memory_space<vmem>>, vector<8x8x128xf32>,
    %cst_169 = arith.constant 0.000000e+00 : f32
    %182 = vector.broadcast %cst_169 : f32 to vector<64x128xf32>
    %c0_170 = arith.constant 0 : index
    %c0_171 = arith.constant 0 : index
    %c0_172 = arith.constant 0 : index
    %183 = vector.load %arg14[%c0_170, %c0_171, %c0_172] : memref<10x10x128xf32, #tpu.memory_space<vmem>>, vector<8x8x128xf32>
    %184 = vector.shape_cast %183 : vector<8x8x128xf32> to vector<64x128xf32>
    %c0_173 = arith.constant 0 : index
    %c0_174 = arith.constant 0 : index
    %c0_175 = arith.constant 0 : index
    %c0_176 = arith.constant 0 : index
    %185 = vector.load %arg6[%c0_173, %c0_174, %c0_175, %c0_176] : memref<3x3x128x128xf32, #tpu.memory_space<vmem>>, vector<1x1x128x128xf32>
    %186 = vector.shape_cast %185 : vector<1x1x128x128xf32> to vector<128x128xf32>
    %cst_177 = arith.constant dense<0.000000e+00> : vector<64x128xf32>
    %187 = tpu.matmul %184, %186, %cst_177 {dimension_numbers = #tpu.dot_dimension_numbers<[1], [0], [0], [1], [0, 0, 1, 1], [], []>} : vector<64x128xf32>, vector<128x128xf32>, vector<64x128xf32> -> vector<64x128xf32>
    %188 = arith.addf %182, %187 : vector<64x128xf32>
    %c0_178 = arith.constant 0 : index
    %c1_179 = arith.constant 1 : index
    %c0_180 = arith.constant 0 : index
    %189 = vector.load %arg14[%c0_178, %c1_179, %c0_180] : memref<10x10x128xf32, #tpu.memory_space<vmem>>, vector<8x8x128xf32>
    %190 = vector.shape_cast %189 : vector<8x8x128xf32> to vector<64x128xf32>
    %c0_181 = arith.constant 0 : index
    %c1_182 = arith.constant 1 : index
    %c0_183 = arith.constant 0 : index
    %c0_184 = arith.constant 0 : index
    %191 = vector.load %arg6[%c0_181, %c1_182, %c0_183, %c0_184] : memref<3x3x128x128xf32, #tpu.memory_space<vmem>>, vector<1x1x128x128xf32>
    %192 = vector.shape_cast %191 : vector<1x1x128x128xf32> to vector<128x128xf32>
    %cst_185 = arith.constant dense<0.000000e+00> : vector<64x128xf32>
    %193 = tpu.matmul %190, %192, %cst_185 {dimension_numbers = #tpu.dot_dimension_numbers<[1], [0], [0], [1], [0, 0, 1, 1], [], []>} : vector<64x128xf32>, vector<128x128xf32>, vector<64x128xf32> -> vector<64x128xf32>
    %194 = arith.addf %188, %193 : vector<64x128xf32>
    %c0_186 = arith.constant 0 : index
    %c2_187 = arith.constant 2 : index
    %c0_188 = arith.constant 0 : index
    %195 = vector.load %arg14[%c0_186, %c2_187, %c0_188] : memref<10x10x128xf32, #tpu.memory_space<vmem>>, vector<8x8x128xf32>
    %196 = vector.shape_cast %195 : vector<8x8x128xf32> to vector<64x128xf32>
    %c0_189 = arith.constant 0 : index
    %c2_190 = arith.constant 2 : index
    %c0_191 = arith.constant 0 : index
    %c0_192 = arith.constant 0 : index
    %197 = vector.load %arg6[%c0_189, %c2_190, %c0_191, %c0_192] : memref<3x3x128x128xf32, #tpu.memory_space<vmem>>, vector<1x1x128x128xf32>
    %198 = vector.shape_cast %197 : vector<1x1x128x128xf32> to vector<128x128xf32>
    %cst_193 = arith.constant dense<0.000000e+00> : vector<64x128xf32>
    %199 = tpu.matmul %196, %198, %cst_193 {dimension_numbers = #tpu.dot_dimension_numbers<[1], [0], [0], [1], [0, 0, 1, 1], [], []>} : vector<64x128xf32>, vector<128x128xf32>, vector<64x128xf32> -> vector<64x128xf32>
    %200 = arith.addf %194, %199 : vector<64x128xf32>
    %c1_194 = arith.constant 1 : index
    %c0_195 = arith.constant 0 : index
    %c0_196 = arith.constant 0 : index
    %201 = vector.load %arg14[%c1_194, %c0_195, %c0_196] : memref<10x10x128xf32, #tpu.memory_space<vmem>>, vector<8x8x128xf32>
    %202 = vector.shape_cast %201 : vector<8x8x128xf32> to vector<64x128xf32>
    %c1_197 = arith.constant 1 : index
    %c0_198 = arith.constant 0 : index
    %c0_199 = arith.constant 0 : index
    %c0_200 = arith.constant 0 : index
    %203 = vector.load %arg6[%c1_197, %c0_198, %c0_199, %c0_200] : memref<3x3x128x128xf32, #tpu.memory_space<vmem>>, vector<1x1x128x128xf32>
    %204 = vector.shape_cast %203 : vector<1x1x128x128xf32> to vector<128x128xf32>
    %cst_201 = arith.constant dense<0.000000e+00> : vector<64x128xf32>
    %205 = tpu.matmul %202, %204, %cst_201 {dimension_numbers = #tpu.dot_dimension_numbers<[1], [0], [0], [1], [0, 0, 1, 1], [], []>} : vector<64x128xf32>, vector<128x128xf32>, vector<64x128xf32> -> vector<64x128xf32>
    %206 = arith.addf %200, %205 : vector<64x128xf32>
    %c1_202 = arith.constant 1 : index
    %c1_203 = arith.constant 1 : index
    %c0_204 = arith.constant 0 : index
    %207 = vector.load %arg14[%c1_202, %c1_203, %c0_204] : memref<10x10x128xf32, #tpu.memory_space<vmem>>, vector<8x8x128xf32>
    %208 = vector.shape_cast %207 : vector<8x8x128xf32> to vector<64x128xf32>
    %c1_205 = arith.constant 1 : index
    %c1_206 = arith.constant 1 : index
    %c0_207 = arith.constant 0 : index
    %c0_208 = arith.constant 0 : index
    %209 = vector.load %arg6[%c1_205, %c1_206, %c0_207, %c0_208] : memref<3x3x128x128xf32, #tpu.memory_space<vmem>>, vector<1x1x128x128xf32>
    %210 = vector.shape_cast %209 : vector<1x1x128x128xf32> to vector<128x128xf32>
    %cst_209 = arith.constant dense<0.000000e+00> : vector<64x128xf32>
    %211 = tpu.matmul %208, %210, %cst_209 {dimension_numbers = #tpu.dot_dimension_numbers<[1], [0], [0], [1], [0, 0, 1, 1], [], []>} : vector<64x128xf32>, vector<128x128xf32>, vector<64x128xf32> -> vector<64x128xf32>
    %212 = arith.addf %206, %211 : vector<64x128xf32>
    %c1_210 = arith.constant 1 : index
    %c2_211 = arith.constant 2 : index
    %c0_212 = arith.constant 0 : index
    %213 = vector.load %arg14[%c1_210, %c2_211, %c0_212] : memref<10x10x128xf32, #tpu.memory_space<vmem>>, vector<8x8x128xf32>
    %214 = vector.shape_cast %213 : vector<8x8x128xf32> to vector<64x128xf32>
    %c1_213 = arith.constant 1 : index
    %c2_214 = arith.constant 2 : index
    %c0_215 = arith.constant 0 : index
    %c0_216 = arith.constant 0 : index
    %215 = vector.load %arg6[%c1_213, %c2_214, %c0_215, %c0_216] : memref<3x3x128x128xf32, #tpu.memory_space<vmem>>, vector<1x1x128x128xf32>
    %216 = vector.shape_cast %215 : vector<1x1x128x128xf32> to vector<128x128xf32>
    %cst_217 = arith.constant dense<0.000000e+00> : vector<64x128xf32>
    %217 = tpu.matmul %214, %216, %cst_217 {dimension_numbers = #tpu.dot_dimension_numbers<[1], [0], [0], [1], [0, 0, 1, 1], [], []>} : vector<64x128xf32>, vector<128x128xf32>, vector<64x128xf32> -> vector<64x128xf32>
    %218 = arith.addf %212, %217 : vector<64x128xf32>
    %c2_218 = arith.constant 2 : index
    %c0_219 = arith.constant 0 : index
    %c0_220 = arith.constant 0 : index
    %219 = vector.load %arg14[%c2_218, %c0_219, %c0_220] : memref<10x10x128xf32, #tpu.memory_space<vmem>>, vector<8x8x128xf32>
    %220 = vector.shape_cast %219 : vector<8x8x128xf32> to vector<64x128xf32>
    %c2_221 = arith.constant 2 : index
    %c0_222 = arith.constant 0 : index
    %c0_223 = arith.constant 0 : index
    %c0_224 = arith.constant 0 : index
    %221 = vector.load %arg6[%c2_221, %c0_222, %c0_223, %c0_224] : memref<3x3x128x128xf32, #tpu.memory_space<vmem>>, vector<1x1x128x128xf32>
    %222 = vector.shape_cast %221 : vector<1x1x128x128xf32> to vector<128x128xf32>
    %cst_225 = arith.constant dense<0.000000e+00> : vector<64x128xf32>
    %223 = tpu.matmul %220, %222, %cst_225 {dimension_numbers = #tpu.dot_dimension_numbers<[1], [0], [0], [1], [0, 0, 1, 1], [], []>} : vector<64x128xf32>, vector<128x128xf32>, vector<64x128xf32> -> vector<64x128xf32>
    %224 = arith.addf %218, %223 : vector<64x128xf32>
    %c2_226 = arith.constant 2 : index
    %c1_227 = arith.constant 1 : index
    %c0_228 = arith.constant 0 : index
    %225 = vector.load %arg14[%c2_226, %c1_227, %c0_228] : memref<10x10x128xf32, #tpu.memory_space<vmem>>, vector<8x8x128xf32>
    %226 = vector.shape_cast %225 : vector<8x8x128xf32> to vector<64x128xf32>
    %c2_229 = arith.constant 2 : index
    %c1_230 = arith.constant 1 : index
    %c0_231 = arith.constant 0 : index
    %c0_232 = arith.constant 0 : index
    %227 = vector.load %arg6[%c2_229, %c1_230, %c0_231, %c0_232] : memref<3x3x128x128xf32, #tpu.memory_space<vmem>>, vector<1x1x128x128xf32>
    %228 = vector.shape_cast %227 : vector<1x1x128x128xf32> to vector<128x128xf32>
    %cst_233 = arith.constant dense<0.000000e+00> : vector<64x128xf32>
    %229 = tpu.matmul %226, %228, %cst_233 {dimension_numbers = #tpu.dot_dimension_numbers<[1], [0], [0], [1], [0, 0, 1, 1], [], []>} : vector<64x128xf32>, vector<128x128xf32>, vector<64x128xf32> -> vector<64x128xf32>
    %230 = arith.addf %224, %229 : vector<64x128xf32>
    %c2_234 = arith.constant 2 : index
    %c2_235 = arith.constant 2 : index
    %c0_236 = arith.constant 0 : index
    %231 = vector.load %arg14[%c2_234, %c2_235, %c0_236] : memref<10x10x128xf32, #tpu.memory_space<vmem>>, vector<8x8x128xf32>
    %232 = vector.shape_cast %231 : vector<8x8x128xf32> to vector<64x128xf32>
    %c2_237 = arith.constant 2 : index
    %c2_238 = arith.constant 2 : index
    %c0_239 = arith.constant 0 : index
    %c0_240 = arith.constant 0 : index
    %233 = vector.load %arg6[%c2_237, %c2_238, %c0_239, %c0_240] : memref<3x3x128x128xf32, #tpu.memory_space<vmem>>, vector<1x1x128x128xf32>
    %234 = vector.shape_cast %233 : vector<1x1x128x128xf32> to vector<128x128xf32>
    %cst_241 = arith.constant dense<0.000000e+00> : vector<64x128xf32>
    %235 = tpu.matmul %232, %234, %cst_241 {dimension_numbers = #tpu.dot_dimension_numbers<[1], [0], [0], [1], [0, 0, 1, 1], [], []>} : vector<64x128xf32>, vector<128x128xf32>, vector<64x128xf32> -> vector<64x128xf32>
    %236 = arith.addf %230, %235 : vector<64x128xf32>
    %c0_242 = arith.constant 0 : index
    %c0_243 = arith.constant 0 : index
    %237 = vector.load %arg7[%c0_242, %c0_243] : memref<1x128xf32, #tpu.memory_space<vmem>>, vector<1x128xf32>
    %238 = vector.broadcast %237 : vector<1x128xf32> to vector<64x128xf32>
    %239 = arith.addf %236, %238 : vector<64x128xf32>
    %240 = vector.shape_cast %239 : vector<64x128xf32> to vector<8x8x128xf32>
    %241 = arith.addf %240, %116 : vector<8x8x128xf32>
    %cst_244 = arith.constant 0.000000e+00 : f32
    %242 = vector.broadcast %cst_244 : f32 to vector<8x8x128xf32>
    %243 = arith.maximumf %241, %242 : vector<8x8x128xf32>
    %c1_245 = arith.constant 1 : index
    %c1_246 = arith.constant 1 : index
    %c0_247 = arith.constant 0 : index
    %244 = vector.load %arg14[%c1_245, %c1_246, %c0_247] : memref<10x10x128xf32, #tpu.memory_space<vmem>>, vector<8x8x128xf32>
    tpu.vector_store %arg14[%c1_245, %c1_246, %c0_247], %243 {strides = array<i32>} : memref<10x10x128xf32, #tpu.memory_space<vmem>>, vector<8x8x128xf32>,
    %cst_248 = arith.constant 0.000000e+00 : f32
    %245 = vector.broadcast %cst_248 : f32 to vector<64x128xf32>
    %c0_249 = arith.constant 0 : index
    %c0_250 = arith.constant 0 : index
    %c0_251 = arith.constant 0 : index
    %246 = vector.load %arg14[%c0_249, %c0_250, %c0_251] : memref<10x10x128xf32, #tpu.memory_space<vmem>>, vector<8x8x128xf32>
    %247 = vector.shape_cast %246 : vector<8x8x128xf32> to vector<64x128xf32>
    %c0_252 = arith.constant 0 : index
    %c0_253 = arith.constant 0 : index
    %c0_254 = arith.constant 0 : index
    %c0_255 = arith.constant 0 : index
    %248 = vector.load %arg8[%c0_252, %c0_253, %c0_254, %c0_255] : memref<3x3x128x128xf32, #tpu.memory_space<vmem>>, vector<1x1x128x128xf32>
    %249 = vector.shape_cast %248 : vector<1x1x128x128xf32> to vector<128x128xf32>
    %cst_256 = arith.constant dense<0.000000e+00> : vector<64x128xf32>
    %250 = tpu.matmul %247, %249, %cst_256 {dimension_numbers = #tpu.dot_dimension_numbers<[1], [0], [0], [1], [0, 0, 1, 1], [], []>} : vector<64x128xf32>, vector<128x128xf32>, vector<64x128xf32> -> vector<64x128xf32>
    %251 = arith.addf %245, %250 : vector<64x128xf32>
    %c0_257 = arith.constant 0 : index
    %c1_258 = arith.constant 1 : index
    %c0_259 = arith.constant 0 : index
    %252 = vector.load %arg14[%c0_257, %c1_258, %c0_259] : memref<10x10x128xf32, #tpu.memory_space<vmem>>, vector<8x8x128xf32>
    %253 = vector.shape_cast %252 : vector<8x8x128xf32> to vector<64x128xf32>
    %c0_260 = arith.constant 0 : index
    %c1_261 = arith.constant 1 : index
    %c0_262 = arith.constant 0 : index
    %c0_263 = arith.constant 0 : index
    %254 = vector.load %arg8[%c0_260, %c1_261, %c0_262, %c0_263] : memref<3x3x128x128xf32, #tpu.memory_space<vmem>>, vector<1x1x128x128xf32>
    %255 = vector.shape_cast %254 : vector<1x1x128x128xf32> to vector<128x128xf32>
    %cst_264 = arith.constant dense<0.000000e+00> : vector<64x128xf32>
    %256 = tpu.matmul %253, %255, %cst_264 {dimension_numbers = #tpu.dot_dimension_numbers<[1], [0], [0], [1], [0, 0, 1, 1], [], []>} : vector<64x128xf32>, vector<128x128xf32>, vector<64x128xf32> -> vector<64x128xf32>
    %257 = arith.addf %251, %256 : vector<64x128xf32>
    %c0_265 = arith.constant 0 : index
    %c2_266 = arith.constant 2 : index
    %c0_267 = arith.constant 0 : index
    %258 = vector.load %arg14[%c0_265, %c2_266, %c0_267] : memref<10x10x128xf32, #tpu.memory_space<vmem>>, vector<8x8x128xf32>
    %259 = vector.shape_cast %258 : vector<8x8x128xf32> to vector<64x128xf32>
    %c0_268 = arith.constant 0 : index
    %c2_269 = arith.constant 2 : index
    %c0_270 = arith.constant 0 : index
    %c0_271 = arith.constant 0 : index
    %260 = vector.load %arg8[%c0_268, %c2_269, %c0_270, %c0_271] : memref<3x3x128x128xf32, #tpu.memory_space<vmem>>, vector<1x1x128x128xf32>
    %261 = vector.shape_cast %260 : vector<1x1x128x128xf32> to vector<128x128xf32>
    %cst_272 = arith.constant dense<0.000000e+00> : vector<64x128xf32>
    %262 = tpu.matmul %259, %261, %cst_272 {dimension_numbers = #tpu.dot_dimension_numbers<[1], [0], [0], [1], [0, 0, 1, 1], [], []>} : vector<64x128xf32>, vector<128x128xf32>, vector<64x128xf32> -> vector<64x128xf32>
    %263 = arith.addf %257, %262 : vector<64x128xf32>
    %c1_273 = arith.constant 1 : index
    %c0_274 = arith.constant 0 : index
    %c0_275 = arith.constant 0 : index
    %264 = vector.load %arg14[%c1_273, %c0_274, %c0_275] : memref<10x10x128xf32, #tpu.memory_space<vmem>>, vector<8x8x128xf32>
    %265 = vector.shape_cast %264 : vector<8x8x128xf32> to vector<64x128xf32>
    %c1_276 = arith.constant 1 : index
    %c0_277 = arith.constant 0 : index
    %c0_278 = arith.constant 0 : index
    %c0_279 = arith.constant 0 : index
    %266 = vector.load %arg8[%c1_276, %c0_277, %c0_278, %c0_279] : memref<3x3x128x128xf32, #tpu.memory_space<vmem>>, vector<1x1x128x128xf32>
    %267 = vector.shape_cast %266 : vector<1x1x128x128xf32> to vector<128x128xf32>
    %cst_280 = arith.constant dense<0.000000e+00> : vector<64x128xf32>
    %268 = tpu.matmul %265, %267, %cst_280 {dimension_numbers = #tpu.dot_dimension_numbers<[1], [0], [0], [1], [0, 0, 1, 1], [], []>} : vector<64x128xf32>, vector<128x128xf32>, vector<64x128xf32> -> vector<64x128xf32>
    %269 = arith.addf %263, %268 : vector<64x128xf32>
    %c1_281 = arith.constant 1 : index
    %c1_282 = arith.constant 1 : index
    %c0_283 = arith.constant 0 : index
    %270 = vector.load %arg14[%c1_281, %c1_282, %c0_283] : memref<10x10x128xf32, #tpu.memory_space<vmem>>, vector<8x8x128xf32>
    %271 = vector.shape_cast %270 : vector<8x8x128xf32> to vector<64x128xf32>
    %c1_284 = arith.constant 1 : index
    %c1_285 = arith.constant 1 : index
    %c0_286 = arith.constant 0 : index
    %c0_287 = arith.constant 0 : index
    %272 = vector.load %arg8[%c1_284, %c1_285, %c0_286, %c0_287] : memref<3x3x128x128xf32, #tpu.memory_space<vmem>>, vector<1x1x128x128xf32>
    %273 = vector.shape_cast %272 : vector<1x1x128x128xf32> to vector<128x128xf32>
    %cst_288 = arith.constant dense<0.000000e+00> : vector<64x128xf32>
    %274 = tpu.matmul %271, %273, %cst_288 {dimension_numbers = #tpu.dot_dimension_numbers<[1], [0], [0], [1], [0, 0, 1, 1], [], []>} : vector<64x128xf32>, vector<128x128xf32>, vector<64x128xf32> -> vector<64x128xf32>
    %275 = arith.addf %269, %274 : vector<64x128xf32>
    %c1_289 = arith.constant 1 : index
    %c2_290 = arith.constant 2 : index
    %c0_291 = arith.constant 0 : index
    %276 = vector.load %arg14[%c1_289, %c2_290, %c0_291] : memref<10x10x128xf32, #tpu.memory_space<vmem>>, vector<8x8x128xf32>
    %277 = vector.shape_cast %276 : vector<8x8x128xf32> to vector<64x128xf32>
    %c1_292 = arith.constant 1 : index
    %c2_293 = arith.constant 2 : index
    %c0_294 = arith.constant 0 : index
    %c0_295 = arith.constant 0 : index
    %278 = vector.load %arg8[%c1_292, %c2_293, %c0_294, %c0_295] : memref<3x3x128x128xf32, #tpu.memory_space<vmem>>, vector<1x1x128x128xf32>
    %279 = vector.shape_cast %278 : vector<1x1x128x128xf32> to vector<128x128xf32>
    %cst_296 = arith.constant dense<0.000000e+00> : vector<64x128xf32>
    %280 = tpu.matmul %277, %279, %cst_296 {dimension_numbers = #tpu.dot_dimension_numbers<[1], [0], [0], [1], [0, 0, 1, 1], [], []>} : vector<64x128xf32>, vector<128x128xf32>, vector<64x128xf32> -> vector<64x128xf32>
    %281 = arith.addf %275, %280 : vector<64x128xf32>
    %c2_297 = arith.constant 2 : index
    %c0_298 = arith.constant 0 : index
    %c0_299 = arith.constant 0 : index
    %282 = vector.load %arg14[%c2_297, %c0_298, %c0_299] : memref<10x10x128xf32, #tpu.memory_space<vmem>>, vector<8x8x128xf32>
    %283 = vector.shape_cast %282 : vector<8x8x128xf32> to vector<64x128xf32>
    %c2_300 = arith.constant 2 : index
    %c0_301 = arith.constant 0 : index
    %c0_302 = arith.constant 0 : index
    %c0_303 = arith.constant 0 : index
    %284 = vector.load %arg8[%c2_300, %c0_301, %c0_302, %c0_303] : memref<3x3x128x128xf32, #tpu.memory_space<vmem>>, vector<1x1x128x128xf32>
    %285 = vector.shape_cast %284 : vector<1x1x128x128xf32> to vector<128x128xf32>
    %cst_304 = arith.constant dense<0.000000e+00> : vector<64x128xf32>
    %286 = tpu.matmul %283, %285, %cst_304 {dimension_numbers = #tpu.dot_dimension_numbers<[1], [0], [0], [1], [0, 0, 1, 1], [], []>} : vector<64x128xf32>, vector<128x128xf32>, vector<64x128xf32> -> vector<64x128xf32>
    %287 = arith.addf %281, %286 : vector<64x128xf32>
    %c2_305 = arith.constant 2 : index
    %c1_306 = arith.constant 1 : index
    %c0_307 = arith.constant 0 : index
    %288 = vector.load %arg14[%c2_305, %c1_306, %c0_307] : memref<10x10x128xf32, #tpu.memory_space<vmem>>, vector<8x8x128xf32>
    %289 = vector.shape_cast %288 : vector<8x8x128xf32> to vector<64x128xf32>
    %c2_308 = arith.constant 2 : index
    %c1_309 = arith.constant 1 : index
    %c0_310 = arith.constant 0 : index
    %c0_311 = arith.constant 0 : index
    %290 = vector.load %arg8[%c2_308, %c1_309, %c0_310, %c0_311] : memref<3x3x128x128xf32, #tpu.memory_space<vmem>>, vector<1x1x128x128xf32>
    %291 = vector.shape_cast %290 : vector<1x1x128x128xf32> to vector<128x128xf32>
    %cst_312 = arith.constant dense<0.000000e+00> : vector<64x128xf32>
    %292 = tpu.matmul %289, %291, %cst_312 {dimension_numbers = #tpu.dot_dimension_numbers<[1], [0], [0], [1], [0, 0, 1, 1], [], []>} : vector<64x128xf32>, vector<128x128xf32>, vector<64x128xf32> -> vector<64x128xf32>
    %293 = arith.addf %287, %292 : vector<64x128xf32>
    %c2_313 = arith.constant 2 : index
    %c2_314 = arith.constant 2 : index
    %c0_315 = arith.constant 0 : index
    %294 = vector.load %arg14[%c2_313, %c2_314, %c0_315] : memref<10x10x128xf32, #tpu.memory_space<vmem>>, vector<8x8x128xf32>
    %295 = vector.shape_cast %294 : vector<8x8x128xf32> to vector<64x128xf32>
    %c2_316 = arith.constant 2 : index
    %c2_317 = arith.constant 2 : index
    %c0_318 = arith.constant 0 : index
    %c0_319 = arith.constant 0 : index
    %296 = vector.load %arg8[%c2_316, %c2_317, %c0_318, %c0_319] : memref<3x3x128x128xf32, #tpu.memory_space<vmem>>, vector<1x1x128x128xf32>
    %297 = vector.shape_cast %296 : vector<1x1x128x128xf32> to vector<128x128xf32>
    %cst_320 = arith.constant dense<0.000000e+00> : vector<64x128xf32>
    %298 = tpu.matmul %295, %297, %cst_320 {dimension_numbers = #tpu.dot_dimension_numbers<[1], [0], [0], [1], [0, 0, 1, 1], [], []>} : vector<64x128xf32>, vector<128x128xf32>, vector<64x128xf32> -> vector<64x128xf32>
    %299 = arith.addf %293, %298 : vector<64x128xf32>
    %c0_321 = arith.constant 0 : index
    %c0_322 = arith.constant 0 : index
    %300 = vector.load %arg9[%c0_321, %c0_322] : memref<1x128xf32, #tpu.memory_space<vmem>>, vector<1x128xf32>
    %301 = vector.broadcast %300 : vector<1x128xf32> to vector<64x128xf32>
    %302 = arith.addf %299, %301 : vector<64x128xf32>
    %303 = vector.shape_cast %302 : vector<64x128xf32> to vector<8x8x128xf32>
    %cst_323 = arith.constant 0.000000e+00 : f32
    %304 = vector.broadcast %cst_323 : f32 to vector<8x8x128xf32>
    %305 = arith.maximumf %303, %304 : vector<8x8x128xf32>
    %c1_324 = arith.constant 1 : index
    %c1_325 = arith.constant 1 : index
    %c0_326 = arith.constant 0 : index
    %306 = vector.load %arg14[%c1_324, %c1_325, %c0_326] : memref<10x10x128xf32, #tpu.memory_space<vmem>>, vector<8x8x128xf32>
    tpu.vector_store %arg14[%c1_324, %c1_325, %c0_326], %305 {strides = array<i32>} : memref<10x10x128xf32, #tpu.memory_space<vmem>>, vector<8x8x128xf32>,
    %cst_327 = arith.constant 0.000000e+00 : f32
    %307 = vector.broadcast %cst_327 : f32 to vector<64x128xf32>
    %c0_328 = arith.constant 0 : index
    %c0_329 = arith.constant 0 : index
    %c0_330 = arith.constant 0 : index
    %308 = vector.load %arg14[%c0_328, %c0_329, %c0_330] : memref<10x10x128xf32, #tpu.memory_space<vmem>>, vector<8x8x128xf32>
    %309 = vector.shape_cast %308 : vector<8x8x128xf32> to vector<64x128xf32>
    %c0_331 = arith.constant 0 : index
    %c0_332 = arith.constant 0 : index
    %c0_333 = arith.constant 0 : index
    %c0_334 = arith.constant 0 : index
    %310 = vector.load %arg10[%c0_331, %c0_332, %c0_333, %c0_334] : memref<3x3x128x128xf32, #tpu.memory_space<vmem>>, vector<1x1x128x128xf32>
    %311 = vector.shape_cast %310 : vector<1x1x128x128xf32> to vector<128x128xf32>
    %cst_335 = arith.constant dense<0.000000e+00> : vector<64x128xf32>
    %312 = tpu.matmul %309, %311, %cst_335 {dimension_numbers = #tpu.dot_dimension_numbers<[1], [0], [0], [1], [0, 0, 1, 1], [], []>} : vector<64x128xf32>, vector<128x128xf32>, vector<64x128xf32> -> vector<64x128xf32>
    %313 = arith.addf %307, %312 : vector<64x128xf32>
    %c0_336 = arith.constant 0 : index
    %c1_337 = arith.constant 1 : index
    %c0_338 = arith.constant 0 : index
    %314 = vector.load %arg14[%c0_336, %c1_337, %c0_338] : memref<10x10x128xf32, #tpu.memory_space<vmem>>, vector<8x8x128xf32>
    %315 = vector.shape_cast %314 : vector<8x8x128xf32> to vector<64x128xf32>
    %c0_339 = arith.constant 0 : index
    %c1_340 = arith.constant 1 : index
    %c0_341 = arith.constant 0 : index
    %c0_342 = arith.constant 0 : index
    %316 = vector.load %arg10[%c0_339, %c1_340, %c0_341, %c0_342] : memref<3x3x128x128xf32, #tpu.memory_space<vmem>>, vector<1x1x128x128xf32>
    %317 = vector.shape_cast %316 : vector<1x1x128x128xf32> to vector<128x128xf32>
    %cst_343 = arith.constant dense<0.000000e+00> : vector<64x128xf32>
    %318 = tpu.matmul %315, %317, %cst_343 {dimension_numbers = #tpu.dot_dimension_numbers<[1], [0], [0], [1], [0, 0, 1, 1], [], []>} : vector<64x128xf32>, vector<128x128xf32>, vector<64x128xf32> -> vector<64x128xf32>
    %319 = arith.addf %313, %318 : vector<64x128xf32>
    %c0_344 = arith.constant 0 : index
    %c2_345 = arith.constant 2 : index
    %c0_346 = arith.constant 0 : index
    %320 = vector.load %arg14[%c0_344, %c2_345, %c0_346] : memref<10x10x128xf32, #tpu.memory_space<vmem>>, vector<8x8x128xf32>
    %321 = vector.shape_cast %320 : vector<8x8x128xf32> to vector<64x128xf32>
    %c0_347 = arith.constant 0 : index
    %c2_348 = arith.constant 2 : index
    %c0_349 = arith.constant 0 : index
    %c0_350 = arith.constant 0 : index
    %322 = vector.load %arg10[%c0_347, %c2_348, %c0_349, %c0_350] : memref<3x3x128x128xf32, #tpu.memory_space<vmem>>, vector<1x1x128x128xf32>
    %323 = vector.shape_cast %322 : vector<1x1x128x128xf32> to vector<128x128xf32>
    %cst_351 = arith.constant dense<0.000000e+00> : vector<64x128xf32>
    %324 = tpu.matmul %321, %323, %cst_351 {dimension_numbers = #tpu.dot_dimension_numbers<[1], [0], [0], [1], [0, 0, 1, 1], [], []>} : vector<64x128xf32>, vector<128x128xf32>, vector<64x128xf32> -> vector<64x128xf32>
    %325 = arith.addf %319, %324 : vector<64x128xf32>
    %c1_352 = arith.constant 1 : index
    %c0_353 = arith.constant 0 : index
    %c0_354 = arith.constant 0 : index
    %326 = vector.load %arg14[%c1_352, %c0_353, %c0_354] : memref<10x10x128xf32, #tpu.memory_space<vmem>>, vector<8x8x128xf32>
    %327 = vector.shape_cast %326 : vector<8x8x128xf32> to vector<64x128xf32>
    %c1_355 = arith.constant 1 : index
    %c0_356 = arith.constant 0 : index
    %c0_357 = arith.constant 0 : index
    %c0_358 = arith.constant 0 : index
    %328 = vector.load %arg10[%c1_355, %c0_356, %c0_357, %c0_358] : memref<3x3x128x128xf32, #tpu.memory_space<vmem>>, vector<1x1x128x128xf32>
    %329 = vector.shape_cast %328 : vector<1x1x128x128xf32> to vector<128x128xf32>
    %cst_359 = arith.constant dense<0.000000e+00> : vector<64x128xf32>
    %330 = tpu.matmul %327, %329, %cst_359 {dimension_numbers = #tpu.dot_dimension_numbers<[1], [0], [0], [1], [0, 0, 1, 1], [], []>} : vector<64x128xf32>, vector<128x128xf32>, vector<64x128xf32> -> vector<64x128xf32>
    %331 = arith.addf %325, %330 : vector<64x128xf32>
    %c1_360 = arith.constant 1 : index
    %c1_361 = arith.constant 1 : index
    %c0_362 = arith.constant 0 : index
    %332 = vector.load %arg14[%c1_360, %c1_361, %c0_362] : memref<10x10x128xf32, #tpu.memory_space<vmem>>, vector<8x8x128xf32>
    %333 = vector.shape_cast %332 : vector<8x8x128xf32> to vector<64x128xf32>
    %c1_363 = arith.constant 1 : index
    %c1_364 = arith.constant 1 : index
    %c0_365 = arith.constant 0 : index
    %c0_366 = arith.constant 0 : index
    %334 = vector.load %arg10[%c1_363, %c1_364, %c0_365, %c0_366] : memref<3x3x128x128xf32, #tpu.memory_space<vmem>>, vector<1x1x128x128xf32>
    %335 = vector.shape_cast %334 : vector<1x1x128x128xf32> to vector<128x128xf32>
    %cst_367 = arith.constant dense<0.000000e+00> : vector<64x128xf32>
    %336 = tpu.matmul %333, %335, %cst_367 {dimension_numbers = #tpu.dot_dimension_numbers<[1], [0], [0], [1], [0, 0, 1, 1], [], []>} : vector<64x128xf32>, vector<128x128xf32>, vector<64x128xf32> -> vector<64x128xf32>
    %337 = arith.addf %331, %336 : vector<64x128xf32>
    %c1_368 = arith.constant 1 : index
    %c2_369 = arith.constant 2 : index
    %c0_370 = arith.constant 0 : index
    %338 = vector.load %arg14[%c1_368, %c2_369, %c0_370] : memref<10x10x128xf32, #tpu.memory_space<vmem>>, vector<8x8x128xf32>
    %339 = vector.shape_cast %338 : vector<8x8x128xf32> to vector<64x128xf32>
    %c1_371 = arith.constant 1 : index
    %c2_372 = arith.constant 2 : index
    %c0_373 = arith.constant 0 : index
    %c0_374 = arith.constant 0 : index
    %340 = vector.load %arg10[%c1_371, %c2_372, %c0_373, %c0_374] : memref<3x3x128x128xf32, #tpu.memory_space<vmem>>, vector<1x1x128x128xf32>
    %341 = vector.shape_cast %340 : vector<1x1x128x128xf32> to vector<128x128xf32>
    %cst_375 = arith.constant dense<0.000000e+00> : vector<64x128xf32>
    %342 = tpu.matmul %339, %341, %cst_375 {dimension_numbers = #tpu.dot_dimension_numbers<[1], [0], [0], [1], [0, 0, 1, 1], [], []>} : vector<64x128xf32>, vector<128x128xf32>, vector<64x128xf32> -> vector<64x128xf32>
    %343 = arith.addf %337, %342 : vector<64x128xf32>
    %c2_376 = arith.constant 2 : index
    %c0_377 = arith.constant 0 : index
    %c0_378 = arith.constant 0 : index
    %344 = vector.load %arg14[%c2_376, %c0_377, %c0_378] : memref<10x10x128xf32, #tpu.memory_space<vmem>>, vector<8x8x128xf32>
    %345 = vector.shape_cast %344 : vector<8x8x128xf32> to vector<64x128xf32>
    %c2_379 = arith.constant 2 : index
    %c0_380 = arith.constant 0 : index
    %c0_381 = arith.constant 0 : index
    %c0_382 = arith.constant 0 : index
    %346 = vector.load %arg10[%c2_379, %c0_380, %c0_381, %c0_382] : memref<3x3x128x128xf32, #tpu.memory_space<vmem>>, vector<1x1x128x128xf32>
    %347 = vector.shape_cast %346 : vector<1x1x128x128xf32> to vector<128x128xf32>
    %cst_383 = arith.constant dense<0.000000e+00> : vector<64x128xf32>
    %348 = tpu.matmul %345, %347, %cst_383 {dimension_numbers = #tpu.dot_dimension_numbers<[1], [0], [0], [1], [0, 0, 1, 1], [], []>} : vector<64x128xf32>, vector<128x128xf32>, vector<64x128xf32> -> vector<64x128xf32>
    %349 = arith.addf %343, %348 : vector<64x128xf32>
    %c2_384 = arith.constant 2 : index
    %c1_385 = arith.constant 1 : index
    %c0_386 = arith.constant 0 : index
    %350 = vector.load %arg14[%c2_384, %c1_385, %c0_386] : memref<10x10x128xf32, #tpu.memory_space<vmem>>, vector<8x8x128xf32>
    %351 = vector.shape_cast %350 : vector<8x8x128xf32> to vector<64x128xf32>
    %c2_387 = arith.constant 2 : index
    %c1_388 = arith.constant 1 : index
    %c0_389 = arith.constant 0 : index
    %c0_390 = arith.constant 0 : index
    %352 = vector.load %arg10[%c2_387, %c1_388, %c0_389, %c0_390] : memref<3x3x128x128xf32, #tpu.memory_space<vmem>>, vector<1x1x128x128xf32>
    %353 = vector.shape_cast %352 : vector<1x1x128x128xf32> to vector<128x128xf32>
    %cst_391 = arith.constant dense<0.000000e+00> : vector<64x128xf32>
    %354 = tpu.matmul %351, %353, %cst_391 {dimension_numbers = #tpu.dot_dimension_numbers<[1], [0], [0], [1], [0, 0, 1, 1], [], []>} : vector<64x128xf32>, vector<128x128xf32>, vector<64x128xf32> -> vector<64x128xf32>
    %355 = arith.addf %349, %354 : vector<64x128xf32>
    %c2_392 = arith.constant 2 : index
    %c2_393 = arith.constant 2 : index
    %c0_394 = arith.constant 0 : index
    %356 = vector.load %arg14[%c2_392, %c2_393, %c0_394] : memref<10x10x128xf32, #tpu.memory_space<vmem>>, vector<8x8x128xf32>
    %357 = vector.shape_cast %356 : vector<8x8x128xf32> to vector<64x128xf32>
    %c2_395 = arith.constant 2 : index
    %c2_396 = arith.constant 2 : index
    %c0_397 = arith.constant 0 : index
    %c0_398 = arith.constant 0 : index
    %358 = vector.load %arg10[%c2_395, %c2_396, %c0_397, %c0_398] : memref<3x3x128x128xf32, #tpu.memory_space<vmem>>, vector<1x1x128x128xf32>
    %359 = vector.shape_cast %358 : vector<1x1x128x128xf32> to vector<128x128xf32>
    %cst_399 = arith.constant dense<0.000000e+00> : vector<64x128xf32>
    %360 = tpu.matmul %357, %359, %cst_399 {dimension_numbers = #tpu.dot_dimension_numbers<[1], [0], [0], [1], [0, 0, 1, 1], [], []>} : vector<64x128xf32>, vector<128x128xf32>, vector<64x128xf32> -> vector<64x128xf32>
    %361 = arith.addf %355, %360 : vector<64x128xf32>
    %c0_400 = arith.constant 0 : index
    %c0_401 = arith.constant 0 : index
    %362 = vector.load %arg11[%c0_400, %c0_401] : memref<1x128xf32, #tpu.memory_space<vmem>>, vector<1x128xf32>
    %363 = vector.broadcast %362 : vector<1x128xf32> to vector<64x128xf32>
    %364 = arith.addf %361, %363 : vector<64x128xf32>
    %365 = vector.shape_cast %364 : vector<64x128xf32> to vector<8x8x128xf32>
    %366 = arith.addf %365, %241 : vector<8x8x128xf32>
    %c0_402 = arith.constant 0 : index
    %c0_403 = arith.constant 0 : index
    %c0_404 = arith.constant 0 : index
    %c0_405 = arith.constant 0 : index
    %367 = vector.load %arg12[%c0_402, %c0_403, %c0_404, %c0_405] : memref<1x8x8x128xf32, #tpu.memory_space<vmem>>, vector<1x8x8x128xf32>
    %368 = vector.shape_cast %367 : vector<1x8x8x128xf32> to vector<8x8x128xf32>
    %369 = vector.shape_cast %366 : vector<8x8x128xf32> to vector<1x8x8x128xf32>
    tpu.vector_store %arg12[%c0_402, %c0_403, %c0_404, %c0_405], %369 {strides = array<i32>} : memref<1x8x8x128xf32, #tpu.memory_space<vmem>>, vector<1x8x8x128xf32>,
    return
  }
  func.func @transform_0(%arg0: i32) -> (i32, i32, i32, i32) {
    %c0_i32 = arith.constant 0 : i32
    %c0_i32_0 = arith.constant 0 : i32
    %c0_i32_1 = arith.constant 0 : i32
    %c0_i32_2 = arith.constant 0 : i32
    return %arg0, %c0_i32, %c0_i32_0, %c0_i32_1 : i32, i32, i32, i32
  }
  func.func @transform_1(%arg0: i32) -> (i32, i32, i32, i32) {
    %c0_i32 = arith.constant 0 : i32
    %c0_i32_0 = arith.constant 0 : i32
    %c0_i32_1 = arith.constant 0 : i32
    %c0_i32_2 = arith.constant 0 : i32
    %c0_i32_3 = arith.constant 0 : i32
    return %c0_i32, %c0_i32_0, %c0_i32_1, %c0_i32_2 : i32, i32, i32, i32
  }
  func.func @transform_2(%arg0: i32) -> (i32, i32) {
    %c0_i32 = arith.constant 0 : i32
    %c0_i32_0 = arith.constant 0 : i32
    %c0_i32_1 = arith.constant 0 : i32
    return %c0_i32, %c0_i32_0 : i32, i32
  }
  func.func @transform_3(%arg0: i32) -> (i32, i32, i32, i32) {
    %c0_i32 = arith.constant 0 : i32
    %c0_i32_0 = arith.constant 0 : i32
    %c0_i32_1 = arith.constant 0 : i32
    %c0_i32_2 = arith.constant 0 : i32
    %c0_i32_3 = arith.constant 0 : i32
    return %c0_i32, %c0_i32_0, %c0_i32_1, %c0_i32_2 : i32, i32, i32, i32
  }
  func.func @transform_4(%arg0: i32) -> (i32, i32) {
    %c0_i32 = arith.constant 0 : i32
    %c0_i32_0 = arith.constant 0 : i32
    %c0_i32_1 = arith.constant 0 : i32
    return %c0_i32, %c0_i32_0 : i32, i32
  }
  func.func @transform_5(%arg0: i32) -> (i32, i32, i32, i32) {
    %c0_i32 = arith.constant 0 : i32
    %c0_i32_0 = arith.constant 0 : i32
    %c0_i32_1 = arith.constant 0 : i32
    %c0_i32_2 = arith.constant 0 : i32
    %c0_i32_3 = arith.constant 0 : i32
    return %c0_i32, %c0_i32_0, %c0_i32_1, %c0_i32_2 : i32, i32, i32, i32
  }
  func.func @transform_6(%arg0: i32) -> (i32, i32) {
    %c0_i32 = arith.constant 0 : i32
    %c0_i32_0 = arith.constant 0 : i32
    %c0_i32_1 = arith.constant 0 : i32
    return %c0_i32, %c0_i32_0 : i32, i32
  }
  func.func @transform_7(%arg0: i32) -> (i32, i32, i32, i32) {
    %c0_i32 = arith.constant 0 : i32
    %c0_i32_0 = arith.constant 0 : i32
    %c0_i32_1 = arith.constant 0 : i32
    %c0_i32_2 = arith.constant 0 : i32
    %c0_i32_3 = arith.constant 0 : i32
    return %c0_i32, %c0_i32_0, %c0_i32_1, %c0_i32_2 : i32, i32, i32, i32
  }
  func.func @transform_8(%arg0: i32) -> (i32, i32) {
    %c0_i32 = arith.constant 0 : i32
    %c0_i32_0 = arith.constant 0 : i32
    %c0_i32_1 = arith.constant 0 : i32
    return %c0_i32, %c0_i32_0 : i32, i32
  }
  func.func @transform_9(%arg0: i32) -> (i32, i32, i32, i32) {
    %c0_i32 = arith.constant 0 : i32
    %c0_i32_0 = arith.constant 0 : i32
    %c0_i32_1 = arith.constant 0 : i32
    %c0_i32_2 = arith.constant 0 : i32
    %c0_i32_3 = arith.constant 0 : i32
    return %c0_i32, %c0_i32_0, %c0_i32_1, %c0_i32_2 : i32, i32, i32, i32
  }
  func.func @transform_10(%arg0: i32) -> (i32, i32) {
    %c0_i32 = arith.constant 0 : i32
    %c0_i32_0 = arith.constant 0 : i32
    %c0_i32_1 = arith.constant 0 : i32
    return %c0_i32, %c0_i32_0 : i32, i32
  }
  func.func @transform_11(%arg0: i32) -> (i32, i32, i32, i32) {
    %c0_i32 = arith.constant 0 : i32
    %c0_i32_0 = arith.constant 0 : i32
    %c0_i32_1 = arith.constant 0 : i32
    %c0_i32_2 = arith.constant 0 : i32
    return %arg0, %c0_i32, %c0_i32_0, %c0_i32_1 : i32, i32, i32, i32
  }
}

</mosaic_0001>

<bundles_post_ra>
// kernel: conv_sequence_forward.1
= control target key start
LH: loop header
LB: loop body
LE: loop exit
PB: predicated region body
PF: predicated region fallthrough
CT: control target
= control target key end

     0   :  { %s15012_s17 = smov 0   ;;  %s18517_s0 = inlined_call_operand.vmem [shape: f32[2,16,16,4], index: 0, kind: input, shape index: {}]   ;;  %s18518_s1 = inlined_call_operand.vmem [shape: f32[3,3,128,128], index: 1, kind: input, shape index: {}]   ;;  %s18519_s2 = inlined_call_operand.vmem [shape: f32[1,128], index: 2, kind: input, shape index: {}]   ;;  %s18520_s3 = inlined_call_operand.vmem [shape: f32[3,3,128,128], index: 3, kind: input, shape index: {}]   ;;  %s18521_s4 = inlined_call_operand.vmem [shape: f32[1,128], index: 4, kind: input, shape index: {}]   ;;  %s18522_s5 = inlined_call_operand.vmem [shape: f32[3,3,128,128], index: 5, kind: input, shape index: {}]   ;;  %s18523_s6 = inlined_call_operand.vmem [shape: f32[1,128], index: 6, kind: input, shape index: {}]   ;;  %s18524_s7 = inlined_call_operand.vmem [shape: f32[3,3,128,128], index: 7, kind: input, shape index: {}]   ;;  %s18525_s8 = inlined_call_operand.vmem [shape: f32[1,128], index: 8, kind: input, shape index: {}]   ;;  %s18526_s9 = inlined_call_operand.vmem [shape: f32[3,3,128,128], index: 9, kind: input, shape index: {}]   ;;  %s18527_s10 = inlined_call_operand.vmem [shape: f32[1,128], index: 10, kind: input, shape index: {}]   ;;  %s18528_s11 = inlined_call_operand.vmem [shape: f32[2,8,8,128], index: 11, kind: output, shape index: {}]  }
   0x1 LB: > { %s8720_s18 = sadd.s32 4294967295, %s14949_s17   ;;  %p8724_p0 = scmp.ge.s32.totalorder %s14949_s17, 1  ;;  %s14949_s17 = sphi %s15012_s17, %s21_s17  }
   0x2   : > { %p337_p1 = scmp.lt.s32.totalorder %s14949_s17, 3 }
   0x4   : > { %p338_p2 = pnand %p8724_p0, %p337_p1 }
   0x6   : > { %341 = sbr.rel (%p338_p2) target bundleno = 2738 (0xab2), region = 64 }
   0xd   : > { %v8729_v0 = vld [vmem:[%s18518_s1 + $0x80] sm:$0xff]  ;;  %v8730_v1 = vld [vmem:[%s18518_s1 + $0x88] sm:$0xff]  ;;  %v15029_v2 = vld [vmem:[%s18518_s1 + $0x90] sm:$0xff]  ;;  %p15033_p3 = scmp.lt.s32.totalorder %s8720_s18, 1  ;;  %v14951_v5 = vmov 0.0   ;;  %vm494_vm0 = vcmask 31744  }
   0xe   : > { %v15037_v3 = vpack.c.bf16 %v8730_v1, %v8729_v0  ;;  %v15042_v4 = vld [vmem:[%s18518_s1 + $0x98] sm:$0xff]  ;;  %387 = vst [vmem:[#allocation2] sm:$0xff] %v14951_v5  ;;  %388 = vst [vmem:[#allocation2 + $0x8] sm:$0xff] %v14951_v5  ;;  %v8733_v7 = vld [vmem:[%s18518_s1 + $0xa0] sm:$0xff]  ;;  %vm3552_vm1 = vcmask 1040384   ;;  %vm3561_vm2 = vcmask 1041408  }
   0xf   : > { %389 = vst [vmem:[#allocation2 + $0x10] sm:$0x3] %v14951_v5  ;;  %390 = vst [vmem:[#allocation2 + $0x18] sm:$0xff] %v14951_v5  ;;  %v12982_v6 = vpack.c.bf16 %v15042_v4, %v15029_v2  ;;  %v8734_v8 = vld [vmem:[%s18518_s1 + $0xa8] sm:$0xff]  ;;  %s18630_s18 = smov (!%p15033_p3, %s8720_s18), 1  ;;  %v8735_v10 = vld [vmem:[%s18518_s1 + $0xb0] sm:$0xff] }
  0x10   : > { %391 = vst [vmem:[#allocation2 + $0x20] sm:$0xff] %v14951_v5  ;;  %392 = vst [vmem:[#allocation2 + $0x28] sm:$0x3] %v14951_v5  ;;  %12979 = vmatprep.subr.bf16.mxu0 %v15037_v3  ;;  %s9376_s13 = sshll.u32 %s18630_s18, 8  ;;  %v12986_v9 = vpack.c.bf16 %v8734_v8, %v8733_v7  ;;  %v8736_v11 = vld [vmem:[%s18518_s1 + $0xb8] sm:$0xff]  ;;  %v8737_v22 = vld [vmem:[%s18518_s1 + $0xc0] sm:$0xff] }
  0x11   : > { %393 = vst [vmem:[#allocation2 + $0x30] sm:$0xff] %v14951_v5  ;;  %394 = vst [vmem:[#allocation2 + $0x38] sm:$0xff] %v14951_v5  ;;  %12981 = vmatpush3.bf16.msra.mxu0 %v15037_v3  ;;  %s15144_s22 = scalar_lea.vmem %s18517_s0, %s9376_s13  ;;  %v12990_v18 = vpack.c.bf16 %v8736_v11, %v8735_v10  ;;  %v8738_v23 = vld [vmem:[%s18518_s1 + $0xc8] sm:$0xff]  ;;  %v8739_v33 = vld [vmem:[%s18518_s1 + $0xd0] sm:$0xff]  ;;  %vm3570_vm3 = vcmask 1042432   ;;  %vm3579_vm4 = vcmask 1043456  }
  0x12   : > { %395 = vst [vmem:[#allocation2 + $0x40] sm:$0x3] %v14951_v5  ;;  %396 = vst [vmem:[#allocation2 + $0x48] sm:$0xff] %v14951_v5  ;;  %12983 = vmatprep.subr.bf16.mxu0 %v12982_v6  ;;  %v461_v12 = vld [vmem:[%s15144_s22] sm:$0xff]  ;;  %v462_v13 = vld [vmem:[%s15144_s22 + $0x8] sm:$0xff]  ;;  %v12994_v29 = vpack.c.bf16 %v8738_v23, %v8737_v22  ;;  %vm3588_vm5 = vcmask 1044480  }
  0x13   : > { %397 = vst [vmem:[#allocation2 + $0x50] sm:$0xff] %v14951_v5  ;;  %398 = vst [vmem:[#allocation2 + $0x58] sm:$0x3] %v14951_v5  ;;  %v463_v14 = vld [vmem:[%s15144_s22 + $0x10] sm:$0xff]  ;;  %v464_v15 = vld [vmem:[%s15144_s22 + $0x18] sm:$0xff]  ;;  %vm3597_vm6 = vcmask 1045504  }
  0x14   : > { %399 = vst [vmem:[#allocation2 + $0x60] sm:$0xff] %v14951_v5  ;;  %400 = vst [vmem:[#allocation2 + $0x68] sm:$0xff] %v14951_v5  ;;  %v465_v17 = vld [vmem:[%s15144_s22 + $0x20] sm:$0xff]  ;;  %v466_v19 = vld [vmem:[%s15144_s22 + $0x28] sm:$0xff]  ;;  %vm3606_vm7 = vcmask 1046528   ;;  %s9377_s14 = sshll.u32 %s18630_s18, 6 }
  0x15   : > { %401 = vst [vmem:[#allocation2 + $0x70] sm:$0x3] %v14951_v5  ;;  %402 = vst [vmem:[#allocation2 + $0x78] sm:$0xff] %v14951_v5  ;;  %12985 = vmatpush3.bf16.msra.mxu0 %v12982_v6  ;;  %v575_v16 = vld [vmem:[#allocation2 + $0x1] sm:$0xff]  ;;  %v467_v20 = vld [vmem:[%s15144_s22 + $0x30] sm:$0xff]  ;;  %s386_s19 = scalar_lea.vmem %s18528_s11, %s9377_s14 }
  0x16   : > { %403 = vst [vmem:[#allocation2 + $0x80] sm:$0xff] %v14951_v5  ;;  %404 = vst [vmem:[#allocation2 + $0x88] sm:$0x3] %v14951_v5  ;;  %12987 = vmatprep.subr.bf16.mxu0 %v12986_v9  ;;  %10706 = vmatprep.mubr.f32.mxu0 %v575_v16  ;;  %v468_v21 = vld [vmem:[%s15144_s22 + $0x38] sm:$0xff]  ;;  %v469_v24 = vld [vmem:[%s15144_s22 + $0x40] sm:$0xff] }
  0x17   : > { %405 = vst [vmem:[#allocation2 + $0x90] sm:$0xff] %v14951_v5  ;;  %406 = vst [vmem:[#allocation2 + $0x98] sm:$0xff] %v14951_v5  ;;  %v470_v25 = vld [vmem:[%s15144_s22 + $0x48] sm:$0xff]  ;;  %v471_v26 = vld [vmem:[%s15144_s22 + $0x50] sm:$0xff] }
  0x18   : > { %407 = vst [vmem:[#allocation2 + $0xa0] sm:$0x3] %v14951_v5  ;;  %408 = vst [vmem:[#allocation2 + $0xa8] sm:$0xff] %v14951_v5  ;;  %v472_v27 = vld [vmem:[%s15144_s22 + $0x58] sm:$0xff]  ;;  %v473_v28 = vld [vmem:[%s15144_s22 + $0x60] sm:$0xff] }
  0x19   : > { %409 = vst [vmem:[#allocation2 + $0xb0] sm:$0xff] %v14951_v5  ;;  %410 = vst [vmem:[#allocation2 + $0xb8] sm:$0x3] %v14951_v5  ;;  %12989 = vmatpush3.bf16.msra.mxu0 %v12986_v9  ;;  %v474_v30 = vld [vmem:[%s15144_s22 + $0x68] sm:$0xff]  ;;  %v475_v31 = vld [vmem:[%s15144_s22 + $0x70] sm:$0xff] }
  0x1a   : > { %411 = vst [vmem:[#allocation2 + $0xc0] sm:$0xff] %v14951_v5  ;;  %412 = vst [vmem:[#allocation2 + $0xc8] sm:$0xff] %v14951_v5  ;;  %12991 = vmatprep.subr.bf16.mxu0 %v12990_v18  ;;  %v476_v32 = vld [vmem:[%s15144_s22 + $0x78] sm:$0xff]  ;;  %v477_v35 = vld [vmem:[%s15144_s22 + $0x80] sm:$0xff] }
  0x1b   : > { %413 = vst [vmem:[#allocation2 + $0xd0] sm:$0x3] %v14951_v5  ;;  %414 = vst [vmem:[#allocation2 + $0xd8] sm:$0xff] %v14951_v5  ;;  %v8740_v34 = vld [vmem:[%s18518_s1 + $0xd8] sm:$0xff]  ;;  %v478_v36 = vld [vmem:[%s15144_s22 + $0x88] sm:$0xff] }
  0x1c   : > { %415 = vst [vmem:[#allocation2 + $0xe0] sm:$0xff] %v14951_v5  ;;  %416 = vst [vmem:[#allocation2 + $0xe8] sm:$0x3] %v14951_v5  ;;  %v12998_v37 = vpack.c.bf16 %v8740_v34, %v8739_v33  ;;  %v8741_v38 = vld [vmem:[%s18518_s1 + $0xe0] sm:$0xff]  ;;  %v8742_v39 = vld [vmem:[%s18518_s1 + $0xe8] sm:$0xff] }
  0x1d   : > { %417 = vst [vmem:[#allocation2 + $0xf0] sm:$0xff] %v14951_v5  ;;  %418 = vst [vmem:[#allocation2 + $0xf8] sm:$0xff] %v14951_v5  ;;  %12993 = vmatpush3.bf16.msra.mxu0 %v12990_v18  ;;  %v479_v40 = vld [vmem:[%s15144_s22 + $0x90] sm:$0xff]  ;;  %v480_v41 = vld [vmem:[%s15144_s22 + $0x98] sm:$0xff]  ;;  %v13002_v42 = vpack.c.bf16 %v8742_v39, %v8741_v38 }
  0x1e   : > { %419 = vst [vmem:[#allocation2 + $0x100] sm:$0x3] %v14951_v5  ;;  %420 = vst [vmem:[#allocation2 + $0x108] sm:$0xff] %v14951_v5  ;;  %12995 = vmatprep.subr.bf16.mxu0 %v12994_v29  ;;  %v8743_v43 = vld [vmem:[%s18518_s1 + $0xf0] sm:$0xff]  ;;  %v8744_v44 = vld [vmem:[%s18518_s1 + $0xf8] sm:$0xff] }
  0x1f   : > { %421 = vst [vmem:[#allocation2 + $0x110] sm:$0xff] %v14951_v5  ;;  %422 = vst [vmem:[#allocation2 + $0x118] sm:$0x3] %v14951_v5  ;;  %v481_v45 = vld [vmem:[%s15144_s22 + $0xa0] sm:$0xff]  ;;  %v482_v46 = vld [vmem:[%s15144_s22 + $0xa8] sm:$0xff]  ;;  %v13006_v50 = vpack.c.bf16 %v8744_v44, %v8743_v43 }
  0x20   : > { %423 = vst [vmem:[#allocation2 + $0x120] sm:$0xff] %v14951_v5  ;;  %424 = vst [vmem:[#allocation2 + $0x128] sm:$0xff] %v14951_v5  ;;  %v483_v47 = vld [vmem:[%s15144_s22 + $0xb0] sm:$0xff]  ;;  %v484_v48 = vld [vmem:[%s15144_s22 + $0xb8] sm:$0xff] }
  0x21   : > { %425 = vst [vmem:[#allocation2 + $0x130] sm:$0x3] %v14951_v5  ;;  %426 = vst [vmem:[#allocation2 + $0x138] sm:$0xff] %v14951_v5  ;;  %12997 = vmatpush3.bf16.msra.mxu0 %v12994_v29  ;;  %v485_v49 = vld [vmem:[%s15144_s22 + $0xc0] sm:$0xff]  ;;  %v486_v51 = vld [vmem:[%s15144_s22 + $0xc8] sm:$0xff] }
  0x22   : > { %427 = vst [vmem:[#allocation2 + $0x140] sm:$0xff] %v14951_v5  ;;  %428 = vst [vmem:[#allocation2 + $0x148] sm:$0x3] %v14951_v5  ;;  %12999 = vmatprep.subr.bf16.mxu0 %v12998_v37  ;;  %v487_v52 = vld [vmem:[%s15144_s22 + $0xd0] sm:$0xff]  ;;  %v488_v53 = vld [vmem:[%s15144_s22 + $0xd8] sm:$0xff] }
  0x23   : > { %429 = vst [vmem:[#allocation2 + $0x150] sm:$0xff] %v14951_v5  ;;  %430 = vst [vmem:[#allocation2 + $0x158] sm:$0xff] %v14951_v5  ;;  %v559_v54 = vld [vmem:[%s18518_s1] sm:$0xff]  ;;  %v560_v55 = vld [vmem:[%s18518_s1 + $0x8] sm:$0xff] }
  0x24   : > { %431 = vst [vmem:[#allocation2 + $0x160] sm:$0x3] %v14951_v5  ;;  %432 = vst [vmem:[#allocation2 + $0x168] sm:$0xff] %v14951_v5  ;;  %v489_v56 = vld [vmem:[%s15144_s22 + $0xe0] sm:$0xff]  ;;  %v490_v57 = vld [vmem:[%s15144_s22 + $0xe8] sm:$0xff]  ;;  %v13010_v58 = vpack.c.bf16 %v560_v55, %v559_v54 }
  0x25   : > { %433 = vst [vmem:[#allocation2 + $0x170] sm:$0xff] %v14951_v5  ;;  %434 = vst [vmem:[#allocation2 + $0x178] sm:$0x3] %v14951_v5  ;;  %13001 = vmatpush3.bf16.msra.mxu0 %v12998_v37  ;;  %v561_v59 = vld [vmem:[%s18518_s1 + $0x10] sm:$0xff]  ;;  %v562_v60 = vld [vmem:[%s18518_s1 + $0x18] sm:$0xff] }
  0x26   : > { %435 = vst [vmem:[#allocation2 + $0x180] sm:$0xff] %v14951_v5  ;;  %436 = vst [vmem:[#allocation2 + $0x188] sm:$0xff] %v14951_v5  ;;  %13003 = vmatprep.subr.bf16.mxu0 %v13002_v42  ;;  %v576_v61 = vld [vmem:[#allocation2 + $0x9] sm:$0xff]  ;;  %v13014_v63 = vpack.c.bf16 %v562_v60, %v561_v59  ;;  %v563_v0 = vld [vmem:[%s18518_s1 + $0x20] sm:$0xff] }
  0x27   : > { %437 = vst [vmem:[#allocation2 + $0x190] sm:$0x3] %v14951_v5  ;;  %438 = vst [vmem:[#allocation2 + $0x198] sm:$0xff] %v14951_v5  ;;  %v564_v1 = vld [vmem:[%s18518_s1 + $0x28] sm:$0xff]  ;;  %v565_v6 = vld [vmem:[%s18518_s1 + $0x30] sm:$0xff] }
  0x28   : > { %439 = vst [vmem:[#allocation2 + $0x1a0] sm:$0xff] %v14951_v5  ;;  %440 = vst [vmem:[#allocation2 + $0x1a8] sm:$0x3] %v14951_v5  ;;  %v13018_v4 = vpack.c.bf16 %v564_v1, %v563_v0  ;;  %v566_v7 = vld [vmem:[%s18518_s1 + $0x38] sm:$0xff]  ;;  %v567_v11 = vld [vmem:[%s18518_s1 + $0x40] sm:$0xff] }
  0x29   : > { %441 = vst [vmem:[#allocation3] sm:$0xff] %v14951_v5  ;;  %442 = vst [vmem:[#allocation3 + $0x8] sm:$0x3] %v14951_v5  ;;  %13005 = vmatpush3.bf16.msra.mxu0 %v13002_v42  ;;  %v13022_v10 = vpack.c.bf16 %v566_v7, %v565_v6  ;;  %v569_v16 = vld [vmem:[%s18518_s1 + $0x50] sm:$0xff]  ;;  %v572_v22 = vld [vmem:[%s18518_s1 + $0x68] sm:$0xff] }
  0x2a   : > { %443 = vst [vmem:[#allocation3 + $0x10] sm:$0xff] %v14951_v5  ;;  %444 = vst [vmem:[#allocation3 + $0x18] sm:$0x3] %v14951_v5  ;;  %13007 = vmatprep.subr.bf16.mxu0 %v13006_v50  ;;  %v8749_v55 = vld [vmem:[%s18518_s1 + $0x120] sm:$0xff]  ;;  %v8751_v60 = vld [vmem:[%s18518_s1 + $0x130] sm:$0xff] }
  0x2b   : > { %445 = vst [vmem:[#allocation3 + $0x20] sm:$0xff] %v14951_v5  ;;  %446 = vst [vmem:[#allocation3 + $0x28] sm:$0x3] %v14951_v5  ;;  %v8753_v1 = vld [vmem:[%s18518_s1 + $0x140] sm:$0xff] }
  0x2c   : > { %447 = vst [vmem:[#allocation3 + $0x30] sm:$0xff] %v14951_v5  ;;  %448 = vst [vmem:[#allocation3 + $0x38] sm:$0x3] %v14951_v5 }
  0x2d   : > { %449 = vst [vmem:[#allocation3 + $0x40] sm:$0xff] %v14951_v5  ;;  %450 = vst [vmem:[#allocation3 + $0x48] sm:$0x3] %v14951_v5  ;;  %13009 = vmatpush3.bf16.msra.mxu0 %v13006_v50 }
  0x2e   : > { %451 = vst [vmem:[#allocation3 + $0x50] sm:$0xff] %v14951_v5  ;;  %452 = vst [vmem:[#allocation3 + $0x58] sm:$0x3] %v14951_v5  ;;  %13011 = vmatprep.subr.bf16.mxu0 %v13010_v58 }
  0x2f   : > { %453 = vst [vmem:[#allocation3 + $0x60] sm:$0xff] %v14951_v5  ;;  %454 = vst [vmem:[#allocation3 + $0x68] sm:$0x3] %v14951_v5 }
  0x30   : > { %455 = vst [vmem:[#allocation3 + $0x70] sm:$0xff] %v14951_v5  ;;  %456 = vst [vmem:[#allocation3 + $0x78] sm:$0x3] %v14951_v5  ;;  %10707 = vmatmul.mubr.f32.vlgmr.msra.gmra.mrb[0].mxu0 %v576_v61  ;;  %v8752_v61 = vld [vmem:[%s18518_s1 + $0x138] sm:$0xff] }
  0x31   : > { %457 = vst [vmem:[#allocation3 + $0x80] sm:$0xff] %v14951_v5  ;;  %458 = vst [vmem:[#allocation3 + $0x88] sm:$0x3] %v14951_v5  ;;  %13013 = vmatpush3.bf16.msra.mxu0 %v13010_v58  ;;  %v13054_v0 = vpack.c.bf16 %v8752_v61, %v8751_v60 }
  0x32   : > { %459 = vst [vmem:[#allocation3 + $0x90] sm:$0xff] %v14951_v5  ;;  %460 = vst [vmem:[#allocation3 + $0x98] sm:$0x3] %v14951_v5  ;;  %13015 = vmatprep.subr.bf16.mxu0 %v13014_v63 }
  0x33   : > { %495 = vst.msk [vmem:[#allocation2 + $0x19] sm:$0xff] %vm494_vm0, %v461_v12  ;;  %496 = vst.msk [vmem:[#allocation2 + $0x21] sm:$0xff] %vm494_vm0, %v462_v13  ;;  %v568_v12 = vld [vmem:[%s18518_s1 + $0x48] sm:$0xff] }
  0x34   : > { %497 = vst.msk [vmem:[#allocation2 + $0x31] sm:$0xff] %vm494_vm0, %v463_v14  ;;  %498 = vst.msk [vmem:[#allocation2 + $0x39] sm:$0xff] %vm494_vm0, %v464_v15  ;;  %v13026_v15 = vpack.c.bf16 %v568_v12, %v567_v11  ;;  %v8755_v11 = vld [vmem:[%s18518_s1 + $0x150] sm:$0xff]  ;;  %v8756_v12 = vld [vmem:[%s18518_s1 + $0x158] sm:$0xff] }
  0x35   : > { %499 = vst.msk [vmem:[#allocation2 + $0x49] sm:$0xff] %vm494_vm0, %v465_v17  ;;  %500 = vst.msk [vmem:[#allocation2 + $0x51] sm:$0xff] %vm494_vm0, %v466_v19  ;;  %13017 = vmatpush3.bf16.msra.mxu0 %v13014_v63  ;;  %v570_v17 = vld [vmem:[%s18518_s1 + $0x58] sm:$0xff] }
  0x36   : > { %501 = vst.msk [vmem:[#allocation2 + $0x61] sm:$0xff] %vm494_vm0, %v467_v20  ;;  %502 = vst.msk [vmem:[#allocation2 + $0x69] sm:$0xff] %vm494_vm0, %v468_v21  ;;  %13019 = vmatprep.subr.bf16.mxu0 %v13018_v4  ;;  %v13030_v20 = vpack.c.bf16 %v570_v17, %v569_v16  ;;  %v571_v21 = vld [vmem:[%s18518_s1 + $0x60] sm:$0xff]  ;;  %v13062_v17 = vpack.c.bf16 %v8756_v12, %v8755_v11 }
  0x37   : > { %503 = vst.msk [vmem:[#allocation2 + $0x79] sm:$0xff] %vm494_vm0, %v469_v24  ;;  %504 = vst.msk [vmem:[#allocation2 + $0x81] sm:$0xff] %vm494_vm0, %v470_v25  ;;  %v13034_v25 = vpack.c.bf16 %v572_v22, %v571_v21  ;;  %v8758_v21 = vld [vmem:[%s18518_s1 + $0x168] sm:$0xff] }
  0x38   : > { %505 = vst.msk [vmem:[#allocation2 + $0x91] sm:$0xff] %vm494_vm0, %v471_v26  ;;  %506 = vst.msk [vmem:[#allocation2 + $0x99] sm:$0xff] %vm494_vm0, %v472_v27  ;;  %v573_v26 = vld [vmem:[%s18518_s1 + $0x70] sm:$0xff]  ;;  %v574_v27 = vld [vmem:[%s18518_s1 + $0x78] sm:$0xff] }
  0x39   : > { %507 = vst.msk [vmem:[#allocation2 + $0xa9] sm:$0xff] %vm494_vm0, %v473_v28  ;;  %508 = vst.msk [vmem:[#allocation2 + $0xb1] sm:$0xff] %vm494_vm0, %v474_v30  ;;  %13021 = vmatpush3.bf16.msra.mxu0 %v13018_v4  ;;  %v13038_v30 = vpack.c.bf16 %v574_v27, %v573_v26  ;;  %v8754_v4 = vld [vmem:[%s18518_s1 + $0x148] sm:$0xff]  ;;  %v8759_v27 = vld [vmem:[%s18518_s1 + $0x170] sm:$0xff] }
  0x3a   : > { %509 = vst.msk [vmem:[#allocation2 + $0xc1] sm:$0xff] %vm494_vm0, %v475_v31  ;;  %510 = vst.msk [vmem:[#allocation2 + $0xc9] sm:$0xff] %vm494_vm0, %v476_v32  ;;  %v15242_v62 = vld [vmem:[#allocation2 + $0x19] sm:$0xff]  ;;  %v15251_v2 = vld [vmem:[#allocation2 + $0x21] sm:$0xff]  ;;  %13023 = vmatprep.subr.bf16.mxu0 %v13022_v10 }
  0x3b   : > { %511 = vst.msk [vmem:[#allocation2 + $0xd9] sm:$0xff] %vm494_vm0, %v477_v35  ;;  %512 = vst.msk [vmem:[#allocation2 + $0xe1] sm:$0xff] %vm494_vm0, %v478_v36  ;;  %10709 = vmatprep.mubr.f32.mxu0 %v15242_v62  ;;  %v15253_v3 = vld [vmem:[#allocation2 + $0x31] sm:$0xff]  ;;  %v15263_v8 = vld [vmem:[#allocation2 + $0x39] sm:$0xff] }
  0x3c   : > { %513 = vst.msk [vmem:[#allocation2 + $0xf1] sm:$0xff] %vm494_vm0, %v479_v40  ;;  %514 = vst.msk [vmem:[#allocation2 + $0xf9] sm:$0xff] %vm494_vm0, %v480_v41  ;;  %10710 = vmatmul.mubr.f32.gmra.mrb[2].mxu0 %v15251_v2  ;;  %v15265_v9 = vld [vmem:[#allocation2 + $0x49] sm:$0xff]  ;;  %v15275_v13 = vld [vmem:[#allocation2 + $0x51] sm:$0xff] }
  0x3d   : > { %515 = vst.msk [vmem:[#allocation2 + $0x109] sm:$0xff] %vm494_vm0, %v481_v45  ;;  %516 = vst.msk [vmem:[#allocation2 + $0x111] sm:$0xff] %vm494_vm0, %v482_v46  ;;  %10712 = vmatprep.mubr.f32.mxu0 %v15253_v3  ;;  %v15277_v14 = vld [vmem:[#allocation2 + $0x61] sm:$0xff]  ;;  %v15287_v18 = vld [vmem:[#allocation2 + $0x69] sm:$0xff]  ;;  %13025 = vmatpush3.bf16.msra.mxu0 %v13022_v10  ;;  %v13058_v10 = vpack.c.bf16 %v8754_v4, %v8753_v1 }
  0x3e   : > { %517 = vst.msk [vmem:[#allocation2 + $0x121] sm:$0xff] %vm494_vm0, %v483_v47  ;;  %518 = vst.msk [vmem:[#allocation2 + $0x129] sm:$0xff] %vm494_vm0, %v484_v48  ;;  %v15289_v19 = vld [vmem:[#allocation2 + $0x79] sm:$0xff]  ;;  %13027 = vmatprep.subr.bf16.mxu0 %v13026_v15  ;;  %v15299_v23 = vld [vmem:[#allocation2 + $0x81] sm:$0xff] }
  0x3f   : > { %519 = vst.msk [vmem:[#allocation2 + $0x139] sm:$0xff] %vm494_vm0, %v485_v49  ;;  %520 = vst.msk [vmem:[#allocation2 + $0x141] sm:$0xff] %vm494_vm0, %v486_v51  ;;  %v15301_v24 = vld [vmem:[#allocation2 + $0x91] sm:$0xff]  ;;  %v15311_v28 = vld [vmem:[#allocation2 + $0x99] sm:$0xff] }
  0x40   : > { %521 = vst.msk [vmem:[#allocation2 + $0x151] sm:$0xff] %vm494_vm0, %v487_v52  ;;  %522 = vst.msk [vmem:[#allocation2 + $0x159] sm:$0xff] %vm494_vm0, %v488_v53  ;;  %10713 = vmatmul.mubr.f32.gmra.mrb[4].mxu0 %v15263_v8  ;;  %v15313_v29 = vld [vmem:[#allocation2 + $0xa9] sm:$0xff]  ;;  %v8745_v31 = vld [vmem:[%s18518_s1 + $0x100] sm:$0xff] }
  0x41   : > { %523 = vst.msk [vmem:[#allocation2 + $0x169] sm:$0xff] %vm494_vm0, %v489_v56  ;;  %524 = vst.msk [vmem:[#allocation2 + $0x171] sm:$0xff] %vm494_vm0, %v490_v57  ;;  %10715 = vmatprep.mubr.f32.mxu0 %v15265_v9  ;;  %13029 = vmatpush3.bf16.msra.mxu0 %v13026_v15  ;;  %v8746_v32 = vld [vmem:[%s18518_s1 + $0x108] sm:$0xff]  ;;  %v15323_v33 = vld [vmem:[#allocation2 + $0xb1] sm:$0xff] }
  0x42   : > { %13031 = vmatprep.subr.bf16.mxu0 %v13030_v20  ;;  %v15325_v34 = vld [vmem:[#allocation2 + $0xc1] sm:$0xff]  ;;  %v13042_v35 = vpack.c.bf16 %v8746_v32, %v8745_v31  ;;  %v15329_v36 = vld [vmem:[#allocation2 + $0xc9] sm:$0xff]  ;;  %v15331_v37 = vld [vmem:[#allocation2 + $0xd9] sm:$0xff] }
  0x43   : > { %v15335_v38 = vld [vmem:[#allocation2 + $0xe1] sm:$0xff]  ;;  %v15337_v39 = vld [vmem:[#allocation2 + $0xf1] sm:$0xff]  ;;  %v15341_v40 = vld [vmem:[#allocation2 + $0xf9] sm:$0xff] }
  0x44   : > { %10716 = vmatmul.mubr.f32.gmra.mrb[6].mxu0 %v15275_v13  ;;  %v15343_v41 = vld [vmem:[#allocation2 + $0x109] sm:$0xff]  ;;  %v15347_v42 = vld [vmem:[#allocation2 + $0x111] sm:$0xff]  ;;  %v15391_v57 = vld [vmem:[#allocation2 + $0x20] sm:$0xff] }
  0x45   : > { %10718 = vmatprep.mubr.f32.mxu0 %v15277_v14  ;;  %13033 = vmatpush3.bf16.msra.mxu0 %v13030_v20  ;;  %v15349_v43 = vld [vmem:[#allocation2 + $0x121] sm:$0xff]  ;;  %v15353_v44 = vld [vmem:[#allocation2 + $0x129] sm:$0xff]  ;;  %v8748_v52 = vld [vmem:[%s18518_s1 + $0x118] sm:$0xff] }
  0x46   : > { %13035 = vmatprep.subr.bf16.mxu0 %v13034_v25  ;;  %18563 = vst [vmem:[#allocation4_spill] sm:$0xff] %v15353_v44  ;;  %v15355_v45 = vld [vmem:[#allocation2 + $0x139] sm:$0xff]  ;;  %v15359_v46 = vld [vmem:[#allocation2 + $0x141] sm:$0xff]  ;;  %v8747_v51 = vld [vmem:[%s18518_s1 + $0x110] sm:$0xff] }
  0x47   : > { %18564 = vst [vmem:[#allocation5_spill] sm:$0xff] %v15355_v45  ;;  %18565 = vst [vmem:[#allocation6_spill] sm:$0xff] %v15359_v46  ;;  %v15361_v47 = vld [vmem:[#allocation2 + $0x151] sm:$0xff]  ;;  %v15365_v48 = vld [vmem:[#allocation2 + $0x159] sm:$0xff]  ;;  %v13046_v54 = vpack.c.bf16 %v8748_v52, %v8747_v51 }
  0x48   : > { %10719 = vmatmul.mubr.f32.gmra.mrb[8].mxu0 %v15287_v18  ;;  %18566 = vst [vmem:[#allocation7_spill] sm:$0xff] %v15361_v47  ;;  %18567 = vst [vmem:[#allocation8_spill] sm:$0xff] %v15365_v48  ;;  %v15367_v49 = vld [vmem:[#allocation2 + $0x169] sm:$0xff]  ;;  %v15371_v50 = vld [vmem:[#allocation2 + $0x171] sm:$0xff] }
  0x49   : > { %10721 = vmatprep.mubr.f32.mxu0 %v15289_v19  ;;  %13037 = vmatpush3.bf16.msra.mxu0 %v13034_v25  ;;  %18568 = vst [vmem:[#allocation9_spill] sm:$0xff] %v15367_v49  ;;  %18569 = vst [vmem:[#allocation10_spill] sm:$0xff] %v15371_v50  ;;  %v15381_v53 = vld [vmem:[#allocation2 + $0x18] sm:$0xff]  ;;  %v8750_v56 = vld [vmem:[%s18518_s1 + $0x128] sm:$0xff] }
  0x4a   : > { %13039 = vmatprep.subr.bf16.mxu0 %v13038_v30  ;;  %v15393_v58 = vld [vmem:[#allocation2 + $0x30] sm:$0xff]  ;;  %v13050_v59 = vpack.c.bf16 %v8750_v56, %v8749_v55  ;;  %v15405_v63 = vld [vmem:[#allocation2 + $0x48] sm:$0xff]  ;;  %v15417_v7 = vld [vmem:[#allocation2 + $0x60] sm:$0xff] }
  0x4b   : > { %v15415_v6 = vld [vmem:[#allocation2 + $0x50] sm:$0xff]  ;;  %v15427_v15 = vld [vmem:[#allocation2 + $0x68] sm:$0xff]  ;;  %v15429_v16 = vld [vmem:[#allocation2 + $0x78] sm:$0xff] }
  0x4c   : > { %10722 = vmatmul.mubr.f32.gmra.mrb[10].mxu0 %v15299_v23  ;;  %v8757_v20 = vld [vmem:[%s18518_s1 + $0x160] sm:$0xff]  ;;  %v15441_v25 = vld [vmem:[#allocation2 + $0x90] sm:$0xff]  ;;  %v15451_v31 = vld [vmem:[#allocation2 + $0x98] sm:$0xff] }
  0x4d   : > { %10724 = vmatprep.mubr.f32.mxu0 %v15301_v24  ;;  %13041 = vmatpush3.bf16.msra.mxu0 %v13038_v30  ;;  %v15439_v22 = vld [vmem:[#allocation2 + $0x80] sm:$0xff]  ;;  %v13066_v26 = vpack.c.bf16 %v8758_v21, %v8757_v20  ;;  %v8760_v30 = vld [vmem:[%s18518_s1 + $0x178] sm:$0xff]  ;;  %v15453_v32 = vld [vmem:[#allocation2 + $0xa8] sm:$0xff] }
  0x4e   : > { %13043 = vmatprep.subr.bf16.mxu0 %v13042_v35  ;;  %v8761_v51 = vld [vmem:[%s18518_s1 + $0x180] sm:$0xff]  ;;  %v8762_v52 = vld [vmem:[%s18518_s1 + $0x188] sm:$0xff]  ;;  %v15471_v60 = vld [vmem:[#allocation2 + $0xd8] sm:$0xff] }
  0x4f   : > { %v15465_v55 = vld [vmem:[#allocation2 + $0xc0] sm:$0xff]  ;;  %v13074_v56 = vpack.c.bf16 %v8762_v52, %v8761_v51  ;;  %v15481_v1 = vld [vmem:[#allocation2 + $0xf8] sm:$0xff]  ;;  %v15483_v4 = vld [vmem:[#allocation2 + $0x108] sm:$0xff] }
  0x50   : > { %10725 = vmatmul.mubr.f32.gmra.mrb[12].mxu0 %v15311_v28  ;;  %v15475_v61 = vld [vmem:[#allocation2 + $0xe0] sm:$0xff]  ;;  %v15493_v12 = vld [vmem:[#allocation2 + $0x128] sm:$0xff]  ;;  %v15501_v21 = vld [vmem:[#allocation2 + $0x150] sm:$0xff] }
  0x51   : > { %10727 = vmatprep.mubr.f32.mxu0 %v15313_v29  ;;  %v15489_v11 = vld [vmem:[#allocation2 + $0x120] sm:$0xff]  ;;  %v15515_v51 = vld [vmem:[#allocation2 + $0x170] sm:$0xff] }
  0x52   : > { %v15499_v20 = vld [vmem:[#allocation2 + $0x140] sm:$0xff] }
  0x53   : > { %v1074_v52 = vld [vmem:[#allocation2 + $0x2] sm:$0xff] }
  0x54   : > { %10728 = vmatmul.mubr.f32.gmra.mrb[14].mxu0 %v15323_v33 }
  0x55   : > { %10730 = vmatprep.mubr.f32.mxu0 %v15325_v34 }
  0x58   : > { %10731 = vmatmul.mubr.f32.gmra.mrb[16].mxu0 %v15329_v36 }
  0x59   : > { %10733 = vmatprep.mubr.f32.mxu0 %v15331_v37 }
  0x5c   : > { %10734 = vmatmul.mubr.f32.gmra.mrb[18].mxu0 %v15335_v38 }
  0x5d   : > { %10736 = vmatprep.mubr.f32.mxu0 %v15337_v39 }
  0x60   : > { %10737 = vmatmul.mubr.f32.gmra.mrb[20].mxu0 %v15341_v40 }
  0x61   : > { %10739 = vmatprep.mubr.f32.mxu0 %v15343_v41 }
  0x64   : > { %10740 = vmatmul.mubr.f32.gmra.mrb[22].mxu0 %v15347_v42 }
  0x65   : > { %10742 = vmatprep.mubr.f32.mxu0 %v15349_v43 }
  0x68   : > { %10743 = vmatmul.mubr.f32.gmra.mrb[24].mxu0 %v15353_v44  ;;  %v15535_v44 = vld [vmem:[#allocation2 + $0x32] sm:$0xff] }
  0x69   : > { %10745 = vmatprep.mubr.f32.mxu0 %v15355_v45  ;;  %v15533_v45 = vld [vmem:[#allocation2 + $0x22] sm:$0xff]  ;;  %18572 = vst [vmem:[#allocation13_spill] sm:$0xff] %v15535_v44 }
  0x6a   : > { %18571 = vst [vmem:[#allocation12_spill] sm:$0xff] %v15533_v45 }
  0x6c   : > { %10746 = vmatmul.mubr.f32.gmra.mrb[26].mxu0 %v15359_v46  ;;  %v8766_v46 = vld [vmem:[%s18518_s1 + $0x1a8] sm:$0xff] }
  0x6d   : > { %10748 = vmatprep.mubr.f32.mxu0 %v15361_v47  ;;  %v8765_v47 = vld [vmem:[%s18518_s1 + $0x1a0] sm:$0xff] }
  0x70   : > { %10749 = vmatmul.mubr.f32.gmra.mrb[28].mxu0 %v15365_v48 }
  0x71   : > { %10751 = vmatprep.mubr.f32.mxu0 %v15367_v49  ;;  %v15524_v49 = vld [vmem:[#allocation2 + $0x1a] sm:$0xff] }
  0x72   : > { %18570 = vst [vmem:[#allocation11_spill] sm:$0xff] %v15524_v49 }
  0x74   : > { %10752 = vmatmul.mubr.f32.gmra.mrb[30].mxu0 %v15371_v50  ;;  %v1075_v50 = vld [vmem:[#allocation2 + $0xa] sm:$0xff] }
  0x75   : > { %10786 = vmatprep.mubr.f32.mxu0 %v14951_v5 }
  0x78   : > { %10787 = vmatmul.mubr.f32.vlgmr.msra.gmra.mrb[0].mxu0 %v14951_v5  ;;  %v15403_v5 = vld [vmem:[#allocation2 + $0x38] sm:$0xff] }
  0x79   : > { %13045 = vmatpush3.bf16.msra.mxu0 %v13042_v35  ;;  %10789 = vmatprep.mubr.f32.mxu0 %v15381_v53  ;;  %v13070_v35 = vpack.c.bf16 %v8760_v30, %v8759_v27  ;;  %v492_v27 = vld [vmem:[%s15144_s22 + $0xf8] sm:$0xff] }
  0x7a   : > { %13047 = vmatprep.subr.bf16.mxu0 %v13046_v54  ;;  %526 = vst.msk [vmem:[#allocation2 + $0x189] sm:$0xff] %vm494_vm0, %v492_v27  ;;  %v15509_v30 = vld [vmem:[#allocation2 + $0x158] sm:$0xff] }
  0x7b   : > { %v8764_v27 = vld [vmem:[%s18518_s1 + $0x198] sm:$0xff] }
  0x7c   : > { %10790 = vmatmul.mubr.f32.gmra.mrb[2].mxu0 %v15391_v57 }
  0x7d   : > { %10792 = vmatprep.mubr.f32.mxu0 %v15393_v58  ;;  %13049 = vmatpush3.bf16.msra.mxu0 %v13046_v54  ;;  %v15463_v54 = vld [vmem:[#allocation2 + $0xb0] sm:$0xff] }
  0x7e   : > { %13051 = vmatprep.subr.bf16.mxu0 %v13050_v59 }
  0x80   : > { %10793 = vmatmul.mubr.f32.gmra.mrb[4].mxu0 %v15403_v5 }
  0x81   : > { %10795 = vmatprep.mubr.f32.mxu0 %v15405_v63  ;;  %13053 = vmatpush3.bf16.msra.mxu0 %v13050_v59  ;;  %v15469_v59 = vld [vmem:[#allocation2 + $0xc8] sm:$0xff] }
  0x82   : > { %13055 = vmatprep.subr.bf16.mxu0 %v13054_v0 }
  0x84   : > { %10796 = vmatmul.mubr.f32.gmra.mrb[6].mxu0 %v15415_v6 }
  0x85   : > { %10798 = vmatprep.mubr.f32.mxu0 %v15417_v7  ;;  %13057 = vmatpush3.bf16.msra.mxu0 %v13054_v0  ;;  %v15477_v0 = vld [vmem:[#allocation2 + $0xf0] sm:$0xff] }
  0x86   : > { %13059 = vmatprep.subr.bf16.mxu0 %v13058_v10 }
  0x88   : > { %10799 = vmatmul.mubr.f32.gmra.mrb[8].mxu0 %v15427_v15 }
  0x89   : > { %10801 = vmatprep.mubr.f32.mxu0 %v15429_v16  ;;  %13061 = vmatpush3.bf16.msra.mxu0 %v13058_v10  ;;  %v15487_v10 = vld [vmem:[#allocation2 + $0x110] sm:$0xff] }
  0x8a   : > { %13063 = vmatprep.subr.bf16.mxu0 %v13062_v17 }
  0x8c   : > { %10802 = vmatmul.mubr.f32.gmra.mrb[10].mxu0 %v15439_v22 }
  0x8d   : > { %10804 = vmatprep.mubr.f32.mxu0 %v15441_v25  ;;  %13065 = vmatpush3.bf16.msra.mxu0 %v13062_v17  ;;  %v15495_v17 = vld [vmem:[#allocation2 + $0x138] sm:$0xff] }
  0x8e   : > { %13067 = vmatprep.subr.bf16.mxu0 %v13066_v26 }
  0x90   : > { %10805 = vmatmul.mubr.f32.gmra.mrb[12].mxu0 %v15451_v31 }
  0x91   : > { %10807 = vmatprep.mubr.f32.mxu0 %v15453_v32  ;;  %13069 = vmatpush3.bf16.msra.mxu0 %v13066_v26  ;;  %v491_v26 = vld [vmem:[%s15144_s22 + $0xf0] sm:$0xff] }
  0x92   : > { %13071 = vmatprep.subr.bf16.mxu0 %v13070_v35  ;;  %525 = vst.msk [vmem:[#allocation2 + $0x181] sm:$0xff] %vm494_vm0, %v491_v26  ;;  %v8763_v26 = vld [vmem:[%s18518_s1 + $0x190] sm:$0xff] }
  0x93   : > { %v13078_v48 = vpack.c.bf16 %v8764_v27, %v8763_v26  ;;  %v8767_v26 = vld [vmem:[%s18518_s1 + $0x1b0] sm:$0xff]  ;;  %v8768_v27 = vld [vmem:[%s18518_s1 + $0x1b8] sm:$0xff] }
  0x94   : > { %10808 = vmatmul.mubr.f32.gmra.mrb[14].mxu0 %v15463_v54 }
  0x95   : > { %10810 = vmatprep.mubr.f32.mxu0 %v15465_v55  ;;  %13073 = vmatpush3.bf16.msra.mxu0 %v13070_v35  ;;  %v15511_v35 = vld [vmem:[#allocation2 + $0x168] sm:$0xff] }
  0x96   : > { %13075 = vmatprep.subr.bf16.mxu0 %v13074_v56 }
  0x98   : > { %10811 = vmatmul.mubr.f32.gmra.mrb[16].mxu0 %v15469_v59 }
  0x99   : > { %10813 = vmatprep.mubr.f32.mxu0 %v15471_v60 }
  0x9c   : > { %10814 = vmatmul.mubr.f32.gmra.mrb[18].mxu0 %v15475_v61 }
  0x9d   : > { %10816 = vmatprep.mubr.f32.mxu0 %v15477_v0 }
  0xa0   : > { %10817 = vmatmul.mubr.f32.gmra.mrb[20].mxu0 %v15481_v1 }
  0xa1   : > { %10819 = vmatprep.mubr.f32.mxu0 %v15483_v4 }
  0xa4   : > { %10820 = vmatmul.mubr.f32.gmra.mrb[22].mxu0 %v15487_v10 }
  0xa5   : > { %10822 = vmatprep.mubr.f32.mxu0 %v15489_v11 }
  0xa8   : > { %10823 = vmatmul.mubr.f32.gmra.mrb[24].mxu0 %v15493_v12 }
  0xa9   : > { %10825 = vmatprep.mubr.f32.mxu0 %v15495_v17 }
  0xac   : > { %10826 = vmatmul.mubr.f32.gmra.mrb[26].mxu0 %v15499_v20 }
  0xad   : > { %10828 = vmatprep.mubr.f32.mxu0 %v15501_v21 }
  0xb0   : > { %10829 = vmatmul.mubr.f32.gmra.mrb[28].mxu0 %v15509_v30 }
  0xb1   : > { %10831 = vmatprep.mubr.f32.mxu0 %v15511_v35 }
  0xb4   : > { %10832 = vmatmul.mubr.f32.gmra.mrb[30].mxu0 %v15515_v51 }
  0xb5   : > { %10866 = vmatprep.mubr.f32.mxu0 %v1074_v52  ;;  %v13082_v52 = vpack.c.bf16 %v8766_v46, %v8765_v47  ;;  %v8769_v46 = vld [vmem:[%s18518_s1 + $0x1c0] sm:$0xff]  ;;  %v8770_v47 = vld [vmem:[%s18518_s1 + $0x1c8] sm:$0xff] }
  0xb8   : > { %10867 = vmatmul.mubr.f32.vlgmr.msra.gmra.mrb[0].mxu0 %v1075_v50  ;;  %v15545_v50 = vld [vmem:[#allocation2 + $0x3a] sm:$0xff] }
  0xb9   : > { %13077 = vmatpush3.bf16.msra.mxu0 %v13074_v56  ;;  %10869 = vmatprep.mubr.f32.mxu0 %v15524_v49  ;;  %18573 = vst [vmem:[#allocation14_spill] sm:$0xff] %v15545_v50  ;;  %v15547_v56 = vld [vmem:[#allocation2 + $0x4a] sm:$0xff]  ;;  %v13086_v49 = vpack.c.bf16 %v8768_v27, %v8767_v26  ;;  %v8772_v27 = vld [vmem:[%s18518_s1 + $0x1d8] sm:$0xff] }
  0xba   : > { %13079 = vmatprep.subr.bf16.mxu0 %v13078_v48  ;;  %18574 = vst [vmem:[#allocation15_spill] sm:$0xff] %v15547_v56  ;;  %v8771_v26 = vld [vmem:[%s18518_s1 + $0x1d0] sm:$0xff] }
  0xbc   : > { %10870 = vmatmul.mubr.f32.gmra.mrb[2].mxu0 %v15533_v45  ;;  %v13090_v45 = vpack.c.bf16 %v8770_v47, %v8769_v46  ;;  %v8773_v46 = vld [vmem:[%s18518_s1 + $0x1e0] sm:$0xff]  ;;  %v8774_v47 = vld [vmem:[%s18518_s1 + $0x1e8] sm:$0xff] }
  0xbd   : > { %10872 = vmatprep.mubr.f32.mxu0 %v15535_v44  ;;  %13081 = vmatpush3.bf16.msra.mxu0 %v13078_v48  ;;  %v15557_v44 = vld [vmem:[#allocation2 + $0x52] sm:$0xff]  ;;  %v15559_v48 = vld [vmem:[#allocation2 + $0x62] sm:$0xff] }
  0xbe   : > { %13083 = vmatprep.subr.bf16.mxu0 %v13082_v52  ;;  %18575 = vst [vmem:[#allocation16_spill] sm:$0xff] %v15557_v44  ;;  %18576 = vst [vmem:[#allocation17_spill] sm:$0xff] %v15559_v48 }
  0xc0   : > { %10873 = vmatmul.mubr.f32.gmra.mrb[4].mxu0 %v15545_v50  ;;  %v13094_v50 = vpack.c.bf16 %v8772_v27, %v8771_v26  ;;  %v8775_v26 = vld [vmem:[%s18518_s1 + $0x1f0] sm:$0xff]  ;;  %v8776_v27 = vld [vmem:[%s18518_s1 + $0x1f8] sm:$0xff] }
  0xc1   : > { %10875 = vmatprep.mubr.f32.mxu0 %v15547_v56  ;;  %13085 = vmatpush3.bf16.msra.mxu0 %v13082_v52  ;;  %v15569_v56 = vld [vmem:[#allocation2 + $0x6a] sm:$0xff]  ;;  %v15571_v52 = vld [vmem:[#allocation2 + $0x7a] sm:$0xff] }
  0xc2   : > { %13087 = vmatprep.subr.bf16.mxu0 %v13086_v49  ;;  %18577 = vst [vmem:[#allocation18_spill] sm:$0xff] %v15569_v56  ;;  %18578 = vst [vmem:[#allocation19_spill] sm:$0xff] %v15571_v52 }
  0xc4   : > { %10876 = vmatmul.mubr.f32.gmra.mrb[6].mxu0 %v15557_v44  ;;  %v13098_v44 = vpack.c.bf16 %v8774_v47, %v8773_v46  ;;  %v8777_v46 = vld [vmem:[%s18518_s1 + $0x200] sm:$0xff]  ;;  %v8778_v47 = vld [vmem:[%s18518_s1 + $0x208] sm:$0xff] }
  0xc5   : > { %10878 = vmatprep.mubr.f32.mxu0 %v15559_v48  ;;  %13089 = vmatpush3.bf16.msra.mxu0 %v13086_v49  ;;  %v15581_v48 = vld [vmem:[#allocation2 + $0x82] sm:$0xff]  ;;  %v15583_v49 = vld [vmem:[#allocation2 + $0x92] sm:$0xff] }
  0xc6   : > { %13091 = vmatprep.subr.bf16.mxu0 %v13090_v45  ;;  %18579 = vst [vmem:[#allocation20_spill] sm:$0xff] %v15581_v48  ;;  %18580 = vst [vmem:[#allocation21_spill] sm:$0xff] %v15583_v49 }
  0xc8   : > { %10879 = vmatmul.mubr.f32.gmra.mrb[8].mxu0 %v15569_v56  ;;  %v13102_v56 = vpack.c.bf16 %v8776_v27, %v8775_v26  ;;  %v15611_v26 = vld [vmem:[#allocation2 + $0xca] sm:$0xff]  ;;  %v15613_v27 = vld [vmem:[#allocation2 + $0xda] sm:$0xff] }
  0xc9   : > { %10881 = vmatprep.mubr.f32.mxu0 %v15571_v52  ;;  %13093 = vmatpush3.bf16.msra.mxu0 %v13090_v45  ;;  %v15593_v52 = vld [vmem:[#allocation2 + $0x9a] sm:$0xff]  ;;  %v15595_v45 = vld [vmem:[#allocation2 + $0xaa] sm:$0xff]  ;;  %18582 = vst [vmem:[#allocation23_spill] sm:$0xff] %v15611_v26  ;;  %18583 = vst [vmem:[#allocation24_spill] sm:$0xff] %v15613_v27 }
  0xca   : > { %13095 = vmatprep.subr.bf16.mxu0 %v13094_v50  ;;  %18581 = vst [vmem:[#allocation22_spill] sm:$0xff] %v15595_v45 }
  0xcc   : > { %10882 = vmatmul.mubr.f32.gmra.mrb[10].mxu0 %v15581_v48  ;;  %v13106_v48 = vpack.c.bf16 %v8778_v47, %v8777_v46  ;;  %v15623_v46 = vld [vmem:[#allocation2 + $0xfa] sm:$0xff]  ;;  %v15625_v47 = vld [vmem:[#allocation2 + $0x10a] sm:$0xff] }
  0xcd   : > { %10884 = vmatprep.mubr.f32.mxu0 %v15583_v49  ;;  %13097 = vmatpush3.bf16.msra.mxu0 %v13094_v50  ;;  %v15605_v49 = vld [vmem:[#allocation2 + $0xb2] sm:$0xff]  ;;  %v15607_v50 = vld [vmem:[#allocation2 + $0xc2] sm:$0xff]  ;;  %18586 = vst [vmem:[#allocation27_spill] sm:$0xff] %v15623_v46  ;;  %18587 = vst [vmem:[#allocation28_spill] sm:$0xff] %v15625_v47 }
  0xce   : > { %13099 = vmatprep.subr.bf16.mxu0 %v13098_v44 }
  0xd0   : > { %10885 = vmatmul.mubr.f32.gmra.mrb[12].mxu0 %v15593_v52 }
  0xd1   : > { %10887 = vmatprep.mubr.f32.mxu0 %v15595_v45  ;;  %13101 = vmatpush3.bf16.msra.mxu0 %v13098_v44  ;;  %v15617_v45 = vld [vmem:[#allocation2 + $0xe2] sm:$0xff]  ;;  %v15619_v44 = vld [vmem:[#allocation2 + $0xf2] sm:$0xff] }
  0xd2   : > { %13103 = vmatprep.subr.bf16.mxu0 %v13102_v56  ;;  %18584 = vst [vmem:[#allocation25_spill] sm:$0xff] %v15617_v45  ;;  %18585 = vst [vmem:[#allocation26_spill] sm:$0xff] %v15619_v44 }
  0xd4   : > { %10888 = vmatmul.mubr.f32.gmra.mrb[14].mxu0 %v15605_v49 }
  0xd5   : > { %10890 = vmatprep.mubr.f32.mxu0 %v15607_v50  ;;  %13105 = vmatpush3.bf16.msra.mxu0 %v13102_v56  ;;  %v15629_v56 = vld [vmem:[#allocation2 + $0x112] sm:$0xff] }
  0xd6   : > { %13107 = vmatprep.subr.bf16.mxu0 %v13106_v48  ;;  %18588 = vst [vmem:[#allocation29_spill] sm:$0xff] %v15629_v56 }
  0xd8   : > { %10891 = vmatmul.mubr.f32.gmra.mrb[16].mxu0 %v15611_v26  ;;  %v15631_v26 = vld [vmem:[#allocation2 + $0x122] sm:$0xff] }
  0xd9   : > { %10893 = vmatprep.mubr.f32.mxu0 %v15613_v27  ;;  %18589 = vst [vmem:[#allocation30_spill] sm:$0xff] %v15631_v26  ;;  %v15635_v27 = vld [vmem:[#allocation2 + $0x12a] sm:$0xff] }
  0xda   : > { %18590 = vst [vmem:[#allocation31_spill] sm:$0xff] %v15635_v27 }
  0xdc   : > { %10894 = vmatmul.mubr.f32.gmra.mrb[18].mxu0 %v15617_v45  ;;  %v15637_v45 = vld [vmem:[#allocation2 + $0x13a] sm:$0xff] }
  0xdd   : > { %10896 = vmatprep.mubr.f32.mxu0 %v15619_v44  ;;  %18591 = vst [vmem:[#allocation32_spill] sm:$0xff] %v15637_v45  ;;  %v15641_v44 = vld [vmem:[#allocation2 + $0x142] sm:$0xff] }
  0xde   : > { %18592 = vst [vmem:[#allocation33_spill] sm:$0xff] %v15641_v44 }
  0xe0   : > { %10897 = vmatmul.mubr.f32.gmra.mrb[20].mxu0 %v15623_v46  ;;  %v15643_v46 = vld [vmem:[#allocation2 + $0x152] sm:$0xff] }
  0xe1   : > { %10899 = vmatprep.mubr.f32.mxu0 %v15625_v47  ;;  %18593 = vst [vmem:[#allocation34_spill] sm:$0xff] %v15643_v46  ;;  %v15647_v47 = vld [vmem:[#allocation2 + $0x15a] sm:$0xff] }
  0xe2   : > { %18594 = vst [vmem:[#allocation35_spill] sm:$0xff] %v15647_v47 }
  0xe4   : > { %10900 = vmatmul.mubr.f32.gmra.mrb[22].mxu0 %v15629_v56  ;;  %v15649_v56 = vld [vmem:[#allocation2 + $0x16a] sm:$0xff] }
  0xe5   : > { %10902 = vmatprep.mubr.f32.mxu0 %v15631_v26  ;;  %18595 = vst [vmem:[#allocation36_spill] sm:$0xff] %v15649_v56  ;;  %v15653_v26 = vld [vmem:[#allocation2 + $0x172] sm:$0xff] }
  0xe8   : > { %10903 = vmatmul.mubr.f32.gmra.mrb[24].mxu0 %v15635_v27 }
  0xe9   : > { %10905 = vmatprep.mubr.f32.mxu0 %v15637_v45  ;;  %v8779_v45 = vld [vmem:[%s18518_s1 + $0x210] sm:$0xff] }
  0xec   : > { %10906 = vmatmul.mubr.f32.gmra.mrb[26].mxu0 %v15641_v44  ;;  %v8780_v44 = vld [vmem:[%s18518_s1 + $0x218] sm:$0xff] }
  0xed   : > { %10908 = vmatprep.mubr.f32.mxu0 %v15643_v46  ;;  %v13110_v46 = vpack.c.bf16 %v8780_v44, %v8779_v45  ;;  %v8784_v45 = vld [vmem:[%s18518_s1 + $0x238] sm:$0xff]  ;;  %v8786_v44 = vld [vmem:[%s18518_s1 + $0x248] sm:$0xff] }
  0xf0   : > { %10909 = vmatmul.mubr.f32.gmra.mrb[28].mxu0 %v15647_v47  ;;  %v8781_v47 = vld [vmem:[%s18518_s1 + $0x220] sm:$0xff] }
  0xf1   : > { %10911 = vmatprep.mubr.f32.mxu0 %v15649_v56  ;;  %v8782_v56 = vld [vmem:[%s18518_s1 + $0x228] sm:$0xff] }
  0xf2   : > { %v13114_v27 = vpack.c.bf16 %v8782_v56, %v8781_v47  ;;  %v8788_v56 = vld [vmem:[%s18518_s1 + $0x258] sm:$0xff] }
  0xf4   : > { %10912 = vmatmul.mubr.f32.gmra.mrb[30].mxu0 %v15653_v26 }
  0xf5   : > { %10946 = vmatprep.mubr.f32.mxu0 %v15381_v53  ;;  %v8783_v53 = vld [vmem:[%s18518_s1 + $0x230] sm:$0xff] }
  0xf8   : > { %10947 = vmatmul.mubr.f32.vlgmr.msra.gmra.mrb[0].mxu0 %v15391_v57  ;;  %v13118_v57 = vpack.c.bf16 %v8784_v45, %v8783_v53  ;;  %v8790_v45 = vld [vmem:[%s18518_s1 + $0x268] sm:$0xff] }
  0xf9   : > { %13109 = vmatpush3.bf16.msra.mxu0 %v13106_v48  ;;  %10949 = vmatprep.mubr.f32.mxu0 %v15393_v58  ;;  %v8785_v48 = vld [vmem:[%s18518_s1 + $0x240] sm:$0xff] }
  0xfa   : > { %13111 = vmatprep.subr.bf16.mxu0 %v13110_v46  ;;  %v13122_v47 = vpack.c.bf16 %v8786_v44, %v8785_v48  ;;  %v8792_v44 = vld [vmem:[%s18518_s1 + $0x278] sm:$0xff] }
  0xfc   : > { %10950 = vmatmul.mubr.f32.gmra.mrb[2].mxu0 %v15403_v5 }
  0xfd   : > { %10952 = vmatprep.mubr.f32.mxu0 %v15405_v63  ;;  %13113 = vmatpush3.bf16.msra.mxu0 %v13110_v46  ;;  %v8787_v46 = vld [vmem:[%s18518_s1 + $0x250] sm:$0xff] }
  0xfe   : > { %13115 = vmatprep.subr.bf16.mxu0 %v13114_v27  ;;  %v13126_v53 = vpack.c.bf16 %v8788_v56, %v8787_v46  ;;  %v8794_v56 = vld [vmem:[%s18518_s1 + $0x288] sm:$0xff] }
 0x100   : > { %10953 = vmatmul.mubr.f32.gmra.mrb[4].mxu0 %v15415_v6 }
 0x101   : > { %10955 = vmatprep.mubr.f32.mxu0 %v15417_v7  ;;  %13117 = vmatpush3.bf16.msra.mxu0 %v13114_v27  ;;  %v8789_v27 = vld [vmem:[%s18518_s1 + $0x260] sm:$0xff] }
 0x102   : > { %13119 = vmatprep.subr.bf16.mxu0 %v13118_v57  ;;  %v13130_v48 = vpack.c.bf16 %v8790_v45, %v8789_v27  ;;  %v15737_v45 = vld [vmem:[#allocation2 + $0x188] sm:$0xff] }
 0x104   : > { %10956 = vmatmul.mubr.f32.gmra.mrb[6].mxu0 %v15427_v15 }
 0x105   : > { %10958 = vmatprep.mubr.f32.mxu0 %v15429_v16  ;;  %13121 = vmatpush3.bf16.msra.mxu0 %v13118_v57  ;;  %v8791_v57 = vld [vmem:[%s18518_s1 + $0x270] sm:$0xff] }
 0x106   : > { %13123 = vmatprep.subr.bf16.mxu0 %v13122_v47  ;;  %v13134_v46 = vpack.c.bf16 %v8792_v44, %v8791_v57  ;;  %v8796_v57 = vld [vmem:[%s18518_s1 + $0x298] sm:$0xff] }
 0x108   : > { %10959 = vmatmul.mubr.f32.gmra.mrb[8].mxu0 %v15439_v22 }
 0x109   : > { %10961 = vmatprep.mubr.f32.mxu0 %v15441_v25  ;;  %13125 = vmatpush3.bf16.msra.mxu0 %v13122_v47  ;;  %v8793_v47 = vld [vmem:[%s18518_s1 + $0x280] sm:$0xff] }
 0x10a   : > { %13127 = vmatprep.subr.bf16.mxu0 %v13126_v53  ;;  %v13138_v27 = vpack.c.bf16 %v8794_v56, %v8793_v47  ;;  %v8798_v47 = vld [vmem:[%s18518_s1 + $0x2a8] sm:$0xff] }
 0x10c   : > { %10962 = vmatmul.mubr.f32.gmra.mrb[10].mxu0 %v15451_v31 }
 0x10d   : > { %10964 = vmatprep.mubr.f32.mxu0 %v15453_v32  ;;  %13129 = vmatpush3.bf16.msra.mxu0 %v13126_v53  ;;  %v15733_v53 = vld [vmem:[#allocation2 + $0x180] sm:$0xff] }
 0x10e   : > { %13131 = vmatprep.subr.bf16.mxu0 %v13130_v48 }
 0x110   : > { %10965 = vmatmul.mubr.f32.gmra.mrb[12].mxu0 %v15463_v54 }
 0x111   : > { %10967 = vmatprep.mubr.f32.mxu0 %v15465_v55  ;;  %13133 = vmatpush3.bf16.msra.mxu0 %v13130_v48  ;;  %v8795_v48 = vld [vmem:[%s18518_s1 + $0x290] sm:$0xff] }
 0x112   : > { %13135 = vmatprep.subr.bf16.mxu0 %v13134_v46  ;;  %v13142_v44 = vpack.c.bf16 %v8796_v57, %v8795_v48  ;;  %v8800_v48 = vld [vmem:[%s18518_s1 + $0x2b8] sm:$0xff] }
 0x113   : > { %v8804_v57 = vld [vmem:[%s18518_s1 + $0x2d8] sm:$0xff] }
 0x114   : > { %10968 = vmatmul.mubr.f32.gmra.mrb[14].mxu0 %v15469_v59 }
 0x115   : > { %10970 = vmatprep.mubr.f32.mxu0 %v15471_v60  ;;  %13137 = vmatpush3.bf16.msra.mxu0 %v13134_v46  ;;  %v8797_v46 = vld [vmem:[%s18518_s1 + $0x2a0] sm:$0xff] }
 0x116   : > { %13139 = vmatprep.subr.bf16.mxu0 %v13138_v27  ;;  %v13146_v56 = vpack.c.bf16 %v8798_v47, %v8797_v46  ;;  %v8808_v46 = vld [vmem:[%s18518_s1 + $0x2f8] sm:$0xff]  ;;  %v8810_v47 = vld [vmem:[%s18518_s1 + $0x308] sm:$0xff] }
 0x118   : > { %10971 = vmatmul.mubr.f32.gmra.mrb[16].mxu0 %v15475_v61 }
 0x119   : > { %10973 = vmatprep.mubr.f32.mxu0 %v15477_v0 }
 0x11c   : > { %10974 = vmatmul.mubr.f32.gmra.mrb[18].mxu0 %v15481_v1 }
 0x11d   : > { %10976 = vmatprep.mubr.f32.mxu0 %v15483_v4 }
 0x120   : > { %10977 = vmatmul.mubr.f32.gmra.mrb[20].mxu0 %v15487_v10 }
 0x121   : > { %10979 = vmatprep.mubr.f32.mxu0 %v15489_v11 }
 0x124   : > { %10980 = vmatmul.mubr.f32.gmra.mrb[22].mxu0 %v15493_v12 }
 0x125   : > { %10982 = vmatprep.mubr.f32.mxu0 %v15495_v17 }
 0x128   : > { %10983 = vmatmul.mubr.f32.gmra.mrb[24].mxu0 %v15499_v20 }
 0x129   : > { %10985 = vmatprep.mubr.f32.mxu0 %v15501_v21 }
 0x12c   : > { %10986 = vmatmul.mubr.f32.gmra.mrb[26].mxu0 %v15509_v30 }
 0x12d   : > { %10988 = vmatprep.mubr.f32.mxu0 %v15511_v35 }
 0x130   : > { %10989 = vmatmul.mubr.f32.gmra.mrb[28].mxu0 %v15515_v51 }
 0x131   : > { %10991 = vmatprep.mubr.f32.mxu0 %v15733_v53 }
 0x134   : > { %10992 = vmatmul.mubr.f32.gmra.mrb[30].mxu0 %v15737_v45 }
 0x135   : > { %11026 = vmatprep.mubr.f32.mxu0 %v15242_v62  ;;  %v8799_v62 = vld [vmem:[%s18518_s1 + $0x2b0] sm:$0xff] }
 0x138   : > { %11027 = vmatmul.mubr.f32.vlgmr.msra.gmra.mrb[0].mxu0 %v15251_v2  ;;  %v13150_v2 = vpack.c.bf16 %v8800_v48, %v8799_v62  ;;  %v8813_v48 = vld [vmem:[%s18518_s1 + $0x320] sm:$0xff] }
 0x139   : > { %13141 = vmatpush3.bf16.msra.mxu0 %v13138_v27  ;;  %11029 = vmatprep.mubr.f32.mxu0 %v15253_v3  ;;  %v8801_v3 = vld [vmem:[%s18518_s1 + $0x2c0] sm:$0xff]  ;;  %v8802_v27 = vld [vmem:[%s18518_s1 + $0x2c8] sm:$0xff] }
 0x13a   : > { %13143 = vmatprep.subr.bf16.mxu0 %v13142_v44 }
 0x13c   : > { %11030 = vmatmul.mubr.f32.gmra.mrb[2].mxu0 %v15263_v8  ;;  %v13154_v8 = vpack.c.bf16 %v8802_v27, %v8801_v3  ;;  %v18604_v3 = vld [vmem:[#allocation12_spill] sm:$0xff]  ;;  %v18605_v27 = vld [vmem:[#allocation13_spill] sm:$0xff] }
 0x13d   : > { %11032 = vmatprep.mubr.f32.mxu0 %v15265_v9  ;;  %13145 = vmatpush3.bf16.msra.mxu0 %v13142_v44  ;;  %v8803_v9 = vld [vmem:[%s18518_s1 + $0x2d0] sm:$0xff]  ;;  %v8806_v44 = vld [vmem:[%s18518_s1 + $0x2e8] sm:$0xff] }
 0x13e   : > { %13147 = vmatprep.subr.bf16.mxu0 %v13146_v56 }
 0x140   : > { %11033 = vmatmul.mubr.f32.gmra.mrb[4].mxu0 %v15275_v13  ;;  %v13158_v13 = vpack.c.bf16 %v8804_v57, %v8803_v9  ;;  %v8815_v9 = vld [vmem:[%s18518_s1 + $0x330] sm:$0xff]  ;;  %v8816_v57 = vld [vmem:[%s18518_s1 + $0x338] sm:$0xff] }
 0x141   : > { %11035 = vmatprep.mubr.f32.mxu0 %v15277_v14  ;;  %13149 = vmatpush3.bf16.msra.mxu0 %v13146_v56  ;;  %v8805_v14 = vld [vmem:[%s18518_s1 + $0x2e0] sm:$0xff]  ;;  %v18603_v56 = vld [vmem:[#allocation11_spill] sm:$0xff] }
 0x142   : > { %13151 = vmatprep.subr.bf16.mxu0 %v13150_v2 }
 0x144   : > { %11036 = vmatmul.mubr.f32.gmra.mrb[6].mxu0 %v15287_v18  ;;  %v13162_v18 = vpack.c.bf16 %v8806_v44, %v8805_v14  ;;  %v18607_v14 = vld [vmem:[#allocation15_spill] sm:$0xff]  ;;  %v13182_v44 = vpack.c.bf16 %v8816_v57, %v8815_v9  ;;  %v18617_v9 = vld [vmem:[#allocation25_spill] sm:$0xff]  ;;  %v18618_v57 = vld [vmem:[#allocation26_spill] sm:$0xff] }
 0x145   : > { %11038 = vmatprep.mubr.f32.mxu0 %v15289_v19  ;;  %13153 = vmatpush3.bf16.msra.mxu0 %v13150_v2  ;;  %v8807_v19 = vld [vmem:[%s18518_s1 + $0x2f0] sm:$0xff]  ;;  %v8814_v2 = vld [vmem:[%s18518_s1 + $0x328] sm:$0xff] }
 0x146   : > { %13155 = vmatprep.subr.bf16.mxu0 %v13154_v8 }
 0x148   : > { %11039 = vmatmul.mubr.f32.gmra.mrb[8].mxu0 %v15299_v23  ;;  %v13166_v23 = vpack.c.bf16 %v8808_v46, %v8807_v19  ;;  %v8818_v19 = vld [vmem:[%s18518_s1 + $0x348] sm:$0xff]  ;;  %v18608_v46 = vld [vmem:[#allocation16_spill] sm:$0xff] }
 0x149   : > { %11041 = vmatprep.mubr.f32.mxu0 %v15301_v24  ;;  %13157 = vmatpush3.bf16.msra.mxu0 %v13154_v8  ;;  %v8809_v24 = vld [vmem:[%s18518_s1 + $0x300] sm:$0xff]  ;;  %v13178_v8 = vpack.c.bf16 %v8814_v2, %v8813_v48 }
 0x14a   : > { %13159 = vmatprep.subr.bf16.mxu0 %v13158_v13  ;;  %v8825_v2 = vld [vmem:[%s18518_s1 + $0x380] sm:$0xff] }
 0x14c   : > { %11042 = vmatmul.mubr.f32.gmra.mrb[10].mxu0 %v15311_v28  ;;  %v13170_v28 = vpack.c.bf16 %v8810_v47, %v8809_v24  ;;  %v8819_v47 = vld [vmem:[%s18518_s1 + $0x350] sm:$0xff] }
 0x14d   : > { %11044 = vmatprep.mubr.f32.mxu0 %v15313_v29  ;;  %13161 = vmatpush3.bf16.msra.mxu0 %v13158_v13  ;;  %v18596_v29 = vld [vmem:[#allocation4_spill] sm:$0xff]  ;;  %v18606_v13 = vld [vmem:[#allocation14_spill] sm:$0xff] }
 0x14e   : > { %13163 = vmatprep.subr.bf16.mxu0 %v13162_v18 }
 0x150   : > { %11045 = vmatmul.mubr.f32.gmra.mrb[12].mxu0 %v15323_v33  ;;  %v18597_v33 = vld [vmem:[#allocation5_spill] sm:$0xff] }
 0x151   : > { %11047 = vmatprep.mubr.f32.mxu0 %v15325_v34  ;;  %13165 = vmatpush3.bf16.msra.mxu0 %v13162_v18  ;;  %v18598_v34 = vld [vmem:[#allocation6_spill] sm:$0xff] }
 0x152   : > { %13167 = vmatprep.subr.bf16.mxu0 %v13166_v23  ;;  %v8817_v18 = vld [vmem:[%s18518_s1 + $0x340] sm:$0xff] }
 0x153   : > { %v13186_v24 = vpack.c.bf16 %v8818_v19, %v8817_v18  ;;  %v18624_v18 = vld [vmem:[#allocation32_spill] sm:$0xff]  ;;  %v18625_v19 = vld [vmem:[#allocation33_spill] sm:$0xff] }
 0x154   : > { %11048 = vmatmul.mubr.f32.gmra.mrb[14].mxu0 %v15329_v36  ;;  %v18599_v36 = vld [vmem:[#allocation7_spill] sm:$0xff] }
 0x155   : > { %11050 = vmatprep.mubr.f32.mxu0 %v15331_v37  ;;  %13169 = vmatpush3.bf16.msra.mxu0 %v13166_v23  ;;  %v18600_v37 = vld [vmem:[#allocation8_spill] sm:$0xff]  ;;  %v18609_v23 = vld [vmem:[#allocation17_spill] sm:$0xff] }
 0x156   : > { %13171 = vmatprep.subr.bf16.mxu0 %v13170_v28 }
 0x158   : > { %11051 = vmatmul.mubr.f32.gmra.mrb[16].mxu0 %v15335_v38  ;;  %v18601_v38 = vld [vmem:[#allocation9_spill] sm:$0xff] }
 0x159   : > { %11053 = vmatprep.mubr.f32.mxu0 %v15337_v39  ;;  %v15817_v39 = vld [vmem:[#allocation2 + $0x181] sm:$0xff] }
 0x15c   : > { %11054 = vmatmul.mubr.f32.gmra.mrb[18].mxu0 %v15341_v40  ;;  %v18602_v40 = vld [vmem:[#allocation10_spill] sm:$0xff] }
 0x15d   : > { %11056 = vmatprep.mubr.f32.mxu0 %v15343_v41  ;;  %v15821_v41 = vld [vmem:[#allocation2 + $0x189] sm:$0xff] }
 0x160   : > { %11057 = vmatmul.mubr.f32.gmra.mrb[20].mxu0 %v15347_v42  ;;  %v8811_v42 = vld [vmem:[%s18518_s1 + $0x310] sm:$0xff] }
 0x161   : > { %11059 = vmatprep.mubr.f32.mxu0 %v15349_v43  ;;  %v8812_v43 = vld [vmem:[%s18518_s1 + $0x318] sm:$0xff] }
 0x162   : > { %v13174_v62 = vpack.c.bf16 %v8812_v43, %v8811_v42  ;;  %v8823_v43 = vld [vmem:[%s18518_s1 + $0x370] sm:$0xff] }
 0x164   : > { %11060 = vmatmul.mubr.f32.gmra.mrb[22].mxu0 %v18596_v29  ;;  %v18610_v29 = vld [vmem:[#allocation18_spill] sm:$0xff] }
 0x165   : > { %11062 = vmatprep.mubr.f32.mxu0 %v18597_v33  ;;  %v18611_v33 = vld [vmem:[#allocation19_spill] sm:$0xff] }
 0x168   : > { %11063 = vmatmul.mubr.f32.gmra.mrb[24].mxu0 %v18598_v34 }
 0x169   : > { %11065 = vmatprep.mubr.f32.mxu0 %v18599_v36  ;;  %v8821_v36 = vld [vmem:[%s18518_s1 + $0x360] sm:$0xff] }
 0x16c   : > { %11066 = vmatmul.mubr.f32.gmra.mrb[26].mxu0 %v18600_v37  ;;  %v8822_v37 = vld [vmem:[%s18518_s1 + $0x368] sm:$0xff] }
 0x16d   : > { %11068 = vmatprep.mubr.f32.mxu0 %v18601_v38  ;;  %v18612_v38 = vld [vmem:[#allocation20_spill] sm:$0xff]  ;;  %v13194_v42 = vpack.c.bf16 %v8822_v37, %v8821_v36  ;;  %v8830_v36 = vld [vmem:[%s18518_s1 + $0x3a8] sm:$0xff] }
 0x170   : > { %11069 = vmatmul.mubr.f32.gmra.mrb[28].mxu0 %v18602_v40  ;;  %v18613_v40 = vld [vmem:[#allocation21_spill] sm:$0xff] }
 0x171   : > { %11071 = vmatprep.mubr.f32.mxu0 %v15817_v39 }
 0x174   : > { %11072 = vmatmul.mubr.f32.gmra.mrb[30].mxu0 %v15821_v41 }
 0x175   : > { %11106 = vmatprep.mubr.f32.mxu0 %v18603_v56  ;;  %v8824_v56 = vld [vmem:[%s18518_s1 + $0x378] sm:$0xff] }
 0x176   : > { %v13198_v48 = vpack.c.bf16 %v8824_v56, %v8823_v43  ;;  %v8838_v43 = vld [vmem:[%s18518_s1 + $0x3e8] sm:$0xff]  ;;  %v8840_v56 = vld [vmem:[%s18518_s1 + $0x3f8] sm:$0xff] }
 0x178   : > { %11107 = vmatmul.mubr.f32.vlgmr.msra.gmra.mrb[0].mxu0 %v18604_v3  ;;  %v8826_v3 = vld [vmem:[%s18518_s1 + $0x388] sm:$0xff] }
 0x179   : > { %13173 = vmatpush3.bf16.msra.mxu0 %v13170_v28  ;;  %11109 = vmatprep.mubr.f32.mxu0 %v18605_v27  ;;  %v8820_v28 = vld [vmem:[%s18518_s1 + $0x358] sm:$0xff]  ;;  %v18615_v27 = vld [vmem:[#allocation23_spill] sm:$0xff] }
 0x17a   : > { %13175 = vmatprep.subr.bf16.mxu0 %v13174_v62  ;;  %v13190_v34 = vpack.c.bf16 %v8820_v28, %v8819_v47  ;;  %v15901_v47 = vld [vmem:[#allocation2 + $0x182] sm:$0xff]  ;;  %v15905_v28 = vld [vmem:[#allocation2 + $0x18a] sm:$0xff] }
 0x17c   : > { %11110 = vmatmul.mubr.f32.gmra.mrb[2].mxu0 %v18606_v13  ;;  %v18619_v13 = vld [vmem:[#allocation27_spill] sm:$0xff] }
 0x17d   : > { %11112 = vmatprep.mubr.f32.mxu0 %v18607_v14  ;;  %13177 = vmatpush3.bf16.msra.mxu0 %v13174_v62  ;;  %v18614_v62 = vld [vmem:[#allocation22_spill] sm:$0xff]  ;;  %v18620_v14 = vld [vmem:[#allocation28_spill] sm:$0xff] }
 0x17e   : > { %13179 = vmatprep.subr.bf16.mxu0 %v13178_v8 }
 0x180   : > { %11113 = vmatmul.mubr.f32.gmra.mrb[4].mxu0 %v18608_v46  ;;  %v18626_v46 = vld [vmem:[#allocation34_spill] sm:$0xff] }
 0x181   : > { %11115 = vmatprep.mubr.f32.mxu0 %v18609_v23  ;;  %13181 = vmatpush3.bf16.msra.mxu0 %v13178_v8  ;;  %v18616_v8 = vld [vmem:[#allocation24_spill] sm:$0xff]  ;;  %v18627_v23 = vld [vmem:[#allocation35_spill] sm:$0xff] }
 0x182   : > { %13183 = vmatprep.subr.bf16.mxu0 %v13182_v44 }
 0x184   : > { %11116 = vmatmul.mubr.f32.gmra.mrb[6].mxu0 %v18610_v29  ;;  %v8827_v29 = vld [vmem:[%s18518_s1 + $0x390] sm:$0xff] }
 0x185   : > { %11118 = vmatprep.mubr.f32.mxu0 %v18611_v33  ;;  %13185 = vmatpush3.bf16.msra.mxu0 %v13182_v44  ;;  %v18623_v44 = vld [vmem:[#allocation31_spill] sm:$0xff]  ;;  %v8828_v33 = vld [vmem:[%s18518_s1 + $0x398] sm:$0xff] }
 0x186   : > { %13187 = vmatprep.subr.bf16.mxu0 %v13186_v24 }
 0x188   : > { %11119 = vmatmul.mubr.f32.gmra.mrb[8].mxu0 %v18612_v38  ;;  %v8832_v38 = vld [vmem:[%s18518_s1 + $0x3b8] sm:$0xff] }
 0x189   : > { %11121 = vmatprep.mubr.f32.mxu0 %v18613_v40  ;;  %13189 = vmatpush3.bf16.msra.mxu0 %v13186_v24  ;;  %v18628_v24 = vld [vmem:[#allocation36_spill] sm:$0xff]  ;;  %v8834_v40 = vld [vmem:[%s18518_s1 + $0x3c8] sm:$0xff] }
 0x18a   : > { %13191 = vmatprep.subr.bf16.mxu0 %v13190_v34 }
 0x18c   : > { %11122 = vmatmul.mubr.f32.gmra.mrb[10].mxu0 %v15593_v52  ;;  %v13202_v52 = vpack.c.bf16 %v8826_v3, %v8825_v2  ;;  %v2612_v2 = vld [vmem:[#allocation2 + $0x81] sm:$0xff]  ;;  %v2613_v3 = vld [vmem:[#allocation2 + $0x91] sm:$0xff] }
 0x18d   : > { %11124 = vmatprep.mubr.f32.mxu0 %v18614_v62  ;;  %13193 = vmatpush3.bf16.msra.mxu0 %v13190_v34  ;;  %v13206_v34 = vpack.c.bf16 %v8828_v33, %v8827_v29  ;;  %v8842_v62 = vld [vmem:[%s18518_s1 + $0x408] sm:$0xff] }
 0x18e   : > { %13195 = vmatprep.subr.bf16.mxu0 %v13194_v42  ;;  %v2620_v33 = vld [vmem:[#allocation2 + $0xe1] sm:$0xff] }
 0x190   : > { %11125 = vmatmul.mubr.f32.gmra.mrb[12].mxu0 %v15605_v49  ;;  %v18621_v49 = vld [vmem:[#allocation29_spill] sm:$0xff] }
 0x191   : > { %11127 = vmatprep.mubr.f32.mxu0 %v15607_v50  ;;  %13197 = vmatpush3.bf16.msra.mxu0 %v13194_v42  ;;  %v18622_v50 = vld [vmem:[#allocation30_spill] sm:$0xff]  ;;  %v8836_v42 = vld [vmem:[%s18518_s1 + $0x3d8] sm:$0xff] }
 0x192   : > { %13199 = vmatprep.subr.bf16.mxu0 %v13198_v48 }
 0x194   : > { %11128 = vmatmul.mubr.f32.gmra.mrb[14].mxu0 %v18615_v27  ;;  %v8851_v27 = vld [vmem:[%s18518_s1 + $0x450] sm:$0xff] }
 0x195   : > { %11130 = vmatprep.mubr.f32.mxu0 %v18616_v8  ;;  %13201 = vmatpush3.bf16.msra.mxu0 %v13198_v48  ;;  %v8850_v48 = vld [vmem:[%s18518_s1 + $0x448] sm:$0xff]  ;;  %v8852_v8 = vld [vmem:[%s18518_s1 + $0x458] sm:$0xff] }
 0x196   : > { %13203 = vmatprep.subr.bf16.mxu0 %v13202_v52 }
 0x198   : > { %11131 = vmatmul.mubr.f32.gmra.mrb[16].mxu0 %v18617_v9  ;;  %v2614_v9 = vld [vmem:[#allocation2 + $0x99] sm:$0xff] }
 0x199   : > { %11133 = vmatprep.mubr.f32.mxu0 %v18618_v57  ;;  %v2615_v57 = vld [vmem:[#allocation2 + $0xa9] sm:$0xff] }
 0x19c   : > { %11134 = vmatmul.mubr.f32.gmra.mrb[18].mxu0 %v18619_v13  ;;  %v13254_v13 = vpack.c.bf16 %v8852_v8, %v8851_v27 }
 0x19d   : > { %11136 = vmatprep.mubr.f32.mxu0 %v18620_v14  ;;  %v8853_v14 = vld [vmem:[%s18518_s1 + $0x460] sm:$0xff] }
 0x1a0   : > { %11137 = vmatmul.mubr.f32.gmra.mrb[20].mxu0 %v18621_v49  ;;  %v8854_v49 = vld [vmem:[%s18518_s1 + $0x468] sm:$0xff] }
 0x1a1   : > { %11139 = vmatprep.mubr.f32.mxu0 %v18622_v50  ;;  %v2616_v50 = vld [vmem:[#allocation2 + $0xb1] sm:$0xff] }
 0x1a4   : > { %11140 = vmatmul.mubr.f32.gmra.mrb[22].mxu0 %v18623_v44  ;;  %v2617_v44 = vld [vmem:[#allocation2 + $0xc1] sm:$0xff] }
 0x1a5   : > { %11142 = vmatprep.mubr.f32.mxu0 %v18624_v18  ;;  %v13258_v18 = vpack.c.bf16 %v8854_v49, %v8853_v14  ;;  %v8864_v14 = vld [vmem:[%s18520_s3 + $0xb0] sm:$0xff]  ;;  %v8865_v49 = vld [vmem:[%s18520_s3 + $0xb8] sm:$0xff] }
 0x1a8   : > { %11143 = vmatmul.mubr.f32.gmra.mrb[24].mxu0 %v18625_v19  ;;  %v8855_v19 = vld [vmem:[%s18518_s1 + $0x470] sm:$0xff] }
 0x1a9   : > { %11145 = vmatprep.mubr.f32.mxu0 %v18626_v46  ;;  %v8856_v46 = vld [vmem:[%s18518_s1 + $0x478] sm:$0xff] }
 0x1aa   : > { %v13262_v29 = vpack.c.bf16 %v8856_v46, %v8855_v19  ;;  %v8868_v46 = vld [vmem:[%s18520_s3 + $0xd0] sm:$0xff] }
 0x1ac   : > { %11146 = vmatmul.mubr.f32.gmra.mrb[26].mxu0 %v18627_v23  ;;  %v2618_v23 = vld [vmem:[#allocation2 + $0xc9] sm:$0xff] }
 0x1ad   : > { %11148 = vmatprep.mubr.f32.mxu0 %v18628_v24  ;;  %v2619_v24 = vld [vmem:[#allocation2 + $0xd9] sm:$0xff] }
 0x1b0   : > { %11149 = vmatmul.mubr.f32.gmra.mrb[28].mxu0 %v15653_v26  ;;  %v8829_v26 = vld [vmem:[%s18518_s1 + $0x3a0] sm:$0xff] }
 0x1b1   : > { %11151 = vmatprep.mubr.f32.mxu0 %v15901_v47  ;;  %v13210_v37 = vpack.c.bf16 %v8830_v36, %v8829_v26  ;;  %v2622_v26 = vld [vmem:[#allocation2 + $0xf9] sm:$0xff]  ;;  %v2623_v36 = vld [vmem:[#allocation2 + $0x109] sm:$0xff] }
 0x1b4   : > { %11152 = vmatmul.mubr.f32.gmra.mrb[30].mxu0 %v15905_v28 }
 0x1b5   : > { %11186 = vmatprep.mubr.f32.mxu0 %v15393_v58  ;;  %v8831_v58 = vld [vmem:[%s18518_s1 + $0x3b0] sm:$0xff] }
 0x1b8   : > { %11187 = vmatmul.mubr.f32.vlgmr.msra.gmra.mrb[0].mxu0 %v15403_v5  ;;  %v13214_v5 = vpack.c.bf16 %v8832_v38, %v8831_v58  ;;  %v2625_v58 = vld [vmem:[#allocation2 + $0x121] sm:$0xff]  ;;  %v2626_v38 = vld [vmem:[#allocation2 + $0x129] sm:$0xff] }
 0x1b9   : > { %13205 = vmatpush3.bf16.msra.mxu0 %v13202_v52  ;;  %11189 = vmatprep.mubr.f32.mxu0 %v15405_v63  ;;  %v8833_v63 = vld [vmem:[%s18518_s1 + $0x3c0] sm:$0xff] }
 0x1ba   : > { %13207 = vmatprep.subr.bf16.mxu0 %v13206_v34 }
 0x1bc   : > { %11190 = vmatmul.mubr.f32.gmra.mrb[2].mxu0 %v15415_v6  ;;  %v13218_v6 = vpack.c.bf16 %v8834_v40, %v8833_v63  ;;  %v2628_v63 = vld [vmem:[#allocation2 + $0x141] sm:$0xff]  ;;  %v2629_v40 = vld [vmem:[#allocation2 + $0x151] sm:$0xff] }
 0x1bd   : > { %11192 = vmatprep.mubr.f32.mxu0 %v15417_v7  ;;  %13209 = vmatpush3.bf16.msra.mxu0 %v13206_v34  ;;  %v8835_v7 = vld [vmem:[%s18518_s1 + $0x3d0] sm:$0xff] }
 0x1be   : > { %13211 = vmatprep.subr.bf16.mxu0 %v13210_v37  ;;  %v2621_v34 = vld [vmem:[#allocation2 + $0xf1] sm:$0xff] }
 0x1c0   : > { %11193 = vmatmul.mubr.f32.gmra.mrb[4].mxu0 %v15427_v15  ;;  %v13222_v15 = vpack.c.bf16 %v8836_v42, %v8835_v7  ;;  %v2631_v7 = vld [vmem:[#allocation2 + $0x169] sm:$0xff]  ;;  %v2632_v42 = vld [vmem:[#allocation2 + $0x171] sm:$0xff] }
 0x1c1   : > { %11195 = vmatprep.mubr.f32.mxu0 %v15429_v16  ;;  %13213 = vmatpush3.bf16.msra.mxu0 %v13210_v37  ;;  %v8837_v16 = vld [vmem:[%s18518_s1 + $0x3e0] sm:$0xff]  ;;  %v2624_v37 = vld [vmem:[#allocation2 + $0x111] sm:$0xff] }
 0x1c2   : > { %13215 = vmatprep.subr.bf16.mxu0 %v13214_v5 }
 0x1c4   : > { %11196 = vmatmul.mubr.f32.gmra.mrb[6].mxu0 %v15439_v22  ;;  %v13226_v22 = vpack.c.bf16 %v8838_v43, %v8837_v16  ;;  %v2636_v16 = vld [vmem:[#allocation2 + $0x1a1] sm:$0xff]  ;;  %v2911_v43 = vld [vmem:[#allocation2 + $0x32] sm:$0xff] }
 0x1c5   : > { %11198 = vmatprep.mubr.f32.mxu0 %v15441_v25  ;;  %13217 = vmatpush3.bf16.msra.mxu0 %v13214_v5  ;;  %v8839_v25 = vld [vmem:[%s18518_s1 + $0x3f0] sm:$0xff]  ;;  %v2627_v5 = vld [vmem:[#allocation2 + $0x139] sm:$0xff] }
 0x1c6   : > { %13219 = vmatprep.subr.bf16.mxu0 %v13218_v6 }
 0x1c8   : > { %11199 = vmatmul.mubr.f32.gmra.mrb[8].mxu0 %v15451_v31  ;;  %v13230_v31 = vpack.c.bf16 %v8840_v56, %v8839_v25  ;;  %v2913_v25 = vld [vmem:[#allocation2 + $0x4a] sm:$0xff]  ;;  %v2914_v56 = vld [vmem:[#allocation2 + $0x52] sm:$0xff] }
 0x1c9   : > { %11201 = vmatprep.mubr.f32.mxu0 %v15453_v32  ;;  %13221 = vmatpush3.bf16.msra.mxu0 %v13218_v6  ;;  %v8841_v32 = vld [vmem:[%s18518_s1 + $0x400] sm:$0xff] }
 0x1ca   : > { %13223 = vmatprep.subr.bf16.mxu0 %v13222_v15  ;;  %v2630_v6 = vld [vmem:[#allocation2 + $0x159] sm:$0xff] }
 0x1cc   : > { %11202 = vmatmul.mubr.f32.gmra.mrb[10].mxu0 %v15463_v54  ;;  %v13234_v54 = vpack.c.bf16 %v8842_v62, %v8841_v32  ;;  %v2916_v32 = vld [vmem:[#allocation2 + $0x6a] sm:$0xff]  ;;  %v2917_v62 = vld [vmem:[#allocation2 + $0x7a] sm:$0xff] }
 0x1cd   : > { %11204 = vmatprep.mubr.f32.mxu0 %v15465_v55  ;;  %13225 = vmatpush3.bf16.msra.mxu0 %v13222_v15  ;;  %v14939_v55 = vld [vmem:[#allocation2] sm:$0xff] }
 0x1ce   : > { %13227 = vmatprep.subr.bf16.mxu0 %v13226_v22  ;;  %v2635_v15 = vld [vmem:[#allocation2 + $0x199] sm:$0xff] }
 0x1d0   : > { %11205 = vmatmul.mubr.f32.gmra.mrb[12].mxu0 %v15469_v59  ;;  %v2605_v59 = vld [vmem:[#allocation2 + $0x31] sm:$0xff] }
 0x1d1   : > { %11207 = vmatprep.mubr.f32.mxu0 %v15471_v60  ;;  %13229 = vmatpush3.bf16.msra.mxu0 %v13226_v22  ;;  %v8843_v60 = vld [vmem:[%s18518_s1 + $0x410] sm:$0xff]  ;;  %v2912_v22 = vld [vmem:[#allocation2 + $0x3a] sm:$0xff] }
 0x1d2   : > { %13231 = vmatprep.subr.bf16.mxu0 %v13230_v31 }
 0x1d4   : > { %11208 = vmatmul.mubr.f32.gmra.mrb[14].mxu0 %v15475_v61  ;;  %v8844_v61 = vld [vmem:[%s18518_s1 + $0x418] sm:$0xff] }
 0x1d5   : > { %11210 = vmatprep.mubr.f32.mxu0 %v15477_v0  ;;  %13233 = vmatpush3.bf16.msra.mxu0 %v13230_v31  ;;  %v2606_v0 = vld [vmem:[#allocation2 + $0x39] sm:$0xff]  ;;  %v2915_v31 = vld [vmem:[#allocation2 + $0x62] sm:$0xff] }
 0x1d6   : > { %13235 = vmatprep.subr.bf16.mxu0 %v13234_v54 }
 0x1d8   : > { %11211 = vmatmul.mubr.f32.gmra.mrb[16].mxu0 %v15481_v1  ;;  %v2607_v1 = vld [vmem:[#allocation2 + $0x49] sm:$0xff] }
 0x1d9   : > { %11213 = vmatprep.mubr.f32.mxu0 %v15483_v4  ;;  %v13238_v4 = vpack.c.bf16 %v8844_v61, %v8843_v60  ;;  %v2923_v60 = vld [vmem:[#allocation2 + $0xc2] sm:$0xff]  ;;  %v2924_v61 = vld [vmem:[#allocation2 + $0xca] sm:$0xff] }
 0x1dc   : > { %11214 = vmatmul.mubr.f32.gmra.mrb[18].mxu0 %v15487_v10  ;;  %v8845_v10 = vld [vmem:[%s18518_s1 + $0x420] sm:$0xff] }
 0x1dd   : > { %11216 = vmatprep.mubr.f32.mxu0 %v15489_v11  ;;  %v8846_v11 = vld [vmem:[%s18518_s1 + $0x428] sm:$0xff] }
 0x1e0   : > { %11217 = vmatmul.mubr.f32.gmra.mrb[20].mxu0 %v15493_v12  ;;  %v2608_v12 = vld [vmem:[#allocation2 + $0x51] sm:$0xff] }
 0x1e1   : > { %11219 = vmatprep.mubr.f32.mxu0 %v15495_v17  ;;  %v2609_v17 = vld [vmem:[#allocation2 + $0x61] sm:$0xff] }
 0x1e4   : > { %11220 = vmatmul.mubr.f32.gmra.mrb[22].mxu0 %v15499_v20  ;;  %v13242_v20 = vpack.c.bf16 %v8846_v11, %v8845_v10  ;;  %v2928_v10 = vld [vmem:[#allocation2 + $0xfa] sm:$0xff]  ;;  %v2929_v11 = vld [vmem:[#allocation2 + $0x10a] sm:$0xff] }
 0x1e5   : > { %11222 = vmatprep.mubr.f32.mxu0 %v15501_v21  ;;  %v8847_v21 = vld [vmem:[%s18518_s1 + $0x430] sm:$0xff] }
 0x1e8   : > { %11223 = vmatmul.mubr.f32.gmra.mrb[24].mxu0 %v15509_v30  ;;  %v8848_v30 = vld [vmem:[%s18518_s1 + $0x438] sm:$0xff] }
 0x1e9   : > { %11225 = vmatprep.mubr.f32.mxu0 %v15511_v35  ;;  %v2610_v35 = vld [vmem:[#allocation2 + $0x69] sm:$0xff] }
 0x1ec   : > { %11226 = vmatmul.mubr.f32.gmra.mrb[26].mxu0 %v15515_v51  ;;  %v2611_v51 = vld [vmem:[#allocation2 + $0x79] sm:$0xff] }
 0x1ed   : > { %11228 = vmatprep.mubr.f32.mxu0 %v15733_v53  ;;  %v13246_v53 = vpack.c.bf16 %v8848_v30, %v8847_v21  ;;  %v2933_v21 = vld [vmem:[#allocation2 + $0x13a] sm:$0xff]  ;;  %v2934_v30 = vld [vmem:[#allocation2 + $0x142] sm:$0xff] }
 0x1f0   : > { %11229 = vmatmul.mubr.f32.gmra.mrb[28].mxu0 %v15737_v45  ;;  %v8849_v45 = vld [vmem:[%s18518_s1 + $0x440] sm:$0xff] }
 0x1f1   : > { %11231 = vmatprep.mubr.f32.mxu0 %v14939_v55  ;;  %v13250_v52 = vpack.c.bf16 %v8850_v48, %v8849_v45  ;;  %v2938_v45 = vld [vmem:[#allocation2 + $0x172] sm:$0xff]  ;;  %v2941_v48 = vld [vmem:[#allocation2 + $0x19a] sm:$0xff] }
 0x1f4   : > { %11232 = vmatmul.mubr.f32.gmra.mrb[30].mxu0 %v14939_v55  ;;  %v2921_v55 = vld [vmem:[#allocation2 + $0xaa] sm:$0xff] }
 0x1f5   : > { %11266 = vmatprep.mubr.f32.mxu0 %v2605_v59  ;;  %v2922_v59 = vld [vmem:[#allocation2 + $0xb2] sm:$0xff] }
 0x1f8   : > { %11267 = vmatmul.mubr.f32.vlgmr.msra.gmra.mrb[0].mxu0 %v2606_v0  ;;  %v2925_v0 = vld [vmem:[#allocation2 + $0xda] sm:$0xff] }
 0x1f9   : > { %13237 = vmatpush3.bf16.msra.mxu0 %v13234_v54  ;;  %11269 = vmatprep.mubr.f32.mxu0 %v2607_v1  ;;  %v2919_v54 = vld [vmem:[#allocation2 + $0x92] sm:$0xff]  ;;  %v2926_v1 = vld [vmem:[#allocation2 + $0xe2] sm:$0xff] }
 0x1fa   : > { %13239 = vmatprep.subr.bf16.mxu0 %v13238_v4 }
 0x1fc   : > { %11270 = vmatmul.mubr.f32.gmra.mrb[2].mxu0 %v2608_v12  ;;  %v2930_v12 = vld [vmem:[#allocation2 + $0x112] sm:$0xff] }
 0x1fd   : > { %11272 = vmatprep.mubr.f32.mxu0 %v2609_v17  ;;  %13241 = vmatpush3.bf16.msra.mxu0 %v13238_v4  ;;  %v2927_v4 = vld [vmem:[#allocation2 + $0xf2] sm:$0xff]  ;;  %v2931_v17 = vld [vmem:[#allocation2 + $0x122] sm:$0xff] }
 0x1fe   : > { %13243 = vmatprep.subr.bf16.mxu0 %v13242_v20 }
 0x200   : > { %11273 = vmatmul.mubr.f32.gmra.mrb[4].mxu0 %v2610_v35  ;;  %v2935_v35 = vld [vmem:[#allocation2 + $0x152] sm:$0xff] }
 0x201   : > { %11275 = vmatprep.mubr.f32.mxu0 %v2611_v51  ;;  %13245 = vmatpush3.bf16.msra.mxu0 %v13242_v20  ;;  %v2932_v20 = vld [vmem:[#allocation2 + $0x12a] sm:$0xff]  ;;  %v2936_v51 = vld [vmem:[#allocation2 + $0x15a] sm:$0xff] }
 0x202   : > { %13247 = vmatprep.subr.bf16.mxu0 %v13246_v53 }
 0x204   : > { %11276 = vmatmul.mubr.f32.gmra.mrb[6].mxu0 %v2612_v2  ;;  %v2942_v2 = vld [vmem:[#allocation2 + $0x1a2] sm:$0xff] }
 0x205   : > { %11278 = vmatprep.mubr.f32.mxu0 %v2613_v3  ;;  %13249 = vmatpush3.bf16.msra.mxu0 %v13246_v53  ;;  %v2937_v53 = vld [vmem:[#allocation2 + $0x16a] sm:$0xff]  ;;  %v8858_v3 = vld [vmem:[%s18520_s3 + $0x80] sm:$0xff] }
 0x206   : > { %13251 = vmatprep.subr.bf16.mxu0 %v13250_v52 }
 0x208   : > { %11279 = vmatmul.mubr.f32.gmra.mrb[8].mxu0 %v2614_v9  ;;  %v8862_v9 = vld [vmem:[%s18520_s3 + $0xa0] sm:$0xff] }
 0x209   : > { %11281 = vmatprep.mubr.f32.mxu0 %v2615_v57  ;;  %13253 = vmatpush3.bf16.msra.mxu0 %v13250_v52  ;;  %v8859_v52 = vld [vmem:[%s18520_s3 + $0x88] sm:$0xff] }
 0x20a   : > { %13255 = vmatprep.subr.bf16.mxu0 %v13254_v13  ;;  %v13266_v27 = vpack.c.bf16 %v8859_v52, %v8858_v3  ;;  %v8863_v57 = vld [vmem:[%s18520_s3 + $0xa8] sm:$0xff] }
 0x20c   : > { %11282 = vmatmul.mubr.f32.gmra.mrb[10].mxu0 %v2616_v50  ;;  %13267 = vmatprep.subr.bf16.mxu1 %v13266_v27  ;;  %v13278_v50 = vpack.c.bf16 %v8865_v49, %v8864_v14 }
 0x20d   : > { %11284 = vmatprep.mubr.f32.mxu0 %v2617_v44  ;;  %13257 = vmatpush3.bf16.msra.mxu0 %v13254_v13  ;;  %v13274_v13 = vpack.c.bf16 %v8863_v57, %v8862_v9  ;;  %v8866_v44 = vld [vmem:[%s18520_s3 + $0xc0] sm:$0xff] }
 0x20e   : > { %13259 = vmatprep.subr.bf16.mxu0 %v13258_v18  ;;  %13269 = vmatpush3.bf16.msra.mxu1 %v13266_v27 }
 0x210   : > { %11285 = vmatmul.mubr.f32.gmra.mrb[12].mxu0 %v2618_v23  ;;  %v8869_v23 = vld [vmem:[%s18520_s3 + $0xd8] sm:$0xff] }
 0x211   : > { %11287 = vmatprep.mubr.f32.mxu0 %v2619_v24  ;;  %13261 = vmatpush3.bf16.msra.mxu0 %v13258_v18  ;;  %v8867_v18 = vld [vmem:[%s18520_s3 + $0xc8] sm:$0xff]  ;;  %v13286_v24 = vpack.c.bf16 %v8869_v23, %v8868_v46 }
 0x212   : > { %13263 = vmatprep.subr.bf16.mxu0 %v13262_v29  ;;  %v13282_v19 = vpack.c.bf16 %v8867_v18, %v8866_v44 }
 0x214   : > { %11288 = vmatmul.mubr.f32.gmra.mrb[14].mxu0 %v2620_v33  ;;  %v8871_v33 = vld [vmem:[%s18520_s3 + $0xe8] sm:$0xff] }
 0x215   : > { %11290 = vmatprep.mubr.f32.mxu0 %v2621_v34  ;;  %13265 = vmatpush3.bf16.msra.mxu0 %v13262_v29  ;;  %v8870_v29 = vld [vmem:[%s18520_s3 + $0xe0] sm:$0xff] }
 0x216   : > { %v13290_v34 = vpack.c.bf16 %v8871_v33, %v8870_v29 }
 0x218   : > { %11291 = vmatmul.mubr.f32.gmra.mrb[16].mxu0 %v2622_v26  ;;  %v8872_v26 = vld [vmem:[%s18520_s3 + $0xf0] sm:$0xff] }
 0x219   : > { %11293 = vmatprep.mubr.f32.mxu0 %v2623_v36  ;;  %v8873_v36 = vld [vmem:[%s18520_s3 + $0xf8] sm:$0xff] }
 0x21c   : > { %11294 = vmatmul.mubr.f32.gmra.mrb[18].mxu0 %v2624_v37  ;;  %v13294_v37 = vpack.c.bf16 %v8873_v36, %v8872_v26 }
 0x21d   : > { %11296 = vmatprep.mubr.f32.mxu0 %v2625_v58  ;;  %v3656_v58 = vld [vmem:[#allocation3 + $0x1] sm:$0xff] }
 0x21e   : > { %11426 = vmatprep.mubr.f32.mxu1 %v3656_v58 }
 0x220   : > { %11297 = vmatmul.mubr.f32.gmra.mrb[20].mxu0 %v2626_v38  ;;  %v3640_v38 = vld [vmem:[%s18520_s3] sm:$0xff] }
 0x221   : > { %11299 = vmatprep.mubr.f32.mxu0 %v2627_v5  ;;  %v3641_v5 = vld [vmem:[%s18520_s3 + $0x8] sm:$0xff] }
 0x224   : > { %11300 = vmatmul.mubr.f32.gmra.mrb[22].mxu0 %v2628_v63  ;;  %v16086_v63 = vpack.c.bf16 %v3641_v5, %v3640_v38 }
 0x225   : > { %11302 = vmatprep.mubr.f32.mxu0 %v2629_v40 }
 0x228   : > { %11303 = vmatmul.mubr.f32.gmra.mrb[24].mxu0 %v2630_v6 }
 0x229   : > { %11305 = vmatprep.mubr.f32.mxu0 %v2631_v7  ;;  %v16092_v7 = vld [vmem:[%s18519_s2] ss:$0 sm:$0xff] }
 0x22c   : > { %11306 = vmatmul.mubr.f32.gmra.mrb[26].mxu0 %v2632_v42 }
 0x22d   : > { %11308 = vmatprep.mubr.f32.mxu0 %v15817_v39  ;;  %v2918_v39 = vld [vmem:[#allocation2 + $0x82] sm:$0xff] }
 0x230   : > { %11309 = vmatmul.mubr.f32.gmra.mrb[28].mxu0 %v15821_v41  ;;  %v2920_v41 = vld [vmem:[#allocation2 + $0x9a] sm:$0xff] }
 0x231   : > { %11311 = vmatprep.mubr.f32.mxu0 %v2635_v15 }
 0x234   : > { %11312 = vmatmul.mubr.f32.gmra.mrb[30].mxu0 %v2636_v16 }
 0x235   : > { %11346 = vmatprep.mubr.f32.mxu0 %v2911_v43 }
 0x238   : > { %11347 = vmatmul.mubr.f32.vlgmr.msra.gmra.mrb[0].mxu0 %v2912_v22 }
 0x239   : > { %11349 = vmatprep.mubr.f32.mxu0 %v2913_v25 }
 0x23c   : > { %11350 = vmatmul.mubr.f32.gmra.mrb[2].mxu0 %v2914_v56 }
 0x23d   : > { %11352 = vmatprep.mubr.f32.mxu0 %v2915_v31 }
 0x240   : > { %11353 = vmatmul.mubr.f32.gmra.mrb[4].mxu0 %v2916_v32 }
 0x241   : > { %11355 = vmatprep.mubr.f32.mxu0 %v2917_v62 }
 0x244   : > { %11356 = vmatmul.mubr.f32.gmra.mrb[6].mxu0 %v2918_v39 }
 0x245   : > { %11358 = vmatprep.mubr.f32.mxu0 %v2919_v54 }
 0x248   : > { %11359 = vmatmul.mubr.f32.gmra.mrb[8].mxu0 %v2920_v41 }
 0x249   : > { %11361 = vmatprep.mubr.f32.mxu0 %v2921_v55 }
 0x24c   : > { %11362 = vmatmul.mubr.f32.gmra.mrb[10].mxu0 %v2922_v59 }
 0x24d   : > { %11364 = vmatprep.mubr.f32.mxu0 %v2923_v60 }
 0x250   : > { %11365 = vmatmul.mubr.f32.gmra.mrb[12].mxu0 %v2924_v61 }
 0x251   : > { %11367 = vmatprep.mubr.f32.mxu0 %v2925_v0 }
 0x254   : > { %11368 = vmatmul.mubr.f32.gmra.mrb[14].mxu0 %v2926_v1 }
 0x255   : > { %11370 = vmatprep.mubr.f32.mxu0 %v2927_v4 }
 0x258   : > { %11371 = vmatmul.mubr.f32.gmra.mrb[16].mxu0 %v2928_v10 }
 0x259   : > { %11373 = vmatprep.mubr.f32.mxu0 %v2929_v11  ;;  %v3642_v11 = vld [vmem:[%s18520_s3 + $0x10] sm:$0xff] }
 0x25c   : > { %11374 = vmatmul.mubr.f32.gmra.mrb[18].mxu0 %v2930_v12 }
 0x25d   : > { %11376 = vmatprep.mubr.f32.mxu0 %v2931_v17 }
 0x260   : > { %11377 = vmatmul.mubr.f32.gmra.mrb[20].mxu0 %v2932_v20 }
 0x261   : > { %11379 = vmatprep.mubr.f32.mxu0 %v2933_v21  ;;  %v3643_v21 = vld [vmem:[%s18520_s3 + $0x18] sm:$0xff] }
 0x264   : > { %11380 = vmatmul.mubr.f32.gmra.mrb[22].mxu0 %v2934_v30  ;;  %v3644_v30 = vld [vmem:[%s18520_s3 + $0x20] sm:$0xff] }
 0x265   : > { %11382 = vmatprep.mubr.f32.mxu0 %v2935_v35  ;;  %v3645_v35 = vld [vmem:[%s18520_s3 + $0x28] sm:$0xff] }
 0x268   : > { %11383 = vmatmul.mubr.f32.gmra.mrb[24].mxu0 %v2936_v51 }
 0x269   : > { %11385 = vmatprep.mubr.f32.mxu0 %v2937_v53 }
 0x26c   : > { %11386 = vmatmul.mubr.f32.gmra.mrb[26].mxu0 %v2938_v45 }
 0x26d   : > { %11388 = vmatprep.mubr.f32.mxu0 %v15901_v47  ;;  %v8860_v47 = vld [vmem:[%s18520_s3 + $0x90] sm:$0xff] }
 0x270   : > { %11389 = vmatmul.mubr.f32.gmra.mrb[28].mxu0 %v15905_v28  ;;  %v8861_v28 = vld [vmem:[%s18520_s3 + $0x98] sm:$0xff] }
 0x271   : > { %11391 = vmatprep.mubr.f32.mxu0 %v2941_v48  ;;  %v13270_v8 = vpack.c.bf16 %v8861_v28, %v8860_v47  ;;  %v16120_v47 = vpack.c.bf16 %v3643_v21, %v3642_v11  ;;  %v16122_v28 = vpack.c.bf16 %v3645_v35, %v3644_v30 }
 0x273   : > { %13271 = vmatprep.subr.bf16.mxu1 %v13270_v8 }
 0x274   : > { %11392 = vmatmul.mubr.f32.gmra.mrb[30].mxu0 %v2942_v2  ;;  %13273 = vmatpush3.bf16.msra.mxu1 %v13270_v8 }
 0x275   : > { %13275 = vmatprep.subr.bf16.mxu1 %v13274_v13 }
 0x278   : > { %13277 = vmatpush3.bf16.msra.mxu1 %v13274_v13 }
 0x279   : > { %13279 = vmatprep.subr.bf16.mxu1 %v13278_v50 }
 0x27c   : > { %13281 = vmatpush3.bf16.msra.mxu1 %v13278_v50 }
 0x27d   : > { %13283 = vmatprep.subr.bf16.mxu1 %v13282_v19 }
 0x280   : > { %13285 = vmatpush3.bf16.msra.mxu1 %v13282_v19 }
 0x281   : > { %13287 = vmatprep.subr.bf16.mxu1 %v13286_v24 }
 0x284   : > { %13289 = vmatpush3.bf16.msra.mxu1 %v13286_v24 }
 0x285   : > { %13291 = vmatprep.subr.bf16.mxu1 %v13290_v34 }
 0x288   : > { %13293 = vmatpush3.bf16.msra.mxu1 %v13290_v34 }
 0x289   : > { %13295 = vmatprep.subr.bf16.mxu1 %v13294_v37 }
 0x28c   : > { %13297 = vmatpush3.bf16.msra.mxu1 %v13294_v37 }
 0x28d   : > { %13299 = vmatprep.subr.bf16.mxu1 %v16086_v63 }
 0x30b   : > { %v11348_v40 = vpop.f32.mrb[0].mxu0 }
 0x30c   : > { %v3026_v6 = vpop.f32.mrb[1].mxu0  ;;  %v3225_v15 = vadd.f32 %v11348_v40, %v16092_v7  ;;  %v3646_v40 = vld [vmem:[%s18520_s3 + $0x30] sm:$0xff] }
 0x30d   : > { %v3224_v22 = vadd.f32 %v16092_v7, %v3026_v6  ;;  %v3647_v6 = vld [vmem:[%s18520_s3 + $0x38] sm:$0xff] }
 0x30f   : > { %v11351_v42 = vpop.f32.mrb[2].mxu0 }
 0x310   : > { %v3227_v16 = vadd.f32 %v11351_v42, %v16092_v7  ;;  %v3036_v43 = vpop.f32.mrb[3].mxu0  ;;  %v3648_v42 = vld [vmem:[%s18520_s3 + $0x40] sm:$0xff] }
 0x311   : > { %v3226_v25 = vadd.f32 %v16092_v7, %v3036_v43 }
 0x312   : > { %v3257_v56 = vmax.f32 %v3225_v15, %v3227_v16 }
 0x313   : > { %v3256_v31 = vmax.f32 %v3224_v22, %v3226_v25  ;;  %v11354_v32 = vpop.f32.mrb[4].mxu0 }
 0x314   : > { %v3273_v62 = vmax.f32 %v3257_v56, %v3225_v15  ;;  %v3046_v39 = vpop.f32.mrb[5].mxu0  ;;  %v3229_v1 = vadd.f32 %v11354_v32, %v16092_v7  ;;  %v3650_v56 = vld [vmem:[%s18520_s3 + $0x50] sm:$0xff] }
 0x315   : > { %v3272_v54 = vmax.f32 %v3256_v31, %v3224_v22  ;;  %v3228_v17 = vadd.f32 %v16092_v7, %v3046_v39  ;;  %v3651_v31 = vld [vmem:[%s18520_s3 + $0x58] sm:$0xff] }
 0x316   : > { %v3360_v41 = vrot.slane %v3273_v62, 1  ;;  %v3392_v0 = vrot.slane %v3273_v62, 7 }
 0x317   : > { %v3296_v55 = vrot.slane %v3272_v54, 1  ;;  %v3328_v59 = vrot.slane %v3272_v54, 7  ;;  %v11357_v60 = vpop.f32.mrb[6].mxu0 }
 0x318   : > { %v3376_v61 = vmax.f32 %v3273_v62, %v3360_v41  ;;  %v16100_v4 = vadd.f32 %v11357_v60, %v16092_v7  ;;  %v3056_v10 = vpop.f32.mrb[7].mxu0 }
 0x319   : > { %v3312_v12 = vmax.f32 %v3272_v54, %v3296_v55  ;;  %v16107_v20 = vadd.f32 %v16092_v7, %v3056_v10 }
 0x31a   : > { %v3408_v51 = vmax.f32 %v3376_v61, %v3392_v0  ;;  %v3384_v53 = vmax.f32 %v3376_v61, %v3328_v59  ;;  %v3259_v45 = vmax.f32 %v3229_v1, %v16100_v4  ;;  %v16159_v0 = vpack.c.bf16 %v3647_v6, %v3646_v40 }
 0x31b   : > { %v3344_v48 = vmax.f32 %v3312_v12, %v3328_v59  ;;  %v3258_v2 = vmax.f32 %v3228_v17, %v16107_v20  ;;  %v11360_v3 = vpop.f32.mrb[8].mxu0  ;;  %v3320_v52 = vmax.f32 %v3312_v12, %v3272_v54  ;;  %v16166_v12 = vpack.c.bf16 %v3651_v31, %v3650_v56 }
 0x31c   : > { %v3066_v27 = vpop.f32.mrb[9].mxu0  ;;  %v3504_v8 = vrot.slane %v3408_v51, 5  ;;  %v3275_v13 = vmax.f32 %v3259_v45, %v3227_v16  ;;  %v3520_v14 = vrot.slane %v3408_v51, 6  ;;  %v3480_v50 = vrot.slane %v3384_v53, 4 }
 0x31d   : > { %v3424_v9 = vrot.slane %v3344_v48, 1  ;;  %v3440_v57 = vrot.slane %v3344_v48, 2  ;;  %v3456_v49 = vrot.slane %v3344_v48, 3  ;;  %v3274_v44 = vmax.f32 %v3258_v2, %v3226_v25  ;;  %v3649_v25 = vld [vmem:[%s18520_s3 + $0x48] sm:$0xff] }
 0x31e   : > { %v3361_v19 = vrot.slane %v3275_v13, 1  ;;  %v3233_v46 = vadd.f32 %v11360_v3, %v16092_v7  ;;  %v3232_v23 = vadd.f32 %v16092_v7, %v3066_v27  ;;  %v3393_v38 = vrot.slane %v3275_v13, 7 }
 0x31f   : > { %v3553_v18 = vsel %vm3552_vm1, %v3320_v52, %v3424_v9  ;;  %v11363_v24 = vpop.f32.mrb[10].mxu0  ;;  %v3297_v33 = vrot.slane %v3274_v44, 1  ;;  %v3329_v34 = vrot.slane %v3274_v44, 7  ;;  %v3536_v15 = vrot.slane %v3408_v51, 7 }
 0x320   : > { %v3562_v29 = vsel %vm3561_vm2, %v3553_v18, %v3440_v57  ;;  %v16129_v26 = vadd.f32 %v11363_v24, %v16092_v7  ;;  %v3076_v36 = vpop.f32.mrb[11].mxu0  ;;  %v3377_v58 = vmax.f32 %v3275_v13, %v3361_v19  ;;  %v16164_v11 = vpack.c.bf16 %v3649_v25, %v3648_v42  ;;  %v8875_v24 = vld [vmem:[%s18520_s3 + $0x108] sm:$0xff] }
 0x321   : > { %v3571_v37 = vsel %vm3570_vm3, %v3562_v29, %v3456_v49  ;;  %v16133_v5 = vadd.f32 %v16092_v7, %v3076_v36  ;;  %v3313_v43 = vmax.f32 %v3274_v44, %v3297_v33  ;;  %v3653_v49 = vld [vmem:[%s18520_s3 + $0x68] sm:$0xff] }
 0x322   : > { %v3580_v16 = vsel %vm3579_vm4, %v3571_v37, %v3480_v50  ;;  %v3261_v22 = vmax.f32 %v3233_v46, %v16129_v26  ;;  %v3409_v62 = vmax.f32 %v3377_v58, %v3393_v38  ;;  %v3385_v39 = vmax.f32 %v3377_v58, %v3329_v34  ;;  %v3654_v50 = vld [vmem:[%s18520_s3 + $0x70] sm:$0xff]  ;;  %v3655_v46 = vld [vmem:[%s18520_s3 + $0x78] sm:$0xff] }
 0x323   : > { %v3589_v32 = vsel %vm3588_vm5, %v3580_v16, %v3504_v8  ;;  %v3260_v54 = vmax.f32 %v3232_v23, %v16133_v5  ;;  %v11366_v41 = vpop.f32.mrb[12].mxu0  ;;  %v3345_v59 = vmax.f32 %v3313_v43, %v3329_v34  ;;  %v3321_v10 = vmax.f32 %v3313_v43, %v3274_v44  ;;  %v8874_v23 = vld [vmem:[%s18520_s3 + $0x100] sm:$0xff] }
 0x324   : > { %v3598_v55 = vsel %vm3597_vm6, %v3589_v32, %v3520_v14  ;;  %v3277_v60 = vmax.f32 %v3261_v22, %v16100_v4  ;;  %v3086_v61 = vpop.f32.mrb[13].mxu0  ;;  %v3505_v21 = vrot.slane %v3409_v62, 5  ;;  %v3521_v51 = vrot.slane %v3409_v62, 6  ;;  %v3652_v14 = vld [vmem:[%s18520_s3 + $0x60] sm:$0xff] }
 0x325   : > { %v16162_v1 = vsel %vm3606_vm7, %v3598_v55, %v3536_v15  ;;  %v3425_v30 = vrot.slane %v3345_v59, 1  ;;  %v3441_v35 = vrot.slane %v3345_v59, 2  ;;  %v3457_v53 = vrot.slane %v3345_v59, 3 }
 0x326   : > { %v16169_v17 = vmax.f32 %v16162_v1, 0.0  ;;  %v3362_v4 = vrot.slane %v3277_v60, 1  ;;  %v16172_v45 = vmax.f32 %v3260_v54, %v16107_v20  ;;  %v3481_v2 = vrot.slane %v3385_v39, 4 }
 0x327   : > { %v11369_v48 = vpop.f32.mrb[14].mxu0  ;;  %v3554_v3 = vsel %vm3552_vm1, %v3321_v10, %v3425_v30  ;;  %v3237_v52 = vadd.f32 %v11366_v41, %v16092_v7  ;;  %v3236_v18 = vadd.f32 %v16092_v7, %v3086_v61  ;;  %v3537_v29 = vrot.slane %v3409_v62, 7 }
 0x328   : > { %3624 = vst [vmem:[#allocation3 + $0x11] sm:$0xff] %v16169_v17  ;;  %v16178_v27 = vadd.f32 %v11369_v48, %v16092_v7  ;;  %v3096_v8 = vpop.f32.mrb[15].mxu0  ;;  %11427 = vmatmul.mubr.f32.vlgmr.msra.gmra.mrb[0].mxu1 %v16169_v17  ;;  %v3563_v9 = vsel %vm3561_vm2, %v3554_v3, %v3441_v35  ;;  %v3378_v57 = vmax.f32 %v3277_v60, %v3362_v4  ;;  %v3298_v20 = vrot.slane %v16172_v45, 1 }
 0x329   : > { %v3330_v13 = vrot.slane %v16172_v45, 7  ;;  %13301 = vmatpush3.bf16.msra.mxu1 %v16086_v63  ;;  %v3572_v44 = vsel %vm3570_vm3, %v3563_v9, %v3457_v53  ;;  %v16198_v63 = vadd.f32 %v16092_v7, %v3096_v8  ;;  %v3394_v38 = vrot.slane %v3277_v60, 7 }
 0x32a   : > { %v3263_v19 = vmax.f32 %v3237_v52, %v16178_v27  ;;  %13303 = vmatprep.subr.bf16.mxu1 %v16120_v47  ;;  %v3581_v33 = vsel %vm3579_vm4, %v3572_v44, %v3481_v2  ;;  %v3314_v34 = vmax.f32 %v16172_v45, %v3298_v20  ;;  %v16217_v16 = vpack.c.bf16 %v3653_v49, %v3652_v14 }
 0x32b   : > { %v3386_v36 = vmax.f32 %v3378_v57, %v3330_v13  ;;  %v11372_v37 = vpop.f32.mrb[16].mxu0  ;;  %v3590_v58 = vsel %vm3588_vm5, %v3581_v33, %v3505_v21  ;;  %v3262_v6 = vmax.f32 %v3236_v18, %v16198_v63  ;;  %v16219_v43 = vpack.c.bf16 %v3655_v46, %v3654_v50 }
 0x32c   : > { %v3279_v40 = vmax.f32 %v3263_v19, %v16129_v26  ;;  %v3106_v42 = vpop.f32.mrb[17].mxu0  ;;  %v3599_v15 = vsel %vm3597_vm6, %v3590_v58, %v3521_v51  ;;  %v16221_v22 = vpack.c.bf16 %v8875_v24, %v8874_v23  ;;  %v3410_v56 = vmax.f32 %v3378_v57, %v3394_v38 }
 0x32d   : > { %13305 = vmatpush3.bf16.msra.mxu1 %v16120_v47  ;;  %v16224_v25 = vsel %vm3606_vm7, %v3599_v15, %v3537_v29  ;;  %v3346_v31 = vmax.f32 %v3314_v34, %v3330_v13  ;;  %v3241_v26 = vadd.f32 %v11372_v37, %v16092_v7  ;;  %v3322_v47 = vmax.f32 %v3314_v34, %v16172_v45 }
 0x32e   : > { %13307 = vmatprep.subr.bf16.mxu1 %v16122_v28  ;;  %v16229_v32 = vmax.f32 %v16224_v25, 0.0  ;;  %v3363_v62 = vrot.slane %v3279_v40, 1  ;;  %v3278_v39 = vmax.f32 %v3262_v6, %v16133_v5  ;;  %v3482_v59 = vrot.slane %v3386_v36, 4 }
 0x32f   : > { %v11375_v54 = vpop.f32.mrb[18].mxu0  ;;  %v3426_v41 = vrot.slane %v3346_v31, 1  ;;  %v3442_v55 = vrot.slane %v3346_v31, 2  ;;  %v3395_v60 = vrot.slane %v3279_v40, 7  ;;  %v3458_v51 = vrot.slane %v3346_v31, 3 }
 0x330   : > { %v3116_v61 = vpop.f32.mrb[19].mxu0  ;;  %3625 = vst [vmem:[#allocation3 + $0x21] sm:$0xff] %v16229_v32  ;;  %v3379_v10 = vmax.f32 %v3279_v40, %v3363_v62  ;;  %v3299_v21 = vrot.slane %v3278_v39, 1  ;;  %v3331_v30 = vrot.slane %v3278_v39, 7  ;;  %v16235_v35 = vadd.f32 %v11375_v54, %v16092_v7  ;;  %11429 = vmatprep.mubr.f32.mxu1 %v16229_v32 }
 0x331   : > { %13309 = vmatpush3.bf16.msra.mxu1 %v16122_v28  ;;  %v3555_v5 = vsel %vm3552_vm1, %v3322_v47, %v3426_v41  ;;  %v3240_v53 = vadd.f32 %v16092_v7, %v3106_v42  ;;  %v3242_v4 = vadd.f32 %v16092_v7, %v3116_v61  ;;  %v3506_v8 = vrot.slane %v3410_v56, 5 }
 0x332   : > { %13311 = vmatprep.subr.bf16.mxu1 %v16159_v0  ;;  %v3564_v45 = vsel %vm3561_vm2, %v3555_v5, %v3442_v55  ;;  %v16244_v48 = vmax.f32 %v3379_v10, %v3395_v60  ;;  %v3315_v2 = vmax.f32 %v3278_v39, %v3299_v21  ;;  %v3387_v3 = vmax.f32 %v3379_v10, %v3331_v30 }
 0x333   : > { %v11378_v52 = vpop.f32.mrb[20].mxu0  ;;  %v3573_v9 = vsel %vm3570_vm3, %v3564_v45, %v3458_v51  ;;  %v3265_v28 = vmax.f32 %v3241_v26, %v16235_v35  ;;  %v3264_v57 = vmax.f32 %v3240_v53, %v3242_v4  ;;  %v3522_v13 = vrot.slane %v3410_v56, 6 }
 0x334   : > { %v3126_v20 = vpop.f32.mrb[21].mxu0  ;;  %v3538_v14 = vrot.slane %v3410_v56, 7  ;;  %v3582_v49 = vsel %vm3579_vm4, %v3573_v9, %v3482_v59  ;;  %v3245_v50 = vadd.f32 %v11378_v52, %v16092_v7  ;;  %v3507_v18 = vrot.slane %v16244_v48, 5 }
 0x335   : > { %13313 = vmatpush3.bf16.msra.mxu1 %v16159_v0  ;;  %v3591_v44 = vsel %vm3588_vm5, %v3582_v49, %v3506_v8  ;;  %v3323_v19 = vmax.f32 %v3315_v2, %v3278_v39  ;;  %v3347_v46 = vmax.f32 %v3315_v2, %v3331_v30  ;;  %v3483_v24 = vrot.slane %v3387_v3, 4 }
 0x336   : > { %13315 = vmatprep.subr.bf16.mxu1 %v16164_v11  ;;  %v3600_v23 = vsel %vm3597_vm6, %v3591_v44, %v3522_v13  ;;  %v3281_v29 = vmax.f32 %v3265_v28, %v16178_v27  ;;  %v3280_v33 = vmax.f32 %v3264_v57, %v16198_v63  ;;  %v3244_v58 = vadd.f32 %v16092_v7, %v3126_v20 }
 0x337   : > { %v11381_v34 = vpop.f32.mrb[22].mxu0  ;;  %v16258_v36 = vsel %vm3606_vm7, %v3600_v23, %v3538_v14  ;;  %v3427_v0 = vrot.slane %v3347_v46, 1  ;;  %v3443_v37 = vrot.slane %v3347_v46, 2  ;;  %v3459_v6 = vrot.slane %v3347_v46, 3 }
 0x338   : > { %v3136_v38 = vpop.f32.mrb[23].mxu0  ;;  %v16262_v40 = vmax.f32 %v16258_v36, 0.0  ;;  %v3364_v42 = vrot.slane %v3281_v29, 1  ;;  %v3300_v15 = vrot.slane %v3280_v33, 1  ;;  %v3332_v63 = vrot.slane %v3280_v33, 7 }
 0x339   : > { %13317 = vmatpush3.bf16.msra.mxu1 %v16164_v11  ;;  %v3556_v27 = vsel %vm3552_vm1, %v3323_v19, %v3427_v0  ;;  %v16267_v56 = vadd.f32 %v11381_v34, %v16092_v7  ;;  %v16270_v31 = vadd.f32 %v16092_v7, %v3136_v38  ;;  %v3396_v62 = vrot.slane %v3281_v29, 7 }
 0x33a   : > { %13319 = vmatprep.subr.bf16.mxu1 %v16166_v12  ;;  %3626 = vst [vmem:[#allocation3 + $0x31] sm:$0xff] %v16262_v40  ;;  %v3565_v26 = vsel %vm3561_vm2, %v3556_v27, %v3443_v37  ;;  %v3380_v47 = vmax.f32 %v3281_v29, %v3364_v42  ;;  %v3316_v39 = vmax.f32 %v3280_v33, %v3300_v15  ;;  %v3523_v11 = vrot.slane %v16244_v48, 6 }
 0x33b   : > { %v11384_v54 = vpop.f32.mrb[24].mxu0  ;;  %11430 = vmatmul.mubr.f32.gmra.mrb[2].mxu1 %v16262_v40  ;;  %v3574_v41 = vsel %vm3570_vm3, %v3565_v26, %v3459_v6  ;;  %v3267_v55 = vmax.f32 %v3245_v50, %v16267_v56  ;;  %v3266_v59 = vmax.f32 %v3244_v58, %v16270_v31  ;;  %v3539_v61 = vrot.slane %v16244_v48, 7 }
 0x33c   : > { %v3146_v60 = vpop.f32.mrb[25].mxu0  ;;  %v3583_v10 = vsel %vm3579_vm4, %v3574_v41, %v3483_v24  ;;  %v3412_v21 = vmax.f32 %v3380_v47, %v3396_v62  ;;  %v3348_v30 = vmax.f32 %v3316_v39, %v3332_v63  ;;  %v3388_v5 = vmax.f32 %v3380_v47, %v3332_v63 }
 0x33d   : > { %13321 = vmatpush3.bf16.msra.mxu1 %v16166_v12  ;;  %v3592_v51 = vsel %vm3588_vm5, %v3583_v10, %v3507_v18  ;;  %v3283_v53 = vmax.f32 %v3267_v55, %v16235_v35  ;;  %v3282_v45 = vmax.f32 %v3266_v59, %v3242_v4  ;;  %v3324_v52 = vmax.f32 %v3316_v39, %v3280_v33 }
 0x33e   : > { %13323 = vmatprep.subr.bf16.mxu1 %v16217_v16  ;;  %v3601_v2 = vsel %vm3597_vm6, %v3592_v51, %v3523_v11  ;;  %v3508_v3 = vrot.slane %v3412_v21, 5  ;;  %v3249_v48 = vadd.f32 %v11384_v54, %v16092_v7  ;;  %v3524_v28 = vrot.slane %v3412_v21, 6 }
 0x33f   : > { %v11387_v8 = vpop.f32.mrb[26].mxu0  ;;  %v16289_v9 = vsel %vm3606_vm7, %v3601_v2, %v3539_v61  ;;  %v3428_v12 = vrot.slane %v3348_v30, 1  ;;  %v3444_v57 = vrot.slane %v3348_v30, 2  ;;  %v3460_v35 = vrot.slane %v3348_v30, 3 }
 0x340   : > { %v3156_v20 = vpop.f32.mrb[27].mxu0  ;;  %v16292_v13 = vmax.f32 %v16289_v9, 0.0  ;;  %v3484_v4 = vrot.slane %v3388_v5, 4  ;;  %v3365_v14 = vrot.slane %v3283_v53, 1  ;;  %v3397_v50 = vrot.slane %v3283_v53, 7 }
 0x341   : > { %13325 = vmatpush3.bf16.msra.mxu1 %v16217_v16  ;;  %v3557_v49 = vsel %vm3552_vm1, %v3324_v52, %v3428_v12  ;;  %v3301_v44 = vrot.slane %v3282_v45, 1  ;;  %v3333_v18 = vrot.slane %v3282_v45, 7  ;;  %v3251_v23 = vadd.f32 %v11387_v8, %v16092_v7 }
 0x342   : > { %13327 = vmatprep.subr.bf16.mxu1 %v16219_v43  ;;  %3627 = vst [vmem:[#allocation3 + $0x41] sm:$0xff] %v16292_v13  ;;  %v3566_v19 = vsel %vm3561_vm2, %v3557_v49, %v3444_v57  ;;  %v3381_v46 = vmax.f32 %v3283_v53, %v3365_v14  ;;  %v3250_v24 = vadd.f32 %v16092_v7, %v3156_v20  ;;  %v3540_v15 = vrot.slane %v3412_v21, 7 }
 0x343   : > { %v11390_v29 = vpop.f32.mrb[28].mxu0  ;;  %11432 = vmatprep.mubr.f32.mxu1 %v16292_v13  ;;  %v3575_v16 = vsel %vm3570_vm3, %v3566_v19, %v3460_v35  ;;  %v3317_v33 = vmax.f32 %v3282_v45, %v3301_v44  ;;  %v3248_v34 = vadd.f32 %v16092_v7, %v3146_v60  ;;  %v3269_v42 = vmax.f32 %v3249_v48, %v3251_v23 }
 0x344   : > { %v3253_v0 = vadd.f32 %v11390_v29, %v16092_v7  ;;  %v3166_v37 = vpop.f32.mrb[29].mxu0  ;;  %v3584_v58 = vsel %vm3579_vm4, %v3575_v16, %v3484_v4  ;;  %v3413_v38 = vmax.f32 %v3381_v46, %v3397_v50  ;;  %v3389_v6 = vmax.f32 %v3381_v46, %v3333_v18 }
 0x345   : > { %13329 = vmatpush3.bf16.msra.mxu1 %v16219_v43  ;;  %v3593_v27 = vsel %vm3588_vm5, %v3584_v58, %v3508_v3  ;;  %v3349_v63 = vmax.f32 %v3317_v33, %v3333_v18  ;;  %v3268_v26 = vmax.f32 %v3248_v34, %v3250_v24  ;;  %v3325_v62 = vmax.f32 %v3317_v33, %v3282_v45 }
 0x346   : > { %13331 = vmatprep.subr.bf16.mxu1 %v16221_v22  ;;  %v3602_v47 = vsel %vm3597_vm6, %v3593_v27, %v3524_v28  ;;  %v3509_v11 = vrot.slane %v3413_v38, 5  ;;  %v3285_v61 = vmax.f32 %v3269_v42, %v16267_v56  ;;  %v3252_v30 = vadd.f32 %v16092_v7, %v3166_v37 }
 0x347   : > { %v11393_v39 = vpop.f32.mrb[30].mxu0  ;;  %v16311_v54 = vsel %vm3606_vm7, %v3602_v47, %v3540_v15  ;;  %v3429_v41 = vrot.slane %v3349_v63, 1  ;;  %v3445_v55 = vrot.slane %v3349_v63, 2  ;;  %v3461_v60 = vrot.slane %v3349_v63, 3 }
 0x348   : > { %v3176_v59 = vpop.f32.mrb[31].mxu0  ;;  %v16314_v43 = vmax.f32 %v16311_v54, 0.0  ;;  %v3284_v10 = vmax.f32 %v3268_v26, %v16270_v31  ;;  %v3255_v51 = vadd.f32 %v11393_v39, %v16092_v7  ;;  %v3485_v53 = vrot.slane %v3389_v6, 4 }
 0x349   : > { %v3558_v21 = vsel %vm3552_vm1, %v3325_v62, %v3429_v41  ;;  %v3254_v5 = vadd.f32 %v16092_v7, %v3176_v59  ;;  %v3366_v2 = vrot.slane %v3285_v61, 1  ;;  %v3525_v8 = vrot.slane %v3413_v38, 6 }
 0x34a   : > { %3628 = vst [vmem:[#allocation3 + $0x51] sm:$0xff] %v16314_v43  ;;  %v3567_v45 = vsel %vm3561_vm2, %v3558_v21, %v3445_v55  ;;  %v3302_v3 = vrot.slane %v3284_v10, 1  ;;  %11433 = vmatmul.mubr.f32.gmra.mrb[4].mxu1 %v16314_v43  ;;  %v3334_v31 = vrot.slane %v3284_v10, 7  ;;  %v3271_v52 = vmax.f32 %v3253_v0, %v3255_v51 }
 0x34b   : > { %v3576_v56 = vsel %vm3570_vm3, %v3567_v45, %v3461_v60  ;;  %v3270_v48 = vmax.f32 %v3252_v30, %v3254_v5  ;;  %v3382_v12 = vmax.f32 %v3285_v61, %v3366_v2  ;;  %v3541_v7 = vrot.slane %v3413_v38, 7  ;;  %v8877_v45 = vld [vmem:[%s18520_s3 + $0x118] sm:$0xff] }
 0x34c   : > { %v3585_v28 = vsel %vm3579_vm4, %v3576_v56, %v3485_v53  ;;  %v3318_v57 = vmax.f32 %v3284_v10, %v3302_v3  ;;  %v3287_v35 = vmax.f32 %v3271_v52, %v3251_v23  ;;  %v3398_v44 = vrot.slane %v3285_v61, 7  ;;  %v8876_v53 = vld [vmem:[%s18520_s3 + $0x110] sm:$0xff]  ;;  %v16360_v52 = vld [vmem:[#allocation2] sm:$0xff] }
 0x34d   : > { %v3594_v20 = vsel %vm3588_vm5, %v3585_v28, %v3509_v11  ;;  %v3286_v4 = vmax.f32 %v3270_v48, %v3250_v24  ;;  %v3390_v18 = vmax.f32 %v3382_v12, %v3334_v31  ;;  %v13334_v28 = vpack.c.bf16 %v8877_v45, %v8876_v53  ;;  %v16452_v53 = vld [vmem:[#allocation3 + $0x22] sm:$0xff] }
 0x34e   : > { %v3603_v14 = vsel %vm3597_vm6, %v3594_v20, %v3525_v8  ;;  %v3350_v49 = vmax.f32 %v3318_v57, %v3334_v31  ;;  %v3367_v19 = vrot.slane %v3287_v35, 1  ;;  %v3414_v29 = vmax.f32 %v3382_v12, %v3398_v44  ;;  %v8878_v20 = vld [vmem:[%s18520_s3 + $0x120] sm:$0xff] }
 0x34f   : > { %v16330_v50 = vsel %vm3606_vm7, %v3603_v14, %v3541_v7  ;;  %v3326_v16 = vmax.f32 %v3318_v57, %v3284_v10  ;;  %v3303_v24 = vrot.slane %v3286_v4, 1  ;;  %v3335_v0 = vrot.slane %v3286_v4, 7  ;;  %v16365_v7 = vld [vmem:[#allocation3 + $0x10] sm:$0xff]  ;;  %v16375_v14 = vld [vmem:[#allocation3 + $0x20] sm:$0xff] }
 0x350   : > { %v16333_v46 = vmax.f32 %v16330_v50, 0.0  ;;  %v3430_v33 = vrot.slane %v3350_v49, 1  ;;  %v3446_v34 = vrot.slane %v3350_v49, 2  ;;  %v3383_v23 = vmax.f32 %v3287_v35, %v3367_v19  ;;  %v16385_v19 = vld [vmem:[#allocation3 + $0x30] sm:$0xff] }
 0x351   : > { %v3462_v37 = vrot.slane %v3350_v49, 3  ;;  %v3486_v38 = vrot.slane %v3390_v18, 4  ;;  %v3319_v42 = vmax.f32 %v3286_v4, %v3303_v24  ;;  %v3510_v27 = vrot.slane %v3414_v29, 5  ;;  %v8883_v24 = vld [vmem:[%s18520_s3 + $0x148] sm:$0xff] }
 0x352   : > { %3629 = vst [vmem:[#allocation3 + $0x61] sm:$0xff] %v16333_v46  ;;  %11435 = vmatprep.mubr.f32.mxu1 %v16333_v46  ;;  %v3559_v58 = vsel %vm3552_vm1, %v3326_v16, %v3430_v33  ;;  %v3391_v15 = vmax.f32 %v3383_v23, %v3335_v0  ;;  %v3526_v26 = vrot.slane %v3414_v29, 6  ;;  %v3399_v62 = vrot.slane %v3287_v35, 7  ;;  %v8879_v35 = vld [vmem:[%s18520_s3 + $0x128] sm:$0xff]  ;;  %v8881_v16 = vld [vmem:[%s18520_s3 + $0x138] sm:$0xff] }
 0x353   : > { %v3568_v6 = vsel %vm3561_vm2, %v3559_v58, %v3446_v34  ;;  %v3542_v39 = vrot.slane %v3414_v29, 7  ;;  %v3351_v41 = vmax.f32 %v3319_v42, %v3335_v0  ;;  %v3327_v61 = vmax.f32 %v3319_v42, %v3286_v4  ;;  %v8880_v29 = vld [vmem:[%s18520_s3 + $0x130] sm:$0xff]  ;;  %v16398_v34 = vld [vmem:[#allocation3 + $0x50] sm:$0xff]  ;;  %v8885_v42 = vld [vmem:[%s18520_s3 + $0x158] sm:$0xff] }
 0x354   : > { %v3577_v63 = vsel %vm3570_vm3, %v3568_v6, %v3462_v37  ;;  %v3415_v59 = vmax.f32 %v3383_v23, %v3399_v62  ;;  %v3487_v2 = vrot.slane %v3391_v15, 4  ;;  %v13338_v18 = vpack.c.bf16 %v8879_v35, %v8878_v20  ;;  %v8882_v23 = vld [vmem:[%s18520_s3 + $0x140] sm:$0xff]  ;;  %v3891_v58 = vld [vmem:[#allocation3 + $0x2] sm:$0xff] }
 0x355   : > { %v3586_v47 = vsel %vm3579_vm4, %v3577_v63, %v3486_v38  ;;  %v3431_v10 = vrot.slane %v3351_v41, 1  ;;  %v3447_v21 = vrot.slane %v3351_v41, 2  ;;  %v3463_v51 = vrot.slane %v3351_v41, 3  ;;  %v8884_v6 = vld [vmem:[%s18520_s3 + $0x150] sm:$0xff]  ;;  %v8887_v63 = vld [vmem:[%s18520_s3 + $0x168] sm:$0xff]  ;;  %v8889_v62 = vld [vmem:[%s18520_s3 + $0x178] sm:$0xff] }
 0x356   : > { %v3595_v11 = vsel %vm3588_vm5, %v3586_v47, %v3510_v27  ;;  %v3511_v56 = vrot.slane %v3415_v59, 5  ;;  %v3527_v48 = vrot.slane %v3415_v59, 6  ;;  %v3543_v12 = vrot.slane %v3415_v59, 7  ;;  %v8886_v27 = vld [vmem:[%s18520_s3 + $0x160] sm:$0xff]  ;;  %v8888_v47 = vld [vmem:[%s18520_s3 + $0x170] sm:$0xff]  ;;  %v8891_v41 = vld [vmem:[%s18520_s3 + $0x188] sm:$0xff] }
 0x357   : > { %v3604_v55 = vsel %vm3597_vm6, %v3595_v11, %v3526_v26  ;;  %v3560_v5 = vsel %vm3552_vm1, %v3327_v61, %v3431_v10  ;;  %v13342_v33 = vpack.c.bf16 %v8881_v16, %v8880_v29  ;;  %v13346_v37 = vpack.c.bf16 %v8883_v24, %v8882_v23  ;;  %v8890_v11 = vld [vmem:[%s18520_s3 + $0x180] sm:$0xff]  ;;  %v8892_v59 = vld [vmem:[%s18520_s3 + $0x190] sm:$0xff]  ;;  %v8893_v61 = vld [vmem:[%s18520_s3 + $0x198] sm:$0xff] }
 0x358   : > { %v16344_v60 = vsel %vm3606_vm7, %v3604_v55, %v3542_v39  ;;  %v3569_v3 = vsel %vm3561_vm2, %v3560_v5, %v3447_v21  ;;  %v13350_v15 = vpack.c.bf16 %v8885_v42, %v8884_v6  ;;  %v13354_v26 = vpack.c.bf16 %v8887_v63, %v8886_v27  ;;  %v16443_v21 = vld [vmem:[#allocation3 + $0x12] sm:$0xff]  ;;  %v8904_v24 = vld [vmem:[%s18520_s3 + $0x1f0] sm:$0xff]  ;;  %v8909_v27 = vld [vmem:[%s18520_s3 + $0x218] sm:$0xff] }
 0x359   : > { %v16347_v30 = vmax.f32 %v16344_v60, 0.0  ;;  %v3578_v31 = vsel %vm3570_vm3, %v3569_v3, %v3463_v51  ;;  %v16407_v0 = vld [vmem:[#allocation3 + $0x60] sm:$0xff]  ;;  %v13358_v39 = vpack.c.bf16 %v8889_v62, %v8888_v47  ;;  %v13362_v55 = vpack.c.bf16 %v8891_v41, %v8890_v11  ;;  %v8894_v51 = vld [vmem:[%s18520_s3 + $0x1a0] sm:$0xff]  ;;  %v8895_v5 = vld [vmem:[%s18520_s3 + $0x1a8] sm:$0xff] }
 0x35a   : > { %v3587_v8 = vsel %vm3579_vm4, %v3578_v31, %v3487_v2  ;;  %v13366_v10 = vpack.c.bf16 %v8893_v61, %v8892_v59  ;;  %v13370_v45 = vpack.c.bf16 %v8895_v5, %v8894_v51  ;;  %v16455_v2 = vld [vmem:[#allocation3 + $0x32] sm:$0xff]  ;;  %v8896_v3 = vld [vmem:[%s18520_s3 + $0x1b0] sm:$0xff]  ;;  %v8913_v11 = vld [vmem:[%s18520_s3 + $0x238] sm:$0xff] }
 0x35b   : > { %3630 = vst [vmem:[#allocation3 + $0x71] sm:$0xff] %v16347_v30  ;;  %11436 = vmatmul.mubr.f32.gmra.mrb[6].mxu1 %v16347_v30  ;;  %v3596_v57 = vsel %vm3588_vm5, %v3587_v8, %v3511_v56  ;;  %v8897_v56 = vld [vmem:[%s18520_s3 + $0x1b8] sm:$0xff]  ;;  %v16467_v8 = vld [vmem:[#allocation3 + $0x52] sm:$0xff]  ;;  %v8916_v51 = vld [vmem:[%s18520_s3 + $0x250] sm:$0xff] }
 0x35c   : > { %11470 = vmatprep.mubr.f32.mxu1 %v16360_v52  ;;  %v3605_v4 = vsel %vm3597_vm6, %v3596_v57, %v3527_v48  ;;  %v16464_v31 = vld [vmem:[#allocation3 + $0x42] sm:$0xff]  ;;  %v13374_v48 = vpack.c.bf16 %v8897_v56, %v8896_v3  ;;  %v8902_v16 = vld [vmem:[%s18520_s3 + $0x1e0] sm:$0xff]  ;;  %v8907_v6 = vld [vmem:[%s18520_s3 + $0x208] sm:$0xff] }
 0x35d   : > { %v16378_v49 = vsel %vm3606_vm7, %v3605_v4, %v3543_v12  ;;  %v8899_v12 = vld [vmem:[%s18520_s3 + $0x1c8] sm:$0xff]  ;;  %v16476_v57 = vld [vmem:[#allocation3 + $0x62] sm:$0xff]  ;;  %v8918_v3 = vld [vmem:[%s18520_s3 + $0x260] sm:$0xff] }
 0x35e   : > { %v16383_v44 = vmax.f32 %v16378_v49, 0.0  ;;  %v8900_v4 = vld [vmem:[%s18520_s3 + $0x1d0] sm:$0xff]  ;;  %v8911_v47 = vld [vmem:[%s18520_s3 + $0x228] sm:$0xff]  ;;  %v8917_v5 = vld [vmem:[%s18520_s3 + $0x258] sm:$0xff] }
 0x35f   : > { %11471 = vmatmul.mubr.f32.vlgmr.msra.gmra.mrb[0].mxu1 %v16365_v7  ;;  %v8915_v59 = vld [vmem:[%s18520_s3 + $0x248] sm:$0xff] }
 0x360   : > { %13333 = vmatpush3.bf16.msra.mxu1 %v16221_v22  ;;  %11473 = vmatprep.mubr.f32.mxu1 %v16375_v14  ;;  %3631 = vst [vmem:[#allocation3 + $0x81] sm:$0xff] %v16383_v44  ;;  %v16395_v22 = vld [vmem:[#allocation3 + $0x40] sm:$0xff]  ;;  %v8919_v56 = vld [vmem:[%s18520_s3 + $0x268] sm:$0xff] }
 0x361   : > { %13335 = vmatprep.subr.bf16.mxu1 %v13334_v28 }
 0x362   : > { %v16410_v38 = vld [vmem:[#allocation3 + $0x70] sm:$0xff] }
 0x363   : > { %11474 = vmatmul.mubr.f32.gmra.mrb[2].mxu1 %v16385_v19  ;;  %v16479_v35 = vld [vmem:[#allocation3 + $0x72] sm:$0xff] }
 0x364   : > { %13337 = vmatpush3.bf16.msra.mxu1 %v13334_v28  ;;  %11476 = vmatprep.mubr.f32.mxu1 %v16395_v22  ;;  %v8898_v28 = vld [vmem:[%s18520_s3 + $0x1c0] sm:$0xff] }
 0x365   : > { %13339 = vmatprep.subr.bf16.mxu1 %v13338_v18  ;;  %v13378_v20 = vpack.c.bf16 %v8899_v12, %v8898_v28  ;;  %v8920_v28 = vld [vmem:[%s18520_s3 + $0x270] sm:$0xff] }
 0x367   : > { %11477 = vmatmul.mubr.f32.gmra.mrb[4].mxu1 %v16398_v34 }
 0x368   : > { %13341 = vmatpush3.bf16.msra.mxu1 %v13338_v18  ;;  %11479 = vmatprep.mubr.f32.mxu1 %v16407_v0  ;;  %v8901_v18 = vld [vmem:[%s18520_s3 + $0x1d8] sm:$0xff] }
 0x369   : > { %13343 = vmatprep.subr.bf16.mxu1 %v13342_v33  ;;  %v13382_v29 = vpack.c.bf16 %v8901_v18, %v8900_v4  ;;  %v8923_v4 = vld [vmem:[%s18520_s3 + $0x288] sm:$0xff] }
 0x36b   : > { %11480 = vmatmul.mubr.f32.gmra.mrb[6].mxu1 %v16410_v38 }
 0x36c   : > { %13345 = vmatpush3.bf16.msra.mxu1 %v13342_v33  ;;  %11514 = vmatprep.mubr.f32.mxu1 %v3891_v58  ;;  %v8903_v33 = vld [vmem:[%s18520_s3 + $0x1e8] sm:$0xff]  ;;  %v8906_v58 = vld [vmem:[%s18520_s3 + $0x200] sm:$0xff] }
 0x36d   : > { %13347 = vmatprep.subr.bf16.mxu1 %v13346_v37  ;;  %v13386_v23 = vpack.c.bf16 %v8903_v33, %v8902_v16  ;;  %v13394_v42 = vpack.c.bf16 %v8907_v6, %v8906_v58  ;;  %v8925_v16 = vld [vmem:[%s18520_s3 + $0x298] sm:$0xff]  ;;  %v8931_v6 = vld [vmem:[%s18520_s3 + $0x2c8] sm:$0xff] }
 0x36e   : > { %v8929_v58 = vld [vmem:[%s18520_s3 + $0x2b8] sm:$0xff] }
 0x370   : > { %13349 = vmatpush3.bf16.msra.mxu1 %v13346_v37 }
 0x371   : > { %13351 = vmatprep.subr.bf16.mxu1 %v13350_v15 }
 0x374   : > { %13353 = vmatpush3.bf16.msra.mxu1 %v13350_v15  ;;  %v8908_v15 = vld [vmem:[%s18520_s3 + $0x210] sm:$0xff] }
 0x375   : > { %13355 = vmatprep.subr.bf16.mxu1 %v13354_v26  ;;  %v13398_v63 = vpack.c.bf16 %v8909_v27, %v8908_v15  ;;  %v8934_v27 = vld [vmem:[%s18520_s3 + $0x2e0] sm:$0xff] }
 0x378   : > { %13357 = vmatpush3.bf16.msra.mxu1 %v13354_v26  ;;  %v8910_v26 = vld [vmem:[%s18520_s3 + $0x220] sm:$0xff] }
 0x379   : > { %13359 = vmatprep.subr.bf16.mxu1 %v13358_v39  ;;  %v13402_v62 = vpack.c.bf16 %v8911_v47, %v8910_v26  ;;  %v8936_v47 = vld [vmem:[%s18520_s3 + $0x2f0] sm:$0xff] }
 0x37c   : > { %13361 = vmatpush3.bf16.msra.mxu1 %v13358_v39  ;;  %v8912_v39 = vld [vmem:[%s18520_s3 + $0x230] sm:$0xff] }
 0x37d   : > { %13363 = vmatprep.subr.bf16.mxu1 %v13362_v55  ;;  %v13406_v41 = vpack.c.bf16 %v8913_v11, %v8912_v39  ;;  %v8938_v39 = vld [vmem:[%s18520_s3 + $0x300] sm:$0xff]  ;;  %v8939_v11 = vld [vmem:[%s18520_s3 + $0x308] sm:$0xff] }
 0x37f   : > { %11515 = vmatmul.mubr.f32.vlgmr.msra.gmra.mrb[0].mxu1 %v16443_v21 }
 0x380   : > { %11517 = vmatprep.mubr.f32.mxu1 %v16452_v53  ;;  %13365 = vmatpush3.bf16.msra.mxu1 %v13362_v55  ;;  %v8914_v55 = vld [vmem:[%s18520_s3 + $0x240] sm:$0xff] }
 0x381   : > { %13367 = vmatprep.subr.bf16.mxu1 %v13366_v10  ;;  %v13410_v61 = vpack.c.bf16 %v8915_v59, %v8914_v55  ;;  %v8940_v55 = vld [vmem:[%s18520_s3 + $0x310] sm:$0xff]  ;;  %v8941_v59 = vld [vmem:[%s18520_s3 + $0x318] sm:$0xff] }
 0x383   : > { %11518 = vmatmul.mubr.f32.gmra.mrb[2].mxu1 %v16455_v2 }
 0x384   : > { %11520 = vmatprep.mubr.f32.mxu1 %v16464_v31  ;;  %13369 = vmatpush3.bf16.msra.mxu1 %v13366_v10  ;;  %v16537_v10 = vld [vmem:[#allocation3 + $0x80] sm:$0xff] }
 0x385   : > { %13371 = vmatprep.subr.bf16.mxu1 %v13370_v45 }
 0x387   : > { %11521 = vmatmul.mubr.f32.gmra.mrb[4].mxu1 %v16467_v8 }
 0x388   : > { %11523 = vmatprep.mubr.f32.mxu1 %v16476_v57  ;;  %13373 = vmatpush3.bf16.msra.mxu1 %v13370_v45  ;;  %v13414_v45 = vpack.c.bf16 %v8917_v5, %v8916_v51  ;;  %v8942_v51 = vld [vmem:[%s18520_s3 + $0x320] sm:$0xff]  ;;  %v8943_v5 = vld [vmem:[%s18520_s3 + $0x328] sm:$0xff] }
 0x389   : > { %13375 = vmatprep.subr.bf16.mxu1 %v13374_v48 }
 0x38b   : > { %11524 = vmatmul.mubr.f32.gmra.mrb[6].mxu1 %v16479_v35 }
 0x38c   : > { %13377 = vmatpush3.bf16.msra.mxu1 %v13374_v48  ;;  %11558 = vmatprep.mubr.f32.mxu1 %v16365_v7  ;;  %v8905_v7 = vld [vmem:[%s18520_s3 + $0x1f8] sm:$0xff]  ;;  %v13418_v48 = vpack.c.bf16 %v8919_v56, %v8918_v3  ;;  %v8944_v3 = vld [vmem:[%s18520_s3 + $0x330] sm:$0xff] }
 0x38d   : > { %13379 = vmatprep.subr.bf16.mxu1 %v13378_v20  ;;  %v13390_v37 = vpack.c.bf16 %v8905_v7, %v8904_v24  ;;  %v8927_v24 = vld [vmem:[%s18520_s3 + $0x2a8] sm:$0xff]  ;;  %v8945_v56 = vld [vmem:[%s18520_s3 + $0x338] sm:$0xff] }
 0x390   : > { %13381 = vmatpush3.bf16.msra.mxu1 %v13378_v20  ;;  %v8922_v20 = vld [vmem:[%s18520_s3 + $0x280] sm:$0xff] }
 0x391   : > { %13383 = vmatprep.subr.bf16.mxu1 %v13382_v29  ;;  %v13426_v18 = vpack.c.bf16 %v8923_v4, %v8922_v20  ;;  %v16651_v20 = vld [vmem:[#allocation3 + $0x82] sm:$0xff] }
 0x392   : > { %v8948_v4 = vld [vmem:[%s18520_s3 + $0x350] sm:$0xff] }
 0x394   : > { %13385 = vmatpush3.bf16.msra.mxu1 %v13382_v29  ;;  %v8924_v29 = vld [vmem:[%s18520_s3 + $0x290] sm:$0xff] }
 0x395   : > { %13387 = vmatprep.subr.bf16.mxu1 %v13386_v23  ;;  %v13430_v33 = vpack.c.bf16 %v8925_v16, %v8924_v29  ;;  %v8950_v16 = vld [vmem:[%s18520_s3 + $0x360] sm:$0xff] }
 0x398   : > { %13389 = vmatpush3.bf16.msra.mxu1 %v13386_v23  ;;  %v8926_v23 = vld [vmem:[%s18520_s3 + $0x2a0] sm:$0xff] }
 0x399   : > { %13391 = vmatprep.subr.bf16.mxu1 %v13390_v37  ;;  %v13434_v7 = vpack.c.bf16 %v8927_v24, %v8926_v23  ;;  %v8952_v24 = vld [vmem:[%s18520_s3 + $0x370] sm:$0xff] }
 0x39c   : > { %13393 = vmatpush3.bf16.msra.mxu1 %v13390_v37  ;;  %v8928_v37 = vld [vmem:[%s18520_s3 + $0x2b0] sm:$0xff] }
 0x39d   : > { %13395 = vmatprep.subr.bf16.mxu1 %v13394_v42 }
 0x39f   : > { %11559 = vmatmul.mubr.f32.vlgmr.msra.gmra.mrb[0].mxu1 %v16375_v14 }
 0x3a0   : > { %11561 = vmatprep.mubr.f32.mxu1 %v16385_v19  ;;  %13397 = vmatpush3.bf16.msra.mxu1 %v13394_v42  ;;  %v8933_v42 = vld [vmem:[%s18520_s3 + $0x2d8] sm:$0xff] }
 0x3a1   : > { %13399 = vmatprep.subr.bf16.mxu1 %v13398_v63 }
 0x3a3   : > { %11562 = vmatmul.mubr.f32.gmra.mrb[2].mxu1 %v16395_v22 }
 0x3a4   : > { %11564 = vmatprep.mubr.f32.mxu1 %v16398_v34  ;;  %13401 = vmatpush3.bf16.msra.mxu1 %v13398_v63  ;;  %v8935_v63 = vld [vmem:[%s18520_s3 + $0x2e8] sm:$0xff] }
 0x3a5   : > { %13403 = vmatprep.subr.bf16.mxu1 %v13402_v62  ;;  %v13450_v26 = vpack.c.bf16 %v8935_v63, %v8934_v27  ;;  %v8960_v27 = vld [vmem:[%s18520_s3 + $0x3b0] sm:$0xff]  ;;  %v8961_v63 = vld [vmem:[%s18520_s3 + $0x3b8] sm:$0xff] }
 0x3a7   : > { %11565 = vmatmul.mubr.f32.gmra.mrb[4].mxu1 %v16407_v0 }
 0x3a8   : > { %11567 = vmatprep.mubr.f32.mxu1 %v16410_v38  ;;  %13405 = vmatpush3.bf16.msra.mxu1 %v13402_v62 }
 0x3a9   : > { %13407 = vmatprep.subr.bf16.mxu1 %v13406_v41 }
 0x3ab   : > { %11568 = vmatmul.mubr.f32.gmra.mrb[6].mxu1 %v16537_v10 }
 0x3ac   : > { %13409 = vmatpush3.bf16.msra.mxu1 %v13406_v41  ;;  %11602 = vmatprep.mubr.f32.mxu1 %v16169_v17  ;;  %v8921_v17 = vld [vmem:[%s18520_s3 + $0x278] sm:$0xff]  ;;  %v13458_v41 = vpack.c.bf16 %v8939_v11, %v8938_v39  ;;  %v8968_v11 = vld [vmem:[%s18520_s3 + $0x3f0] sm:$0xff] }
 0x3ad   : > { %13411 = vmatprep.subr.bf16.mxu1 %v13410_v61  ;;  %v13422_v12 = vpack.c.bf16 %v8921_v17, %v8920_v28  ;;  %v8946_v28 = vld [vmem:[%s18520_s3 + $0x340] sm:$0xff]  ;;  %v8947_v17 = vld [vmem:[%s18520_s3 + $0x348] sm:$0xff] }
 0x3b0   : > { %13413 = vmatpush3.bf16.msra.mxu1 %v13410_v61  ;;  %v13462_v61 = vpack.c.bf16 %v8941_v59, %v8940_v55  ;;  %v8970_v59 = vld [vmem:[%s18520_s3 + $0x400] sm:$0xff] }
 0x3b1   : > { %13415 = vmatprep.subr.bf16.mxu1 %v13414_v45 }
 0x3b4   : > { %13417 = vmatpush3.bf16.msra.mxu1 %v13414_v45  ;;  %v13466_v45 = vpack.c.bf16 %v8943_v5, %v8942_v51  ;;  %v8972_v5 = vld [vmem:[%s18520_s3 + $0x410] sm:$0xff] }
 0x3b5   : > { %13419 = vmatprep.subr.bf16.mxu1 %v13418_v48 }
 0x3b8   : > { %13421 = vmatpush3.bf16.msra.mxu1 %v13418_v48  ;;  %v13470_v48 = vpack.c.bf16 %v8945_v56, %v8944_v3  ;;  %v4583_v56 = vld [vmem:[#allocation3 + $0x31] sm:$0xff] }
 0x3b9   : > { %13423 = vmatprep.subr.bf16.mxu1 %v13422_v12 }
 0x3bc   : > { %13425 = vmatpush3.bf16.msra.mxu1 %v13422_v12  ;;  %v13474_v12 = vpack.c.bf16 %v8947_v17, %v8946_v28  ;;  %v8975_v28 = vld [vmem:[%s18520_s3 + $0x428] sm:$0xff]  ;;  %v4584_v17 = vld [vmem:[#allocation3 + $0x41] sm:$0xff] }
 0x3bd   : > { %13427 = vmatprep.subr.bf16.mxu1 %v13426_v18 }
 0x3bf   : > { %11603 = vmatmul.mubr.f32.vlgmr.msra.gmra.mrb[0].mxu1 %v16229_v32  ;;  %v13438_v32 = vpack.c.bf16 %v8929_v58, %v8928_v37  ;;  %v8954_v37 = vld [vmem:[%s18520_s3 + $0x380] sm:$0xff]  ;;  %v8955_v58 = vld [vmem:[%s18520_s3 + $0x388] sm:$0xff] }
 0x3c0   : > { %11605 = vmatprep.mubr.f32.mxu1 %v16262_v40  ;;  %13429 = vmatpush3.bf16.msra.mxu1 %v13426_v18  ;;  %v8930_v40 = vld [vmem:[%s18520_s3 + $0x2c0] sm:$0xff]  ;;  %v8949_v18 = vld [vmem:[%s18520_s3 + $0x358] sm:$0xff] }
 0x3c1   : > { %13431 = vmatprep.subr.bf16.mxu1 %v13430_v33  ;;  %v13478_v29 = vpack.c.bf16 %v8949_v18, %v8948_v4  ;;  %v4585_v4 = vld [vmem:[#allocation3 + $0x51] sm:$0xff]  ;;  %v8976_v18 = vld [vmem:[%s18520_s3 + $0x430] sm:$0xff] }
 0x3c3   : > { %11606 = vmatmul.mubr.f32.gmra.mrb[2].mxu1 %v16292_v13  ;;  %v13442_v13 = vpack.c.bf16 %v8931_v6, %v8930_v40  ;;  %v8956_v40 = vld [vmem:[%s18520_s3 + $0x390] sm:$0xff]  ;;  %v8957_v6 = vld [vmem:[%s18520_s3 + $0x398] sm:$0xff] }
 0x3c4   : > { %11608 = vmatprep.mubr.f32.mxu1 %v16314_v43  ;;  %13433 = vmatpush3.bf16.msra.mxu1 %v13430_v33  ;;  %v8932_v43 = vld [vmem:[%s18520_s3 + $0x2d0] sm:$0xff]  ;;  %v8951_v33 = vld [vmem:[%s18520_s3 + $0x368] sm:$0xff] }
 0x3c5   : > { %13435 = vmatprep.subr.bf16.mxu1 %v13434_v7  ;;  %v13446_v15 = vpack.c.bf16 %v8933_v42, %v8932_v43  ;;  %v13482_v23 = vpack.c.bf16 %v8951_v33, %v8950_v16  ;;  %v8958_v43 = vld [vmem:[%s18520_s3 + $0x3a0] sm:$0xff]  ;;  %v8959_v42 = vld [vmem:[%s18520_s3 + $0x3a8] sm:$0xff] }
 0x3c6   : > { %v8978_v33 = vld [vmem:[%s18520_s3 + $0x440] sm:$0xff] }
 0x3c7   : > { %11609 = vmatmul.mubr.f32.gmra.mrb[4].mxu1 %v16333_v46 }
 0x3c8   : > { %11611 = vmatprep.mubr.f32.mxu1 %v16347_v30  ;;  %13437 = vmatpush3.bf16.msra.mxu1 %v13434_v7 }
 0x3c9   : > { %13439 = vmatprep.subr.bf16.mxu1 %v13438_v32 }
 0x3cb   : > { %11612 = vmatmul.mubr.f32.gmra.mrb[6].mxu1 %v16383_v44 }
 0x3cc   : > { %13441 = vmatpush3.bf16.msra.mxu1 %v13438_v32  ;;  %11646 = vmatprep.mubr.f32.mxu1 %v16443_v21  ;;  %v8937_v21 = vld [vmem:[%s18520_s3 + $0x2f8] sm:$0xff]  ;;  %v13490_v32 = vpack.c.bf16 %v8955_v58, %v8954_v37  ;;  %v8983_v37 = vld [vmem:[%s18520_s3 + $0x468] sm:$0xff] }
 0x3cd   : > { %13443 = vmatprep.subr.bf16.mxu1 %v13442_v13  ;;  %v13454_v62 = vpack.c.bf16 %v8937_v21, %v8936_v47  ;;  %v8965_v47 = vld [vmem:[%s18520_s3 + $0x3d8] sm:$0xff] }
 0x3ce   : > { %v4582_v21 = vld [vmem:[#allocation3 + $0x21] sm:$0xff] }
 0x3d0   : > { %13445 = vmatpush3.bf16.msra.mxu1 %v13442_v13  ;;  %v13494_v13 = vpack.c.bf16 %v8957_v6, %v8956_v40  ;;  %v8987_v6 = vld [vmem:[%s18522_s5 + $0x80] sm:$0xff] }
 0x3d1   : > { %13447 = vmatprep.subr.bf16.mxu1 %v13446_v15 }
 0x3d4   : > { %13449 = vmatpush3.bf16.msra.mxu1 %v13446_v15  ;;  %v13498_v15 = vpack.c.bf16 %v8959_v42, %v8958_v43  ;;  %v8989_v42 = vld [vmem:[%s18522_s5 + $0x90] sm:$0xff] }
 0x3d5   : > { %13451 = vmatprep.subr.bf16.mxu1 %v13450_v26 }
 0x3d8   : > { %13453 = vmatpush3.bf16.msra.mxu1 %v13450_v26  ;;  %v8963_v26 = vld [vmem:[%s18520_s3 + $0x3c8] sm:$0xff] }
 0x3d9   : > { %13455 = vmatprep.subr.bf16.mxu1 %v13454_v62 }
 0x3dc   : > { %13457 = vmatpush3.bf16.msra.mxu1 %v13454_v62  ;;  %v8967_v62 = vld [vmem:[%s18520_s3 + $0x3e8] sm:$0xff] }
 0x3dd   : > { %13459 = vmatprep.subr.bf16.mxu1 %v13458_v41 }
 0x3df   : > { %11647 = vmatmul.mubr.f32.vlgmr.msra.gmra.mrb[0].mxu1 %v16452_v53 }
 0x3e0   : > { %11649 = vmatprep.mubr.f32.mxu1 %v16455_v2  ;;  %13461 = vmatpush3.bf16.msra.mxu1 %v13458_v41  ;;  %v8969_v41 = vld [vmem:[%s18520_s3 + $0x3f8] sm:$0xff] }
 0x3e1   : > { %13463 = vmatprep.subr.bf16.mxu1 %v13462_v61  ;;  %v13518_v55 = vpack.c.bf16 %v8969_v41, %v8968_v11  ;;  %v4897_v41 = vld [vmem:[%s18522_s5] sm:$0xff] }
 0x3e3   : > { %11650 = vmatmul.mubr.f32.gmra.mrb[2].mxu1 %v16464_v31 }
 0x3e4   : > { %11652 = vmatprep.mubr.f32.mxu1 %v16467_v8  ;;  %13465 = vmatpush3.bf16.msra.mxu1 %v13462_v61  ;;  %v8971_v61 = vld [vmem:[%s18520_s3 + $0x408] sm:$0xff] }
 0x3e5   : > { %13467 = vmatprep.subr.bf16.mxu1 %v13466_v45  ;;  %v13522_v51 = vpack.c.bf16 %v8971_v61, %v8970_v59  ;;  %v4913_v61 = vld [vmem:[#allocation3 + $0x1] sm:$0xff] }
 0x3e7   : > { %11653 = vmatmul.mubr.f32.gmra.mrb[4].mxu1 %v16476_v57 }
 0x3e8   : > { %11655 = vmatprep.mubr.f32.mxu1 %v16479_v35  ;;  %13469 = vmatpush3.bf16.msra.mxu1 %v13466_v45  ;;  %v8973_v45 = vld [vmem:[%s18520_s3 + $0x418] sm:$0xff] }
 0x3e9   : > { %13471 = vmatprep.subr.bf16.mxu1 %v13470_v48  ;;  %v13526_v3 = vpack.c.bf16 %v8973_v45, %v8972_v5 }
 0x3eb   : > { %11656 = vmatmul.mubr.f32.gmra.mrb[6].mxu1 %v16651_v20 }
 0x3ec   : > { %13473 = vmatpush3.bf16.msra.mxu1 %v13470_v48  ;;  %11690 = vmatprep.mubr.f32.mxu1 %v16375_v14  ;;  %v8953_v14 = vld [vmem:[%s18520_s3 + $0x378] sm:$0xff]  ;;  %v8974_v48 = vld [vmem:[%s18520_s3 + $0x420] sm:$0xff] }
 0x3ed   : > { %13475 = vmatprep.subr.bf16.mxu1 %v13474_v12  ;;  %v13486_v7 = vpack.c.bf16 %v8953_v14, %v8952_v24  ;;  %v4589_v24 = vld [vmem:[#allocation3 + $0x91] sm:$0xff] }
 0x3f0   : > { %13477 = vmatpush3.bf16.msra.mxu1 %v13474_v12  ;;  %v13530_v12 = vpack.c.bf16 %v8975_v28, %v8974_v48  ;;  %v4900_v48 = vld [vmem:[%s18522_s5 + $0x18] sm:$0xff] }
 0x3f1   : > { %13479 = vmatprep.subr.bf16.mxu1 %v13478_v29 }
 0x3f4   : > { %13481 = vmatpush3.bf16.msra.mxu1 %v13478_v29  ;;  %v8977_v29 = vld [vmem:[%s18520_s3 + $0x438] sm:$0xff] }
 0x3f5   : > { %13483 = vmatprep.subr.bf16.mxu1 %v13482_v23  ;;  %v13534_v16 = vpack.c.bf16 %v8977_v29, %v8976_v18 }
 0x3f8   : > { %13485 = vmatpush3.bf16.msra.mxu1 %v13482_v23  ;;  %v8979_v23 = vld [vmem:[%s18520_s3 + $0x448] sm:$0xff] }
 0x3f9   : > { %13487 = vmatprep.subr.bf16.mxu1 %v13486_v7  ;;  %v13538_v14 = vpack.c.bf16 %v8979_v23, %v8978_v33  ;;  %v4901_v33 = vld [vmem:[%s18522_s5 + $0x20] sm:$0xff]  ;;  %v4902_v23 = vld [vmem:[%s18522_s5 + $0x28] sm:$0xff] }
 0x3fc   : > { %13489 = vmatpush3.bf16.msra.mxu1 %v13486_v7  ;;  %v8981_v7 = vld [vmem:[%s18520_s3 + $0x458] sm:$0xff] }
 0x3fd   : > { %13491 = vmatprep.subr.bf16.mxu1 %v13490_v32 }
 0x3ff   : > { %11691 = vmatmul.mubr.f32.vlgmr.msra.gmra.mrb[0].mxu1 %v16385_v19  ;;  %v13502_v19 = vpack.c.bf16 %v8961_v63, %v8960_v27  ;;  %v8991_v63 = vld [vmem:[%s18522_s5 + $0xa0] sm:$0xff] }
 0x400   : > { %11693 = vmatprep.mubr.f32.mxu1 %v16395_v22  ;;  %13493 = vmatpush3.bf16.msra.mxu1 %v13490_v32  ;;  %v8962_v22 = vld [vmem:[%s18520_s3 + $0x3c0] sm:$0xff]  ;;  %v8984_v32 = vld [vmem:[%s18520_s3 + $0x470] sm:$0xff] }
 0x401   : > { %13495 = vmatprep.subr.bf16.mxu1 %v13494_v13 }
 0x403   : > { %11694 = vmatmul.mubr.f32.gmra.mrb[2].mxu1 %v16398_v34  ;;  %v13506_v34 = vpack.c.bf16 %v8963_v26, %v8962_v22  ;;  %v8993_v26 = vld [vmem:[%s18522_s5 + $0xb0] sm:$0xff] }
 0x404   : > { %11696 = vmatprep.mubr.f32.mxu1 %v16407_v0  ;;  %13497 = vmatpush3.bf16.msra.mxu1 %v13494_v13  ;;  %v8964_v0 = vld [vmem:[%s18520_s3 + $0x3d0] sm:$0xff]  ;;  %v8988_v13 = vld [vmem:[%s18522_s5 + $0x88] sm:$0xff] }
 0x405   : > { %13499 = vmatprep.subr.bf16.mxu1 %v13498_v15  ;;  %v13554_v43 = vpack.c.bf16 %v8988_v13, %v8987_v6 }
 0x407   : > { %11697 = vmatmul.mubr.f32.gmra.mrb[4].mxu1 %v16410_v38  ;;  %v13510_v38 = vpack.c.bf16 %v8965_v47, %v8964_v0  ;;  %v8996_v0 = vld [vmem:[%s18522_s5 + $0xc8] sm:$0xff] }
 0x408   : > { %11699 = vmatprep.mubr.f32.mxu1 %v16537_v10  ;;  %13501 = vmatpush3.bf16.msra.mxu1 %v13498_v15  ;;  %v8966_v10 = vld [vmem:[%s18520_s3 + $0x3e0] sm:$0xff]  ;;  %v8990_v15 = vld [vmem:[%s18522_s5 + $0x98] sm:$0xff] }
 0x409   : > { %13503 = vmatprep.subr.bf16.mxu1 %v13502_v19  ;;  %v13514_v39 = vpack.c.bf16 %v8967_v62, %v8966_v10  ;;  %v13558_v27 = vpack.c.bf16 %v8990_v15, %v8989_v42  ;;  %v4727_v47 = vld [vmem:[#allocation3 + $0x92] sm:$0xff]  ;;  %v9001_v62 = vld [vmem:[%s18522_s5 + $0xf0] sm:$0xff] }
 0x40b   : > { %11700 = vmatmul.mubr.f32.gmra.mrb[6].mxu1 %v16360_v52 }
 0x40c   : > { %13505 = vmatpush3.bf16.msra.mxu1 %v13502_v19  ;;  %11734 = vmatprep.mubr.f32.mxu1 %v4582_v21  ;;  %v8992_v19 = vld [vmem:[%s18522_s5 + $0xa8] sm:$0xff]  ;;  %v8998_v21 = vld [vmem:[%s18522_s5 + $0xd8] sm:$0xff] }
 0x40d   : > { %13507 = vmatprep.subr.bf16.mxu1 %v13506_v34  ;;  %v13562_v22 = vpack.c.bf16 %v8992_v19, %v8991_v63  ;;  %v4906_v63 = vld [vmem:[%s18522_s5 + $0x48] sm:$0xff] }
 0x410   : > { %13509 = vmatpush3.bf16.msra.mxu1 %v13506_v34  ;;  %v8994_v34 = vld [vmem:[%s18522_s5 + $0xb8] sm:$0xff] }
 0x411   : > { %13511 = vmatprep.subr.bf16.mxu1 %v13510_v38 }
 0x414   : > { %13513 = vmatpush3.bf16.msra.mxu1 %v13510_v38 }
 0x415   : > { %13515 = vmatprep.subr.bf16.mxu1 %v13514_v39 }
 0x418   : > { %13517 = vmatpush3.bf16.msra.mxu1 %v13514_v39  ;;  %v9002_v39 = vld [vmem:[%s18522_s5 + $0xf8] sm:$0xff] }
 0x419   : > { %13519 = vmatprep.subr.bf16.mxu1 %v13518_v55  ;;  %v13582_v11 = vpack.c.bf16 %v9002_v39, %v9001_v62  ;;  %v9005_v62 = vld [vmem:[%s18522_s5 + $0x110] sm:$0xff]  ;;  %v9006_v39 = vld [vmem:[%s18522_s5 + $0x118] sm:$0xff] }
 0x41c   : > { %13521 = vmatpush3.bf16.msra.mxu1 %v13518_v55  ;;  %v4898_v55 = vld [vmem:[%s18522_s5 + $0x8] sm:$0xff] }
 0x41d   : > { %13523 = vmatprep.subr.bf16.mxu1 %v13522_v51  ;;  %v13586_v59 = vpack.c.bf16 %v4898_v55, %v4897_v41  ;;  %v9007_v55 = vld [vmem:[%s18522_s5 + $0x120] sm:$0xff] }
 0x41f   : > { %11735 = vmatmul.mubr.f32.vlgmr.msra.gmra.mrb[0].mxu1 %v4583_v56  ;;  %v4899_v56 = vld [vmem:[%s18522_s5 + $0x10] sm:$0xff] }
 0x420   : > { %11737 = vmatprep.mubr.f32.mxu1 %v4584_v17  ;;  %13525 = vmatpush3.bf16.msra.mxu1 %v13522_v51  ;;  %v8986_v51 = vld [vmem:[%s18521_s4] ss:$0 sm:$0xff]  ;;  %v13590_v18 = vpack.c.bf16 %v4900_v48, %v4899_v56 }
 0x421   : > { %13527 = vmatprep.subr.bf16.mxu1 %v13526_v3 }
 0x423   : > { %11738 = vmatmul.mubr.f32.gmra.mrb[2].mxu1 %v4585_v4 }
 0x424   : > { %11740 = vmatprep.mubr.f32.mxu1 %v16333_v46  ;;  %13529 = vmatpush3.bf16.msra.mxu1 %v13526_v3  ;;  %v8980_v46 = vld [vmem:[%s18520_s3 + $0x450] sm:$0xff] }
 0x425   : > { %13531 = vmatprep.subr.bf16.mxu1 %v13530_v12 }
 0x427   : > { %11741 = vmatmul.mubr.f32.gmra.mrb[4].mxu1 %v16347_v30  ;;  %v13542_v30 = vpack.c.bf16 %v8981_v7, %v8980_v46 }
 0x428   : > { %11743 = vmatprep.mubr.f32.mxu1 %v16383_v44  ;;  %13533 = vmatpush3.bf16.msra.mxu1 %v13530_v12  ;;  %v8982_v44 = vld [vmem:[%s18520_s3 + $0x460] sm:$0xff] }
 0x429   : > { %13535 = vmatprep.subr.bf16.mxu1 %v13534_v16  ;;  %v13546_v58 = vpack.c.bf16 %v8983_v37, %v8982_v44 }
 0x42b   : > { %11744 = vmatmul.mubr.f32.gmra.mrb[6].mxu1 %v4589_v24 }
 0x42c   : > { %13537 = vmatpush3.bf16.msra.mxu1 %v13534_v16  ;;  %11778 = vmatprep.mubr.f32.mxu1 %v16452_v53  ;;  %v8985_v53 = vld [vmem:[%s18520_s3 + $0x478] sm:$0xff] }
 0x42d   : > { %13539 = vmatprep.subr.bf16.mxu1 %v13538_v14  ;;  %v13550_v40 = vpack.c.bf16 %v8985_v53, %v8984_v32  ;;  %v4904_v32 = vld [vmem:[%s18522_s5 + $0x38] sm:$0xff] }
 0x430   : > { %13541 = vmatpush3.bf16.msra.mxu1 %v13538_v14 }
 0x431   : > { %13543 = vmatprep.subr.bf16.mxu1 %v13542_v30 }
 0x434   : > { %13545 = vmatpush3.bf16.msra.mxu1 %v13542_v30  ;;  %v13594_v30 = vpack.c.bf16 %v4902_v23, %v4901_v33  ;;  %v5148_v33 = vld [vmem:[#allocation3 + $0x2] sm:$0xff] }
 0x435   : > { %13547 = vmatprep.subr.bf16.mxu1 %v13546_v58 }
 0x438   : > { %13549 = vmatpush3.bf16.msra.mxu1 %v13546_v58  ;;  %v4903_v58 = vld [vmem:[%s18522_s5 + $0x30] sm:$0xff] }
 0x439   : > { %13551 = vmatprep.subr.bf16.mxu1 %v13550_v40 }
 0x43c   : > { %13553 = vmatpush3.bf16.msra.mxu1 %v13550_v40 }
 0x43d   : > { %13555 = vmatprep.subr.bf16.mxu1 %v13554_v43 }
 0x43f   : > { %11779 = vmatmul.mubr.f32.vlgmr.msra.gmra.mrb[0].mxu1 %v16455_v2  ;;  %v13566_v2 = vpack.c.bf16 %v8994_v34, %v8993_v26 }
 0x440   : > { %11781 = vmatprep.mubr.f32.mxu1 %v16464_v31  ;;  %13557 = vmatpush3.bf16.msra.mxu1 %v13554_v43  ;;  %v8995_v31 = vld [vmem:[%s18522_s5 + $0xc0] sm:$0xff]  ;;  %v13598_v43 = vpack.c.bf16 %v4904_v32, %v4903_v58  ;;  %v9017_v32 = vld [vmem:[%s18522_s5 + $0x170] sm:$0xff] }
 0x441   : > { %13559 = vmatprep.subr.bf16.mxu1 %v13558_v27 }
 0x443   : > { %11782 = vmatmul.mubr.f32.gmra.mrb[2].mxu1 %v16467_v8  ;;  %v13570_v8 = vpack.c.bf16 %v8996_v0, %v8995_v31  ;;  %v4908_v31 = vld [vmem:[%s18522_s5 + $0x58] sm:$0xff] }
 0x444   : > { %11784 = vmatprep.mubr.f32.mxu1 %v16476_v57  ;;  %13561 = vmatpush3.bf16.msra.mxu1 %v13558_v27  ;;  %v8997_v57 = vld [vmem:[%s18522_s5 + $0xd0] sm:$0xff]  ;;  %v4905_v27 = vld [vmem:[%s18522_s5 + $0x40] sm:$0xff] }
 0x445   : > { %13563 = vmatprep.subr.bf16.mxu1 %v13562_v22  ;;  %v13574_v38 = vpack.c.bf16 %v8998_v21, %v8997_v57  ;;  %v13602_v34 = vpack.c.bf16 %v4906_v63, %v4905_v27  ;;  %v4911_v21 = vld [vmem:[%s18522_s5 + $0x70] sm:$0xff]  ;;  %v9022_v63 = vld [vmem:[%s18522_s5 + $0x198] sm:$0xff] }
 0x446   : > { %v9021_v27 = vld [vmem:[%s18522_s5 + $0x190] sm:$0xff] }
 0x447   : > { %11785 = vmatmul.mubr.f32.gmra.mrb[4].mxu1 %v16479_v35  ;;  %v8999_v35 = vld [vmem:[%s18522_s5 + $0xe0] sm:$0xff] }
 0x448   : > { %11787 = vmatprep.mubr.f32.mxu1 %v16651_v20  ;;  %13565 = vmatpush3.bf16.msra.mxu1 %v13562_v22  ;;  %v9000_v20 = vld [vmem:[%s18522_s5 + $0xe8] sm:$0xff] }
 0x449   : > { %13567 = vmatprep.subr.bf16.mxu1 %v13566_v2  ;;  %v13578_v10 = vpack.c.bf16 %v9000_v20, %v8999_v35  ;;  %v9003_v35 = vld [vmem:[%s18522_s5 + $0x100] sm:$0xff]  ;;  %v9004_v20 = vld [vmem:[%s18522_s5 + $0x108] sm:$0xff] }
 0x44b   : > { %11788 = vmatmul.mubr.f32.gmra.mrb[6].mxu1 %v4727_v47  ;;  %v4909_v47 = vld [vmem:[%s18522_s5 + $0x60] sm:$0xff] }
 0x44c   : > { %13569 = vmatpush3.bf16.msra.mxu1 %v13566_v2  ;;  %11822 = vmatprep.mubr.f32.mxu1 %v4913_v61  ;;  %v4907_v2 = vld [vmem:[%s18522_s5 + $0x50] sm:$0xff] }
 0x44d   : > { %13571 = vmatprep.subr.bf16.mxu1 %v13570_v8  ;;  %v13606_v0 = vpack.c.bf16 %v4908_v31, %v4907_v2  ;;  %v9023_v2 = vld [vmem:[%s18522_s5 + $0x1a0] sm:$0xff]  ;;  %v9024_v31 = vld [vmem:[%s18522_s5 + $0x1a8] sm:$0xff] }
 0x450   : > { %13573 = vmatpush3.bf16.msra.mxu1 %v13570_v8  ;;  %v4910_v8 = vld [vmem:[%s18522_s5 + $0x68] sm:$0xff] }
 0x451   : > { %13575 = vmatprep.subr.bf16.mxu1 %v13574_v38  ;;  %v13610_v57 = vpack.c.bf16 %v4910_v8, %v4909_v47  ;;  %v13658_v47 = vpack.c.bf16 %v9024_v31, %v9023_v2  ;;  %v9046_v2 = vld [vmem:[%s18522_s5 + $0x258] sm:$0xff] }
 0x454   : > { %13577 = vmatpush3.bf16.msra.mxu1 %v13574_v38 }
 0x455   : > { %13579 = vmatprep.subr.bf16.mxu1 %v13578_v10 }
 0x458   : > { %13581 = vmatpush3.bf16.msra.mxu1 %v13578_v10  ;;  %v13618_v10 = vpack.c.bf16 %v9004_v20, %v9003_v35  ;;  %v9027_v20 = vld [vmem:[%s18522_s5 + $0x1c0] sm:$0xff] }
 0x459   : > { %13583 = vmatprep.subr.bf16.mxu1 %v13582_v11 }
 0x45c   : > { %13585 = vmatpush3.bf16.msra.mxu1 %v13582_v11  ;;  %v13622_v11 = vpack.c.bf16 %v9006_v39, %v9005_v62 }
 0x45d   : > { %13587 = vmatprep.subr.bf16.mxu1 %v13586_v59 }
 0x512   : > { %v11780_v5 = vpop.f32.mrb[0].mxu1 }
 0x513   : > { %v4866_v45 = vadd.f32 %v11780_v5, %v8986_v51  ;;  %v4811_v3 = vpop.f32.mrb[1].mxu1 }
 0x514   : > { %v4865_v28 = vadd.f32 %v8986_v51, %v4811_v3  ;;  %v9010_v3 = vld [vmem:[%s18522_s5 + $0x138] sm:$0xff] }
 0x515   : > { %v16849_v17 = vmax.f32 %v4866_v45, 0.0  ;;  %v9009_v45 = vld [vmem:[%s18522_s5 + $0x130] sm:$0xff] }
 0x516   : > { %v16851_v12 = vmax.f32 %v4865_v28, 0.0  ;;  %v11783_v4 = vpop.f32.mrb[2].mxu1  ;;  %v13630_v48 = vpack.c.bf16 %v9010_v3, %v9009_v45  ;;  %v9031_v45 = vld [vmem:[%s18522_s5 + $0x1e0] sm:$0xff]  ;;  %v9032_v3 = vld [vmem:[%s18522_s5 + $0x1e8] sm:$0xff] }
 0x517   : > { %4882 = vst [vmem:[#allocation3 + $0x21] sm:$0xff] %v16849_v17  ;;  %v4868_v29 = vadd.f32 %v11783_v4, %v8986_v51  ;;  %v4821_v16 = vpop.f32.mrb[3].mxu1  ;;  %v9011_v4 = vld [vmem:[%s18522_s5 + $0x140] sm:$0xff] }
 0x518   : > { %4881 = vst [vmem:[#allocation3 + $0x11] sm:$0xff] %v16851_v12  ;;  %v4867_v24 = vadd.f32 %v8986_v51, %v4821_v16  ;;  %11823 = vmatmul.mubr.f32.vlgmr.msra.gmra.mrb[8].mxu1 %v16851_v12 }
 0x519   : > { %v16862_v14 = vmax.f32 %v4868_v29, 0.0  ;;  %13589 = vmatpush3.bf16.msra.mxu1 %v13586_v59  ;;  %11825 = vmatprep.mubr.f32.mxu1 %v16849_v17  ;;  %v9008_v59 = vld [vmem:[%s18522_s5 + $0x128] sm:$0xff] }
 0x51a   : > { %v16865_v46 = vmax.f32 %v4867_v24, 0.0  ;;  %v11786_v7 = vpop.f32.mrb[4].mxu1  ;;  %13591 = vmatprep.subr.bf16.mxu1 %v13590_v18  ;;  %v9013_v24 = vld [vmem:[%s18522_s5 + $0x150] sm:$0xff] }
 0x51b   : > { %4884 = vst [vmem:[#allocation3 + $0x41] sm:$0xff] %v16862_v14  ;;  %v4870_v44 = vadd.f32 %v11786_v7, %v8986_v51  ;;  %v4831_v37 = vpop.f32.mrb[5].mxu1  ;;  %v9014_v7 = vld [vmem:[%s18522_s5 + $0x158] sm:$0xff] }
 0x51c   : > { %4883 = vst [vmem:[#allocation3 + $0x31] sm:$0xff] %v16865_v46  ;;  %v4869_v53 = vadd.f32 %v8986_v51, %v4831_v37  ;;  %11826 = vmatmul.mubr.f32.gmra.mrb[10].mxu1 %v16865_v46  ;;  %v9016_v37 = vld [vmem:[%s18522_s5 + $0x168] sm:$0xff] }
 0x51d   : > { %v16876_v40 = vmax.f32 %v4870_v44, 0.0  ;;  %13593 = vmatpush3.bf16.msra.mxu1 %v13590_v18  ;;  %11828 = vmatprep.mubr.f32.mxu1 %v16862_v14  ;;  %v9012_v18 = vld [vmem:[%s18522_s5 + $0x148] sm:$0xff]  ;;  %v9015_v44 = vld [vmem:[%s18522_s5 + $0x160] sm:$0xff] }
 0x51e   : > { %v16879_v6 = vmax.f32 %v4869_v53, 0.0  ;;  %v11789_v13 = vpop.f32.mrb[6].mxu1  ;;  %13595 = vmatprep.subr.bf16.mxu1 %v13594_v30  ;;  %v16938_v61 = vld [vmem:[#allocation3 + $0x20] sm:$0xff]  ;;  %v13634_v16 = vpack.c.bf16 %v9012_v18, %v9011_v4  ;;  %v13642_v58 = vpack.c.bf16 %v9016_v37, %v9015_v44  ;;  %v9018_v53 = vld [vmem:[%s18522_s5 + $0x178] sm:$0xff]  ;;  %v9039_v37 = vld [vmem:[%s18522_s5 + $0x220] sm:$0xff] }
 0x51f   : > { %4886 = vst [vmem:[#allocation3 + $0x61] sm:$0xff] %v16876_v40  ;;  %v4872_v42 = vadd.f32 %v11789_v13, %v8986_v51  ;;  %v4841_v15 = vpop.f32.mrb[7].mxu1  ;;  %v16929_v41 = vld [vmem:[#allocation3 + $0x10] sm:$0xff]  ;;  %v13646_v13 = vpack.c.bf16 %v9018_v53, %v9017_v32  ;;  %v9033_v4 = vld [vmem:[%s18522_s5 + $0x1f0] sm:$0xff] }
 0x520   : > { %4885 = vst [vmem:[#allocation3 + $0x51] sm:$0xff] %v16879_v6  ;;  %v4871_v19 = vadd.f32 %v8986_v51, %v4841_v15  ;;  %11829 = vmatmul.mubr.f32.gmra.mrb[12].mxu1 %v16879_v6  ;;  %v13626_v51 = vpack.c.bf16 %v9008_v59, %v9007_v55  ;;  %v9029_v55 = vld [vmem:[%s18522_s5 + $0x1d0] sm:$0xff]  ;;  %v9030_v59 = vld [vmem:[%s18522_s5 + $0x1d8] sm:$0xff] }
 0x521   : > { %v16890_v22 = vmax.f32 %v4872_v42, 0.0  ;;  %13597 = vmatpush3.bf16.msra.mxu1 %v13594_v30  ;;  %11831 = vmatprep.mubr.f32.mxu1 %v16876_v40  ;;  %v13638_v30 = vpack.c.bf16 %v9014_v7, %v9013_v24  ;;  %v9020_v42 = vld [vmem:[%s18522_s5 + $0x188] sm:$0xff]  ;;  %v9037_v7 = vld [vmem:[%s18522_s5 + $0x210] sm:$0xff] }
 0x522   : > { %v16893_v26 = vmax.f32 %v4871_v19, 0.0  ;;  %13599 = vmatprep.subr.bf16.mxu1 %v13598_v43  ;;  %v16950_v56 = vld [vmem:[#allocation3 + $0x40] sm:$0xff]  ;;  %v13654_v19 = vpack.c.bf16 %v9022_v63, %v9021_v27 }
 0x523   : > { %4888 = vst [vmem:[#allocation3 + $0x81] sm:$0xff] %v16890_v22  ;;  %v16941_v5 = vld [vmem:[#allocation3 + $0x30] sm:$0xff]  ;;  %v9041_v53 = vld [vmem:[%s18522_s5 + $0x230] sm:$0xff] }
 0x524   : > { %4887 = vst [vmem:[#allocation3 + $0x71] sm:$0xff] %v16893_v26  ;;  %11832 = vmatmul.mubr.f32.gmra.mrb[14].mxu1 %v16893_v26  ;;  %v17010_v8 = vld [vmem:[#allocation3 + $0x32] sm:$0xff] }
 0x525   : > { %13601 = vmatpush3.bf16.msra.mxu1 %v13598_v43  ;;  %11866 = vmatprep.mubr.f32.mxu1 %v16360_v52  ;;  %v4912_v52 = vld [vmem:[%s18522_s5 + $0x78] sm:$0xff]  ;;  %v9019_v43 = vld [vmem:[%s18522_s5 + $0x180] sm:$0xff] }
 0x526   : > { %13603 = vmatprep.subr.bf16.mxu1 %v13602_v34  ;;  %v13614_v38 = vpack.c.bf16 %v4912_v52, %v4911_v21  ;;  %v16962_v29 = vld [vmem:[#allocation3 + $0x60] sm:$0xff]  ;;  %v13650_v15 = vpack.c.bf16 %v9020_v42, %v9019_v43  ;;  %v9026_v21 = vld [vmem:[%s18522_s5 + $0x1b8] sm:$0xff]  ;;  %v9043_v42 = vld [vmem:[%s18522_s5 + $0x240] sm:$0xff] }
 0x527   : > { %v16953_v28 = vld [vmem:[#allocation3 + $0x50] sm:$0xff]  ;;  %v17019_v52 = vld [vmem:[#allocation3 + $0x42] sm:$0xff] }
 0x528   : > { %v17022_v35 = vld [vmem:[#allocation3 + $0x52] sm:$0xff]  ;;  %v17031_v62 = vld [vmem:[#allocation3 + $0x62] sm:$0xff] }
 0x529   : > { %13605 = vmatpush3.bf16.msra.mxu1 %v13602_v34  ;;  %v16998_v34 = vld [vmem:[#allocation3 + $0x12] sm:$0xff] }
 0x52a   : > { %13607 = vmatprep.subr.bf16.mxu1 %v13606_v0  ;;  %v17092_v63 = vld [vmem:[#allocation3 + $0x80] sm:$0xff] }
 0x52b   : > { %v16965_v23 = vld [vmem:[#allocation3 + $0x70] sm:$0xff] }
 0x52d   : > { %13609 = vmatpush3.bf16.msra.mxu1 %v13606_v0  ;;  %v17007_v0 = vld [vmem:[#allocation3 + $0x22] sm:$0xff] }
 0x52e   : > { %13611 = vmatprep.subr.bf16.mxu1 %v13610_v57 }
 0x531   : > { %13613 = vmatpush3.bf16.msra.mxu1 %v13610_v57  ;;  %v9025_v57 = vld [vmem:[%s18522_s5 + $0x1b0] sm:$0xff] }
 0x532   : > { %13615 = vmatprep.subr.bf16.mxu1 %v13614_v38 }
 0x535   : > { %13617 = vmatpush3.bf16.msra.mxu1 %v13614_v38  ;;  %v13662_v38 = vpack.c.bf16 %v9026_v21, %v9025_v57  ;;  %v9048_v57 = vld [vmem:[%s18522_s5 + $0x268] sm:$0xff] }
 0x536   : > { %13619 = vmatprep.subr.bf16.mxu1 %v13618_v10 }
 0x538   : > { %11867 = vmatmul.mubr.f32.vlgmr.msra.gmra.mrb[8].mxu1 %v16929_v41 }
 0x539   : > { %11869 = vmatprep.mubr.f32.mxu1 %v16938_v61  ;;  %13621 = vmatpush3.bf16.msra.mxu1 %v13618_v10  ;;  %v9028_v10 = vld [vmem:[%s18522_s5 + $0x1c8] sm:$0xff] }
 0x53a   : > { %13623 = vmatprep.subr.bf16.mxu1 %v13622_v11  ;;  %v13666_v39 = vpack.c.bf16 %v9028_v10, %v9027_v20  ;;  %v9051_v10 = vld [vmem:[%s18522_s5 + $0x280] sm:$0xff] }
 0x53c   : > { %11870 = vmatmul.mubr.f32.gmra.mrb[10].mxu1 %v16941_v5 }
 0x53d   : > { %11872 = vmatprep.mubr.f32.mxu1 %v16950_v56  ;;  %13625 = vmatpush3.bf16.msra.mxu1 %v13622_v11  ;;  %v17034_v11 = vld [vmem:[#allocation3 + $0x72] sm:$0xff] }
 0x53e   : > { %13627 = vmatprep.subr.bf16.mxu1 %v13626_v51 }
 0x540   : > { %11873 = vmatmul.mubr.f32.gmra.mrb[12].mxu1 %v16953_v28 }
 0x541   : > { %11875 = vmatprep.mubr.f32.mxu1 %v16962_v29  ;;  %13629 = vmatpush3.bf16.msra.mxu1 %v13626_v51  ;;  %v13670_v51 = vpack.c.bf16 %v9030_v59, %v9029_v55  ;;  %v9053_v59 = vld [vmem:[%s18522_s5 + $0x290] sm:$0xff] }
 0x542   : > { %13631 = vmatprep.subr.bf16.mxu1 %v13630_v48 }
 0x544   : > { %11876 = vmatmul.mubr.f32.gmra.mrb[14].mxu1 %v16965_v23 }
 0x545   : > { %13633 = vmatpush3.bf16.msra.mxu1 %v13630_v48  ;;  %11910 = vmatprep.mubr.f32.mxu1 %v5148_v33  ;;  %v13674_v48 = vpack.c.bf16 %v9032_v3, %v9031_v45  ;;  %v9036_v33 = vld [vmem:[%s18522_s5 + $0x208] sm:$0xff]  ;;  %v9055_v3 = vld [vmem:[%s18522_s5 + $0x2a0] sm:$0xff] }
 0x546   : > { %13635 = vmatprep.subr.bf16.mxu1 %v13634_v16 }
 0x549   : > { %13637 = vmatpush3.bf16.msra.mxu1 %v13634_v16  ;;  %v9035_v16 = vld [vmem:[%s18522_s5 + $0x200] sm:$0xff] }
 0x54a   : > { %13639 = vmatprep.subr.bf16.mxu1 %v13638_v30  ;;  %v13682_v24 = vpack.c.bf16 %v9036_v33, %v9035_v16  ;;  %v9059_v33 = vld [vmem:[%s18522_s5 + $0x2c0] sm:$0xff] }
 0x54d   : > { %13641 = vmatpush3.bf16.msra.mxu1 %v13638_v30  ;;  %v9038_v30 = vld [vmem:[%s18522_s5 + $0x218] sm:$0xff] }
 0x54e   : > { %13643 = vmatprep.subr.bf16.mxu1 %v13642_v58  ;;  %v13686_v44 = vpack.c.bf16 %v9038_v30, %v9037_v7  ;;  %v9061_v30 = vld [vmem:[%s18522_s5 + $0x2d0] sm:$0xff] }
 0x551   : > { %13645 = vmatpush3.bf16.msra.mxu1 %v13642_v58  ;;  %v9040_v58 = vld [vmem:[%s18522_s5 + $0x228] sm:$0xff] }
 0x552   : > { %13647 = vmatprep.subr.bf16.mxu1 %v13646_v13  ;;  %v13690_v32 = vpack.c.bf16 %v9040_v58, %v9039_v37  ;;  %v9116_v37 = vld [vmem:[%s18524_s7 + $0x80] sm:$0xff]  ;;  %v9117_v58 = vld [vmem:[%s18524_s7 + $0x88] sm:$0xff] }
 0x555   : > { %13649 = vmatpush3.bf16.msra.mxu1 %v13646_v13  ;;  %v9042_v13 = vld [vmem:[%s18522_s5 + $0x238] sm:$0xff] }
 0x556   : > { %13651 = vmatprep.subr.bf16.mxu1 %v13650_v15  ;;  %v13694_v43 = vpack.c.bf16 %v9042_v13, %v9041_v53  ;;  %v13842_v53 = vpack.c.bf16 %v9117_v58, %v9116_v37  ;;  %v9119_v13 = vld [vmem:[%s18524_s7 + $0x98] sm:$0xff]  ;;  %v9075_v58 = vld [vmem:[%s18522_s5 + $0x340] sm:$0xff] }
 0x558   : > { %11911 = vmatmul.mubr.f32.vlgmr.msra.gmra.mrb[8].mxu1 %v16998_v34  ;;  %13843 = vmatprep.subr.bf16.mxu0 %v13842_v53 }
 0x559   : > { %11913 = vmatprep.mubr.f32.mxu1 %v17007_v0  ;;  %13653 = vmatpush3.bf16.msra.mxu1 %v13650_v15  ;;  %v9044_v15 = vld [vmem:[%s18522_s5 + $0x248] sm:$0xff] }
 0x55a   : > { %13655 = vmatprep.subr.bf16.mxu1 %v13654_v19  ;;  %v13698_v27 = vpack.c.bf16 %v9044_v15, %v9043_v42  ;;  %v9120_v15 = vld [vmem:[%s18524_s7 + $0xa0] sm:$0xff]  ;;  %13845 = vmatpush3.bf16.msra.mxu0 %v13842_v53 }
 0x55c   : > { %11914 = vmatmul.mubr.f32.gmra.mrb[10].mxu1 %v17010_v8 }
 0x55d   : > { %11916 = vmatprep.mubr.f32.mxu1 %v17019_v52  ;;  %13657 = vmatpush3.bf16.msra.mxu1 %v13654_v19  ;;  %v9045_v19 = vld [vmem:[%s18522_s5 + $0x250] sm:$0xff] }
 0x55e   : > { %13659 = vmatprep.subr.bf16.mxu1 %v13658_v47  ;;  %v13702_v31 = vpack.c.bf16 %v9046_v2, %v9045_v19  ;;  %v9064_v19 = vld [vmem:[%s18522_s5 + $0x2e8] sm:$0xff] }
 0x560   : > { %11917 = vmatmul.mubr.f32.gmra.mrb[12].mxu1 %v17022_v35 }
 0x561   : > { %11919 = vmatprep.mubr.f32.mxu1 %v17031_v62  ;;  %13661 = vmatpush3.bf16.msra.mxu1 %v13658_v47  ;;  %v9047_v47 = vld [vmem:[%s18522_s5 + $0x260] sm:$0xff] }
 0x562   : > { %13663 = vmatprep.subr.bf16.mxu1 %v13662_v38  ;;  %v13706_v21 = vpack.c.bf16 %v9048_v57, %v9047_v47  ;;  %v9122_v47 = vld [vmem:[%s18524_s7 + $0xb0] sm:$0xff]  ;;  %v9123_v57 = vld [vmem:[%s18524_s7 + $0xb8] sm:$0xff] }
 0x564   : > { %11920 = vmatmul.mubr.f32.gmra.mrb[14].mxu1 %v17034_v11 }
 0x565   : > { %13665 = vmatpush3.bf16.msra.mxu1 %v13662_v38  ;;  %11954 = vmatprep.mubr.f32.mxu1 %v16929_v41  ;;  %v9034_v41 = vld [vmem:[%s18522_s5 + $0x1f8] sm:$0xff]  ;;  %v9049_v38 = vld [vmem:[%s18522_s5 + $0x270] sm:$0xff] }
 0x566   : > { %13667 = vmatprep.subr.bf16.mxu1 %v13666_v39  ;;  %v13678_v18 = vpack.c.bf16 %v9034_v41, %v9033_v4  ;;  %v9057_v41 = vld [vmem:[%s18522_s5 + $0x2b0] sm:$0xff] }
 0x569   : > { %13669 = vmatpush3.bf16.msra.mxu1 %v13666_v39  ;;  %v9052_v39 = vld [vmem:[%s18522_s5 + $0x288] sm:$0xff] }
 0x56a   : > { %13671 = vmatprep.subr.bf16.mxu1 %v13670_v51  ;;  %v13714_v55 = vpack.c.bf16 %v9052_v39, %v9051_v10  ;;  %v9124_v10 = vld [vmem:[%s18524_s7 + $0xc0] sm:$0xff]  ;;  %v9125_v39 = vld [vmem:[%s18524_s7 + $0xc8] sm:$0xff] }
 0x56d   : > { %13673 = vmatpush3.bf16.msra.mxu1 %v13670_v51  ;;  %v9054_v51 = vld [vmem:[%s18522_s5 + $0x298] sm:$0xff] }
 0x56e   : > { %13675 = vmatprep.subr.bf16.mxu1 %v13674_v48  ;;  %v13718_v45 = vpack.c.bf16 %v9054_v51, %v9053_v59  ;;  %v9068_v59 = vld [vmem:[%s18522_s5 + $0x308] sm:$0xff]  ;;  %v13858_v51 = vpack.c.bf16 %v9125_v39, %v9124_v10  ;;  %v9087_v10 = vld [vmem:[%s18522_s5 + $0x3a0] sm:$0xff] }
 0x56f   : > { %v9088_v39 = vld [vmem:[%s18522_s5 + $0x3a8] sm:$0xff] }
 0x571   : > { %13677 = vmatpush3.bf16.msra.mxu1 %v13674_v48  ;;  %v9056_v48 = vld [vmem:[%s18522_s5 + $0x2a8] sm:$0xff] }
 0x572   : > { %13679 = vmatprep.subr.bf16.mxu1 %v13678_v18  ;;  %v13722_v4 = vpack.c.bf16 %v9056_v48, %v9055_v3  ;;  %v9069_v3 = vld [vmem:[%s18522_s5 + $0x310] sm:$0xff]  ;;  %v9070_v48 = vld [vmem:[%s18522_s5 + $0x318] sm:$0xff] }
 0x575   : > { %13681 = vmatpush3.bf16.msra.mxu1 %v13678_v18  ;;  %v9058_v18 = vld [vmem:[%s18522_s5 + $0x2b8] sm:$0xff] }
 0x576   : > { %13683 = vmatprep.subr.bf16.mxu1 %v13682_v24  ;;  %v13726_v16 = vpack.c.bf16 %v9058_v18, %v9057_v41  ;;  %v9127_v41 = vld [vmem:[%s18524_s7 + $0xd8] sm:$0xff]  ;;  %v13750_v18 = vpack.c.bf16 %v9070_v48, %v9069_v3  ;;  %v17306_v48 = vld [vmem:[#allocation2] sm:$0xff] }
 0x577   : > { %v9094_v3 = vld [vmem:[%s18522_s5 + $0x3d8] sm:$0xff] }
 0x578   : > { %11955 = vmatmul.mubr.f32.vlgmr.msra.gmra.mrb[8].mxu1 %v16938_v61 }
 0x579   : > { %11957 = vmatprep.mubr.f32.mxu1 %v16941_v5  ;;  %13685 = vmatpush3.bf16.msra.mxu1 %v13682_v24  ;;  %v9060_v24 = vld [vmem:[%s18522_s5 + $0x2c8] sm:$0xff] }
 0x57a   : > { %13687 = vmatprep.subr.bf16.mxu1 %v13686_v44  ;;  %v13730_v7 = vpack.c.bf16 %v9060_v24, %v9059_v33  ;;  %v9071_v33 = vld [vmem:[%s18522_s5 + $0x320] sm:$0xff]  ;;  %v9072_v24 = vld [vmem:[%s18522_s5 + $0x328] sm:$0xff] }
 0x57c   : > { %11958 = vmatmul.mubr.f32.gmra.mrb[10].mxu1 %v16950_v56 }
 0x57d   : > { %11960 = vmatprep.mubr.f32.mxu1 %v16953_v28  ;;  %13689 = vmatpush3.bf16.msra.mxu1 %v13686_v44  ;;  %v9062_v44 = vld [vmem:[%s18522_s5 + $0x2d8] sm:$0xff] }
 0x57e   : > { %13691 = vmatprep.subr.bf16.mxu1 %v13690_v32 }
 0x580   : > { %11961 = vmatmul.mubr.f32.gmra.mrb[12].mxu1 %v16962_v29 }
 0x581   : > { %11963 = vmatprep.mubr.f32.mxu1 %v16965_v23  ;;  %13693 = vmatpush3.bf16.msra.mxu1 %v13690_v32  ;;  %v9118_v32 = vld [vmem:[%s18524_s7 + $0x90] sm:$0xff] }
 0x582   : > { %13695 = vmatprep.subr.bf16.mxu1 %v13694_v43  ;;  %v13846_v42 = vpack.c.bf16 %v9119_v13, %v9118_v32  ;;  %v9076_v32 = vld [vmem:[%s18522_s5 + $0x348] sm:$0xff]  ;;  %v17242_v13 = vld [vmem:[#allocation3 + $0x82] sm:$0xff] }
 0x583   : > { %v13762_v53 = vpack.c.bf16 %v9076_v32, %v9075_v58  ;;  %v9103_v58 = vld [vmem:[%s18522_s5 + $0x420] sm:$0xff]  ;;  %v9104_v32 = vld [vmem:[%s18522_s5 + $0x428] sm:$0xff] }
 0x584   : > { %11964 = vmatmul.mubr.f32.gmra.mrb[14].mxu1 %v17092_v63  ;;  %13847 = vmatprep.subr.bf16.mxu0 %v13846_v42 }
 0x585   : > { %13697 = vmatpush3.bf16.msra.mxu1 %v13694_v43  ;;  %11998 = vmatprep.mubr.f32.mxu1 %v16851_v12  ;;  %v9050_v12 = vld [vmem:[%s18522_s5 + $0x278] sm:$0xff]  ;;  %v13734_v43 = vpack.c.bf16 %v9062_v44, %v9061_v30  ;;  %v9073_v30 = vld [vmem:[%s18522_s5 + $0x330] sm:$0xff] }
 0x586   : > { %13699 = vmatprep.subr.bf16.mxu1 %v13698_v27  ;;  %v13710_v20 = vpack.c.bf16 %v9050_v12, %v9049_v38  ;;  %v9066_v38 = vld [vmem:[%s18522_s5 + $0x2f8] sm:$0xff]  ;;  %13849 = vmatpush3.bf16.msra.mxu0 %v13846_v42  ;;  %v13854_v12 = vpack.c.bf16 %v9123_v57, %v9122_v47  ;;  %v9083_v47 = vld [vmem:[%s18522_s5 + $0x380] sm:$0xff]  ;;  %v9084_v57 = vld [vmem:[%s18522_s5 + $0x388] sm:$0xff] }
 0x587   : > { %v9074_v44 = vld [vmem:[%s18522_s5 + $0x338] sm:$0xff] }
 0x588   : > { %v13758_v37 = vpack.c.bf16 %v9074_v44, %v9073_v30  ;;  %v9078_v42 = vld [vmem:[%s18522_s5 + $0x358] sm:$0xff]  ;;  %v9101_v30 = vld [vmem:[%s18522_s5 + $0x410] sm:$0xff] }
 0x589   : > { %13701 = vmatpush3.bf16.msra.mxu1 %v13698_v27  ;;  %v9121_v27 = vld [vmem:[%s18524_s7 + $0xa8] sm:$0xff]  ;;  %v9102_v44 = vld [vmem:[%s18522_s5 + $0x418] sm:$0xff] }
 0x58a   : > { %13703 = vmatprep.subr.bf16.mxu1 %v13702_v31  ;;  %v13850_v2 = vpack.c.bf16 %v9121_v27, %v9120_v15  ;;  %v9079_v27 = vld [vmem:[%s18522_s5 + $0x360] sm:$0xff] }
 0x58c   : > { %13851 = vmatprep.subr.bf16.mxu0 %v13850_v2 }
 0x58d   : > { %13705 = vmatpush3.bf16.msra.mxu1 %v13702_v31  ;;  %13853 = vmatpush3.bf16.msra.mxu0 %v13850_v2  ;;  %v9081_v2 = vld [vmem:[%s18522_s5 + $0x370] sm:$0xff] }
 0x58e   : > { %13707 = vmatprep.subr.bf16.mxu1 %v13706_v21  ;;  %13855 = vmatprep.subr.bf16.mxu0 %v13854_v12 }
 0x591   : > { %13709 = vmatpush3.bf16.msra.mxu1 %v13706_v21  ;;  %v9065_v21 = vld [vmem:[%s18522_s5 + $0x2f0] sm:$0xff]  ;;  %13857 = vmatpush3.bf16.msra.mxu0 %v13854_v12  ;;  %v9086_v12 = vld [vmem:[%s18522_s5 + $0x398] sm:$0xff] }
 0x592   : > { %13711 = vmatprep.subr.bf16.mxu1 %v13710_v20  ;;  %13859 = vmatprep.subr.bf16.mxu0 %v13858_v51 }
 0x595   : > { %13713 = vmatpush3.bf16.msra.mxu1 %v13710_v20  ;;  %v13742_v20 = vpack.c.bf16 %v9066_v38, %v9065_v21  ;;  %13861 = vmatpush3.bf16.msra.mxu0 %v13858_v51  ;;  %v13778_v21 = vpack.c.bf16 %v9084_v57, %v9083_v47  ;;  %v9085_v38 = vld [vmem:[%s18522_s5 + $0x390] sm:$0xff]  ;;  %v9090_v51 = vld [vmem:[%s18522_s5 + $0x3b8] sm:$0xff]  ;;  %v5983_v47 = vld [vmem:[#allocation3 + $0x92] sm:$0xff] }
 0x596   : > { %13715 = vmatprep.subr.bf16.mxu1 %v13714_v55  ;;  %v9128_v57 = vld [vmem:[%s18524_s7 + $0xe0] sm:$0xff] }
 0x598   : > { %11999 = vmatmul.mubr.f32.vlgmr.msra.gmra.mrb[8].mxu1 %v16849_v17 }
 0x599   : > { %12001 = vmatprep.mubr.f32.mxu1 %v16865_v46  ;;  %13717 = vmatpush3.bf16.msra.mxu1 %v13714_v55  ;;  %v9067_v55 = vld [vmem:[%s18522_s5 + $0x300] sm:$0xff] }
 0x59a   : > { %13719 = vmatprep.subr.bf16.mxu1 %v13718_v45 }
 0x59c   : > { %12002 = vmatmul.mubr.f32.gmra.mrb[10].mxu1 %v16862_v14 }
 0x59d   : > { %12004 = vmatprep.mubr.f32.mxu1 %v16879_v6  ;;  %13721 = vmatpush3.bf16.msra.mxu1 %v13718_v45  ;;  %v13746_v45 = vpack.c.bf16 %v9068_v59, %v9067_v55  ;;  %v13786_v55 = vpack.c.bf16 %v9088_v39, %v9087_v10  ;;  %v9089_v59 = vld [vmem:[%s18522_s5 + $0x3b0] sm:$0xff] }
 0x59e   : > { %13723 = vmatprep.subr.bf16.mxu1 %v13722_v4 }
 0x5a0   : > { %12005 = vmatmul.mubr.f32.gmra.mrb[12].mxu1 %v16876_v40 }
 0x5a1   : > { %12007 = vmatprep.mubr.f32.mxu1 %v16893_v26  ;;  %13725 = vmatpush3.bf16.msra.mxu1 %v13722_v4  ;;  %v9126_v4 = vld [vmem:[%s18524_s7 + $0xd0] sm:$0xff] }
 0x5a2   : > { %13727 = vmatprep.subr.bf16.mxu1 %v13726_v16 }
 0x5a4   : > { %12008 = vmatmul.mubr.f32.gmra.mrb[14].mxu1 %v16890_v22 }
 0x5a5   : > { %13729 = vmatpush3.bf16.msra.mxu1 %v13726_v16  ;;  %12042 = vmatprep.mubr.f32.mxu1 %v16998_v34  ;;  %v9063_v34 = vld [vmem:[%s18522_s5 + $0x2e0] sm:$0xff]  ;;  %v13862_v16 = vpack.c.bf16 %v9127_v41, %v9126_v4  ;;  %v9096_v4 = vld [vmem:[%s18522_s5 + $0x3e8] sm:$0xff] }
 0x5a6   : > { %13731 = vmatprep.subr.bf16.mxu1 %v13730_v7  ;;  %v13738_v31 = vpack.c.bf16 %v9064_v19, %v9063_v34  ;;  %v9080_v34 = vld [vmem:[%s18522_s5 + $0x368] sm:$0xff] }
 0x5a7   : > { %13863 = vmatprep.subr.bf16.mxu0 %v13862_v16  ;;  %v13770_v19 = vpack.c.bf16 %v9080_v34, %v9079_v27  ;;  %v5845_v27 = vld [vmem:[#allocation3 + $0x91] sm:$0xff]  ;;  %v9110_v34 = vld [vmem:[%s18522_s5 + $0x458] sm:$0xff] }
 0x5a8   : > { %13865 = vmatpush3.bf16.msra.mxu0 %v13862_v16 }
 0x5a9   : > { %13733 = vmatpush3.bf16.msra.mxu1 %v13730_v7  ;;  %v13754_v7 = vpack.c.bf16 %v9072_v24, %v9071_v33  ;;  %v9099_v33 = vld [vmem:[%s18522_s5 + $0x400] sm:$0xff]  ;;  %v9100_v24 = vld [vmem:[%s18522_s5 + $0x408] sm:$0xff] }
 0x5aa   : > { %13735 = vmatprep.subr.bf16.mxu1 %v13734_v43 }
 0x5ad   : > { %13737 = vmatpush3.bf16.msra.mxu1 %v13734_v43  ;;  %v9077_v43 = vld [vmem:[%s18522_s5 + $0x350] sm:$0xff] }
 0x5ae   : > { %13739 = vmatprep.subr.bf16.mxu1 %v13738_v31  ;;  %v13766_v15 = vpack.c.bf16 %v9078_v42, %v9077_v43  ;;  %v9105_v43 = vld [vmem:[%s18522_s5 + $0x430] sm:$0xff]  ;;  %v9106_v42 = vld [vmem:[%s18522_s5 + $0x438] sm:$0xff] }
 0x5b1   : > { %13741 = vmatpush3.bf16.msra.mxu1 %v13738_v31 }
 0x5b2   : > { %13743 = vmatprep.subr.bf16.mxu1 %v13742_v20 }
 0x5b5   : > { %13745 = vmatpush3.bf16.msra.mxu1 %v13742_v20  ;;  %v13782_v20 = vpack.c.bf16 %v9086_v12, %v9085_v38  ;;  %v6177_v12 = vld [vmem:[#allocation3 + $0x1] sm:$0xff] }
 0x5b6   : > { %13747 = vmatprep.subr.bf16.mxu1 %v13746_v45  ;;  %12218 = vmatprep.mubr.f32.mxu0 %v6177_v12  ;;  %v9137_v12 = vld [vmem:[%s18524_s7 + $0x128] sm:$0xff] }
 0x5b8   : > { %12043 = vmatmul.mubr.f32.vlgmr.msra.gmra.mrb[8].mxu1 %v17007_v0 }
 0x5b9   : > { %12045 = vmatprep.mubr.f32.mxu1 %v17010_v8  ;;  %13749 = vmatpush3.bf16.msra.mxu1 %v13746_v45  ;;  %v9092_v45 = vld [vmem:[%s18522_s5 + $0x3c8] sm:$0xff] }
 0x5ba   : > { %13751 = vmatprep.subr.bf16.mxu1 %v13750_v18 }
 0x5bc   : > { %12046 = vmatmul.mubr.f32.gmra.mrb[10].mxu1 %v17019_v52 }
 0x5bd   : > { %12048 = vmatprep.mubr.f32.mxu1 %v17022_v35  ;;  %13753 = vmatpush3.bf16.msra.mxu1 %v13750_v18  ;;  %v9097_v18 = vld [vmem:[%s18522_s5 + $0x3f0] sm:$0xff] }
 0x5be   : > { %13755 = vmatprep.subr.bf16.mxu1 %v13754_v7 }
 0x5c0   : > { %12049 = vmatmul.mubr.f32.gmra.mrb[12].mxu1 %v17031_v62 }
 0x5c1   : > { %12051 = vmatprep.mubr.f32.mxu1 %v17034_v11  ;;  %13757 = vmatpush3.bf16.msra.mxu1 %v13754_v7  ;;  %v13810_v7 = vpack.c.bf16 %v9100_v24, %v9099_v33 }
 0x5c2   : > { %13759 = vmatprep.subr.bf16.mxu1 %v13758_v37 }
 0x5c4   : > { %12052 = vmatmul.mubr.f32.gmra.mrb[14].mxu1 %v17242_v13 }
 0x5c5   : > { %13761 = vmatpush3.bf16.msra.mxu1 %v13758_v37  ;;  %12086 = vmatprep.mubr.f32.mxu1 %v16938_v61  ;;  %v9082_v61 = vld [vmem:[%s18522_s5 + $0x378] sm:$0xff]  ;;  %v13814_v37 = vpack.c.bf16 %v9102_v44, %v9101_v30 }
 0x5c6   : > { %13763 = vmatprep.subr.bf16.mxu1 %v13762_v53  ;;  %v13774_v31 = vpack.c.bf16 %v9082_v61, %v9081_v2  ;;  %v9113_v61 = vld [vmem:[%s18522_s5 + $0x470] sm:$0xff] }
 0x5c9   : > { %13765 = vmatpush3.bf16.msra.mxu1 %v13762_v53  ;;  %v13818_v53 = vpack.c.bf16 %v9104_v32, %v9103_v58  ;;  %v6168_v58 = vld [vmem:[%s18524_s7 + $0x38] sm:$0xff] }
 0x5ca   : > { %13767 = vmatprep.subr.bf16.mxu1 %v13766_v15 }
 0x5cd   : > { %13769 = vmatpush3.bf16.msra.mxu1 %v13766_v15  ;;  %v9108_v15 = vld [vmem:[%s18522_s5 + $0x448] sm:$0xff] }
 0x5ce   : > { %13771 = vmatprep.subr.bf16.mxu1 %v13770_v19 }
 0x5d1   : > { %13773 = vmatpush3.bf16.msra.mxu1 %v13770_v19  ;;  %v9112_v19 = vld [vmem:[%s18522_s5 + $0x468] sm:$0xff] }
 0x5d2   : > { %13775 = vmatprep.subr.bf16.mxu1 %v13774_v31 }
 0x5d5   : > { %13777 = vmatpush3.bf16.msra.mxu1 %v13774_v31 }
 0x5d6   : > { %13779 = vmatprep.subr.bf16.mxu1 %v13778_v21 }
 0x5d8   : > { %12087 = vmatmul.mubr.f32.vlgmr.msra.gmra.mrb[8].mxu1 %v16941_v5  ;;  %v13790_v5 = vpack.c.bf16 %v9090_v51, %v9089_v59 }
 0x5d9   : > { %12089 = vmatprep.mubr.f32.mxu1 %v16950_v56  ;;  %13781 = vmatpush3.bf16.msra.mxu1 %v13778_v21  ;;  %v9091_v56 = vld [vmem:[%s18522_s5 + $0x3c0] sm:$0xff] }
 0x5da   : > { %13783 = vmatprep.subr.bf16.mxu1 %v13782_v20 }
 0x5dc   : > { %12090 = vmatmul.mubr.f32.gmra.mrb[10].mxu1 %v16953_v28  ;;  %v13794_v28 = vpack.c.bf16 %v9092_v45, %v9091_v56  ;;  %v6164_v56 = vld [vmem:[%s18524_s7 + $0x18] sm:$0xff] }
 0x5dd   : > { %12092 = vmatprep.mubr.f32.mxu1 %v16962_v29  ;;  %13785 = vmatpush3.bf16.msra.mxu1 %v13782_v20  ;;  %v9093_v29 = vld [vmem:[%s18522_s5 + $0x3d0] sm:$0xff]  ;;  %v9115_v20 = vld [vmem:[%s18523_s6] ss:$0 sm:$0xff] }
 0x5de   : > { %13787 = vmatprep.subr.bf16.mxu1 %v13786_v55 }
 0x5e0   : > { %12093 = vmatmul.mubr.f32.gmra.mrb[12].mxu1 %v16965_v23  ;;  %v13798_v23 = vpack.c.bf16 %v9094_v3, %v9093_v29 }
 0x5e1   : > { %12095 = vmatprep.mubr.f32.mxu1 %v17092_v63  ;;  %13789 = vmatpush3.bf16.msra.mxu1 %v13786_v55  ;;  %v9095_v63 = vld [vmem:[%s18522_s5 + $0x3e0] sm:$0xff] }
 0x5e2   : > { %13791 = vmatprep.subr.bf16.mxu1 %v13790_v5  ;;  %v13802_v41 = vpack.c.bf16 %v9096_v4, %v9095_v63 }
 0x5e4   : > { %12096 = vmatmul.mubr.f32.gmra.mrb[14].mxu1 %v17306_v48 }
 0x5e5   : > { %13793 = vmatpush3.bf16.msra.mxu1 %v13790_v5  ;;  %12130 = vmatprep.mubr.f32.mxu1 %v16849_v17  ;;  %v9098_v17 = vld [vmem:[%s18522_s5 + $0x3f8] sm:$0xff]  ;;  %v6163_v5 = vld [vmem:[%s18524_s7 + $0x10] sm:$0xff] }
 0x5e6   : > { %13795 = vmatprep.subr.bf16.mxu1 %v13794_v28  ;;  %v13806_v16 = vpack.c.bf16 %v9098_v17, %v9097_v18  ;;  %v13878_v4 = vpack.c.bf16 %v6164_v56, %v6163_v5  ;;  %v6166_v18 = vld [vmem:[%s18524_s7 + $0x28] sm:$0xff] }
 0x5e9   : > { %13797 = vmatpush3.bf16.msra.mxu1 %v13794_v28 }
 0x5ea   : > { %13799 = vmatprep.subr.bf16.mxu1 %v13798_v23 }
 0x5ed   : > { %13801 = vmatpush3.bf16.msra.mxu1 %v13798_v23 }
 0x5ee   : > { %13803 = vmatprep.subr.bf16.mxu1 %v13802_v41 }
 0x5f1   : > { %13805 = vmatpush3.bf16.msra.mxu1 %v13802_v41 }
 0x5f2   : > { %13807 = vmatprep.subr.bf16.mxu1 %v13806_v16 }
 0x5f5   : > { %13809 = vmatpush3.bf16.msra.mxu1 %v13806_v16 }
 0x5f6   : > { %13811 = vmatprep.subr.bf16.mxu1 %v13810_v7 }
 0x5f8   : > { %12131 = vmatmul.mubr.f32.vlgmr.msra.gmra.mrb[8].mxu1 %v16865_v46  ;;  %v13822_v46 = vpack.c.bf16 %v9106_v42, %v9105_v43 }
 0x5f9   : > { %12133 = vmatprep.mubr.f32.mxu1 %v16862_v14  ;;  %13813 = vmatpush3.bf16.msra.mxu1 %v13810_v7  ;;  %v9107_v14 = vld [vmem:[%s18522_s5 + $0x440] sm:$0xff] }
 0x5fa   : > { %13815 = vmatprep.subr.bf16.mxu1 %v13814_v37 }
 0x5fc   : > { %12134 = vmatmul.mubr.f32.gmra.mrb[10].mxu1 %v16879_v6  ;;  %v13826_v6 = vpack.c.bf16 %v9108_v15, %v9107_v14 }
 0x5fd   : > { %12136 = vmatprep.mubr.f32.mxu1 %v16876_v40  ;;  %13817 = vmatpush3.bf16.msra.mxu1 %v13814_v37  ;;  %v9109_v40 = vld [vmem:[%s18522_s5 + $0x450] sm:$0xff] }
 0x5fe   : > { %13819 = vmatprep.subr.bf16.mxu1 %v13818_v53  ;;  %v6167_v37 = vld [vmem:[%s18524_s7 + $0x30] sm:$0xff] }
 0x5ff   : > { %v13886_v15 = vpack.c.bf16 %v6168_v58, %v6167_v37  ;;  %v9146_v58 = vld [vmem:[%s18524_s7 + $0x170] sm:$0xff] }
 0x600   : > { %12137 = vmatmul.mubr.f32.gmra.mrb[12].mxu1 %v16893_v26  ;;  %v13830_v26 = vpack.c.bf16 %v9110_v34, %v9109_v40 }
 0x601   : > { %12139 = vmatprep.mubr.f32.mxu1 %v16890_v22  ;;  %13821 = vmatpush3.bf16.msra.mxu1 %v13818_v53  ;;  %v9111_v22 = vld [vmem:[%s18522_s5 + $0x460] sm:$0xff] }
 0x602   : > { %13823 = vmatprep.subr.bf16.mxu1 %v13822_v46  ;;  %v13834_v2 = vpack.c.bf16 %v9112_v19, %v9111_v22  ;;  %v6172_v22 = vld [vmem:[%s18524_s7 + $0x58] sm:$0xff] }
 0x604   : > { %12140 = vmatmul.mubr.f32.gmra.mrb[14].mxu1 %v5845_v27  ;;  %v6169_v27 = vld [vmem:[%s18524_s7 + $0x40] sm:$0xff] }
 0x605   : > { %13825 = vmatpush3.bf16.msra.mxu1 %v13822_v46  ;;  %12174 = vmatprep.mubr.f32.mxu1 %v17007_v0  ;;  %v9114_v0 = vld [vmem:[%s18522_s5 + $0x478] sm:$0xff] }
 0x606   : > { %13827 = vmatprep.subr.bf16.mxu1 %v13826_v6  ;;  %v13838_v31 = vpack.c.bf16 %v9114_v0, %v9113_v61  ;;  %v6174_v61 = vld [vmem:[%s18524_s7 + $0x68] sm:$0xff] }
 0x609   : > { %13829 = vmatpush3.bf16.msra.mxu1 %v13826_v6  ;;  %v6170_v6 = vld [vmem:[%s18524_s7 + $0x48] sm:$0xff] }
 0x60a   : > { %13831 = vmatprep.subr.bf16.mxu1 %v13830_v26 }
 0x60d   : > { %13833 = vmatpush3.bf16.msra.mxu1 %v13830_v26  ;;  %v13890_v26 = vpack.c.bf16 %v6170_v6, %v6169_v27  ;;  %v9150_v27 = vld [vmem:[%s18524_s7 + $0x190] sm:$0xff]  ;;  %v9151_v6 = vld [vmem:[%s18524_s7 + $0x198] sm:$0xff] }
 0x60e   : > { %13835 = vmatprep.subr.bf16.mxu1 %v13834_v2 }
 0x611   : > { %13837 = vmatpush3.bf16.msra.mxu1 %v13834_v2  ;;  %v6173_v2 = vld [vmem:[%s18524_s7 + $0x60] sm:$0xff] }
 0x612   : > { %13839 = vmatprep.subr.bf16.mxu1 %v13838_v31  ;;  %v13898_v0 = vpack.c.bf16 %v6174_v61, %v6173_v2 }
 0x615   : > { %13841 = vmatpush3.bf16.msra.mxu1 %v13838_v31  ;;  %v6175_v31 = vld [vmem:[%s18524_s7 + $0x70] sm:$0xff] }
 0x618   : > { %12175 = vmatmul.mubr.f32.vlgmr.msra.gmra.mrb[8].mxu1 %v17010_v8  ;;  %v9129_v8 = vld [vmem:[%s18524_s7 + $0xe8] sm:$0xff] }
 0x619   : > { %12177 = vmatprep.mubr.f32.mxu1 %v17019_v52  ;;  %v13866_v21 = vpack.c.bf16 %v9129_v8, %v9128_v57  ;;  %v9130_v52 = vld [vmem:[%s18524_s7 + $0xf0] sm:$0xff]  ;;  %v9132_v8 = vld [vmem:[%s18524_s7 + $0x100] sm:$0xff] }
 0x61b   : > { %13867 = vmatprep.subr.bf16.mxu0 %v13866_v21 }
 0x61c   : > { %12178 = vmatmul.mubr.f32.gmra.mrb[10].mxu1 %v17022_v35  ;;  %13869 = vmatpush3.bf16.msra.mxu0 %v13866_v21  ;;  %v9131_v35 = vld [vmem:[%s18524_s7 + $0xf8] sm:$0xff]  ;;  %v9133_v21 = vld [vmem:[%s18524_s7 + $0x108] sm:$0xff] }
 0x61d   : > { %12180 = vmatprep.mubr.f32.mxu1 %v17031_v62  ;;  %v13870_v62 = vpack.c.bf16 %v9131_v35, %v9130_v52  ;;  %v13906_v52 = vpack.c.bf16 %v9133_v21, %v9132_v8  ;;  %v9134_v35 = vld [vmem:[%s18524_s7 + $0x110] sm:$0xff] }
 0x61f   : > { %13871 = vmatprep.subr.bf16.mxu0 %v13870_v62 }
 0x620   : > { %12181 = vmatmul.mubr.f32.gmra.mrb[12].mxu1 %v17034_v11  ;;  %13873 = vmatpush3.bf16.msra.mxu0 %v13870_v62  ;;  %v6161_v11 = vld [vmem:[%s18524_s7] sm:$0xff]  ;;  %v9135_v62 = vld [vmem:[%s18524_s7 + $0x118] sm:$0xff] }
 0x621   : > { %12183 = vmatprep.mubr.f32.mxu1 %v17242_v13  ;;  %v6162_v13 = vld [vmem:[%s18524_s7 + $0x8] sm:$0xff] }
 0x622   : > { %v13874_v38 = vpack.c.bf16 %v6162_v13, %v6161_v11  ;;  %v13910_v11 = vpack.c.bf16 %v9135_v62, %v9134_v35  ;;  %v9157_v35 = vld [vmem:[%s18524_s7 + $0x1c8] sm:$0xff] }
 0x624   : > { %12184 = vmatmul.mubr.f32.gmra.mrb[14].mxu1 %v5983_v47  ;;  %13875 = vmatprep.subr.bf16.mxu0 %v13874_v38  ;;  %v6176_v47 = vld [vmem:[%s18524_s7 + $0x78] sm:$0xff] }
 0x625   : > { %v13902_v57 = vpack.c.bf16 %v6176_v47, %v6175_v31  ;;  %v9154_v31 = vld [vmem:[%s18524_s7 + $0x1b0] sm:$0xff]  ;;  %v9155_v47 = vld [vmem:[%s18524_s7 + $0x1b8] sm:$0xff] }
 0x626   : > { %v13950_v8 = vpack.c.bf16 %v9155_v47, %v9154_v31  ;;  %v9176_v31 = vld [vmem:[%s18524_s7 + $0x260] sm:$0xff]  ;;  %v9177_v47 = vld [vmem:[%s18524_s7 + $0x268] sm:$0xff] }
 0x6eb   : > { %v12176_v10 = vpop.f32.mrb[8].mxu1 }
 0x6ec   : > { %v6122_v39 = vadd.f32 %v12176_v10, %v9115_v20  ;;  %v6067_v55 = vpop.f32.mrb[9].mxu1 }
 0x6ed   : > { %v6121_v59 = vadd.f32 %v9115_v20, %v6067_v55  ;;  %v9138_v55 = vld [vmem:[%s18524_s7 + $0x130] sm:$0xff] }
 0x6ee   : > { %v17405_v51 = vadd.f32 %v6122_v39, %v16224_v25 }
 0x6ef   : > { %v17414_v45 = vadd.f32 %v6121_v59, %v16162_v1  ;;  %v12179_v28 = vpop.f32.mrb[10].mxu1  ;;  %v6165_v1 = vld [vmem:[%s18524_s7 + $0x20] sm:$0xff]  ;;  %v9139_v59 = vld [vmem:[%s18524_s7 + $0x138] sm:$0xff] }
 0x6f0   : > { %v17417_v29 = vmax.f32 %v17405_v51, 0.0  ;;  %v6124_v3 = vadd.f32 %v12179_v28, %v9115_v20  ;;  %v6077_v23 = vpop.f32.mrb[11].mxu1  ;;  %v13882_v44 = vpack.c.bf16 %v6166_v18, %v6165_v1  ;;  %v13918_v56 = vpack.c.bf16 %v9139_v59, %v9138_v55  ;;  %v6412_v1 = vld [vmem:[#allocation3 + $0x2] sm:$0xff]  ;;  %v9160_v59 = vld [vmem:[%s18524_s7 + $0x1e0] sm:$0xff] }
 0x6f1   : > { %v17420_v25 = vmax.f32 %v17414_v45, 0.0  ;;  %v6123_v63 = vadd.f32 %v9115_v20, %v6077_v23  ;;  %v9141_v23 = vld [vmem:[%s18524_s7 + $0x148] sm:$0xff] }
 0x6f2   : > { %6146 = vst [vmem:[#allocation3 + $0x21] sm:$0xff] %v17417_v29  ;;  %v17424_v41 = vadd.f32 %v6124_v3, %v16289_v9  ;;  %v9140_v3 = vld [vmem:[%s18524_s7 + $0x140] sm:$0xff] }
 0x6f3   : > { %6145 = vst [vmem:[#allocation3 + $0x11] sm:$0xff] %v17420_v25  ;;  %v17434_v17 = vadd.f32 %v6123_v63, %v16258_v36  ;;  %v12182_v16 = vpop.f32.mrb[12].mxu1  ;;  %12219 = vmatmul.mubr.f32.vlgmr.msra.gmra.mrb[32].mxu0 %v17420_v25 }
 0x6f4   : > { %v17438_v33 = vmax.f32 %v17424_v41, 0.0  ;;  %v6126_v9 = vadd.f32 %v12182_v16, %v9115_v20  ;;  %v6087_v24 = vpop.f32.mrb[13].mxu1  ;;  %13877 = vmatpush3.bf16.msra.mxu0 %v13874_v38  ;;  %12221 = vmatprep.mubr.f32.mxu0 %v17417_v29  ;;  %v9136_v38 = vld [vmem:[%s18524_s7 + $0x120] sm:$0xff]  ;;  %v9142_v16 = vld [vmem:[%s18524_s7 + $0x150] sm:$0xff] }
 0x6f5   : > { %v17442_v7 = vmax.f32 %v17434_v17, 0.0  ;;  %v6125_v30 = vadd.f32 %v9115_v20, %v6087_v24  ;;  %13879 = vmatprep.subr.bf16.mxu0 %v13878_v4  ;;  %v13914_v10 = vpack.c.bf16 %v9137_v12, %v9136_v38  ;;  %v9158_v12 = vld [vmem:[%s18524_s7 + $0x1d0] sm:$0xff] }
 0x6f6   : > { %6148 = vst [vmem:[#allocation3 + $0x41] sm:$0xff] %v17438_v33  ;;  %v17446_v36 = vadd.f32 %v6126_v9, %v16330_v50  ;;  %v9143_v9 = vld [vmem:[%s18524_s7 + $0x158] sm:$0xff] }
 0x6f7   : > { %6147 = vst [vmem:[#allocation3 + $0x31] sm:$0xff] %v17442_v7  ;;  %v17456_v32 = vadd.f32 %v6125_v30, %v16311_v54  ;;  %v12185_v53 = vpop.f32.mrb[14].mxu1  ;;  %12222 = vmatmul.mubr.f32.gmra.mrb[34].mxu0 %v17442_v7  ;;  %v13926_v24 = vpack.c.bf16 %v9143_v9, %v9142_v16  ;;  %v9144_v30 = vld [vmem:[%s18524_s7 + $0x160] sm:$0xff]  ;;  %v9165_v16 = vld [vmem:[%s18524_s7 + $0x208] sm:$0xff] }
 0x6f8   : > { %v17460_v43 = vmax.f32 %v17446_v36, 0.0  ;;  %v6128_v50 = vadd.f32 %v12185_v53, %v9115_v20  ;;  %v6097_v42 = vpop.f32.mrb[15].mxu1  ;;  %13881 = vmatpush3.bf16.msra.mxu0 %v13878_v4  ;;  %12224 = vmatprep.mubr.f32.mxu0 %v17438_v33  ;;  %v13922_v4 = vpack.c.bf16 %v9141_v23, %v9140_v3  ;;  %v9147_v53 = vld [vmem:[%s18524_s7 + $0x178] sm:$0xff]  ;;  %v9162_v23 = vld [vmem:[%s18524_s7 + $0x1f0] sm:$0xff] }
 0x6f9   : > { %v17464_v46 = vmax.f32 %v17456_v32, 0.0  ;;  %v6127_v14 = vadd.f32 %v9115_v20, %v6097_v42  ;;  %13883 = vmatprep.subr.bf16.mxu0 %v13882_v44  ;;  %v17531_v20 = vld [vmem:[#allocation3 + $0x20] sm:$0xff]  ;;  %v9148_v42 = vld [vmem:[%s18524_s7 + $0x180] sm:$0xff] }
 0x6fa   : > { %6150 = vst [vmem:[#allocation3 + $0x61] sm:$0xff] %v17460_v43  ;;  %v17468_v54 = vadd.f32 %v6128_v50, %v16378_v49  ;;  %v17522_v13 = vld [vmem:[#allocation3 + $0x10] sm:$0xff]  ;;  %v13934_v50 = vpack.c.bf16 %v9147_v53, %v9146_v58  ;;  %v17600_v2 = vld [vmem:[#allocation3 + $0x22] sm:$0xff]  ;;  %v9169_v58 = vld [vmem:[%s18524_s7 + $0x228] sm:$0xff] }
 0x6fb   : > { %6149 = vst [vmem:[#allocation3 + $0x51] sm:$0xff] %v17464_v46  ;;  %v17478_v40 = vadd.f32 %v6127_v14, %v16344_v60  ;;  %12225 = vmatmul.mubr.f32.gmra.mrb[36].mxu0 %v17464_v46  ;;  %v6171_v60 = vld [vmem:[%s18524_s7 + $0x50] sm:$0xff]  ;;  %v9149_v14 = vld [vmem:[%s18524_s7 + $0x188] sm:$0xff] }
 0x6fc   : > { %v17482_v34 = vmax.f32 %v17468_v54, 0.0  ;;  %13885 = vmatpush3.bf16.msra.mxu0 %v13882_v44  ;;  %12227 = vmatprep.mubr.f32.mxu0 %v17460_v43  ;;  %v13894_v19 = vpack.c.bf16 %v6172_v22, %v6171_v60  ;;  %v9145_v44 = vld [vmem:[%s18524_s7 + $0x168] sm:$0xff]  ;;  %v9152_v22 = vld [vmem:[%s18524_s7 + $0x1a0] sm:$0xff] }
 0x6fd   : > { %v17486_v49 = vmax.f32 %v17478_v40, 0.0  ;;  %13887 = vmatprep.subr.bf16.mxu0 %v13886_v15  ;;  %v17543_v5 = vld [vmem:[#allocation3 + $0x40] sm:$0xff]  ;;  %v13930_v37 = vpack.c.bf16 %v9145_v44, %v9144_v30  ;;  %v17591_v60 = vld [vmem:[#allocation3 + $0x12] sm:$0xff]  ;;  %v9167_v30 = vld [vmem:[%s18524_s7 + $0x218] sm:$0xff] }
 0x6fe   : > { %6152 = vst [vmem:[#allocation3 + $0x81] sm:$0xff] %v17482_v34  ;;  %v17534_v39 = vld [vmem:[#allocation3 + $0x30] sm:$0xff] }
 0x6ff   : > { %6151 = vst [vmem:[#allocation3 + $0x71] sm:$0xff] %v17486_v49  ;;  %12228 = vmatmul.mubr.f32.gmra.mrb[38].mxu0 %v17486_v49 }
 0x700   : > { %13889 = vmatpush3.bf16.msra.mxu0 %v13886_v15  ;;  %12262 = vmatprep.mubr.f32.mxu0 %v17306_v48  ;;  %v13938_v15 = vpack.c.bf16 %v9149_v14, %v9148_v42  ;;  %v9171_v42 = vld [vmem:[%s18524_s7 + $0x238] sm:$0xff] }
 0x701   : > { %13891 = vmatprep.subr.bf16.mxu0 %v13890_v26  ;;  %v17555_v63 = vld [vmem:[#allocation3 + $0x60] sm:$0xff] }
 0x702   : > { %v17546_v28 = vld [vmem:[#allocation3 + $0x50] sm:$0xff]  ;;  %v17624_v62 = vld [vmem:[#allocation3 + $0x62] sm:$0xff] }
 0x703   : > { %v17615_v21 = vld [vmem:[#allocation3 + $0x52] sm:$0xff] }
 0x704   : > { %13893 = vmatpush3.bf16.msra.mxu0 %v13890_v26  ;;  %v13942_v26 = vpack.c.bf16 %v9151_v6, %v9150_v27  ;;  %v9173_v27 = vld [vmem:[%s18524_s7 + $0x248] sm:$0xff] }
 0x705   : > { %13895 = vmatprep.subr.bf16.mxu0 %v13894_v19 }
 0x706   : > { %v17558_v18 = vld [vmem:[#allocation3 + $0x70] sm:$0xff] }
 0x707   : > { %v17627_v38 = vld [vmem:[#allocation3 + $0x72] sm:$0xff] }
 0x708   : > { %13897 = vmatpush3.bf16.msra.mxu0 %v13894_v19  ;;  %v9153_v19 = vld [vmem:[%s18524_s7 + $0x1a8] sm:$0xff] }
 0x709   : > { %13899 = vmatprep.subr.bf16.mxu0 %v13898_v0  ;;  %v13946_v61 = vpack.c.bf16 %v9153_v19, %v9152_v22  ;;  %v9174_v22 = vld [vmem:[%s18524_s7 + $0x250] sm:$0xff]  ;;  %v9175_v19 = vld [vmem:[%s18524_s7 + $0x258] sm:$0xff] }
 0x70c   : > { %13901 = vmatpush3.bf16.msra.mxu0 %v13898_v0  ;;  %v17603_v0 = vld [vmem:[#allocation3 + $0x32] sm:$0xff] }
 0x70d   : > { %13903 = vmatprep.subr.bf16.mxu0 %v13902_v57 }
 0x710   : > { %13905 = vmatpush3.bf16.msra.mxu0 %v13902_v57  ;;  %v17612_v57 = vld [vmem:[#allocation3 + $0x42] sm:$0xff] }
 0x711   : > { %13907 = vmatprep.subr.bf16.mxu0 %v13906_v52 }
 0x713   : > { %12263 = vmatmul.mubr.f32.vlgmr.msra.gmra.mrb[32].mxu0 %v17522_v13 }
 0x714   : > { %12265 = vmatprep.mubr.f32.mxu0 %v17531_v20  ;;  %13909 = vmatpush3.bf16.msra.mxu0 %v13906_v52  ;;  %v9156_v52 = vld [vmem:[%s18524_s7 + $0x1c0] sm:$0xff] }
 0x715   : > { %13911 = vmatprep.subr.bf16.mxu0 %v13910_v11 }
 0x717   : > { %12266 = vmatmul.mubr.f32.gmra.mrb[34].mxu0 %v17534_v39 }
 0x718   : > { %12268 = vmatprep.mubr.f32.mxu0 %v17543_v5  ;;  %13913 = vmatpush3.bf16.msra.mxu0 %v13910_v11  ;;  %v13954_v11 = vpack.c.bf16 %v9157_v35, %v9156_v52  ;;  %v9178_v52 = vld [vmem:[%s18524_s7 + $0x270] sm:$0xff] }
 0x719   : > { %13915 = vmatprep.subr.bf16.mxu0 %v13914_v10 }
 0x71b   : > { %12269 = vmatmul.mubr.f32.gmra.mrb[36].mxu0 %v17546_v28 }
 0x71c   : > { %12271 = vmatprep.mubr.f32.mxu0 %v17555_v63  ;;  %13917 = vmatpush3.bf16.msra.mxu0 %v13914_v10  ;;  %v9159_v10 = vld [vmem:[%s18524_s7 + $0x1d8] sm:$0xff] }
 0x71d   : > { %13919 = vmatprep.subr.bf16.mxu0 %v13918_v56  ;;  %v13958_v55 = vpack.c.bf16 %v9159_v10, %v9158_v12  ;;  %v9181_v12 = vld [vmem:[%s18524_s7 + $0x288] sm:$0xff] }
 0x71f   : > { %12272 = vmatmul.mubr.f32.gmra.mrb[38].mxu0 %v17558_v18 }
 0x720   : > { %13921 = vmatpush3.bf16.msra.mxu0 %v13918_v56  ;;  %12306 = vmatprep.mubr.f32.mxu0 %v6412_v1  ;;  %v9161_v56 = vld [vmem:[%s18524_s7 + $0x1e8] sm:$0xff]  ;;  %v9164_v1 = vld [vmem:[%s18524_s7 + $0x200] sm:$0xff] }
 0x721   : > { %13923 = vmatprep.subr.bf16.mxu0 %v13922_v4  ;;  %v13962_v3 = vpack.c.bf16 %v9161_v56, %v9160_v59  ;;  %v13970_v9 = vpack.c.bf16 %v9165_v16, %v9164_v1  ;;  %v9183_v59 = vld [vmem:[%s18524_s7 + $0x298] sm:$0xff] }
 0x722   : > { %v9187_v1 = vld [vmem:[%s18524_s7 + $0x2b8] sm:$0xff] }
 0x724   : > { %13925 = vmatpush3.bf16.msra.mxu0 %v13922_v4 }
 0x725   : > { %13927 = vmatprep.subr.bf16.mxu0 %v13926_v24 }
 0x728   : > { %13929 = vmatpush3.bf16.msra.mxu0 %v13926_v24  ;;  %v9166_v24 = vld [vmem:[%s18524_s7 + $0x210] sm:$0xff] }
 0x729   : > { %13931 = vmatprep.subr.bf16.mxu0 %v13930_v37  ;;  %v13974_v44 = vpack.c.bf16 %v9167_v30, %v9166_v24  ;;  %v9189_v24 = vld [vmem:[%s18524_s7 + $0x2c8] sm:$0xff] }
 0x72c   : > { %13933 = vmatpush3.bf16.msra.mxu0 %v13930_v37  ;;  %v9168_v37 = vld [vmem:[%s18524_s7 + $0x220] sm:$0xff] }
 0x72d   : > { %13935 = vmatprep.subr.bf16.mxu0 %v13934_v50  ;;  %v13978_v53 = vpack.c.bf16 %v9169_v58, %v9168_v37  ;;  %v9191_v37 = vld [vmem:[%s18524_s7 + $0x2d8] sm:$0xff]  ;;  %v9245_v58 = vld [vmem:[%s18526_s9 + $0x80] sm:$0xff] }
 0x730   : > { %13937 = vmatpush3.bf16.msra.mxu0 %v13934_v50  ;;  %v9170_v50 = vld [vmem:[%s18524_s7 + $0x230] sm:$0xff] }
 0x731   : > { %13939 = vmatprep.subr.bf16.mxu0 %v13938_v15  ;;  %v13982_v14 = vpack.c.bf16 %v9171_v42, %v9170_v50  ;;  %v9247_v50 = vld [vmem:[%s18526_s9 + $0x90] sm:$0xff] }
 0x733   : > { %12307 = vmatmul.mubr.f32.vlgmr.msra.gmra.mrb[32].mxu0 %v17591_v60 }
 0x734   : > { %12309 = vmatprep.mubr.f32.mxu0 %v17600_v2  ;;  %13941 = vmatpush3.bf16.msra.mxu0 %v13938_v15  ;;  %v9172_v15 = vld [vmem:[%s18524_s7 + $0x240] sm:$0xff] }
 0x735   : > { %13943 = vmatprep.subr.bf16.mxu0 %v13942_v26  ;;  %v13986_v6 = vpack.c.bf16 %v9173_v27, %v9172_v15 }
 0x737   : > { %12310 = vmatmul.mubr.f32.gmra.mrb[34].mxu0 %v17603_v0 }
 0x738   : > { %12312 = vmatprep.mubr.f32.mxu0 %v17612_v57  ;;  %13945 = vmatpush3.bf16.msra.mxu0 %v13942_v26  ;;  %v17685_v26 = vld [vmem:[#allocation3 + $0x80] sm:$0xff] }
 0x739   : > { %13947 = vmatprep.subr.bf16.mxu0 %v13946_v61 }
 0x73b   : > { %12313 = vmatmul.mubr.f32.gmra.mrb[36].mxu0 %v17615_v21 }
 0x73c   : > { %12315 = vmatprep.mubr.f32.mxu0 %v17624_v62  ;;  %13949 = vmatpush3.bf16.msra.mxu0 %v13946_v61  ;;  %v13990_v61 = vpack.c.bf16 %v9175_v19, %v9174_v22  ;;  %v9250_v22 = vld [vmem:[%s18526_s9 + $0xa8] sm:$0xff] }
 0x73d   : > { %13951 = vmatprep.subr.bf16.mxu0 %v13950_v8  ;;  %v9193_v19 = vld [vmem:[%s18524_s7 + $0x2e8] sm:$0xff] }
 0x73f   : > { %12316 = vmatmul.mubr.f32.gmra.mrb[38].mxu0 %v17627_v38 }
 0x740   : > { %13953 = vmatpush3.bf16.msra.mxu0 %v13950_v8  ;;  %12350 = vmatprep.mubr.f32.mxu0 %v17522_v13  ;;  %v9163_v13 = vld [vmem:[%s18524_s7 + $0x1f8] sm:$0xff]  ;;  %v13994_v8 = vpack.c.bf16 %v9177_v47, %v9176_v31  ;;  %v9251_v47 = vld [vmem:[%s18526_s9 + $0xb0] sm:$0xff] }
 0x741   : > { %13955 = vmatprep.subr.bf16.mxu0 %v13954_v11  ;;  %v13966_v4 = vpack.c.bf16 %v9163_v13, %v9162_v23  ;;  %v9185_v23 = vld [vmem:[%s18524_s7 + $0x2a8] sm:$0xff] }
 0x744   : > { %13957 = vmatpush3.bf16.msra.mxu0 %v13954_v11  ;;  %v9180_v11 = vld [vmem:[%s18524_s7 + $0x280] sm:$0xff] }
 0x745   : > { %13959 = vmatprep.subr.bf16.mxu0 %v13958_v55  ;;  %v14002_v10 = vpack.c.bf16 %v9181_v12, %v9180_v11  ;;  %v9253_v12 = vld [vmem:[%s18526_s9 + $0xc0] sm:$0xff] }
 0x748   : > { %13961 = vmatpush3.bf16.msra.mxu0 %v13958_v55  ;;  %v9182_v55 = vld [vmem:[%s18524_s7 + $0x290] sm:$0xff] }
 0x749   : > { %13963 = vmatprep.subr.bf16.mxu0 %v13962_v3  ;;  %v14006_v56 = vpack.c.bf16 %v9183_v59, %v9182_v55  ;;  %v9196_v55 = vld [vmem:[%s18524_s7 + $0x300] sm:$0xff]  ;;  %v9197_v59 = vld [vmem:[%s18524_s7 + $0x308] sm:$0xff] }
 0x74c   : > { %13965 = vmatpush3.bf16.msra.mxu0 %v13962_v3  ;;  %v9184_v3 = vld [vmem:[%s18524_s7 + $0x2a0] sm:$0xff] }
 0x74d   : > { %13967 = vmatprep.subr.bf16.mxu0 %v13966_v4  ;;  %v14010_v13 = vpack.c.bf16 %v9185_v23, %v9184_v3  ;;  %v14034_v3 = vpack.c.bf16 %v9197_v59, %v9196_v55  ;;  %v9198_v23 = vld [vmem:[%s18524_s7 + $0x310] sm:$0xff]  ;;  %v9219_v55 = vld [vmem:[%s18524_s7 + $0x3b8] sm:$0xff]  ;;  %v9221_v59 = vld [vmem:[%s18524_s7 + $0x3c8] sm:$0xff] }
 0x750   : > { %13969 = vmatpush3.bf16.msra.mxu0 %v13966_v4  ;;  %v9186_v4 = vld [vmem:[%s18524_s7 + $0x2b0] sm:$0xff] }
 0x751   : > { %13971 = vmatprep.subr.bf16.mxu0 %v13970_v9  ;;  %v14014_v16 = vpack.c.bf16 %v9187_v1, %v9186_v4  ;;  %v9200_v1 = vld [vmem:[%s18524_s7 + $0x320] sm:$0xff] }
 0x753   : > { %12351 = vmatmul.mubr.f32.vlgmr.msra.gmra.mrb[32].mxu0 %v17531_v20 }
 0x754   : > { %12353 = vmatprep.mubr.f32.mxu0 %v17534_v39  ;;  %13973 = vmatpush3.bf16.msra.mxu0 %v13970_v9  ;;  %v9188_v9 = vld [vmem:[%s18524_s7 + $0x2c0] sm:$0xff] }
 0x755   : > { %13975 = vmatprep.subr.bf16.mxu0 %v13974_v44  ;;  %v14018_v30 = vpack.c.bf16 %v9189_v24, %v9188_v9  ;;  %v9202_v24 = vld [vmem:[%s18524_s7 + $0x330] sm:$0xff] }
 0x757   : > { %12354 = vmatmul.mubr.f32.gmra.mrb[34].mxu0 %v17543_v5 }
 0x758   : > { %12356 = vmatprep.mubr.f32.mxu0 %v17546_v28  ;;  %13977 = vmatpush3.bf16.msra.mxu0 %v13974_v44  ;;  %v9190_v44 = vld [vmem:[%s18524_s7 + $0x2d0] sm:$0xff] }
 0x759   : > { %13979 = vmatprep.subr.bf16.mxu0 %v13978_v53  ;;  %v14022_v15 = vpack.c.bf16 %v9191_v37, %v9190_v44  ;;  %v9204_v37 = vld [vmem:[%s18524_s7 + $0x340] sm:$0xff] }
 0x75b   : > { %12357 = vmatmul.mubr.f32.gmra.mrb[36].mxu0 %v17555_v63 }
 0x75c   : > { %12359 = vmatprep.mubr.f32.mxu0 %v17558_v18  ;;  %13981 = vmatpush3.bf16.msra.mxu0 %v13978_v53  ;;  %v9246_v53 = vld [vmem:[%s18526_s9 + $0x88] sm:$0xff] }
 0x75d   : > { %13983 = vmatprep.subr.bf16.mxu0 %v13982_v14  ;;  %v14130_v42 = vpack.c.bf16 %v9246_v53, %v9245_v58  ;;  %v9205_v58 = vld [vmem:[%s18524_s7 + $0x348] sm:$0xff] }
 0x75e   : > { %v14050_v53 = vpack.c.bf16 %v9205_v58, %v9204_v37  ;;  %v9233_v37 = vld [vmem:[%s18524_s7 + $0x428] sm:$0xff] }
 0x75f   : > { %12360 = vmatmul.mubr.f32.gmra.mrb[38].mxu0 %v17685_v26  ;;  %14131 = vmatprep.subr.bf16.mxu1 %v14130_v42 }
 0x760   : > { %13985 = vmatpush3.bf16.msra.mxu0 %v13982_v14  ;;  %12394 = vmatprep.mubr.f32.mxu0 %v17420_v25  ;;  %v9179_v25 = vld [vmem:[%s18524_s7 + $0x278] sm:$0xff] }
 0x761   : > { %13987 = vmatprep.subr.bf16.mxu0 %v13986_v6  ;;  %v13998_v35 = vpack.c.bf16 %v9179_v25, %v9178_v52  ;;  %v9248_v14 = vld [vmem:[%s18526_s9 + $0x98] sm:$0xff]  ;;  %14133 = vmatpush3.bf16.msra.mxu1 %v14130_v42  ;;  %v9194_v52 = vld [vmem:[%s18524_s7 + $0x2f0] sm:$0xff] }
 0x762   : > { %v14134_v27 = vpack.c.bf16 %v9248_v14, %v9247_v50  ;;  %v9195_v25 = vld [vmem:[%s18524_s7 + $0x2f8] sm:$0xff]  ;;  %v9206_v42 = vld [vmem:[%s18524_s7 + $0x350] sm:$0xff] }
 0x763   : > { %v14030_v11 = vpack.c.bf16 %v9195_v25, %v9194_v52  ;;  %v17829_v50 = vld [vmem:[#allocation3 + $0x82] sm:$0xff] }
 0x764   : > { %13989 = vmatpush3.bf16.msra.mxu0 %v13986_v6  ;;  %v9249_v6 = vld [vmem:[%s18526_s9 + $0xa0] sm:$0xff]  ;;  %14135 = vmatprep.subr.bf16.mxu1 %v14134_v27  ;;  %v9207_v14 = vld [vmem:[%s18524_s7 + $0x358] sm:$0xff] }
 0x765   : > { %13991 = vmatprep.subr.bf16.mxu0 %v13990_v61  ;;  %14137 = vmatpush3.bf16.msra.mxu1 %v14134_v27  ;;  %v9208_v27 = vld [vmem:[%s18524_s7 + $0x360] sm:$0xff]  ;;  %v9215_v52 = vld [vmem:[%s18524_s7 + $0x398] sm:$0xff] }
 0x768   : > { %13993 = vmatpush3.bf16.msra.mxu0 %v13990_v61  ;;  %v14138_v61 = vpack.c.bf16 %v9250_v22, %v9249_v6  ;;  %v9209_v6 = vld [vmem:[%s18524_s7 + $0x368] sm:$0xff] }
 0x769   : > { %13995 = vmatprep.subr.bf16.mxu0 %v13994_v8  ;;  %v14058_v22 = vpack.c.bf16 %v9209_v6, %v9208_v27  ;;  %v9239_v27 = vld [vmem:[%s18524_s7 + $0x458] sm:$0xff]  ;;  %v9241_v6 = vld [vmem:[%s18524_s7 + $0x468] sm:$0xff] }
 0x76a   : > { %14139 = vmatprep.subr.bf16.mxu1 %v14138_v61 }
 0x76b   : > { %14141 = vmatpush3.bf16.msra.mxu1 %v14138_v61  ;;  %v9212_v61 = vld [vmem:[%s18524_s7 + $0x380] sm:$0xff] }
 0x76c   : > { %13997 = vmatpush3.bf16.msra.mxu0 %v13994_v8  ;;  %v9252_v8 = vld [vmem:[%s18526_s9 + $0xb8] sm:$0xff] }
 0x76d   : > { %13999 = vmatprep.subr.bf16.mxu0 %v13998_v35 }
 0x770   : > { %14001 = vmatpush3.bf16.msra.mxu0 %v13998_v35  ;;  %v14142_v35 = vpack.c.bf16 %v9252_v8, %v9251_v47  ;;  %v9214_v8 = vld [vmem:[%s18524_s7 + $0x390] sm:$0xff] }
 0x771   : > { %14003 = vmatprep.subr.bf16.mxu0 %v14002_v10  ;;  %v14070_v25 = vpack.c.bf16 %v9215_v52, %v9214_v8  ;;  %v7417_v8 = vld [vmem:[%s18526_s9] sm:$0xff]  ;;  %v7418_v52 = vld [vmem:[%s18526_s9 + $0x8] sm:$0xff] }
 0x772   : > { %14143 = vmatprep.subr.bf16.mxu1 %v14142_v35 }
 0x773   : > { %12395 = vmatmul.mubr.f32.vlgmr.msra.gmra.mrb[32].mxu0 %v17417_v29  ;;  %14145 = vmatpush3.bf16.msra.mxu1 %v14142_v35  ;;  %v9216_v35 = vld [vmem:[%s18524_s7 + $0x3a0] sm:$0xff] }
 0x774   : > { %12397 = vmatprep.mubr.f32.mxu0 %v17442_v7  ;;  %14005 = vmatpush3.bf16.msra.mxu0 %v14002_v10  ;;  %v9254_v10 = vld [vmem:[%s18526_s9 + $0xc8] sm:$0xff] }
 0x775   : > { %14007 = vmatprep.subr.bf16.mxu0 %v14006_v56 }
 0x777   : > { %12398 = vmatmul.mubr.f32.gmra.mrb[34].mxu0 %v17438_v33 }
 0x778   : > { %12400 = vmatprep.mubr.f32.mxu0 %v17464_v46  ;;  %14009 = vmatpush3.bf16.msra.mxu0 %v14006_v56  ;;  %v14146_v56 = vpack.c.bf16 %v9254_v10, %v9253_v12  ;;  %v9218_v10 = vld [vmem:[%s18524_s7 + $0x3b0] sm:$0xff] }
 0x779   : > { %14011 = vmatprep.subr.bf16.mxu0 %v14010_v13 }
 0x77a   : > { %14147 = vmatprep.subr.bf16.mxu1 %v14146_v56 }
 0x77b   : > { %12401 = vmatmul.mubr.f32.gmra.mrb[36].mxu0 %v17460_v43  ;;  %14149 = vmatpush3.bf16.msra.mxu1 %v14146_v56  ;;  %v9223_v56 = vld [vmem:[%s18524_s7 + $0x3d8] sm:$0xff] }
 0x77c   : > { %12403 = vmatprep.mubr.f32.mxu0 %v17486_v49  ;;  %14013 = vmatpush3.bf16.msra.mxu0 %v14010_v13  ;;  %v9199_v13 = vld [vmem:[%s18524_s7 + $0x318] sm:$0xff] }
 0x77d   : > { %14015 = vmatprep.subr.bf16.mxu0 %v14014_v16  ;;  %v14038_v4 = vpack.c.bf16 %v9199_v13, %v9198_v23 }
 0x77f   : > { %12404 = vmatmul.mubr.f32.gmra.mrb[38].mxu0 %v17482_v34 }
 0x780   : > { %14017 = vmatpush3.bf16.msra.mxu0 %v14014_v16  ;;  %12438 = vmatprep.mubr.f32.mxu0 %v17591_v60  ;;  %v9192_v60 = vld [vmem:[%s18524_s7 + $0x2e0] sm:$0xff]  ;;  %v9201_v16 = vld [vmem:[%s18524_s7 + $0x328] sm:$0xff] }
 0x781   : > { %14019 = vmatprep.subr.bf16.mxu0 %v14018_v30  ;;  %v14026_v31 = vpack.c.bf16 %v9193_v19, %v9192_v60  ;;  %v14042_v9 = vpack.c.bf16 %v9201_v16, %v9200_v1  ;;  %v9210_v60 = vld [vmem:[%s18524_s7 + $0x370] sm:$0xff]  ;;  %v9229_v1 = vld [vmem:[%s18524_s7 + $0x408] sm:$0xff] }
 0x784   : > { %14021 = vmatpush3.bf16.msra.mxu0 %v14018_v30  ;;  %v9203_v30 = vld [vmem:[%s18524_s7 + $0x338] sm:$0xff] }
 0x785   : > { %14023 = vmatprep.subr.bf16.mxu0 %v14022_v15  ;;  %v14046_v44 = vpack.c.bf16 %v9203_v30, %v9202_v24  ;;  %v9231_v24 = vld [vmem:[%s18524_s7 + $0x418] sm:$0xff] }
 0x788   : > { %14025 = vmatpush3.bf16.msra.mxu0 %v14022_v15  ;;  %v14054_v15 = vpack.c.bf16 %v9207_v14, %v9206_v42  ;;  %v9235_v42 = vld [vmem:[%s18524_s7 + $0x438] sm:$0xff]  ;;  %v9237_v14 = vld [vmem:[%s18524_s7 + $0x448] sm:$0xff] }
 0x789   : > { %14027 = vmatprep.subr.bf16.mxu0 %v14026_v31 }
 0x78c   : > { %14029 = vmatpush3.bf16.msra.mxu0 %v14026_v31  ;;  %v9213_v31 = vld [vmem:[%s18524_s7 + $0x388] sm:$0xff] }
 0x78d   : > { %14031 = vmatprep.subr.bf16.mxu0 %v14030_v11  ;;  %v14066_v47 = vpack.c.bf16 %v9213_v31, %v9212_v61  ;;  %v9255_v61 = vld [vmem:[%s18526_s9 + $0xd0] sm:$0xff] }
 0x790   : > { %14033 = vmatpush3.bf16.msra.mxu0 %v14030_v11  ;;  %v9217_v11 = vld [vmem:[%s18524_s7 + $0x3a8] sm:$0xff] }
 0x791   : > { %14035 = vmatprep.subr.bf16.mxu0 %v14034_v3  ;;  %v14074_v12 = vpack.c.bf16 %v9217_v11, %v9216_v35  ;;  %v7433_v35 = vld [vmem:[#allocation3 + $0x1] sm:$0xff]  ;;  %v9244_v11 = vld [vmem:[%s18525_s8] ss:$0 sm:$0xff] }
 0x792   : > { %12614 = vmatprep.mubr.f32.mxu1 %v7433_v35  ;;  %v9266_v35 = vld [vmem:[%s18526_s9 + $0x128] sm:$0xff] }
 0x793   : > { %12439 = vmatmul.mubr.f32.vlgmr.msra.gmra.mrb[32].mxu0 %v17600_v2 }
 0x794   : > { %12441 = vmatprep.mubr.f32.mxu0 %v17603_v0  ;;  %14037 = vmatpush3.bf16.msra.mxu0 %v14034_v3  ;;  %v9225_v3 = vld [vmem:[%s18524_s7 + $0x3e8] sm:$0xff] }
 0x795   : > { %14039 = vmatprep.subr.bf16.mxu0 %v14038_v4 }
 0x797   : > { %12442 = vmatmul.mubr.f32.gmra.mrb[34].mxu0 %v17612_v57 }
 0x798   : > { %12444 = vmatprep.mubr.f32.mxu0 %v17615_v21  ;;  %14041 = vmatpush3.bf16.msra.mxu0 %v14038_v4  ;;  %v9228_v4 = vld [vmem:[%s18524_s7 + $0x400] sm:$0xff] }
 0x799   : > { %14043 = vmatprep.subr.bf16.mxu0 %v14042_v9  ;;  %v14098_v16 = vpack.c.bf16 %v9229_v1, %v9228_v4 }
 0x79b   : > { %12445 = vmatmul.mubr.f32.gmra.mrb[36].mxu0 %v17624_v62 }
 0x79c   : > { %12447 = vmatprep.mubr.f32.mxu0 %v17627_v38  ;;  %14045 = vmatpush3.bf16.msra.mxu0 %v14042_v9  ;;  %v9230_v9 = vld [vmem:[%s18524_s7 + $0x410] sm:$0xff] }
 0x79d   : > { %14047 = vmatprep.subr.bf16.mxu0 %v14046_v44  ;;  %v14102_v30 = vpack.c.bf16 %v9231_v24, %v9230_v9 }
 0x79f   : > { %12448 = vmatmul.mubr.f32.gmra.mrb[38].mxu0 %v17829_v50 }
 0x7a0   : > { %14049 = vmatpush3.bf16.msra.mxu0 %v14046_v44  ;;  %12482 = vmatprep.mubr.f32.mxu0 %v17531_v20  ;;  %v9211_v20 = vld [vmem:[%s18524_s7 + $0x378] sm:$0xff]  ;;  %v9232_v44 = vld [vmem:[%s18524_s7 + $0x420] sm:$0xff] }
 0x7a1   : > { %14051 = vmatprep.subr.bf16.mxu0 %v14050_v53  ;;  %v14062_v19 = vpack.c.bf16 %v9211_v20, %v9210_v60  ;;  %v14106_v58 = vpack.c.bf16 %v9233_v37, %v9232_v44  ;;  %v9242_v60 = vld [vmem:[%s18524_s7 + $0x470] sm:$0xff]  ;;  %v7424_v44 = vld [vmem:[%s18526_s9 + $0x38] sm:$0xff] }
 0x7a4   : > { %14053 = vmatpush3.bf16.msra.mxu0 %v14050_v53  ;;  %v9234_v53 = vld [vmem:[%s18524_s7 + $0x430] sm:$0xff] }
 0x7a5   : > { %14055 = vmatprep.subr.bf16.mxu0 %v14054_v15 }
 0x7a8   : > { %14057 = vmatpush3.bf16.msra.mxu0 %v14054_v15  ;;  %v7109_v15 = vld [vmem:[#allocation3 + $0x91] sm:$0xff] }
 0x7a9   : > { %14059 = vmatprep.subr.bf16.mxu0 %v14058_v22 }
 0x7ac   : > { %14061 = vmatpush3.bf16.msra.mxu0 %v14058_v22 }
 0x7ad   : > { %14063 = vmatprep.subr.bf16.mxu0 %v14062_v19 }
 0x7b0   : > { %14065 = vmatpush3.bf16.msra.mxu0 %v14062_v19  ;;  %v7247_v19 = vld [vmem:[#allocation3 + $0x92] sm:$0xff] }
 0x7b1   : > { %14067 = vmatprep.subr.bf16.mxu0 %v14066_v47 }
 0x7b3   : > { %12483 = vmatmul.mubr.f32.vlgmr.msra.gmra.mrb[32].mxu0 %v17534_v39  ;;  %v14078_v39 = vpack.c.bf16 %v9219_v55, %v9218_v10 }
 0x7b4   : > { %12485 = vmatprep.mubr.f32.mxu0 %v17543_v5  ;;  %14069 = vmatpush3.bf16.msra.mxu0 %v14066_v47  ;;  %v9220_v5 = vld [vmem:[%s18524_s7 + $0x3c0] sm:$0xff] }
 0x7b5   : > { %14071 = vmatprep.subr.bf16.mxu0 %v14070_v25 }
 0x7b7   : > { %12486 = vmatmul.mubr.f32.gmra.mrb[34].mxu0 %v17546_v28  ;;  %v14082_v28 = vpack.c.bf16 %v9221_v59, %v9220_v5  ;;  %v7420_v5 = vld [vmem:[%s18526_s9 + $0x18] sm:$0xff] }
 0x7b8   : > { %12488 = vmatprep.mubr.f32.mxu0 %v17555_v63  ;;  %14073 = vmatpush3.bf16.msra.mxu0 %v14070_v25  ;;  %v9222_v63 = vld [vmem:[%s18524_s7 + $0x3d0] sm:$0xff]  ;;  %v14162_v25 = vpack.c.bf16 %v7418_v52, %v7417_v8 }
 0x7b9   : > { %14075 = vmatprep.subr.bf16.mxu0 %v14074_v12 }
 0x7bb   : > { %12489 = vmatmul.mubr.f32.gmra.mrb[36].mxu0 %v17558_v18  ;;  %v14086_v18 = vpack.c.bf16 %v9223_v56, %v9222_v63 }
 0x7bc   : > { %12491 = vmatprep.mubr.f32.mxu0 %v17685_v26  ;;  %14077 = vmatpush3.bf16.msra.mxu0 %v14074_v12  ;;  %v9224_v26 = vld [vmem:[%s18524_s7 + $0x3e0] sm:$0xff] }
 0x7bd   : > { %14079 = vmatprep.subr.bf16.mxu0 %v14078_v39  ;;  %v14090_v23 = vpack.c.bf16 %v9225_v3, %v9224_v26 }
 0x7bf   : > { %12492 = vmatmul.mubr.f32.gmra.mrb[38].mxu0 %v17306_v48  ;;  %v9226_v48 = vld [vmem:[%s18524_s7 + $0x3f0] sm:$0xff] }
 0x7c0   : > { %14081 = vmatpush3.bf16.msra.mxu0 %v14078_v39  ;;  %12526 = vmatprep.mubr.f32.mxu0 %v17417_v29  ;;  %v9227_v29 = vld [vmem:[%s18524_s7 + $0x3f8] sm:$0xff]  ;;  %v7419_v39 = vld [vmem:[%s18526_s9 + $0x10] sm:$0xff] }
 0x7c1   : > { %14083 = vmatprep.subr.bf16.mxu0 %v14082_v28  ;;  %v14094_v13 = vpack.c.bf16 %v9227_v29, %v9226_v48  ;;  %v7422_v48 = vld [vmem:[%s18526_s9 + $0x28] sm:$0xff] }
 0x7c4   : > { %14085 = vmatpush3.bf16.msra.mxu0 %v14082_v28 }
 0x7c5   : > { %14087 = vmatprep.subr.bf16.mxu0 %v14086_v18 }
 0x7c8   : > { %14089 = vmatpush3.bf16.msra.mxu0 %v14086_v18  ;;  %v14166_v18 = vpack.c.bf16 %v7420_v5, %v7419_v39  ;;  %v9268_v39 = vld [vmem:[%s18526_s9 + $0x138] sm:$0xff] }
 0x7c9   : > { %14091 = vmatprep.subr.bf16.mxu0 %v14090_v23 }
 0x7cc   : > { %14093 = vmatpush3.bf16.msra.mxu0 %v14090_v23  ;;  %v7421_v23 = vld [vmem:[%s18526_s9 + $0x20] sm:$0xff] }
 0x7cd   : > { %14095 = vmatprep.subr.bf16.mxu0 %v14094_v13 }
 0x7d0   : > { %14097 = vmatpush3.bf16.msra.mxu0 %v14094_v13 }
 0x7d1   : > { %14099 = vmatprep.subr.bf16.mxu0 %v14098_v16 }
 0x7d3   : > { %12527 = vmatmul.mubr.f32.vlgmr.msra.gmra.mrb[32].mxu0 %v17442_v7  ;;  %v14110_v7 = vpack.c.bf16 %v9235_v42, %v9234_v53 }
 0x7d4   : > { %12529 = vmatprep.mubr.f32.mxu0 %v17438_v33  ;;  %14101 = vmatpush3.bf16.msra.mxu0 %v14098_v16  ;;  %v9236_v33 = vld [vmem:[%s18524_s7 + $0x440] sm:$0xff]  ;;  %v14170_v16 = vpack.c.bf16 %v7422_v48, %v7421_v23  ;;  %v7668_v48 = vld [vmem:[#allocation3 + $0x2] sm:$0xff] }
 0x7d5   : > { %14103 = vmatprep.subr.bf16.mxu0 %v14102_v30 }
 0x7d7   : > { %12530 = vmatmul.mubr.f32.gmra.mrb[34].mxu0 %v17464_v46  ;;  %v14114_v46 = vpack.c.bf16 %v9237_v14, %v9236_v33 }
 0x7d8   : > { %12532 = vmatprep.mubr.f32.mxu0 %v17460_v43  ;;  %14105 = vmatpush3.bf16.msra.mxu0 %v14102_v30  ;;  %v9238_v43 = vld [vmem:[%s18524_s7 + $0x450] sm:$0xff] }
 0x7d9   : > { %14107 = vmatprep.subr.bf16.mxu0 %v14106_v58  ;;  %v7423_v30 = vld [vmem:[%s18526_s9 + $0x30] sm:$0xff] }
 0x7db   : > { %12533 = vmatmul.mubr.f32.gmra.mrb[36].mxu0 %v17486_v49  ;;  %v14118_v49 = vpack.c.bf16 %v9239_v27, %v9238_v43 }
 0x7dc   : > { %12535 = vmatprep.mubr.f32.mxu0 %v17482_v34  ;;  %14109 = vmatpush3.bf16.msra.mxu0 %v14106_v58  ;;  %v9240_v34 = vld [vmem:[%s18524_s7 + $0x460] sm:$0xff] }
 0x7dd   : > { %14111 = vmatprep.subr.bf16.mxu0 %v14110_v7  ;;  %v14122_v22 = vpack.c.bf16 %v9241_v6, %v9240_v34  ;;  %v7427_v6 = vld [vmem:[%s18526_s9 + $0x50] sm:$0xff] }
 0x7df   : > { %12536 = vmatmul.mubr.f32.gmra.mrb[38].mxu0 %v7109_v15  ;;  %v7425_v15 = vld [vmem:[%s18526_s9 + $0x40] sm:$0xff] }
 0x7e0   : > { %14113 = vmatpush3.bf16.msra.mxu0 %v14110_v7  ;;  %12570 = vmatprep.mubr.f32.mxu0 %v17600_v2  ;;  %v9243_v2 = vld [vmem:[%s18524_s7 + $0x478] sm:$0xff]  ;;  %v14174_v7 = vpack.c.bf16 %v7424_v44, %v7423_v30  ;;  %v9274_v30 = vld [vmem:[%s18526_s9 + $0x168] sm:$0xff] }
 0x7e1   : > { %14115 = vmatprep.subr.bf16.mxu0 %v14114_v46  ;;  %v14126_v20 = vpack.c.bf16 %v9243_v2, %v9242_v60  ;;  %v18056_v60 = vld [vmem:[#allocation2] sm:$0xff] }
 0x7e4   : > { %14117 = vmatpush3.bf16.msra.mxu0 %v14114_v46  ;;  %v7426_v46 = vld [vmem:[%s18526_s9 + $0x48] sm:$0xff] }
 0x7e5   : > { %14119 = vmatprep.subr.bf16.mxu0 %v14118_v49  ;;  %v14178_v34 = vpack.c.bf16 %v7426_v46, %v7425_v15  ;;  %v9279_v46 = vld [vmem:[%s18526_s9 + $0x190] sm:$0xff] }
 0x7e8   : > { %14121 = vmatpush3.bf16.msra.mxu0 %v14118_v49 }
 0x7e9   : > { %14123 = vmatprep.subr.bf16.mxu0 %v14122_v22 }
 0x7ec   : > { %14125 = vmatpush3.bf16.msra.mxu0 %v14122_v22  ;;  %v7428_v22 = vld [vmem:[%s18526_s9 + $0x58] sm:$0xff] }
 0x7ed   : > { %14127 = vmatprep.subr.bf16.mxu0 %v14126_v20  ;;  %v14182_v2 = vpack.c.bf16 %v7428_v22, %v7427_v6  ;;  %v9281_v22 = vld [vmem:[%s18526_s9 + $0x1a0] sm:$0xff] }
 0x7f0   : > { %14129 = vmatpush3.bf16.msra.mxu0 %v14126_v20  ;;  %v7429_v20 = vld [vmem:[%s18526_s9 + $0x60] sm:$0xff] }
 0x7f3   : > { %12571 = vmatmul.mubr.f32.vlgmr.msra.gmra.mrb[32].mxu0 %v17603_v0  ;;  %v9256_v0 = vld [vmem:[%s18526_s9 + $0xd8] sm:$0xff] }
 0x7f4   : > { %12573 = vmatprep.mubr.f32.mxu0 %v17612_v57  ;;  %v14150_v31 = vpack.c.bf16 %v9256_v0, %v9255_v61  ;;  %v9257_v57 = vld [vmem:[%s18526_s9 + $0xe0] sm:$0xff]  ;;  %v7431_v0 = vld [vmem:[%s18526_s9 + $0x70] sm:$0xff] }
 0x7f6   : > { %14151 = vmatprep.subr.bf16.mxu1 %v14150_v31 }
 0x7f7   : > { %12574 = vmatmul.mubr.f32.gmra.mrb[34].mxu0 %v17615_v21  ;;  %14153 = vmatpush3.bf16.msra.mxu1 %v14150_v31  ;;  %v9258_v21 = vld [vmem:[%s18526_s9 + $0xe8] sm:$0xff]  ;;  %v7432_v31 = vld [vmem:[%s18526_s9 + $0x78] sm:$0xff] }
 0x7f8   : > { %12576 = vmatprep.mubr.f32.mxu0 %v17624_v62  ;;  %v14154_v62 = vpack.c.bf16 %v9258_v21, %v9257_v57  ;;  %v14190_v57 = vpack.c.bf16 %v7432_v31, %v7431_v0  ;;  %v9261_v21 = vld [vmem:[%s18526_s9 + $0x100] sm:$0xff]  ;;  %v9283_v0 = vld [vmem:[%s18526_s9 + $0x1b0] sm:$0xff]  ;;  %v9284_v31 = vld [vmem:[%s18526_s9 + $0x1b8] sm:$0xff] }
 0x7fa   : > { %14155 = vmatprep.subr.bf16.mxu1 %v14154_v62 }
 0x7fb   : > { %12577 = vmatmul.mubr.f32.gmra.mrb[36].mxu0 %v17627_v38  ;;  %14157 = vmatpush3.bf16.msra.mxu1 %v14154_v62  ;;  %v9259_v38 = vld [vmem:[%s18526_s9 + $0xf0] sm:$0xff]  ;;  %v9262_v62 = vld [vmem:[%s18526_s9 + $0x108] sm:$0xff] }
 0x7fc   : > { %12579 = vmatprep.mubr.f32.mxu0 %v17829_v50  ;;  %v9260_v50 = vld [vmem:[%s18526_s9 + $0xf8] sm:$0xff] }
 0x7fd   : > { %v14158_v47 = vpack.c.bf16 %v9260_v50, %v9259_v38  ;;  %v14194_v38 = vpack.c.bf16 %v9262_v62, %v9261_v21  ;;  %v9263_v50 = vld [vmem:[%s18526_s9 + $0x110] sm:$0xff]  ;;  %v14238_v21 = vpack.c.bf16 %v9284_v31, %v9283_v0  ;;  %v9305_v0 = vld [vmem:[%s18526_s9 + $0x260] sm:$0xff]  ;;  %v9306_v31 = vld [vmem:[%s18526_s9 + $0x268] sm:$0xff] }
 0x7ff   : > { %12580 = vmatmul.mubr.f32.gmra.mrb[38].mxu0 %v7247_v19  ;;  %14159 = vmatprep.subr.bf16.mxu1 %v14158_v47  ;;  %v7430_v19 = vld [vmem:[%s18526_s9 + $0x68] sm:$0xff] }
 0x800   : > { %14161 = vmatpush3.bf16.msra.mxu1 %v14158_v47  ;;  %v14186_v61 = vpack.c.bf16 %v7430_v19, %v7429_v20  ;;  %v9264_v47 = vld [vmem:[%s18526_s9 + $0x118] sm:$0xff] }
 0x801   : > { %14163 = vmatprep.subr.bf16.mxu1 %v14162_v25  ;;  %v14198_v8 = vpack.c.bf16 %v9264_v47, %v9263_v50  ;;  %v9286_v50 = vld [vmem:[%s18526_s9 + $0x1c8] sm:$0xff] }
 0x8c6   : > { %v12572_v12 = vpop.f32.mrb[32].mxu0 }
 0x8c7   : > { %v7386_v10 = vadd.f32 %v12572_v12, %v9244_v11  ;;  %v7331_v55 = vpop.f32.mrb[33].mxu0 }
 0x8c8   : > { %v7385_v59 = vadd.f32 %v9244_v11, %v7331_v55  ;;  %v9267_v55 = vld [vmem:[%s18526_s9 + $0x130] sm:$0xff] }
 0x8c9   : > { %v18001_v28 = vmax.f32 %v7386_v10, 0.0 }
 0x8ca   : > { %v18003_v63 = vmax.f32 %v7385_v59, 0.0  ;;  %v12575_v56 = vpop.f32.mrb[34].mxu0  ;;  %v14206_v59 = vpack.c.bf16 %v9268_v39, %v9267_v55  ;;  %v9289_v39 = vld [vmem:[%s18526_s9 + $0x1e0] sm:$0xff] }
 0x8cb   : > { %7402 = vst [vmem:[#allocation3 + $0x21] sm:$0xff] %v18001_v28  ;;  %v7388_v26 = vadd.f32 %v12575_v56, %v9244_v11  ;;  %v7341_v3 = vpop.f32.mrb[35].mxu0 }
 0x8cc   : > { %7401 = vst [vmem:[#allocation3 + $0x11] sm:$0xff] %v18003_v63  ;;  %v7387_v29 = vadd.f32 %v9244_v11, %v7341_v3  ;;  %12615 = vmatmul.mubr.f32.vlgmr.msra.gmra.mrb[16].mxu1 %v18003_v63 }
 0x8cd   : > { %v18014_v13 = vmax.f32 %v7388_v26, 0.0  ;;  %14165 = vmatpush3.bf16.msra.mxu1 %v14162_v25  ;;  %12617 = vmatprep.mubr.f32.mxu1 %v18001_v28  ;;  %v9265_v25 = vld [vmem:[%s18526_s9 + $0x120] sm:$0xff]  ;;  %v9270_v26 = vld [vmem:[%s18526_s9 + $0x148] sm:$0xff] }
 0x8ce   : > { %v18017_v4 = vmax.f32 %v7387_v29, 0.0  ;;  %v12578_v1 = vpop.f32.mrb[36].mxu0  ;;  %14167 = vmatprep.subr.bf16.mxu1 %v14166_v18  ;;  %v14202_v12 = vpack.c.bf16 %v9266_v35, %v9265_v25  ;;  %v9287_v35 = vld [vmem:[%s18526_s9 + $0x1d0] sm:$0xff] }
 0x8cf   : > { %7404 = vst [vmem:[#allocation3 + $0x41] sm:$0xff] %v18014_v13  ;;  %v7390_v9 = vadd.f32 %v12578_v1, %v9244_v11  ;;  %v7351_v24 = vpop.f32.mrb[37].mxu0  ;;  %v9271_v1 = vld [vmem:[%s18526_s9 + $0x150] sm:$0xff] }
 0x8d0   : > { %7403 = vst [vmem:[#allocation3 + $0x31] sm:$0xff] %v18017_v4  ;;  %v7389_v37 = vadd.f32 %v9244_v11, %v7351_v24  ;;  %12618 = vmatmul.mubr.f32.gmra.mrb[18].mxu1 %v18017_v4  ;;  %v9273_v24 = vld [vmem:[%s18526_s9 + $0x160] sm:$0xff] }
 0x8d1   : > { %v18028_v58 = vmax.f32 %v7390_v9, 0.0  ;;  %14169 = vmatpush3.bf16.msra.mxu1 %v14166_v18  ;;  %12620 = vmatprep.mubr.f32.mxu1 %v18014_v13  ;;  %v9269_v18 = vld [vmem:[%s18526_s9 + $0x140] sm:$0xff]  ;;  %v14218_v44 = vpack.c.bf16 %v9274_v30, %v9273_v24  ;;  %v9296_v24 = vld [vmem:[%s18526_s9 + $0x218] sm:$0xff] }
 0x8d2   : > { %v18031_v53 = vmax.f32 %v7389_v37, 0.0  ;;  %v12581_v42 = vpop.f32.mrb[38].mxu0  ;;  %14171 = vmatprep.subr.bf16.mxu1 %v14170_v16  ;;  %v14210_v23 = vpack.c.bf16 %v9270_v26, %v9269_v18  ;;  %v9275_v37 = vld [vmem:[%s18526_s9 + $0x170] sm:$0xff] }
 0x8d3   : > { %7406 = vst [vmem:[#allocation3 + $0x61] sm:$0xff] %v18028_v58  ;;  %v7392_v33 = vadd.f32 %v12581_v42, %v9244_v11  ;;  %v7361_v14 = vpop.f32.mrb[39].mxu0  ;;  %v18083_v52 = vld [vmem:[#allocation3 + $0x10] sm:$0xff]  ;;  %v9276_v42 = vld [vmem:[%s18526_s9 + $0x178] sm:$0xff]  ;;  %v9291_v26 = vld [vmem:[%s18526_s9 + $0x1f0] sm:$0xff] }
 0x8d4   : > { %7405 = vst [vmem:[#allocation3 + $0x51] sm:$0xff] %v18031_v53  ;;  %v7391_v43 = vadd.f32 %v9244_v11, %v7361_v14  ;;  %12621 = vmatmul.mubr.f32.gmra.mrb[20].mxu1 %v18031_v53  ;;  %v18092_v11 = vld [vmem:[#allocation3 + $0x20] sm:$0xff]  ;;  %v9278_v14 = vld [vmem:[%s18526_s9 + $0x188] sm:$0xff] }
 0x8d5   : > { %v18042_v27 = vmax.f32 %v7392_v33, 0.0  ;;  %14173 = vmatpush3.bf16.msra.mxu1 %v14170_v16  ;;  %12623 = vmatprep.mubr.f32.mxu1 %v18028_v58  ;;  %v9272_v16 = vld [vmem:[%s18526_s9 + $0x158] sm:$0xff]  ;;  %v9277_v33 = vld [vmem:[%s18526_s9 + $0x180] sm:$0xff] }
 0x8d6   : > { %v18045_v49 = vmax.f32 %v7391_v43, 0.0  ;;  %14175 = vmatprep.subr.bf16.mxu1 %v14174_v7  ;;  %v18104_v5 = vld [vmem:[#allocation3 + $0x40] sm:$0xff]  ;;  %v14214_v9 = vpack.c.bf16 %v9272_v16, %v9271_v1  ;;  %v14226_v15 = vpack.c.bf16 %v9278_v14, %v9277_v33  ;;  %v9280_v43 = vld [vmem:[%s18526_s9 + $0x198] sm:$0xff]  ;;  %v18152_v6 = vld [vmem:[#allocation3 + $0x12] sm:$0xff] }
 0x8d7   : > { %7408 = vst [vmem:[#allocation3 + $0x81] sm:$0xff] %v18042_v27  ;;  %v18095_v10 = vld [vmem:[#allocation3 + $0x30] sm:$0xff]  ;;  %v18161_v20 = vld [vmem:[#allocation3 + $0x22] sm:$0xff]  ;;  %v9294_v1 = vld [vmem:[%s18526_s9 + $0x208] sm:$0xff] }
 0x8d8   : > { %7407 = vst [vmem:[#allocation3 + $0x71] sm:$0xff] %v18045_v49  ;;  %12624 = vmatmul.mubr.f32.gmra.mrb[22].mxu1 %v18045_v49  ;;  %v9300_v33 = vld [vmem:[%s18526_s9 + $0x238] sm:$0xff] }
 0x8d9   : > { %14177 = vmatpush3.bf16.msra.mxu1 %v14174_v7  ;;  %12658 = vmatprep.mubr.f32.mxu1 %v18056_v60  ;;  %v14222_v7 = vpack.c.bf16 %v9276_v42, %v9275_v37  ;;  %v9298_v37 = vld [vmem:[%s18526_s9 + $0x228] sm:$0xff] }
 0x8da   : > { %14179 = vmatprep.subr.bf16.mxu1 %v14178_v34  ;;  %v18116_v3 = vld [vmem:[#allocation3 + $0x60] sm:$0xff] }
 0x8db   : > { %v18107_v56 = vld [vmem:[#allocation3 + $0x50] sm:$0xff]  ;;  %v18185_v47 = vld [vmem:[#allocation3 + $0x62] sm:$0xff] }
 0x8dc   : > { %v18176_v62 = vld [vmem:[#allocation3 + $0x52] sm:$0xff] }
 0x8dd   : > { %14181 = vmatpush3.bf16.msra.mxu1 %v14178_v34  ;;  %v14230_v34 = vpack.c.bf16 %v9280_v43, %v9279_v46  ;;  %v9302_v46 = vld [vmem:[%s18526_s9 + $0x248] sm:$0xff] }
 0x8de   : > { %14183 = vmatprep.subr.bf16.mxu1 %v14182_v2 }
 0x8df   : > { %v18119_v29 = vld [vmem:[#allocation3 + $0x70] sm:$0xff] }
 0x8e0   : > { %v18188_v25 = vld [vmem:[#allocation3 + $0x72] sm:$0xff] }
 0x8e1   : > { %14185 = vmatpush3.bf16.msra.mxu1 %v14182_v2  ;;  %v9282_v2 = vld [vmem:[%s18526_s9 + $0x1a8] sm:$0xff] }
 0x8e2   : > { %14187 = vmatprep.subr.bf16.mxu1 %v14186_v61  ;;  %v14234_v19 = vpack.c.bf16 %v9282_v2, %v9281_v22  ;;  %v9303_v22 = vld [vmem:[%s18526_s9 + $0x250] sm:$0xff]  ;;  %v9304_v2 = vld [vmem:[%s18526_s9 + $0x258] sm:$0xff] }
 0x8e5   : > { %14189 = vmatpush3.bf16.msra.mxu1 %v14186_v61  ;;  %v18164_v61 = vld [vmem:[#allocation3 + $0x32] sm:$0xff] }
 0x8e6   : > { %14191 = vmatprep.subr.bf16.mxu1 %v14190_v57 }
 0x8e9   : > { %14193 = vmatpush3.bf16.msra.mxu1 %v14190_v57  ;;  %v18173_v57 = vld [vmem:[#allocation3 + $0x42] sm:$0xff] }
 0x8ea   : > { %14195 = vmatprep.subr.bf16.mxu1 %v14194_v38 }
 0x8ec   : > { %12659 = vmatmul.mubr.f32.vlgmr.msra.gmra.mrb[16].mxu1 %v18083_v52 }
 0x8ed   : > { %12661 = vmatprep.mubr.f32.mxu1 %v18092_v11  ;;  %14197 = vmatpush3.bf16.msra.mxu1 %v14194_v38  ;;  %v9285_v38 = vld [vmem:[%s18526_s9 + $0x1c0] sm:$0xff] }
 0x8ee   : > { %14199 = vmatprep.subr.bf16.mxu1 %v14198_v8 }
 0x8f0   : > { %12662 = vmatmul.mubr.f32.gmra.mrb[18].mxu1 %v18095_v10 }
 0x8f1   : > { %12664 = vmatprep.mubr.f32.mxu1 %v18104_v5  ;;  %14201 = vmatpush3.bf16.msra.mxu1 %v14198_v8  ;;  %v14242_v8 = vpack.c.bf16 %v9286_v50, %v9285_v38  ;;  %v9307_v38 = vld [vmem:[%s18526_s9 + $0x270] sm:$0xff] }
 0x8f2   : > { %14203 = vmatprep.subr.bf16.mxu1 %v14202_v12 }
 0x8f4   : > { %12665 = vmatmul.mubr.f32.gmra.mrb[20].mxu1 %v18107_v56 }
 0x8f5   : > { %12667 = vmatprep.mubr.f32.mxu1 %v18116_v3  ;;  %14205 = vmatpush3.bf16.msra.mxu1 %v14202_v12  ;;  %v9288_v12 = vld [vmem:[%s18526_s9 + $0x1d8] sm:$0xff] }
 0x8f6   : > { %14207 = vmatprep.subr.bf16.mxu1 %v14206_v59  ;;  %v14246_v55 = vpack.c.bf16 %v9288_v12, %v9287_v35  ;;  %v9310_v35 = vld [vmem:[%s18526_s9 + $0x288] sm:$0xff] }
 0x8f8   : > { %12668 = vmatmul.mubr.f32.gmra.mrb[22].mxu1 %v18119_v29 }
 0x8f9   : > { %14209 = vmatpush3.bf16.msra.mxu1 %v14206_v59  ;;  %12702 = vmatprep.mubr.f32.mxu1 %v7668_v48  ;;  %v9290_v59 = vld [vmem:[%s18526_s9 + $0x1e8] sm:$0xff]  ;;  %v9293_v48 = vld [vmem:[%s18526_s9 + $0x200] sm:$0xff] }
 0x8fa   : > { %14211 = vmatprep.subr.bf16.mxu1 %v14210_v23  ;;  %v14250_v18 = vpack.c.bf16 %v9290_v59, %v9289_v39  ;;  %v14258_v16 = vpack.c.bf16 %v9294_v1, %v9293_v48  ;;  %v9312_v39 = vld [vmem:[%s18526_s9 + $0x298] sm:$0xff] }
 0x8fb   : > { %v9316_v48 = vld [vmem:[%s18526_s9 + $0x2b8] sm:$0xff] }
 0x8fd   : > { %14213 = vmatpush3.bf16.msra.mxu1 %v14210_v23 }
 0x8fe   : > { %14215 = vmatprep.subr.bf16.mxu1 %v14214_v9 }
 0x901   : > { %14217 = vmatpush3.bf16.msra.mxu1 %v14214_v9  ;;  %v9295_v9 = vld [vmem:[%s18526_s9 + $0x210] sm:$0xff] }
 0x902   : > { %14219 = vmatprep.subr.bf16.mxu1 %v14218_v44  ;;  %v14262_v30 = vpack.c.bf16 %v9296_v24, %v9295_v9  ;;  %v9318_v9 = vld [vmem:[%s18526_s9 + $0x2c8] sm:$0xff] }
 0x905   : > { %14221 = vmatpush3.bf16.msra.mxu1 %v14218_v44  ;;  %v9297_v44 = vld [vmem:[%s18526_s9 + $0x220] sm:$0xff] }
 0x906   : > { %14223 = vmatprep.subr.bf16.mxu1 %v14222_v7  ;;  %v14266_v42 = vpack.c.bf16 %v9298_v37, %v9297_v44  ;;  %v9320_v44 = vld [vmem:[%s18526_s9 + $0x2d8] sm:$0xff] }
 0x909   : > { %14225 = vmatpush3.bf16.msra.mxu1 %v14222_v7  ;;  %v9299_v7 = vld [vmem:[%s18526_s9 + $0x230] sm:$0xff] }
 0x90a   : > { %14227 = vmatprep.subr.bf16.mxu1 %v14226_v15  ;;  %v14270_v14 = vpack.c.bf16 %v9300_v33, %v9299_v7  ;;  %v9322_v7 = vld [vmem:[%s18526_s9 + $0x2e8] sm:$0xff] }
 0x90c   : > { %12703 = vmatmul.mubr.f32.vlgmr.msra.gmra.mrb[16].mxu1 %v18152_v6 }
 0x90d   : > { %12705 = vmatprep.mubr.f32.mxu1 %v18161_v20  ;;  %14229 = vmatpush3.bf16.msra.mxu1 %v14226_v15  ;;  %v9301_v15 = vld [vmem:[%s18526_s9 + $0x240] sm:$0xff] }
 0x90e   : > { %14231 = vmatprep.subr.bf16.mxu1 %v14230_v34  ;;  %v14274_v43 = vpack.c.bf16 %v9302_v46, %v9301_v15  ;;  %v9325_v46 = vld [vmem:[%s18526_s9 + $0x300] sm:$0xff] }
 0x910   : > { %12706 = vmatmul.mubr.f32.gmra.mrb[18].mxu1 %v18164_v61 }
 0x911   : > { %12708 = vmatprep.mubr.f32.mxu1 %v18173_v57  ;;  %14233 = vmatpush3.bf16.msra.mxu1 %v14230_v34  ;;  %v18246_v34 = vld [vmem:[#allocation3 + $0x80] sm:$0xff] }
 0x912   : > { %14235 = vmatprep.subr.bf16.mxu1 %v14234_v19 }
 0x914   : > { %12709 = vmatmul.mubr.f32.gmra.mrb[20].mxu1 %v18176_v62 }
 0x915   : > { %12711 = vmatprep.mubr.f32.mxu1 %v18185_v47  ;;  %14237 = vmatpush3.bf16.msra.mxu1 %v14234_v19  ;;  %v14278_v19 = vpack.c.bf16 %v9304_v2, %v9303_v22  ;;  %v9327_v2 = vld [vmem:[%s18526_s9 + $0x310] sm:$0xff] }
 0x916   : > { %14239 = vmatprep.subr.bf16.mxu1 %v14238_v21 }
 0x918   : > { %12712 = vmatmul.mubr.f32.gmra.mrb[22].mxu1 %v18188_v25 }
 0x919   : > { %14241 = vmatpush3.bf16.msra.mxu1 %v14238_v21  ;;  %12746 = vmatprep.mubr.f32.mxu1 %v18083_v52  ;;  %v9292_v52 = vld [vmem:[%s18526_s9 + $0x1f8] sm:$0xff]  ;;  %v14282_v21 = vpack.c.bf16 %v9306_v31, %v9305_v0  ;;  %v9329_v31 = vld [vmem:[%s18526_s9 + $0x320] sm:$0xff] }
 0x91a   : > { %14243 = vmatprep.subr.bf16.mxu1 %v14242_v8  ;;  %v14254_v23 = vpack.c.bf16 %v9292_v52, %v9291_v26  ;;  %v9314_v26 = vld [vmem:[%s18526_s9 + $0x2a8] sm:$0xff] }
 0x91d   : > { %14245 = vmatpush3.bf16.msra.mxu1 %v14242_v8  ;;  %v9309_v8 = vld [vmem:[%s18526_s9 + $0x280] sm:$0xff] }
 0x91e   : > { %14247 = vmatprep.subr.bf16.mxu1 %v14246_v55  ;;  %v14290_v12 = vpack.c.bf16 %v9310_v35, %v9309_v8  ;;  %v9333_v35 = vld [vmem:[%s18526_s9 + $0x340] sm:$0xff] }
 0x921   : > { %14249 = vmatpush3.bf16.msra.mxu1 %v14246_v55  ;;  %v9311_v55 = vld [vmem:[%s18526_s9 + $0x290] sm:$0xff] }
 0x922   : > { %14251 = vmatprep.subr.bf16.mxu1 %v14250_v18  ;;  %v14294_v59 = vpack.c.bf16 %v9312_v39, %v9311_v55  ;;  %v18360_v39 = vld [vmem:[#allocation3 + $0x82] sm:$0xff] }
 0x925   : > { %14253 = vmatpush3.bf16.msra.mxu1 %v14250_v18  ;;  %v9313_v18 = vld [vmem:[%s18526_s9 + $0x2a0] sm:$0xff] }
 0x926   : > { %14255 = vmatprep.subr.bf16.mxu1 %v14254_v23  ;;  %v14298_v52 = vpack.c.bf16 %v9314_v26, %v9313_v18  ;;  %v9336_v18 = vld [vmem:[%s18526_s9 + $0x358] sm:$0xff] }
 0x929   : > { %14257 = vmatpush3.bf16.msra.mxu1 %v14254_v23  ;;  %v9315_v23 = vld [vmem:[%s18526_s9 + $0x2b0] sm:$0xff] }
 0x92a   : > { %14259 = vmatprep.subr.bf16.mxu1 %v14258_v16  ;;  %v14302_v1 = vpack.c.bf16 %v9316_v48, %v9315_v23  ;;  %v9338_v23 = vld [vmem:[%s18526_s9 + $0x368] sm:$0xff] }
 0x92c   : > { %12747 = vmatmul.mubr.f32.vlgmr.msra.gmra.mrb[16].mxu1 %v18092_v11 }
 0x92d   : > { %12749 = vmatprep.mubr.f32.mxu1 %v18095_v10  ;;  %14261 = vmatpush3.bf16.msra.mxu1 %v14258_v16  ;;  %v9317_v16 = vld [vmem:[%s18526_s9 + $0x2c0] sm:$0xff] }
 0x92e   : > { %14263 = vmatprep.subr.bf16.mxu1 %v14262_v30  ;;  %v14306_v24 = vpack.c.bf16 %v9318_v9, %v9317_v16  ;;  %v9341_v9 = vld [vmem:[%s18526_s9 + $0x380] sm:$0xff] }
 0x930   : > { %12750 = vmatmul.mubr.f32.gmra.mrb[18].mxu1 %v18104_v5 }
 0x931   : > { %12752 = vmatprep.mubr.f32.mxu1 %v18107_v56  ;;  %14265 = vmatpush3.bf16.msra.mxu1 %v14262_v30  ;;  %v9319_v30 = vld [vmem:[%s18526_s9 + $0x2d0] sm:$0xff] }
 0x932   : > { %14267 = vmatprep.subr.bf16.mxu1 %v14266_v42  ;;  %v14310_v37 = vpack.c.bf16 %v9320_v44, %v9319_v30  ;;  %v9343_v44 = vld [vmem:[%s18526_s9 + $0x390] sm:$0xff] }
 0x934   : > { %12753 = vmatmul.mubr.f32.gmra.mrb[20].mxu1 %v18116_v3 }
 0x935   : > { %12755 = vmatprep.mubr.f32.mxu1 %v18119_v29  ;;  %14269 = vmatpush3.bf16.msra.mxu1 %v14266_v42  ;;  %v9321_v42 = vld [vmem:[%s18526_s9 + $0x2e0] sm:$0xff] }
 0x936   : > { %14271 = vmatprep.subr.bf16.mxu1 %v14270_v14  ;;  %v14314_v33 = vpack.c.bf16 %v9322_v7, %v9321_v42  ;;  %v9345_v7 = vld [vmem:[%s18526_s9 + $0x3a0] sm:$0xff] }
 0x938   : > { %12756 = vmatmul.mubr.f32.gmra.mrb[22].mxu1 %v18246_v34 }
 0x939   : > { %14273 = vmatpush3.bf16.msra.mxu1 %v14270_v14  ;;  %12790 = vmatprep.mubr.f32.mxu1 %v18003_v63  ;;  %v9308_v63 = vld [vmem:[%s18526_s9 + $0x278] sm:$0xff]  ;;  %v9323_v14 = vld [vmem:[%s18526_s9 + $0x2f0] sm:$0xff] }
 0x93a   : > { %14275 = vmatprep.subr.bf16.mxu1 %v14274_v43  ;;  %v14286_v50 = vpack.c.bf16 %v9308_v63, %v9307_v38  ;;  %v9331_v63 = vld [vmem:[%s18526_s9 + $0x330] sm:$0xff] }
 0x93d   : > { %14277 = vmatpush3.bf16.msra.mxu1 %v14274_v43  ;;  %v9326_v43 = vld [vmem:[%s18526_s9 + $0x308] sm:$0xff] }
 0x93e   : > { %14279 = vmatprep.subr.bf16.mxu1 %v14278_v19  ;;  %v14322_v22 = vpack.c.bf16 %v9326_v43, %v9325_v46  ;;  %v9350_v46 = vld [vmem:[%s18526_s9 + $0x3c8] sm:$0xff]  ;;  %v9352_v43 = vld [vmem:[%s18526_s9 + $0x3d8] sm:$0xff] }
 0x941   : > { %14281 = vmatpush3.bf16.msra.mxu1 %v14278_v19  ;;  %v9328_v19 = vld [vmem:[%s18526_s9 + $0x318] sm:$0xff] }
 0x942   : > { %14283 = vmatprep.subr.bf16.mxu1 %v14282_v21  ;;  %v14326_v0 = vpack.c.bf16 %v9328_v19, %v9327_v2 }
 0x945   : > { %14285 = vmatpush3.bf16.msra.mxu1 %v14282_v21  ;;  %v9330_v21 = vld [vmem:[%s18526_s9 + $0x328] sm:$0xff] }
 0x946   : > { %14287 = vmatprep.subr.bf16.mxu1 %v14286_v50  ;;  %v14330_v38 = vpack.c.bf16 %v9330_v21, %v9329_v31  ;;  %v9358_v31 = vld [vmem:[%s18526_s9 + $0x408] sm:$0xff] }
 0x949   : > { %14289 = vmatpush3.bf16.msra.mxu1 %v14286_v50  ;;  %v9332_v50 = vld [vmem:[%s18526_s9 + $0x338] sm:$0xff] }
 0x94a   : > { %14291 = vmatprep.subr.bf16.mxu1 %v14290_v12  ;;  %v14334_v8 = vpack.c.bf16 %v9332_v50, %v9331_v63  ;;  %v9360_v63 = vld [vmem:[%s18526_s9 + $0x418] sm:$0xff] }
 0x94c   : > { %12791 = vmatmul.mubr.f32.vlgmr.msra.gmra.mrb[16].mxu1 %v18001_v28 }
 0x94d   : > { %12793 = vmatprep.mubr.f32.mxu1 %v18017_v4  ;;  %14293 = vmatpush3.bf16.msra.mxu1 %v14290_v12  ;;  %v9334_v12 = vld [vmem:[%s18526_s9 + $0x348] sm:$0xff] }
 0x94e   : > { %14295 = vmatprep.subr.bf16.mxu1 %v14294_v59  ;;  %v14338_v55 = vpack.c.bf16 %v9334_v12, %v9333_v35  ;;  %v9362_v35 = vld [vmem:[%s18526_s9 + $0x428] sm:$0xff] }
 0x950   : > { %12794 = vmatmul.mubr.f32.gmra.mrb[18].mxu1 %v18014_v13 }
 0x951   : > { %12796 = vmatprep.mubr.f32.mxu1 %v18031_v53  ;;  %14297 = vmatpush3.bf16.msra.mxu1 %v14294_v59  ;;  %v9335_v59 = vld [vmem:[%s18526_s9 + $0x350] sm:$0xff] }
 0x952   : > { %14299 = vmatprep.subr.bf16.mxu1 %v14298_v52  ;;  %v14342_v26 = vpack.c.bf16 %v9336_v18, %v9335_v59  ;;  %v9364_v59 = vld [vmem:[%s18526_s9 + $0x438] sm:$0xff]  ;;  %v9366_v18 = vld [vmem:[%s18526_s9 + $0x448] sm:$0xff] }
 0x954   : > { %12797 = vmatmul.mubr.f32.gmra.mrb[20].mxu1 %v18028_v58 }
 0x955   : > { %12799 = vmatprep.mubr.f32.mxu1 %v18045_v49  ;;  %14301 = vmatpush3.bf16.msra.mxu1 %v14298_v52  ;;  %v9337_v52 = vld [vmem:[%s18526_s9 + $0x360] sm:$0xff] }
 0x956   : > { %14303 = vmatprep.subr.bf16.mxu1 %v14302_v1  ;;  %v14346_v48 = vpack.c.bf16 %v9338_v23, %v9337_v52  ;;  %v9368_v52 = vld [vmem:[%s18526_s9 + $0x458] sm:$0xff]  ;;  %v9370_v23 = vld [vmem:[%s18526_s9 + $0x468] sm:$0xff] }
 0x958   : > { %12800 = vmatmul.mubr.f32.gmra.mrb[22].mxu1 %v18042_v27 }
 0x959   : > { %14305 = vmatpush3.bf16.msra.mxu1 %v14302_v1  ;;  %12834 = vmatprep.mubr.f32.mxu1 %v18152_v6  ;;  %v9324_v6 = vld [vmem:[%s18526_s9 + $0x2f8] sm:$0xff]  ;;  %v9339_v1 = vld [vmem:[%s18526_s9 + $0x370] sm:$0xff] }
 0x95a   : > { %14307 = vmatprep.subr.bf16.mxu1 %v14306_v24  ;;  %v14318_v15 = vpack.c.bf16 %v9324_v6, %v9323_v14  ;;  %v9347_v6 = vld [vmem:[%s18526_s9 + $0x3b0] sm:$0xff] }
 0x95d   : > { %14309 = vmatpush3.bf16.msra.mxu1 %v14306_v24  ;;  %v9342_v24 = vld [vmem:[%s18526_s9 + $0x388] sm:$0xff] }
 0x95e   : > { %14311 = vmatprep.subr.bf16.mxu1 %v14310_v37  ;;  %v14354_v30 = vpack.c.bf16 %v9342_v24, %v9341_v9  ;;  %v9373_v9 = vld [vmem:[%s18527_s10] ss:$0 sm:$0xff] }
 0x961   : > { %14313 = vmatpush3.bf16.msra.mxu1 %v14310_v37  ;;  %v9344_v37 = vld [vmem:[%s18526_s9 + $0x398] sm:$0xff] }
 0x962   : > { %14315 = vmatprep.subr.bf16.mxu1 %v14314_v33  ;;  %v14358_v42 = vpack.c.bf16 %v9344_v37, %v9343_v44 }
 0x965   : > { %14317 = vmatpush3.bf16.msra.mxu1 %v14314_v33  ;;  %v9346_v33 = vld [vmem:[%s18526_s9 + $0x3a8] sm:$0xff] }
 0x966   : > { %14319 = vmatprep.subr.bf16.mxu1 %v14318_v15  ;;  %v14362_v14 = vpack.c.bf16 %v9346_v33, %v9345_v7 }
 0x969   : > { %14321 = vmatpush3.bf16.msra.mxu1 %v14318_v15  ;;  %v9348_v15 = vld [vmem:[%s18526_s9 + $0x3b8] sm:$0xff] }
 0x96a   : > { %14323 = vmatprep.subr.bf16.mxu1 %v14322_v22 }
 0x96c   : > { %12835 = vmatmul.mubr.f32.vlgmr.msra.gmra.mrb[16].mxu1 %v18161_v20 }
 0x96d   : > { %12837 = vmatprep.mubr.f32.mxu1 %v18164_v61  ;;  %14325 = vmatpush3.bf16.msra.mxu1 %v14322_v22  ;;  %v9354_v22 = vld [vmem:[%s18526_s9 + $0x3e8] sm:$0xff] }
 0x96e   : > { %14327 = vmatprep.subr.bf16.mxu1 %v14326_v0 }
 0x970   : > { %12838 = vmatmul.mubr.f32.gmra.mrb[18].mxu1 %v18173_v57 }
 0x971   : > { %12840 = vmatprep.mubr.f32.mxu1 %v18176_v62  ;;  %14329 = vmatpush3.bf16.msra.mxu1 %v14326_v0  ;;  %v9357_v0 = vld [vmem:[%s18526_s9 + $0x400] sm:$0xff] }
 0x972   : > { %14331 = vmatprep.subr.bf16.mxu1 %v14330_v38  ;;  %v14386_v21 = vpack.c.bf16 %v9358_v31, %v9357_v0 }
 0x974   : > { %12841 = vmatmul.mubr.f32.gmra.mrb[20].mxu1 %v18185_v47 }
 0x975   : > { %12843 = vmatprep.mubr.f32.mxu1 %v18188_v25  ;;  %14333 = vmatpush3.bf16.msra.mxu1 %v14330_v38  ;;  %v9359_v38 = vld [vmem:[%s18526_s9 + $0x410] sm:$0xff] }
 0x976   : > { %14335 = vmatprep.subr.bf16.mxu1 %v14334_v8  ;;  %v14390_v50 = vpack.c.bf16 %v9360_v63, %v9359_v38 }
 0x978   : > { %12844 = vmatmul.mubr.f32.gmra.mrb[22].mxu1 %v18360_v39 }
 0x979   : > { %14337 = vmatpush3.bf16.msra.mxu1 %v14334_v8  ;;  %12878 = vmatprep.mubr.f32.mxu1 %v18092_v11  ;;  %v9340_v11 = vld [vmem:[%s18526_s9 + $0x378] sm:$0xff]  ;;  %v9361_v8 = vld [vmem:[%s18526_s9 + $0x420] sm:$0xff] }
 0x97a   : > { %14339 = vmatprep.subr.bf16.mxu1 %v14338_v55  ;;  %v14350_v16 = vpack.c.bf16 %v9340_v11, %v9339_v1  ;;  %v14394_v12 = vpack.c.bf16 %v9362_v35, %v9361_v8  ;;  %v9371_v1 = vld [vmem:[%s18526_s9 + $0x470] sm:$0xff] }
 0x97d   : > { %14341 = vmatpush3.bf16.msra.mxu1 %v14338_v55  ;;  %v9363_v55 = vld [vmem:[%s18526_s9 + $0x430] sm:$0xff] }
 0x97e   : > { %14343 = vmatprep.subr.bf16.mxu1 %v14342_v26 }
 0x981   : > { %14345 = vmatpush3.bf16.msra.mxu1 %v14342_v26  ;;  %v8365_v26 = vld [vmem:[#allocation3 + $0x91] sm:$0xff] }
 0x982   : > { %14347 = vmatprep.subr.bf16.mxu1 %v14346_v48 }
 0x985   : > { %14349 = vmatpush3.bf16.msra.mxu1 %v14346_v48 }
 0x986   : > { %14351 = vmatprep.subr.bf16.mxu1 %v14350_v16 }
 0x989   : > { %14353 = vmatpush3.bf16.msra.mxu1 %v14350_v16  ;;  %v8503_v16 = vld [vmem:[#allocation3 + $0x92] sm:$0xff] }
 0x98a   : > { %14355 = vmatprep.subr.bf16.mxu1 %v14354_v30 }
 0x98c   : > { %12879 = vmatmul.mubr.f32.vlgmr.msra.gmra.mrb[16].mxu1 %v18095_v10  ;;  %v14366_v10 = vpack.c.bf16 %v9348_v15, %v9347_v6 }
 0x98d   : > { %12881 = vmatprep.mubr.f32.mxu1 %v18104_v5  ;;  %14357 = vmatpush3.bf16.msra.mxu1 %v14354_v30  ;;  %v9349_v5 = vld [vmem:[%s18526_s9 + $0x3c0] sm:$0xff] }
 0x98e   : > { %14359 = vmatprep.subr.bf16.mxu1 %v14358_v42 }
 0x990   : > { %12882 = vmatmul.mubr.f32.gmra.mrb[18].mxu1 %v18107_v56  ;;  %v14370_v56 = vpack.c.bf16 %v9350_v46, %v9349_v5 }
 0x991   : > { %12884 = vmatprep.mubr.f32.mxu1 %v18116_v3  ;;  %14361 = vmatpush3.bf16.msra.mxu1 %v14358_v42  ;;  %v9351_v3 = vld [vmem:[%s18526_s9 + $0x3d0] sm:$0xff] }
 0x992   : > { %14363 = vmatprep.subr.bf16.mxu1 %v14362_v14 }
 0x994   : > { %12885 = vmatmul.mubr.f32.gmra.mrb[20].mxu1 %v18119_v29  ;;  %v14374_v29 = vpack.c.bf16 %v9352_v43, %v9351_v3 }
 0x995   : > { %12887 = vmatprep.mubr.f32.mxu1 %v18246_v34  ;;  %14365 = vmatpush3.bf16.msra.mxu1 %v14362_v14  ;;  %v9353_v34 = vld [vmem:[%s18526_s9 + $0x3e0] sm:$0xff] }
 0x996   : > { %14367 = vmatprep.subr.bf16.mxu1 %v14366_v10  ;;  %v14378_v2 = vpack.c.bf16 %v9354_v22, %v9353_v34 }
 0x998   : > { %12888 = vmatmul.mubr.f32.gmra.mrb[22].mxu1 %v18056_v60  ;;  %v9355_v60 = vld [vmem:[%s18526_s9 + $0x3f0] sm:$0xff] }
 0x999   : > { %14369 = vmatpush3.bf16.msra.mxu1 %v14366_v10  ;;  %12922 = vmatprep.mubr.f32.mxu1 %v18001_v28  ;;  %v9356_v28 = vld [vmem:[%s18526_s9 + $0x3f8] sm:$0xff] }
 0x99a   : > { %14371 = vmatprep.subr.bf16.mxu1 %v14370_v56  ;;  %v14382_v19 = vpack.c.bf16 %v9356_v28, %v9355_v60 }
 0x99d   : > { %14373 = vmatpush3.bf16.msra.mxu1 %v14370_v56 }
 0x99e   : > { %14375 = vmatprep.subr.bf16.mxu1 %v14374_v29 }
 0x9a1   : > { %14377 = vmatpush3.bf16.msra.mxu1 %v14374_v29 }
 0x9a2   : > { %14379 = vmatprep.subr.bf16.mxu1 %v14378_v2 }
 0x9a5   : > { %14381 = vmatpush3.bf16.msra.mxu1 %v14378_v2 }
 0x9a6   : > { %14383 = vmatprep.subr.bf16.mxu1 %v14382_v19 }
 0x9a9   : > { %14385 = vmatpush3.bf16.msra.mxu1 %v14382_v19 }
 0x9aa   : > { %14387 = vmatprep.subr.bf16.mxu1 %v14386_v21 }
 0x9ac   : > { %12923 = vmatmul.mubr.f32.vlgmr.msra.gmra.mrb[16].mxu1 %v18017_v4  ;;  %v14398_v4 = vpack.c.bf16 %v9364_v59, %v9363_v55 }
 0x9ad   : > { %12925 = vmatprep.mubr.f32.mxu1 %v18014_v13  ;;  %14389 = vmatpush3.bf16.msra.mxu1 %v14386_v21  ;;  %v9365_v13 = vld [vmem:[%s18526_s9 + $0x440] sm:$0xff] }
 0x9ae   : > { %14391 = vmatprep.subr.bf16.mxu1 %v14390_v50 }
 0x9b0   : > { %12926 = vmatmul.mubr.f32.gmra.mrb[18].mxu1 %v18031_v53  ;;  %v14402_v53 = vpack.c.bf16 %v9366_v18, %v9365_v13 }
 0x9b1   : > { %12928 = vmatprep.mubr.f32.mxu1 %v18028_v58  ;;  %14393 = vmatpush3.bf16.msra.mxu1 %v14390_v50  ;;  %v9367_v58 = vld [vmem:[%s18526_s9 + $0x450] sm:$0xff] }
 0x9b2   : > { %14395 = vmatprep.subr.bf16.mxu1 %v14394_v12 }
 0x9b4   : > { %12929 = vmatmul.mubr.f32.gmra.mrb[20].mxu1 %v18045_v49  ;;  %v14406_v49 = vpack.c.bf16 %v9368_v52, %v9367_v58 }
 0x9b5   : > { %12931 = vmatprep.mubr.f32.mxu1 %v18042_v27  ;;  %14397 = vmatpush3.bf16.msra.mxu1 %v14394_v12  ;;  %v9369_v27 = vld [vmem:[%s18526_s9 + $0x460] sm:$0xff] }
 0x9b6   : > { %14399 = vmatprep.subr.bf16.mxu1 %v14398_v4  ;;  %v14410_v48 = vpack.c.bf16 %v9370_v23, %v9369_v27 }
 0x9b8   : > { %12932 = vmatmul.mubr.f32.gmra.mrb[22].mxu1 %v8365_v26 }
 0x9b9   : > { %14401 = vmatpush3.bf16.msra.mxu1 %v14398_v4  ;;  %12966 = vmatprep.mubr.f32.mxu1 %v18161_v20  ;;  %v9372_v20 = vld [vmem:[%s18526_s9 + $0x478] sm:$0xff] }
 0x9ba   : > { %14403 = vmatprep.subr.bf16.mxu1 %v14402_v53  ;;  %v14414_v11 = vpack.c.bf16 %v9372_v20, %v9371_v1 }
 0x9bd   : > { %14405 = vmatpush3.bf16.msra.mxu1 %v14402_v53 }
 0x9be   : > { %14407 = vmatprep.subr.bf16.mxu1 %v14406_v49 }
 0x9c1   : > { %14409 = vmatpush3.bf16.msra.mxu1 %v14406_v49 }
 0x9c2   : > { %14411 = vmatprep.subr.bf16.mxu1 %v14410_v48 }
 0x9c5   : > { %14413 = vmatpush3.bf16.msra.mxu1 %v14410_v48 }
 0x9c6   : > { %14415 = vmatprep.subr.bf16.mxu1 %v14414_v11 }
 0x9c9   : > { %14417 = vmatpush3.bf16.msra.mxu1 %v14414_v11 }
 0x9cc   : > { %12967 = vmatmul.mubr.f32.vlgmr.msra.gmra.mrb[16].mxu1 %v18164_v61 }
 0x9cd   : > { %12969 = vmatprep.mubr.f32.mxu1 %v18173_v57 }
 0x9d0   : > { %12970 = vmatmul.mubr.f32.gmra.mrb[18].mxu1 %v18176_v62 }
 0x9d1   : > { %12972 = vmatprep.mubr.f32.mxu1 %v18185_v47 }
 0x9d4   : > { %12973 = vmatmul.mubr.f32.gmra.mrb[20].mxu1 %v18188_v25 }
 0x9d5   : > { %12975 = vmatprep.mubr.f32.mxu1 %v18360_v39 }
 0x9d8   : > { %12976 = vmatmul.mubr.f32.gmra.mrb[22].mxu1 %v8503_v16 }
 0xa9f   : > { %v12968_v24 = vpop.f32.mrb[16].mxu1 }
 0xaa0   : > { %v8642_v30 = vadd.f32 %v12968_v24, %v9373_v9  ;;  %v8587_v61 = vpop.f32.mrb[17].mxu1 }
 0xaa1   : > { %v8641_v57 = vadd.f32 %v9373_v9, %v8587_v61 }
 0xaa2   : > { %v8650_v62 = vadd.f32 %v8642_v30, %v17405_v51 }
 0xaa3   : > { %v8649_v47 = vadd.f32 %v8641_v57, %v17414_v45  ;;  %v12971_v25 = vpop.f32.mrb[18].mxu1 }
 0xaa4   : > { %8658 = vst [vmem:[%s386_s19 + $0x8] sm:$0xff] %v8650_v62  ;;  %v8644_v39 = vadd.f32 %v12971_v25, %v9373_v9  ;;  %v8597_v44 = vpop.f32.mrb[19].mxu1 }
 0xaa5   : > { %8657 = vst [vmem:[%s386_s19] sm:$0xff] %v8649_v47  ;;  %v8643_v37 = vadd.f32 %v9373_v9, %v8597_v44 }
 0xaa6   : > { %v8652_v42 = vadd.f32 %v8644_v39, %v17424_v41 }
 0xaa7   : > { %v8651_v7 = vadd.f32 %v8643_v37, %v17434_v17  ;;  %v12974_v33 = vpop.f32.mrb[20].mxu1 }
 0xaa8   : > { %8660 = vst [vmem:[%s386_s19 + $0x18] sm:$0xff] %v8652_v42  ;;  %v8646_v14 = vadd.f32 %v12974_v33, %v9373_v9  ;;  %v8607_v6 = vpop.f32.mrb[21].mxu1 }
 0xaa9   : > { %8659 = vst [vmem:[%s386_s19 + $0x10] sm:$0xff] %v8651_v7  ;;  %v8645_v15 = vadd.f32 %v9373_v9, %v8607_v6 }
 0xaaa   : > { %v8654_v51 = vadd.f32 %v8646_v14, %v17446_v36 }
 0xaab   : > { %v8653_v45 = vadd.f32 %v8645_v15, %v17456_v32  ;;  %v12977_v10 = vpop.f32.mrb[22].mxu1 }
 0xaac   : > { %8662 = vst [vmem:[%s386_s19 + $0x28] sm:$0xff] %v8654_v51  ;;  %v8648_v5 = vadd.f32 %v12977_v10, %v9373_v9  ;;  %v8617_v46 = vpop.f32.mrb[23].mxu1 }
 0xaad   : > { %8661 = vst [vmem:[%s386_s19 + $0x20] sm:$0xff] %v8653_v45  ;;  %v8647_v56 = vadd.f32 %v9373_v9, %v8617_v46 }
 0xaae   : > { %v8656_v41 = vadd.f32 %v8648_v5, %v17468_v54 }
 0xaaf   : > { %v8655_v17 = vadd.f32 %v8647_v56, %v17478_v40 }
 0xab0   : > { %8664 = vst [vmem:[%s386_s19 + $0x38] sm:$0xff] %v8656_v41 }
 0xab1   : > { %8663 = vst [vmem:[%s386_s19 + $0x30] sm:$0xff] %v8655_v17 }
 0xab2 PF: > { %s21_s17 = sadd.s32 1, %s14949_s17  }
 0xab3   : > { %p18_p4 = scmp.ge.s32.totalorder %s21_s17, 4  }
 0xab5   :  { %20 = sbr.rel (!%p18_p4) target bundleno = 1 (0x1), region = 138 }

</bundles_post_ra>
